<compile_context>
chip_gen: v7x
topology: tpu7x:2x2x1
jax: 0.10.0
libtpu: 0.0.40
codegen_flags: <defaults>
</compile_context>

<pallas_src>
import jax
import jax.numpy as jnp
from jax.experimental import pallas as pl
from jax.experimental.pallas import tpu as pltpu

N_CLASS = 7
FEAT = 2048
H1 = 1024
H2 = 512
C_PAD = 16      # padded contraction dim for the fused backbone projection (bf16 sublane min)
OUT_PAD = 128   # lane-dense packed output: cols [0:7] = c, col [7] = r, rest 0


def _head_kernel(pooled_ref,
                 projw_ref, projb_ref,
                 p1w_ref, p1b_ref,
                 p2w_ref, p2b_ref,
                 fcw_ref, p3w_ref, bout_ref,
                 out_ref):
    """Fused backbone projection (stand-in) + VideoNet head.

       v  = pooled @ projW + projB                    (backbone stand-in)
       c  = fc(dropout(v))                            (dropout == identity)
       r  = p3(dropout(relu(p2(dropout(relu(p1(v)))))))
       out[:, 0:7] = c ; out[:, 7] = r   (packed via zero-padded weights)
    """
    pooled = pooled_ref[...].astype(jnp.bfloat16)                  # (TM, C_PAD)

    v = jnp.dot(pooled, projw_ref[...],
                preferred_element_type=jnp.float32) + projb_ref[...]
    vb = v.astype(jnp.bfloat16)                                    # (TM, 2048)

    h1 = jnp.dot(vb, p1w_ref[...],
                 preferred_element_type=jnp.float32) + p1b_ref[...]
    h1 = jnp.maximum(h1, 0.0).astype(jnp.bfloat16)                 # (TM, 1024)

    h2 = jnp.dot(h1, p2w_ref[...],
                 preferred_element_type=jnp.float32) + p2b_ref[...]
    h2 = jnp.maximum(h2, 0.0).astype(jnp.bfloat16)                 # (TM, 512)

    # Single lane-dense packed output slab (one unmasked 128-lane store):
    # fc weight occupies output columns 0..6, p3 weight occupies column 7.
    out = (jnp.dot(vb, fcw_ref[...], preferred_element_type=jnp.float32)
           + jnp.dot(h2, p3w_ref[...], preferred_element_type=jnp.float32)
           + bout_ref[...])
    out_ref[...] = out.astype(out_ref.dtype)


def _resident(shape):
    # Whole-array block whose index_map ignores the M grid index: loaded into
    # VMEM once and resident across all M grid steps.  Single-buffered —
    # the block index never changes, so a second buffer is pure VMEM waste.
    zeros = (0,) * len(shape)
    return pl.BlockSpec(shape, lambda i, _z=zeros: _z,
                        pipeline_mode=pl.Buffered(1))


def _default_tm():
    """Generation-aware batch tile: 128 on v5e (128x128 MXU), 256 otherwise."""
    try:
        kind = jax.devices()[0].device_kind.lower()
    except Exception:
        return 256
    if "v5e" in kind or "v5 lite" in kind or "v5lite" in kind:
        return 128
    return 256


def _choose_tile(n_rows, tm_max):
    """Pad M to a sublane multiple (>=8); tile with TM=tm_max for big batches."""
    m8 = max(8, ((n_rows + 7) // 8) * 8)
    if m8 <= tm_max:
        return m8, m8
    m_pad = ((m8 + tm_max - 1) // tm_max) * tm_max
    return m_pad, tm_max


def videonet_forward(x, packed_params):
    """x: (N, C, T, H, W) video batch (NCDHW).  Returns (c, r)."""
    (projw, projb, p1w, p1b, p2w, p2b, fcw_p, p3w_p, bout) = packed_params
    n, c_in = x.shape[0], x.shape[1]

    # TODO(synk): the full P3D199 pseudo-3D ResNet backbone is an external
    # dependency not defined in the provided module; replaced by a
    # deterministic global-average-pool over (T,H,W) + linear projection to
    # 2048 features (projection fused into the Pallas kernel below).
    pooled = x.reshape(n, c_in, -1).mean(axis=-1)                  # (N, C)

    m_pad, tm = _choose_tile(n, _default_tm())
    pooled_p = jnp.zeros((m_pad, C_PAD), jnp.float32).at[:n, :c_in].set(pooled)

    # Megacore sharding (v7x) only pays off once per-core MXU work exceeds the
    # duplicated resident-weight DMA; gate on padded batch size.
    semantics = ("parallel",) if m_pad >= 512 else ("arbitrary",)

    out = pl.pallas_call(
        _head_kernel,
        out_shape=jax.ShapeDtypeStruct((m_pad, OUT_PAD), jnp.float32),
        grid=(m_pad // tm,),
        in_specs=[
            pl.BlockSpec((tm, C_PAD), lambda i: (i, 0)),   # activations: tiled over M
            _resident(projw.shape), _resident(projb.shape),
            _resident(p1w.shape), _resident(p1b.shape),
            _resident(p2w.shape), _resident(p2b.shape),
            _resident(fcw_p.shape), _resident(p3w_p.shape), _resident(bout.shape),
        ],
        out_specs=pl.BlockSpec((tm, OUT_PAD), lambda i: (i, 0)),
        compiler_params=pltpu.CompilerParams(
            dimension_semantics=semantics,
            vmem_limit_bytes=32 * 1024 * 1024),
    )(pooled_p, projw, projb, p1w, p1b, p2w, p2b, fcw_p, p3w_p, bout)

    c_out = out[:n, :N_CLASS]
    r_out = out[:n, N_CLASS:N_CLASS + 1]
    return c_out, r_out


def init_params(key, in_ch=3):
    """PyTorch-Linear-style init, then pack for the kernel (bf16 + padding)."""
    ks = jax.random.split(key, 5)

    def lin_w(k, fan_in, fan_out):
        s = 1.0 / jnp.sqrt(jnp.float32(fan_in))
        return jax.random.uniform(k, (fan_in, fan_out), jnp.float32, -s, s)

    proj_w = lin_w(ks[0], in_ch, FEAT)                 # backbone stand-in proj
    proj_b = jnp.zeros((1, FEAT), jnp.float32)
    fcw = lin_w(ks[1], FEAT, N_CLASS)
    fcb = jnp.zeros((N_CLASS,), jnp.float32)
    p1w = lin_w(ks[2], FEAT, H1)
    p1b = jnp.full((1, H1), 0.01, jnp.float32)
    p2w = lin_w(ks[3], H1, H2)
    p2b = jnp.full((1, H2), 0.01, jnp.float32)
    p3w = lin_w(ks[4], H2, 1)
    p3b = jnp.zeros((1,), jnp.float32)

    # Pack: zero-pad the projection contraction dim to C_PAD (=16, bf16 sublane
    # minimum) and the fc / p3 output columns into one OUT_PAD-wide lane-dense
    # slab; weights -> bf16.
    proj_w_p = jnp.zeros((C_PAD, FEAT), jnp.float32).at[:in_ch].set(proj_w)
    fcw_p = jnp.zeros((FEAT, OUT_PAD), jnp.float32).at[:, :N_CLASS].set(fcw)
    p3w_p = jnp.zeros((H2, OUT_PAD), jnp.float32).at[:, N_CLASS:N_CLASS + 1].set(p3w)
    bout = jnp.zeros((1, OUT_PAD), jnp.float32)
    bout = bout.at[0, :N_CLASS].set(fcb).at[0, N_CLASS].set(p3b[0])

    return (proj_w_p.astype(jnp.bfloat16), proj_b,
            p1w.astype(jnp.bfloat16), p1b,
            p2w.astype(jnp.bfloat16), p2b,
            fcw_p.astype(jnp.bfloat16), p3w_p.astype(jnp.bfloat16), bout)


def reference_forward(x, packed_params):
    """Plain-JAX reference matching the kernel's bf16-weight / f32-acc math."""
    (projw, projb, p1w, p1b, p2w, p2b, fcw_p, p3w_p, bout) = [
        p.astype(jnp.float32) for p in packed_params]
    n, c_in = x.shape[0], x.shape[1]
    pooled = x.reshape(n, c_in, -1).mean(axis=-1)
    pooled_p = jnp.zeros((n, C_PAD), jnp.float32).at[:, :c_in].set(pooled)
    pooled_p = pooled_p.astype(jnp.bfloat16).astype(jnp.float32)

    v = pooled_p @ projw + projb
    vb = v.astype(jnp.bfloat16).astype(jnp.float32)
    h1 = jnp.maximum(vb @ p1w + p1b, 0.0).astype(jnp.bfloat16).astype(jnp.float32)
    h2 = jnp.maximum(h1 @ p2w + p2b, 0.0).astype(jnp.bfloat16).astype(jnp.float32)
    out = vb @ fcw_p + h2 @ p3w_p + bout
    return out[:, :N_CLASS], out[:, N_CLASS:N_CLASS + 1]


if __name__ == "__main__":
    key = jax.random.PRNGKey(0)
    kx, kp = jax.random.split(key)

    # Small synthetic video batch: (N=2, C=3, T=8, H=16, W=16), NCDHW.
    x = jax.random.normal(kx, (2, 3, 8, 16, 16), jnp.float32)
    params = init_params(kp, in_ch=3)

    fwd = jax.jit(videonet_forward)
    c, r = fwd(x, params)
    jax.block_until_ready((c, r))

    c_ref, r_ref = reference_forward(x, params)
    assert c.shape == (2, N_CLASS) and r.shape == (2, 1)
    assert jnp.allclose(c, c_ref, atol=1e-3, rtol=1e-2)
    assert jnp.allclose(r, r_ref, atol=1e-3, rtol=1e-2)

    print("KERNEL_OK")
</pallas_src>

<mosaic_0001>
module attributes {stable_mosaic.version = 11 : i64} {
  func.func @_head_kernel(%arg0: i32, %arg1: memref<8x16xf32, #tpu.memory_space<vmem>>, %arg2: memref<16x2048xbf16, #tpu.memory_space<vmem>>, %arg3: memref<1x2048xf32, #tpu.memory_space<vmem>>, %arg4: memref<2048x1024xbf16, #tpu.memory_space<vmem>>, %arg5: memref<1x1024xf32, #tpu.memory_space<vmem>>, %arg6: memref<1024x512xbf16, #tpu.memory_space<vmem>>, %arg7: memref<1x512xf32, #tpu.memory_space<vmem>>, %arg8: memref<2048x128xbf16, #tpu.memory_space<vmem>>, %arg9: memref<512x128xbf16, #tpu.memory_space<vmem>>, %arg10: memref<1x128xf32, #tpu.memory_space<vmem>>, %arg11: memref<8x128xf32, #tpu.memory_space<vmem>>) attributes {dimension_semantics = [#tpu.dimension_semantics<arbitrary>], iteration_bounds = array<i64: 1>, scalar_prefetch = 0 : i64, scratch_operands = 0 : i64, tpu.core_type = #tpu.core_type<tc>, window_params = [{transform_indices = @transform_0, window_bounds = array<i64: 8, 16>}, {pipeline_mode = #tpu.pipeline_mode<synchronous>, transform_indices = @transform_1, window_bounds = array<i64: 16, 2048>}, {pipeline_mode = #tpu.pipeline_mode<synchronous>, transform_indices = @transform_2, window_bounds = array<i64: 1, 2048>}, {pipeline_mode = #tpu.pipeline_mode<synchronous>, transform_indices = @transform_3, window_bounds = array<i64: 2048, 1024>}, {pipeline_mode = #tpu.pipeline_mode<synchronous>, transform_indices = @transform_4, window_bounds = array<i64: 1, 1024>}, {pipeline_mode = #tpu.pipeline_mode<synchronous>, transform_indices = @transform_5, window_bounds = array<i64: 1024, 512>}, {pipeline_mode = #tpu.pipeline_mode<synchronous>, transform_indices = @transform_6, window_bounds = array<i64: 1, 512>}, {pipeline_mode = #tpu.pipeline_mode<synchronous>, transform_indices = @transform_7, window_bounds = array<i64: 2048, 128>}, {pipeline_mode = #tpu.pipeline_mode<synchronous>, transform_indices = @transform_8, window_bounds = array<i64: 512, 128>}, {pipeline_mode = #tpu.pipeline_mode<synchronous>, transform_indices = @transform_9, window_bounds = array<i64: 1, 128>}, {transform_indices = @transform_10, window_bounds = array<i64: 8, 128>}]} {
    %c0 = arith.constant 0 : index
    %c0_0 = arith.constant 0 : index
    %0 = vector.load %arg1[%c0, %c0_0] : memref<8x16xf32, #tpu.memory_space<vmem>>, vector<8x16xf32>
    %1 = arith.truncf %0 : vector<8x16xf32> to vector<8x16xbf16>
    %c0_1 = arith.constant 0 : index
    %c0_2 = arith.constant 0 : index
    %2 = vector.load %arg2[%c0_1, %c0_2] : memref<16x2048xbf16, #tpu.memory_space<vmem>>, vector<16x2048xbf16>
    %cst = arith.constant dense<0.000000e+00> : vector<8x2048xf32>
    %3 = tpu.matmul %1, %2, %cst {dimension_numbers = #tpu.dot_dimension_numbers<[1], [0], [0], [1], [0, 0, 1, 1], [], []>} : vector<8x16xbf16>, vector<16x2048xbf16>, vector<8x2048xf32> -> vector<8x2048xf32>
    %c0_3 = arith.constant 0 : index
    %c0_4 = arith.constant 0 : index
    %4 = vector.load %arg3[%c0_3, %c0_4] : memref<1x2048xf32, #tpu.memory_space<vmem>>, vector<1x2048xf32>
    %5 = vector.broadcast %4 : vector<1x2048xf32> to vector<8x2048xf32>
    %6 = arith.addf %3, %5 : vector<8x2048xf32>
    %7 = arith.truncf %6 : vector<8x2048xf32> to vector<8x2048xbf16>
    %c0_5 = arith.constant 0 : index
    %c0_6 = arith.constant 0 : index
    %8 = vector.load %arg4[%c0_5, %c0_6] : memref<2048x1024xbf16, #tpu.memory_space<vmem>>, vector<2048x1024xbf16>
    %cst_7 = arith.constant dense<0.000000e+00> : vector<8x1024xf32>
    %9 = tpu.matmul %7, %8, %cst_7 {dimension_numbers = #tpu.dot_dimension_numbers<[1], [0], [0], [1], [0, 0, 1, 1], [], []>} : vector<8x2048xbf16>, vector<2048x1024xbf16>, vector<8x1024xf32> -> vector<8x1024xf32>
    %c0_8 = arith.constant 0 : index
    %c0_9 = arith.constant 0 : index
    %10 = vector.load %arg5[%c0_8, %c0_9] : memref<1x1024xf32, #tpu.memory_space<vmem>>, vector<1x1024xf32>
    %11 = vector.broadcast %10 : vector<1x1024xf32> to vector<8x1024xf32>
    %12 = arith.addf %9, %11 : vector<8x1024xf32>
    %cst_10 = arith.constant 0.000000e+00 : f32
    %13 = vector.broadcast %cst_10 : f32 to vector<8x1024xf32>
    %14 = arith.maximumf %12, %13 : vector<8x1024xf32>
    %15 = arith.truncf %14 : vector<8x1024xf32> to vector<8x1024xbf16>
    %c0_11 = arith.constant 0 : index
    %c0_12 = arith.constant 0 : index
    %16 = vector.load %arg6[%c0_11, %c0_12] : memref<1024x512xbf16, #tpu.memory_space<vmem>>, vector<1024x512xbf16>
    %cst_13 = arith.constant dense<0.000000e+00> : vector<8x512xf32>
    %17 = tpu.matmul %15, %16, %cst_13 {dimension_numbers = #tpu.dot_dimension_numbers<[1], [0], [0], [1], [0, 0, 1, 1], [], []>} : vector<8x1024xbf16>, vector<1024x512xbf16>, vector<8x512xf32> -> vector<8x512xf32>
    %c0_14 = arith.constant 0 : index
    %c0_15 = arith.constant 0 : index
    %18 = vector.load %arg7[%c0_14, %c0_15] : memref<1x512xf32, #tpu.memory_space<vmem>>, vector<1x512xf32>
    %19 = vector.broadcast %18 : vector<1x512xf32> to vector<8x512xf32>
    %20 = arith.addf %17, %19 : vector<8x512xf32>
    %cst_16 = arith.constant 0.000000e+00 : f32
    %21 = vector.broadcast %cst_16 : f32 to vector<8x512xf32>
    %22 = arith.maximumf %20, %21 : vector<8x512xf32>
    %23 = arith.truncf %22 : vector<8x512xf32> to vector<8x512xbf16>
    %c0_17 = arith.constant 0 : index
    %c0_18 = arith.constant 0 : index
    %24 = vector.load %arg8[%c0_17, %c0_18] : memref<2048x128xbf16, #tpu.memory_space<vmem>>, vector<2048x128xbf16>
    %cst_19 = arith.constant dense<0.000000e+00> : vector<8x128xf32>
    %25 = tpu.matmul %7, %24, %cst_19 {dimension_numbers = #tpu.dot_dimension_numbers<[1], [0], [0], [1], [0, 0, 1, 1], [], []>} : vector<8x2048xbf16>, vector<2048x128xbf16>, vector<8x128xf32> -> vector<8x128xf32>
    %c0_20 = arith.constant 0 : index
    %c0_21 = arith.constant 0 : index
    %26 = vector.load %arg9[%c0_20, %c0_21] : memref<512x128xbf16, #tpu.memory_space<vmem>>, vector<512x128xbf16>
    %cst_22 = arith.constant dense<0.000000e+00> : vector<8x128xf32>
    %27 = tpu.matmul %23, %26, %cst_22 {dimension_numbers = #tpu.dot_dimension_numbers<[1], [0], [0], [1], [0, 0, 1, 1], [], []>} : vector<8x512xbf16>, vector<512x128xbf16>, vector<8x128xf32> -> vector<8x128xf32>
    %28 = arith.addf %25, %27 : vector<8x128xf32>
    %c0_23 = arith.constant 0 : index
    %c0_24 = arith.constant 0 : index
    %29 = vector.load %arg10[%c0_23, %c0_24] : memref<1x128xf32, #tpu.memory_space<vmem>>, vector<1x128xf32>
    %30 = vector.broadcast %29 : vector<1x128xf32> to vector<8x128xf32>
    %31 = arith.addf %28, %30 : vector<8x128xf32>
    %c0_25 = arith.constant 0 : index
    %c0_26 = arith.constant 0 : index
    %32 = vector.load %arg11[%c0_25, %c0_26] : memref<8x128xf32, #tpu.memory_space<vmem>>, vector<8x128xf32>
    tpu.vector_store %arg11[%c0_25, %c0_26], %31 {strides = array<i32>} : memref<8x128xf32, #tpu.memory_space<vmem>>, vector<8x128xf32>,
    return
  }
  func.func @transform_0(%arg0: i32) -> (i32, i32) {
    %c0_i32 = arith.constant 0 : i32
    %c0_i32_0 = arith.constant 0 : i32
    return %arg0, %c0_i32 : i32, i32
  }
  func.func @transform_1(%arg0: i32) -> (i32, i32) {
    %c0_i32 = arith.constant 0 : i32
    %c0_i32_0 = arith.constant 0 : i32
    %c0_i32_1 = arith.constant 0 : i32
    return %c0_i32, %c0_i32_0 : i32, i32
  }
  func.func @transform_2(%arg0: i32) -> (i32, i32) {
    %c0_i32 = arith.constant 0 : i32
    %c0_i32_0 = arith.constant 0 : i32
    %c0_i32_1 = arith.constant 0 : i32
    return %c0_i32, %c0_i32_0 : i32, i32
  }
  func.func @transform_3(%arg0: i32) -> (i32, i32) {
    %c0_i32 = arith.constant 0 : i32
    %c0_i32_0 = arith.constant 0 : i32
    %c0_i32_1 = arith.constant 0 : i32
    return %c0_i32, %c0_i32_0 : i32, i32
  }
  func.func @transform_4(%arg0: i32) -> (i32, i32) {
    %c0_i32 = arith.constant 0 : i32
    %c0_i32_0 = arith.constant 0 : i32
    %c0_i32_1 = arith.constant 0 : i32
    return %c0_i32, %c0_i32_0 : i32, i32
  }
  func.func @transform_5(%arg0: i32) -> (i32, i32) {
    %c0_i32 = arith.constant 0 : i32
    %c0_i32_0 = arith.constant 0 : i32
    %c0_i32_1 = arith.constant 0 : i32
    return %c0_i32, %c0_i32_0 : i32, i32
  }
  func.func @transform_6(%arg0: i32) -> (i32, i32) {
    %c0_i32 = arith.constant 0 : i32
    %c0_i32_0 = arith.constant 0 : i32
    %c0_i32_1 = arith.constant 0 : i32
    return %c0_i32, %c0_i32_0 : i32, i32
  }
  func.func @transform_7(%arg0: i32) -> (i32, i32) {
    %c0_i32 = arith.constant 0 : i32
    %c0_i32_0 = arith.constant 0 : i32
    %c0_i32_1 = arith.constant 0 : i32
    return %c0_i32, %c0_i32_0 : i32, i32
  }
  func.func @transform_8(%arg0: i32) -> (i32, i32) {
    %c0_i32 = arith.constant 0 : i32
    %c0_i32_0 = arith.constant 0 : i32
    %c0_i32_1 = arith.constant 0 : i32
    return %c0_i32, %c0_i32_0 : i32, i32
  }
  func.func @transform_9(%arg0: i32) -> (i32, i32) {
    %c0_i32 = arith.constant 0 : i32
    %c0_i32_0 = arith.constant 0 : i32
    %c0_i32_1 = arith.constant 0 : i32
    return %c0_i32, %c0_i32_0 : i32, i32
  }
  func.func @transform_10(%arg0: i32) -> (i32, i32) {
    %c0_i32 = arith.constant 0 : i32
    %c0_i32_0 = arith.constant 0 : i32
    return %arg0, %c0_i32 : i32, i32
  }
}

</mosaic_0001>

<bundles_post_ra>
// kernel: videonet_forward.1
= control target key start
LH: loop header
LB: loop body
LE: loop exit
PB: predicated region body
PF: predicated region fallthrough
CT: control target
= control target key end

     0   :  { %15 = vsyncpa [#allocation3], 0  ;;  %s14869_s0 = inlined_call_operand.vmem [shape: f32[8,16], index: 0, kind: input, shape index: {}]   ;;  %s14870_s1 = inlined_call_operand.hbm [shape: bf16[16,2048], index: 1, kind: input, shape index: {}]   ;;  %s14871_s2 = inlined_call_operand.hbm [shape: f32[1,2048], index: 2, kind: input, shape index: {}]   ;;  %s14872_s3 = inlined_call_operand.hbm [shape: bf16[2048,1024], index: 3, kind: input, shape index: {}]   ;;  %s14873_s4 = inlined_call_operand.hbm [shape: f32[1,1024], index: 4, kind: input, shape index: {}]   ;;  %s14874_s5 = inlined_call_operand.hbm [shape: bf16[1024,512], index: 5, kind: input, shape index: {}]   ;;  %s14875_s6 = inlined_call_operand.hbm [shape: f32[1,512], index: 6, kind: input, shape index: {}]   ;;  %s14876_s7 = inlined_call_operand.hbm [shape: bf16[2048,128], index: 7, kind: input, shape index: {}]   ;;  %s14877_s8 = inlined_call_operand.hbm [shape: bf16[512,128], index: 8, kind: input, shape index: {}]   ;;  %s14878_s9 = inlined_call_operand.hbm [shape: f32[1,128], index: 9, kind: input, shape index: {}]   ;;  %s14879_s10 = inlined_call_operand.vmem [shape: f32[8,128], index: 10, kind: output, shape index: {}]  }
   0x1   :  { %16 = vsyncpa [#allocation5], 0 }
   0x2   :  { %17 = vsyncpa [#allocation8], 0 }
   0x3   :  { %18 = vsyncpa [#allocation11], 0 }
   0x4   :  { %19 = vsyncpa [#allocation14], 0  ;;  %s14391_s13 = smov [#allocation4]   ;;  %s14392_s15 = smov [#allocation7]  }
   0x5   :  { %s40_s14 = sshll.u32 %s14391_s13, 4  ;;  %s62_s16 = sshll.u32 %s14392_s15, 4  ;;  %s41_s14 = int_to_ptr.vmem [resolvable:$true] %s40_s14  ;;  %s63_s16 = int_to_ptr.vmem [resolvable:$true] %s62_s16 }
   0x6   :  { %s14183_s19 = scalar_lea.hbm %s14871_s2, 256 }
   0x7   :  { %p14184_p0 = scmp.ne.s32.totalorder %s14871_s2, %s14183_s19  ;;  %p14187_p1 = scmp.lt.u32.totalorder %s14183_s19, %s14871_s2 }
   0x9   :  { %p14189_p2 = pnand %p14187_p1, %p14184_p0 }
   0xb   :  { %14192 = shalt.err (!%p14189_p2)
}
   0xc   :  { %s14193_s24 = scalar_lea.vmem %s41_s14, 256  ;;  %p14198_p4 = scmp.lt.s32.totalorder %s41_s14, %s41_s14 }
   0xd   :  { %p14194_p3 = scmp.ne.s32.totalorder %s41_s14, %s14193_s24  ;;  %p14199_p5 = scmp.lt.s32.totalorder %s14193_s24, %s14193_s24 }
   0xf   :  { %p14200_p6 = por %p14199_p5, %p14198_p4 }
  0x11   :  { %p14201_p7 = pnand %p14200_p6, %p14194_p3 }
  0x13   :  { %14204 = shalt.err (!%p14201_p7)
}
  0x14   :  { %43 = dma.hbm_to_vmem [thread:$0]  %s14871_s2, 256, %s41_s14, [#allocation5]  }
  0x15   :  { %s14205_s29 = scalar_lea.hbm %s14873_s4, 128 }
  0x16   :  { %p14206_p8 = scmp.ne.s32.totalorder %s14873_s4, %s14205_s29  ;;  %p14209_p9 = scmp.lt.u32.totalorder %s14205_s29, %s14873_s4 }
  0x18   :  { %p14211_p10 = pnand %p14209_p9, %p14206_p8 }
  0x1a   :  { %14214 = shalt.err (!%p14211_p10)
}
  0x1b   :  { %s14215_s15 = scalar_lea.vmem %s63_s16, 128  ;;  %p14220_p12 = scmp.lt.s32.totalorder %s63_s16, %s63_s16 }
  0x1c   :  { %p14216_p11 = scmp.ne.s32.totalorder %s63_s16, %s14215_s15  ;;  %p14221_p13 = scmp.lt.s32.totalorder %s14215_s15, %s14215_s15 }
  0x1e   :  { %p14222_p0 = por %p14221_p13, %p14220_p12 }
  0x20   :  { %p14223_p1 = pnand %p14222_p0, %p14216_p11 }
  0x22   :  { %14226 = shalt.err (!%p14223_p1)
}
  0x23   :  { %65 = dma.hbm_to_vmem [thread:$0]  %s14873_s4, 128, %s63_s16, [#allocation8]  }
  0x24   :  { %s14393_s17 = smov [#allocation10]   ;;  %s14227_s21 = scalar_lea.hbm %s14875_s6, 64 }
  0x25   :  { %s84_s18 = sshll.u32 %s14393_s17, 4  ;;  %p14228_p2 = scmp.ne.s32.totalorder %s14875_s6, %s14227_s21  ;;  %s85_s18 = int_to_ptr.vmem [resolvable:$true] %s84_s18 }
  0x26   :  { %p14231_p3 = scmp.lt.u32.totalorder %s14227_s21, %s14875_s6 }
  0x28   :  { %p14233_p4 = pnand %p14231_p3, %p14228_p2 }
  0x2a   :  { %14236 = shalt.err (!%p14233_p4)
}
  0x2b   :  { %s14237_s26 = scalar_lea.vmem %s85_s18, 64  ;;  %p14242_p6 = scmp.lt.s32.totalorder %s85_s18, %s85_s18 }
  0x2c   :  { %p14238_p5 = scmp.ne.s32.totalorder %s85_s18, %s14237_s26  ;;  %p14243_p7 = scmp.lt.s32.totalorder %s14237_s26, %s14237_s26 }
  0x2e   :  { %p14244_p8 = por %p14243_p7, %p14242_p6 }
  0x30   :  { %p14245_p9 = pnand %p14244_p8, %p14238_p5 }
  0x32   :  { %14248 = shalt.err (!%p14245_p9)
}
  0x33   :  { %87 = dma.hbm_to_vmem [thread:$0]  %s14875_s6, 64, %s85_s18, [#allocation11]  }
  0x34   :  { %s14394_s27 = smov [#allocation13]   ;;  %s14395_s29 = smov [#allocation2]  }
  0x35   :  { %s105_s28 = sshll.u32 %s14394_s27, 4  ;;  %s27_s30 = sshll.u32 %s14395_s29, 4  ;;  %s106_s28 = int_to_ptr.vmem [resolvable:$true] %s105_s28  ;;  %s28_s30 = int_to_ptr.vmem [resolvable:$true] %s27_s30 }
  0x36   :  { %s14249_s13 = scalar_lea.hbm %s14877_s8, 4096 }
  0x37   :  { %p14250_p10 = scmp.ne.s32.totalorder %s14877_s8, %s14249_s13  ;;  %p14253_p11 = scmp.lt.u32.totalorder %s14249_s13, %s14877_s8 }
  0x39   :  { %p14255_p12 = pnand %p14253_p11, %p14250_p10 }
  0x3b   :  { %14258 = shalt.err (!%p14255_p12)
}
  0x3c   :  { %s14259_s6 = scalar_lea.vmem %s106_s28, 4096  ;;  %p14264_p0 = scmp.lt.s32.totalorder %s106_s28, %s106_s28 }
  0x3d   :  { %p14260_p13 = scmp.ne.s32.totalorder %s106_s28, %s14259_s6  ;;  %p14265_p1 = scmp.lt.s32.totalorder %s14259_s6, %s14259_s6 }
  0x3f   :  { %p14266_p2 = por %p14265_p1, %p14264_p0 }
  0x41   :  { %p14267_p3 = pnand %p14266_p2, %p14260_p13 }
  0x43   :  { %14270 = shalt.err (!%p14267_p3)
}
  0x44   :  { %s14396_s18 = smov 64   ;;  %s14397_s19 = smov 4  }
  0x45   :  { %111 = dma.hbm_to_vmem [thread:$0]  %s14877_s8, 4096, %s106_s28, [#allocation14], %s14396_s18, %s14396_s18, %s14397_s19  }
  0x46   :  { %s14271_s24 = scalar_lea.hbm %s14870_s1, 2048 }
  0x47   :  { %p14272_p4 = scmp.ne.s32.totalorder %s14870_s1, %s14271_s24  ;;  %p14275_p5 = scmp.lt.u32.totalorder %s14271_s24, %s14870_s1 }
  0x49   :  { %p14277_p6 = pnand %p14275_p5, %p14272_p4 }
  0x4b   :  { %14280 = shalt.err (!%p14277_p6)
}
  0x4c   :  { %s14281_s27 = scalar_lea.vmem %s28_s30, 2048  ;;  %p14286_p8 = scmp.lt.s32.totalorder %s28_s30, %s28_s30 }
  0x4d   :  { %p14282_p7 = scmp.ne.s32.totalorder %s28_s30, %s14281_s27  ;;  %p14287_p9 = scmp.lt.s32.totalorder %s14281_s27, %s14281_s27 }
  0x4f   :  { %p14288_p10 = por %p14287_p9, %p14286_p8 }
  0x51   :  { %p14289_p11 = pnand %p14288_p10, %p14282_p7 }
  0x53   :  { %14292 = shalt.err (!%p14289_p11)
}
  0x54   :  { %s14398_s8 = smov 1024   ;;  %s14399_s11 = smov [#allocation6]  }
  0x55   :  { %33 = dma.hbm_to_vmem [thread:$0]  %s14870_s1, 2048, %s28_s30, [#allocation3], %s14398_s8, %s14398_s8, %s14396_s18  }
  0x56   :  { %s49_s12 = sshll.u32 %s14399_s11, 4  ;;  %s14293_s2 = scalar_lea.hbm %s14872_s3, 131072  ;;  %s50_s12 = int_to_ptr.vmem [resolvable:$true] %s49_s12 }
  0x57   :  { %p14294_p12 = scmp.ne.s32.totalorder %s14872_s3, %s14293_s2  ;;  %p14297_p13 = scmp.lt.u32.totalorder %s14293_s2, %s14872_s3 }
  0x59   :  { %p14299_p0 = pnand %p14297_p13, %p14294_p12 }
  0x5b   :  { %14302 = shalt.err (!%p14299_p0)
}
  0x5c   :  { %s14303_s21 = scalar_lea.vmem %s50_s12, 131072  ;;  %p14308_p2 = scmp.lt.s32.totalorder %s50_s12, %s50_s12 }
  0x5d   :  { %p14304_p1 = scmp.ne.s32.totalorder %s50_s12, %s14303_s21  ;;  %p14309_p3 = scmp.lt.s32.totalorder %s14303_s21, %s14303_s21 }
  0x5f   :  { %p14310_p4 = por %p14309_p3, %p14308_p2 }
  0x61   :  { %p14311_p5 = pnand %p14310_p4, %p14304_p1 }
  0x63   :  { %14314 = shalt.err (!%p14311_p5)
}
  0x64   :  { %s14400_s1 = smov 512   ;;  %s14401_s30 = smov 32  }
  0x65   :  { %55 = dma.hbm_to_vmem [thread:$0]  %s14872_s3, 131072, %s50_s12, [#allocation5], %s14400_s1, %s14400_s1, %s14401_s30  }
  0x66   :  { %s14402_s24 = smov [#allocation9]   ;;  %s14315_s16 = scalar_lea.hbm %s14874_s5, 32768 }
  0x67   :  { %s71_s25 = sshll.u32 %s14402_s24, 4  ;;  %p14316_p6 = scmp.ne.s32.totalorder %s14874_s5, %s14315_s16  ;;  %s72_s25 = int_to_ptr.vmem [resolvable:$true] %s71_s25 }
  0x68   :  { %p14319_p7 = scmp.lt.u32.totalorder %s14315_s16, %s14874_s5 }
  0x6a   :  { %p14321_p8 = pnand %p14319_p7, %p14316_p6 }
  0x6c   :  { %14324 = shalt.err (!%p14321_p8)
}
  0x6d   :  { %s14325_s11 = scalar_lea.vmem %s72_s25, 32768  ;;  %p14330_p10 = scmp.lt.s32.totalorder %s72_s25, %s72_s25 }
  0x6e   :  { %p14326_p9 = scmp.ne.s32.totalorder %s72_s25, %s14325_s11  ;;  %p14331_p11 = scmp.lt.s32.totalorder %s14325_s11, %s14325_s11 }
  0x70   :  { %p14332_p12 = por %p14331_p11, %p14330_p10 }
  0x72   :  { %p14333_p13 = pnand %p14332_p12, %p14326_p9 }
  0x74   :  { %14336 = shalt.err (!%p14333_p13)
}
  0x75   :  { %s14403_s3 = smov 256   ;;  %s14404_s12 = smov 16  }
  0x76   :  { %77 = dma.hbm_to_vmem [thread:$0]  %s14874_s5, 32768, %s72_s25, [#allocation8], %s14403_s3, %s14403_s3, %s14404_s12  }
  0x77   :  { %s14405_s2 = smov [#allocation12]   ;;  %s14406_s17 = smov [#allocation15]  }
  0x78   :  { %s93_s14 = sshll.u32 %s14405_s2, 4  ;;  %s118_s6 = sshll.u32 %s14406_s17, 4  ;;  %s94_s14 = int_to_ptr.vmem [resolvable:$true] %s93_s14  ;;  %s119_s6 = int_to_ptr.vmem [resolvable:$true] %s118_s6 }
  0x79   :  { %s14337_s1 = scalar_lea.hbm %s14876_s7, 16384 }
  0x7a   :  { %p14338_p0 = scmp.ne.s32.totalorder %s14876_s7, %s14337_s1  ;;  %p14341_p1 = scmp.lt.u32.totalorder %s14337_s1, %s14876_s7 }
  0x7c   :  { %p14343_p2 = pnand %p14341_p1, %p14338_p0 }
  0x7e   :  { %14346 = shalt.err (!%p14343_p2)
}
  0x7f   :  { %s14347_s5 = scalar_lea.vmem %s94_s14, 16384  ;;  %p14352_p4 = scmp.lt.s32.totalorder %s94_s14, %s94_s14 }
  0x80   :  { %p14348_p3 = scmp.ne.s32.totalorder %s94_s14, %s14347_s5  ;;  %p14353_p5 = scmp.lt.s32.totalorder %s14347_s5, %s14347_s5 }
  0x82   :  { %p14354_p6 = por %p14353_p5, %p14352_p4 }
  0x84   :  { %p14355_p7 = pnand %p14354_p6, %p14348_p3 }
  0x86   :  { %14358 = shalt.err (!%p14355_p7)
}
  0x87   :  { %99 = dma.hbm_to_vmem [thread:$0]  %s14876_s7, 16384, %s94_s14, [#allocation11], %s14396_s18, %s14396_s18, %s14397_s19  }
  0x88   :  { %s14359_s27 = scalar_lea.hbm %s14878_s9, 16 }
  0x89   :  { %p14360_p8 = scmp.ne.s32.totalorder %s14878_s9, %s14359_s27  ;;  %p14363_p9 = scmp.lt.u32.totalorder %s14359_s27, %s14878_s9 }
  0x8b   :  { %p14365_p10 = pnand %p14363_p9, %p14360_p8 }
  0x8d   :  { %14368 = shalt.err (!%p14365_p10)
}
  0x8e   :  { %s14369_s3 = scalar_lea.vmem %s119_s6, 16  ;;  %s14373_s12 = scalar_lea.vmem %s119_s6, 32 }
  0x8f   :  { %p14370_p11 = scmp.ne.s32.totalorder %s119_s6, %s14369_s3  ;;  %p14374_p12 = scmp.lt.s32.totalorder %s119_s6, %s119_s6 }
  0x90   :  { %p14375_p13 = scmp.lt.s32.totalorder %s14373_s12, %s14369_s3 }
  0x92   :  { %p14376_p0 = por %p14375_p13, %p14374_p12 }
  0x94   :  { %p14377_p1 = pnand %p14376_p0, %p14370_p11 }
  0x96   :  { %14380 = shalt.err (!%p14377_p1)
}
  0x97   :  { %121 = dma.hbm_to_vmem [thread:$0]  %s14878_s9, 16, %s119_s6, [#allocation14]  }
  0x98   :  { %14381 = dma.done.wait [#allocation3], 2048  }
  0x99   :  { %14382 = vsyncadd [#allocation3], 4294965248 }
  0x9a   :  { %14383 = dma.done.wait [#allocation5], 131328  }
  0x9b   :  { %14384 = vsyncadd [#allocation5], 4294835968 }
  0x9c   :  { %14385 = dma.done.wait [#allocation8], 32896  }
  0x9d   :  { %14386 = vsyncadd [#allocation8], 4294934400 }
  0x9e   :  { %14387 = dma.done.wait [#allocation11], 16448  }
  0x9f   :  { %14388 = vsyncadd [#allocation11], 4294950848 }
  0xa0   :  { %14389 = dma.done.wait [#allocation14], 4112  }
  0xa1   :  { %14390 = vsyncadd [#allocation14], 4294963184  ;;  %v14407_v0 = vmov 0   ;;  %v152_v1 = vld [vmem:[#allocation2] sm:$0xff]  ;;  %v153_v6 = vld [vmem:[#allocation2 + $0x8] sm:$0xff]  ;;  %vm332_vm0 = vcmask 130048  }
  0xa2   :  { %368 = vmatprep.mubr.bf16.mxu0 %v14407_v0  ;;  %409 = vmatprep.mubr.bf16.mxu1 %v14407_v0  ;;  %v160_v2 = vld [vmem:[#allocation2 + $0x40] sm:$0xff]  ;;  %v161_v7 = vld [vmem:[#allocation2 + $0x48] sm:$0xff]  ;;  %v154_v8 = vld [vmem:[#allocation2 + $0x10] sm:$0xff] }
  0xa3   :  { %v150_v3 = vld [vmem:[%s14869_s0] sm:$0xff]  ;;  %v11787_v4 = vcombine.high %v152_v1, %v160_v2  ;;  %v11786_v5 = vcombine.low %v152_v1, %v160_v2  ;;  %v11789_v9 = vcombine.high %v153_v6, %v161_v7  ;;  %v11788_v10 = vcombine.low %v153_v6, %v161_v7  ;;  %v162_v11 = vld [vmem:[#allocation2 + $0x50] sm:$0xff]  ;;  %v155_v12 = vld [vmem:[#allocation2 + $0x18] sm:$0xff] }
  0xa4   :  { %v163_v13 = vld [vmem:[#allocation2 + $0x58] sm:$0xff]  ;;  %v14583_v14 = vpack.c.bf16 %v150_v3, %v150_v3  ;;  %v11791_v15 = vcombine.high %v154_v8, %v162_v11  ;;  %v156_v17 = vld [vmem:[#allocation2 + $0x20] sm:$0xff]  ;;  %v11790_v19 = vcombine.low %v154_v8, %v162_v11  ;;  %v157_v20 = vld [vmem:[#allocation2 + $0x28] sm:$0xff] }
  0xa5   :  { %336 = vmatprep.subr.bf16.mxu0 %v11787_v4  ;;  %v11793_v16 = vcombine.high %v155_v12, %v163_v13  ;;  %v164_v18 = vld [vmem:[#allocation2 + $0x60] sm:$0xff]  ;;  %377 = vmatprep.subr.bf16.mxu1 %v11789_v9  ;;  %v165_v21 = vld [vmem:[#allocation2 + $0x68] sm:$0xff]  ;;  %v11792_v22 = vcombine.low %v155_v12, %v163_v13  ;;  %v158_v25 = vld [vmem:[#allocation2 + $0x30] sm:$0xff] }
  0xa6   :  { %337 = vmatpush1.bf16.msra.mxu0 %v11786_v5  ;;  %378 = vmatpush1.bf16.msra.mxu1 %v11788_v10  ;;  %v11795_v23 = vcombine.high %v156_v17, %v164_v18  ;;  %v11797_v24 = vcombine.high %v157_v20, %v165_v21  ;;  %v166_v26 = vld [vmem:[#allocation2 + $0x70] sm:$0xff]  ;;  %v11794_v27 = vcombine.low %v156_v17, %v164_v18  ;;  %v159_v28 = vld [vmem:[#allocation2 + $0x38] sm:$0xff] }
  0xa7   :  { %418 = vmatprep.subr.bf16.mxu0 %v11791_v15  ;;  %459 = vmatprep.subr.bf16.mxu1 %v11793_v16  ;;  %v167_v29 = vld [vmem:[#allocation2 + $0x78] sm:$0xff]  ;;  %v11796_v30 = vcombine.low %v157_v20, %v165_v21  ;;  %v11799_v31 = vcombine.high %v158_v25, %v166_v26  ;;  %v680_v33 = vld [vmem:[#allocation6] sm:$0xff]  ;;  %v11798_v35 = vcombine.low %v158_v25, %v166_v26 }
  0xa8   :  { %v11801_v32 = vcombine.high %v159_v28, %v167_v29  ;;  %v684_v34 = vld [vmem:[#allocation6 + $0x20] sm:$0xff]  ;;  %v681_v36 = vld [vmem:[#allocation6 + $0x8] sm:$0xff]  ;;  %v11800_v38 = vcombine.low %v159_v28, %v167_v29 }
  0xa9   :  { %11802 = vmatmul.mubr.msk.bf16.vlgmr.msra.gmra.mrb[0].mxu0 %vm332_vm0, %v14583_v14  ;;  %11803 = vmatmul.mubr.msk.bf16.vlgmr.msra.gmra.mrb[0].mxu1 %vm332_vm0, %v14583_v14  ;;  %v685_v37 = vld [vmem:[#allocation6 + $0x28] sm:$0xff]  ;;  %v11811_v39 = vcombine.high %v680_v33, %v684_v34  ;;  %v688_v41 = vld [vmem:[#allocation6 + $0x40] sm:$0xff]  ;;  %v11810_v45 = vcombine.low %v680_v33, %v684_v34 }
  0xaa   :  { %419 = vmatpush1.bf16.msra.mxu0 %v11790_v19  ;;  %450 = vmatprep.mubr.bf16.mxu0 %v14407_v0  ;;  %v11813_v40 = vcombine.high %v681_v36, %v685_v37  ;;  %v692_v42 = vld [vmem:[#allocation6 + $0x60] sm:$0xff]  ;;  %v689_v43 = vld [vmem:[#allocation6 + $0x48] sm:$0xff]  ;;  %v11812_v48 = vcombine.low %v681_v36, %v685_v37 }
  0xab   :  { %460 = vmatpush1.bf16.msra.mxu1 %v11792_v22  ;;  %491 = vmatprep.mubr.bf16.mxu1 %v14407_v0  ;;  %v693_v44 = vld [vmem:[#allocation6 + $0x68] sm:$0xff]  ;;  %v696_v46 = vld [vmem:[#allocation6 + $0x80] sm:$0xff]  ;;  %v11819_v49 = vcombine.high %v688_v41, %v692_v42  ;;  %v11818_v53 = vcombine.low %v688_v41, %v692_v42 }
  0xac   :  { %500 = vmatprep.subr.bf16.mxu0 %v11795_v23  ;;  %541 = vmatprep.subr.bf16.mxu1 %v11797_v24  ;;  %v700_v47 = vld [vmem:[#allocation6 + $0xa0] sm:$0xff]  ;;  %v697_v50 = vld [vmem:[#allocation6 + $0x88] sm:$0xff]  ;;  %v11821_v52 = vcombine.high %v689_v43, %v693_v44  ;;  %v11820_v56 = vcombine.low %v689_v43, %v693_v44 }
  0xad   :  { %v701_v51 = vld [vmem:[#allocation6 + $0xa8] sm:$0xff]  ;;  %v704_v54 = vld [vmem:[#allocation6 + $0xc0] sm:$0xff]  ;;  %v11827_v57 = vcombine.high %v696_v46, %v700_v47  ;;  %v11826_v61 = vcombine.low %v696_v46, %v700_v47 }
  0xae   :  { %v708_v55 = vld [vmem:[#allocation6 + $0xe0] sm:$0xff]  ;;  %v705_v58 = vld [vmem:[#allocation6 + $0xc8] sm:$0xff]  ;;  %v11829_v60 = vcombine.high %v697_v50, %v701_v51 }
  0xaf   :  { %v709_v59 = vld [vmem:[#allocation6 + $0xe8] sm:$0xff]  ;;  %v712_v62 = vld [vmem:[#allocation6 + $0x100] sm:$0xff]  ;;  %v11835_v1 = vcombine.high %v704_v54, %v708_v55  ;;  %v11834_v5 = vcombine.low %v704_v54, %v708_v55 }
  0xb0   :  { %v716_v63 = vld [vmem:[#allocation6 + $0x120] sm:$0xff]  ;;  %v713_v2 = vld [vmem:[#allocation6 + $0x108] sm:$0xff]  ;;  %v11837_v4 = vcombine.high %v705_v58, %v709_v59  ;;  %v11836_v8 = vcombine.low %v705_v58, %v709_v59 }
  0xb1   :  { %11804 = vmatmul.mubr.msk.bf16.vlgmr.msra.gmra.mrb[4].mxu0 %vm332_vm0, %v14583_v14  ;;  %11805 = vmatmul.mubr.msk.bf16.vlgmr.msra.gmra.mrb[4].mxu1 %vm332_vm0, %v14583_v14  ;;  %v717_v3 = vld [vmem:[#allocation6 + $0x128] sm:$0xff]  ;;  %v720_v6 = vld [vmem:[#allocation6 + $0x140] sm:$0xff]  ;;  %v11843_v9 = vcombine.high %v712_v62, %v716_v63  ;;  %v11842_v13 = vcombine.low %v712_v62, %v716_v63 }
  0xb2   :  { %501 = vmatpush1.bf16.msra.mxu0 %v11794_v27  ;;  %532 = vmatprep.mubr.bf16.mxu0 %v14407_v0  ;;  %v724_v7 = vld [vmem:[#allocation6 + $0x160] sm:$0xff]  ;;  %v721_v10 = vld [vmem:[#allocation6 + $0x148] sm:$0xff]  ;;  %v11845_v12 = vcombine.high %v713_v2, %v717_v3  ;;  %v11844_v16 = vcombine.low %v713_v2, %v717_v3 }
  0xb3   :  { %542 = vmatpush1.bf16.msra.mxu1 %v11796_v30  ;;  %573 = vmatprep.mubr.bf16.mxu1 %v14407_v0  ;;  %v725_v11 = vld [vmem:[#allocation6 + $0x168] sm:$0xff]  ;;  %v732_v15 = vld [vmem:[#allocation6 + $0x1a0] sm:$0xff]  ;;  %v11851_v17 = vcombine.high %v720_v6, %v724_v7  ;;  %v11850_v21 = vcombine.low %v720_v6, %v724_v7 }
  0xb4   :  { %582 = vmatprep.subr.bf16.mxu0 %v11799_v31  ;;  %623 = vmatprep.subr.bf16.mxu1 %v11801_v32  ;;  %v729_v18 = vld [vmem:[#allocation6 + $0x188] sm:$0xff]  ;;  %v11853_v20 = vcombine.high %v721_v10, %v725_v11  ;;  %v736_v22 = vld [vmem:[#allocation6 + $0x1c0] sm:$0xff]  ;;  %v11852_v24 = vcombine.low %v721_v10, %v725_v11 }
  0xb5   :  { %v733_v19 = vld [vmem:[#allocation6 + $0x1a8] sm:$0xff]  ;;  %v740_v23 = vld [vmem:[#allocation6 + $0x1e0] sm:$0xff] }
  0xb6   :  { %v737_v26 = vld [vmem:[#allocation6 + $0x1c8] sm:$0xff]  ;;  %v11861_v28 = vcombine.high %v729_v18, %v733_v19  ;;  %v744_v30 = vld [vmem:[#allocation6 + $0x200] sm:$0xff]  ;;  %v11860_v32 = vcombine.low %v729_v18, %v733_v19  ;;  %v11867_v33 = vcombine.high %v736_v22, %v740_v23  ;;  %v11866_v37 = vcombine.low %v736_v22, %v740_v23 }
  0xb7   :  { %v741_v27 = vld [vmem:[#allocation6 + $0x1e8] sm:$0xff]  ;;  %v748_v31 = vld [vmem:[#allocation6 + $0x220] sm:$0xff] }
  0xb8   :  { %v745_v34 = vld [vmem:[#allocation6 + $0x208] sm:$0xff]  ;;  %v11869_v36 = vcombine.high %v737_v26, %v741_v27  ;;  %v11875_v41 = vcombine.high %v744_v30, %v748_v31  ;;  %v760_v46 = vld [vmem:[#allocation6 + $0x280] sm:$0xff] }
  0xb9   :  { %11806 = vmatmul.mubr.msk.bf16.vlgmr.msra.gmra.mrb[8].mxu0 %vm332_vm0, %v14583_v14  ;;  %11807 = vmatmul.mubr.msk.bf16.vlgmr.msra.gmra.mrb[8].mxu1 %vm332_vm0, %v14583_v14  ;;  %v753_v42 = vld [vmem:[#allocation6 + $0x248] sm:$0xff]  ;;  %v764_v47 = vld [vmem:[#allocation6 + $0x2a0] sm:$0xff] }
  0xba   :  { %583 = vmatpush1.bf16.msra.mxu0 %v11798_v35  ;;  %614 = vmatprep.mubr.bf16.mxu0 %v14407_v0  ;;  %v749_v35 = vld [vmem:[#allocation6 + $0x228] sm:$0xff]  ;;  %v768_v54 = vld [vmem:[#allocation6 + $0x2c0] sm:$0xff] }
  0xbb   :  { %624 = vmatpush1.bf16.msra.mxu1 %v11800_v38  ;;  %655 = vmatprep.mubr.bf16.mxu1 %v14407_v0  ;;  %v11828_v0 = vcombine.low %v697_v50, %v701_v51  ;;  %v752_v38 = vld [vmem:[#allocation6 + $0x240] sm:$0xff]  ;;  %v757_v43 = vld [vmem:[#allocation6 + $0x268] sm:$0xff]  ;;  %v11877_v44 = vcombine.high %v745_v34, %v749_v35 }
  0xbc   :  { %6866 = vmatprep.subr.bf16.mxu0 %v11811_v39  ;;  %7194 = vmatprep.subr.bf16.mxu1 %v11813_v40  ;;  %v756_v39 = vld [vmem:[#allocation6 + $0x260] sm:$0xff]  ;;  %v11868_v40 = vcombine.low %v737_v26, %v741_v27  ;;  %v761_v50 = vld [vmem:[#allocation6 + $0x288] sm:$0xff] }
  0xbd   :  { %v765_v51 = vld [vmem:[#allocation6 + $0x2a8] sm:$0xff]  ;;  %v772_v55 = vld [vmem:[#allocation6 + $0x2e0] sm:$0xff] }
  0xbe   :  { %v769_v58 = vld [vmem:[#allocation6 + $0x2c8] sm:$0xff]  ;;  %v776_v62 = vld [vmem:[#allocation6 + $0x300] sm:$0xff] }
  0xbf   :  { %v773_v59 = vld [vmem:[#allocation6 + $0x2e8] sm:$0xff]  ;;  %v780_v63 = vld [vmem:[#allocation6 + $0x320] sm:$0xff] }
  0xc0   :  { %v777_v2 = vld [vmem:[#allocation6 + $0x308] sm:$0xff]  ;;  %v784_v6 = vld [vmem:[#allocation6 + $0x340] sm:$0xff] }
  0xc1   :  { %11808 = vmatmul.mubr.msk.bf16.vlgmr.msra.gmra.mrb[12].mxu0 %vm332_vm0, %v14583_v14  ;;  %11809 = vmatmul.mubr.msk.bf16.vlgmr.msra.gmra.mrb[12].mxu1 %vm332_vm0, %v14583_v14  ;;  %v728_v14 = vld [vmem:[#allocation6 + $0x180] sm:$0xff]  ;;  %v781_v3 = vld [vmem:[#allocation6 + $0x328] sm:$0xff] }
  0xc2   :  { %6867 = vmatpush1.bf16.msra.mxu0 %v11810_v45  ;;  %7195 = vmatpush1.bf16.msra.mxu1 %v11812_v48  ;;  %v11859_v25 = vcombine.high %v728_v14, %v732_v15  ;;  %v11858_v29 = vcombine.low %v728_v14, %v732_v15  ;;  %v11874_v45 = vcombine.low %v744_v30, %v748_v31  ;;  %v788_v7 = vld [vmem:[#allocation6 + $0x360] sm:$0xff]  ;;  %v785_v10 = vld [vmem:[#allocation6 + $0x348] sm:$0xff] }
  0xc3   :  { %6868 = vmatprep.subr.bf16.mxu0 %v11819_v49  ;;  %7196 = vmatprep.subr.bf16.mxu1 %v11821_v52  ;;  %v11876_v48 = vcombine.low %v745_v34, %v749_v35  ;;  %v11883_v49 = vcombine.high %v752_v38, %v756_v39  ;;  %v11885_v52 = vcombine.high %v753_v42, %v757_v43  ;;  %v789_v11 = vld [vmem:[#allocation6 + $0x368] sm:$0xff]  ;;  %v792_v14 = vld [vmem:[#allocation6 + $0x380] sm:$0xff] }
  0xc4   :  { %v796_v15 = vld [vmem:[#allocation6 + $0x3a0] sm:$0xff]  ;;  %v793_v18 = vld [vmem:[#allocation6 + $0x388] sm:$0xff]  ;;  %v11916_v22 = vcombine.low %v785_v10, %v789_v11 }
  0xc5   :  { %v797_v19 = vld [vmem:[#allocation6 + $0x3a8] sm:$0xff]  ;;  %v11923_v23 = vcombine.high %v792_v14, %v796_v15  ;;  %v800_v27 = vld [vmem:[#allocation6 + $0x3c0] sm:$0xff] }
  0xc6   :  { %6869 = vmatpush1.bf16.msra.mxu0 %v11818_v53  ;;  %7197 = vmatpush1.bf16.msra.mxu1 %v11820_v56  ;;  %v11882_v53 = vcombine.low %v752_v38, %v756_v39  ;;  %v11884_v56 = vcombine.low %v753_v42, %v757_v43  ;;  %v11924_v26 = vcombine.low %v793_v18, %v797_v19  ;;  %v805_v31 = vld [vmem:[#allocation6 + $0x3e8] sm:$0xff]  ;;  %v808_v35 = vld [vmem:[#allocation6 + $0x400] sm:$0xff]  ;;  %v172_v43 = vlaneseq }
  0xc7   :  { %6870 = vmatprep.subr.bf16.mxu0 %v11827_v57  ;;  %7198 = vmatprep.subr.bf16.mxu1 %v11829_v60  ;;  %v11891_v57 = vcombine.high %v760_v46, %v764_v47  ;;  %v11893_v60 = vcombine.high %v761_v50, %v765_v51  ;;  %v813_v39 = vld [vmem:[#allocation6 + $0x428] sm:$0xff] }
  0xca   :  { %6871 = vmatpush1.bf16.msra.mxu0 %v11826_v61  ;;  %7199 = vmatpush1.bf16.msra.mxu1 %v11828_v0  ;;  %v11890_v61 = vcombine.low %v760_v46, %v764_v47  ;;  %v11892_v0 = vcombine.low %v761_v50, %v765_v51 }
  0xcb   :  { %6872 = vmatprep.subr.bf16.mxu0 %v11835_v1  ;;  %7200 = vmatprep.subr.bf16.mxu1 %v11837_v4  ;;  %v11899_v1 = vcombine.high %v768_v54, %v772_v55  ;;  %v11901_v4 = vcombine.high %v769_v58, %v773_v59 }
  0xce   :  { %6873 = vmatpush1.bf16.msra.mxu0 %v11834_v5  ;;  %7201 = vmatpush1.bf16.msra.mxu1 %v11836_v8  ;;  %v11898_v5 = vcombine.low %v768_v54, %v772_v55  ;;  %v11900_v8 = vcombine.low %v769_v58, %v773_v59  ;;  %v820_v54 = vld [vmem:[#allocation6 + $0x460] sm:$0xff]  ;;  %v821_v58 = vld [vmem:[#allocation6 + $0x468] sm:$0xff] }
  0xcf   :  { %6874 = vmatprep.subr.bf16.mxu0 %v11843_v9  ;;  %7202 = vmatprep.subr.bf16.mxu1 %v11845_v12  ;;  %v11907_v9 = vcombine.high %v776_v62, %v780_v63  ;;  %v11909_v12 = vcombine.high %v777_v2, %v781_v3 }
  0xd2   :  { %6875 = vmatpush1.bf16.msra.mxu0 %v11842_v13  ;;  %7203 = vmatpush1.bf16.msra.mxu1 %v11844_v16  ;;  %v11906_v13 = vcombine.low %v776_v62, %v780_v63  ;;  %v11908_v16 = vcombine.low %v777_v2, %v781_v3  ;;  %v824_v3 = vld [vmem:[#allocation6 + $0x480] sm:$0xff] }
  0xd3   :  { %6876 = vmatprep.subr.bf16.mxu0 %v11851_v17  ;;  %7204 = vmatprep.subr.bf16.mxu1 %v11853_v20  ;;  %v11915_v17 = vcombine.high %v784_v6, %v788_v7  ;;  %v11917_v20 = vcombine.high %v785_v10, %v789_v11  ;;  %v829_v10 = vld [vmem:[#allocation6 + $0x4a8] sm:$0xff] }
  0xd6   :  { %6877 = vmatpush1.bf16.msra.mxu0 %v11850_v21  ;;  %7205 = vmatpush1.bf16.msra.mxu1 %v11852_v24  ;;  %v11914_v21 = vcombine.low %v784_v6, %v788_v7  ;;  %v11925_v24 = vcombine.high %v793_v18, %v797_v19  ;;  %v833_v19 = vld [vmem:[#allocation6 + $0x4c8] sm:$0xff] }
  0xd7   :  { %6878 = vmatprep.subr.bf16.mxu0 %v11859_v25  ;;  %7206 = vmatprep.subr.bf16.mxu1 %v11861_v28  ;;  %v11922_v25 = vcombine.low %v792_v14, %v796_v15  ;;  %v804_v28 = vld [vmem:[#allocation6 + $0x3e0] sm:$0xff] }
  0xd8   :  { %v11931_v30 = vcombine.high %v800_v27, %v804_v28  ;;  %v832_v14 = vld [vmem:[#allocation6 + $0x4c0] sm:$0xff] }
  0xd9   :  { %v836_v15 = vld [vmem:[#allocation6 + $0x4e0] sm:$0xff] }
  0xda   :  { %6879 = vmatpush1.bf16.msra.mxu0 %v11858_v29  ;;  %7207 = vmatpush1.bf16.msra.mxu1 %v11860_v32  ;;  %v801_v29 = vld [vmem:[#allocation6 + $0x3c8] sm:$0xff]  ;;  %v11930_v32 = vcombine.low %v800_v27, %v804_v28  ;;  %v844_v27 = vld [vmem:[#allocation6 + $0x520] sm:$0xff]  ;;  %v11963_v28 = vcombine.high %v832_v14, %v836_v15 }
  0xdb   :  { %6880 = vmatprep.subr.bf16.mxu0 %v11867_v33  ;;  %7208 = vmatprep.subr.bf16.mxu1 %v11869_v36  ;;  %v11932_v33 = vcombine.low %v801_v29, %v805_v31  ;;  %v11933_v34 = vcombine.high %v801_v29, %v805_v31  ;;  %v812_v36 = vld [vmem:[#allocation6 + $0x420] sm:$0xff]  ;;  %v845_v31 = vld [vmem:[#allocation6 + $0x528] sm:$0xff] }
  0xdc   :  { %v11939_v38 = vcombine.high %v808_v35, %v812_v36 }
  0xde   :  { %6881 = vmatpush1.bf16.msra.mxu0 %v11866_v37  ;;  %7209 = vmatpush1.bf16.msra.mxu1 %v11868_v40  ;;  %v809_v37 = vld [vmem:[#allocation6 + $0x408] sm:$0xff]  ;;  %v11938_v40 = vcombine.low %v808_v35, %v812_v36  ;;  %v852_v35 = vld [vmem:[#allocation6 + $0x560] sm:$0xff] }
  0xdf   :  { %6882 = vmatprep.subr.bf16.mxu0 %v11875_v41  ;;  %7210 = vmatprep.subr.bf16.mxu1 %v11877_v44  ;;  %v11940_v41 = vcombine.low %v809_v37, %v813_v39  ;;  %v11941_v42 = vcombine.high %v809_v37, %v813_v39  ;;  %v14607_v44 = vshrl.u32 %v172_v43, 7  ;;  %v849_v39 = vld [vmem:[#allocation6 + $0x548] sm:$0xff] }
  0xe1   :  { %v14612_v46 = vsub.s32 0, %v14607_v44  ;;  %v14615_v47 = vsub.s32 1, %v14607_v44  ;;  %v14649_v43 = vsub.s32 4, %v14607_v44 }
  0xe2   :  { %6883 = vmatpush1.bf16.msra.mxu0 %v11874_v45  ;;  %7211 = vmatpush1.bf16.msra.mxu1 %v11876_v48  ;;  %v14609_v45 = vld [vmem:[#allocation4] sm:$0xff]  ;;  %v14618_v48 = vsub.s32 3, %v14607_v44 }
  0xe3   :  { %6884 = vmatprep.subr.bf16.mxu0 %v11883_v49  ;;  %7212 = vmatprep.subr.bf16.mxu1 %v11885_v52  ;;  %v175_v49 = vrot.slane %v14609_v45, %v14612_v46  ;;  %v179_v50 = vrot.slane %v14609_v45, %v14615_v47 }
  0xe4   :  { %v187_v51 = vrot.slane %v14609_v45, %v14618_v48 }
  0xe6   :  { %6885 = vmatpush1.bf16.msra.mxu0 %v11882_v53  ;;  %7213 = vmatpush1.bf16.msra.mxu1 %v11884_v56  ;;  %v816_v53 = vld [vmem:[#allocation6 + $0x440] sm:$0xff] }
  0xe7   :  { %6886 = vmatprep.subr.bf16.mxu0 %v11891_v57  ;;  %7214 = vmatprep.subr.bf16.mxu1 %v11893_v60  ;;  %v817_v57 = vld [vmem:[#allocation6 + $0x448] sm:$0xff] }
  0xea   :  { %6887 = vmatpush1.bf16.msra.mxu0 %v11890_v61  ;;  %7215 = vmatpush1.bf16.msra.mxu1 %v11892_v0 }
  0xeb   :  { %6888 = vmatprep.subr.bf16.mxu0 %v11899_v1  ;;  %7216 = vmatprep.subr.bf16.mxu1 %v11901_v4  ;;  %v828_v4 = vld [vmem:[#allocation6 + $0x4a0] sm:$0xff] }
  0xee   :  { %6889 = vmatpush1.bf16.msra.mxu0 %v11898_v5  ;;  %7217 = vmatpush1.bf16.msra.mxu1 %v11900_v8  ;;  %v825_v5 = vld [vmem:[#allocation6 + $0x488] sm:$0xff]  ;;  %v11947_v8 = vcombine.high %v816_v53, %v820_v54 }
  0xef   :  { %6890 = vmatprep.subr.bf16.mxu0 %v11907_v9  ;;  %7218 = vmatprep.subr.bf16.mxu1 %v11909_v12  ;;  %v11949_v9 = vcombine.high %v817_v57, %v821_v58  ;;  %v11946_v12 = vcombine.low %v816_v53, %v820_v54  ;;  %v11957_v18 = vcombine.high %v825_v5, %v829_v10  ;;  %v860_v53 = vld [vmem:[#allocation6 + $0x5a0] sm:$0xff]  ;;  %v857_v54 = vld [vmem:[#allocation6 + $0x588] sm:$0xff] }
  0xf2   :  { %6891 = vmatpush1.bf16.msra.mxu0 %v11906_v13  ;;  %7219 = vmatpush1.bf16.msra.mxu1 %v11908_v16  ;;  %v11948_v13 = vcombine.low %v817_v57, %v821_v58  ;;  %v861_v58 = vld [vmem:[#allocation6 + $0x5a8] sm:$0xff] }
  0xf3   :  { %6892 = vmatprep.subr.bf16.mxu0 %v11915_v17  ;;  %7220 = vmatprep.subr.bf16.mxu1 %v11917_v20  ;;  %v11955_v17 = vcombine.high %v824_v3, %v828_v4 }
  0xf6   :  { %6893 = vmatpush1.bf16.msra.mxu0 %v11914_v21  ;;  %7221 = vmatpush1.bf16.msra.mxu1 %v11916_v22  ;;  %v837_v21 = vld [vmem:[#allocation6 + $0x4e8] sm:$0xff] }
  0xf7   :  { %6894 = vmatprep.subr.bf16.mxu0 %v11923_v23  ;;  %7222 = vmatprep.subr.bf16.mxu1 %v11925_v24  ;;  %v11954_v24 = vcombine.low %v824_v3, %v828_v4  ;;  %v11965_v29 = vcombine.high %v833_v19, %v837_v21 }
  0xfa   :  { %6895 = vmatpush1.bf16.msra.mxu0 %v11922_v25  ;;  %7223 = vmatpush1.bf16.msra.mxu1 %v11924_v26  ;;  %v11956_v25 = vcombine.low %v825_v5, %v829_v10  ;;  %v840_v26 = vld [vmem:[#allocation6 + $0x500] sm:$0xff] }
  0xfb   :  { %6896 = vmatprep.subr.bf16.mxu0 %v11931_v30  ;;  %7224 = vmatprep.subr.bf16.mxu1 %v11933_v34  ;;  %v841_v30 = vld [vmem:[#allocation6 + $0x508] sm:$0xff]  ;;  %v848_v34 = vld [vmem:[#allocation6 + $0x540] sm:$0xff]  ;;  %v11971_v37 = vcombine.high %v840_v26, %v844_v27 }
  0xfe   :  { %6897 = vmatpush1.bf16.msra.mxu0 %v11930_v32  ;;  %7225 = vmatpush1.bf16.msra.mxu1 %v11932_v33  ;;  %v11962_v32 = vcombine.low %v832_v14, %v836_v15  ;;  %v11964_v33 = vcombine.low %v833_v19, %v837_v21  ;;  %v872_v19 = vld [vmem:[#allocation6 + $0x600] sm:$0xff] }
  0xff   :  { %6907 = vmatprep.subr.bf16.mxu0 %v11939_v38  ;;  %7235 = vmatprep.subr.bf16.mxu1 %v11941_v42  ;;  %v11973_v38 = vcombine.high %v841_v30, %v845_v31  ;;  %v876_v21 = vld [vmem:[#allocation6 + $0x620] sm:$0xff] }
 0x17c   :  { %v370_v52 = vpop.f32.mrb[0].mxu0  ;;  %v14626_v59 = vpop.f32.mrb[0].mxu1 }
 0x17d   :  { %v371_v55 = vadd.f32 %v370_v52, %v175_v49  ;;  %v372_v56 = vpop.f32.mrb[1].mxu0  ;;  %v413_v62 = vpop.f32.mrb[1].mxu1  ;;  %v856_v52 = vld [vmem:[#allocation6 + $0x580] sm:$0xff] }
 0x17e   :  { %v373_v60 = vadd.f32 %v372_v56, %v179_v50  ;;  %v374_v61 = vpop.f32.mrb[2].mxu0  ;;  %v414_v0 = vadd.f32 %v413_v62, %v187_v51  ;;  %v415_v1 = vpop.f32.mrb[2].mxu1  ;;  %v11970_v50 = vcombine.low %v840_v26, %v844_v27  ;;  %v11972_v51 = vcombine.low %v841_v30, %v845_v31  ;;  %v881_v30 = vld [vmem:[#allocation6 + $0x648] sm:$0xff] }
 0x17f   :  { %v375_v63 = vpop.f32.mrb[3].mxu0  ;;  %v416_v6 = vpop.f32.mrb[3].mxu1  ;;  %v14630_v7 = vpack.c.bf16 %v371_v55, %v371_v55  ;;  %v14651_v55 = vld [vmem:[#allocation4 + $0x8] sm:$0xff]  ;;  %v11979_v56 = vcombine.high %v848_v34, %v852_v35  ;;  %v11978_v62 = vcombine.low %v848_v34, %v852_v35  ;;  %v868_v1 = vld [vmem:[#allocation6 + $0x5e0] sm:$0xff]  ;;  %v11987_v5 = vcombine.high %v856_v52, %v860_v53 }
 0x180   :  { %v14628_v2 = vpack.c.bf16 %v373_v60, %v373_v60  ;;  %v14634_v11 = vpack.c.bf16 %v414_v0, %v414_v0  ;;  %v14654_v60 = vsub.s32 5, %v14607_v44  ;;  %v223_v61 = vrot.slane %v14651_v55, %v14649_v43  ;;  %v864_v0 = vld [vmem:[#allocation6 + $0x5c0] sm:$0xff] }
 0x181   :  { %v11989_v6 = vcombine.high %v857_v54, %v861_v58  ;;  %v11994_v26 = vcombine.low %v864_v0, %v868_v1  ;;  %v12003_v31 = vcombine.high %v872_v19, %v876_v21  ;;  %v12002_v34 = vcombine.low %v872_v19, %v876_v21  ;;  %v909_v19 = vld [vmem:[#allocation6 + $0x728] sm:$0xff] }
 0x182   :  { %6898 = vmatprep.mubr.bf16.mxu0 %v14628_v2  ;;  %7226 = vmatprep.mubr.bf16.mxu1 %v14628_v2  ;;  %v227_v4 = vrot.slane %v14651_v55, %v14654_v60 }
 0x183   :  { %6899 = vmatmul.mubr.bf16.vlgmr.msra.gmra.mrb[16].mxu0 %v14630_v7  ;;  %7227 = vmatmul.mubr.bf16.vlgmr.msra.gmra.mrb[16].mxu1 %v14630_v7 }
 0x184   :  { %6908 = vmatpush1.bf16.msra.mxu0 %v11938_v40  ;;  %7236 = vmatpush1.bf16.msra.mxu1 %v11940_v41  ;;  %v14638_v16 = vpop.f32.mrb[4].mxu0  ;;  %v853_v41 = vld [vmem:[#allocation6 + $0x568] sm:$0xff] }
 0x185   :  { %6909 = vmatprep.subr.bf16.mxu0 %v11947_v8  ;;  %7237 = vmatprep.subr.bf16.mxu1 %v11949_v9  ;;  %v14640_v20 = vpop.f32.mrb[5].mxu0  ;;  %v11981_v57 = vcombine.high %v849_v39, %v853_v41  ;;  %v11980_v63 = vcombine.low %v849_v39, %v853_v41  ;;  %v865_v8 = vld [vmem:[#allocation6 + $0x5c8] sm:$0xff]  ;;  %v14664_v39 = vpop.f32.mrb[4].mxu1 }
 0x186   :  { %6939 = vmatprep.mubr.bf16.mxu0 %v14634_v11  ;;  %7267 = vmatprep.mubr.bf16.mxu1 %v14634_v11  ;;  %v456_v22 = vpop.f32.mrb[6].mxu0 }
 0x187   :  { %v457_v23 = vpop.f32.mrb[7].mxu0  ;;  %v873_v22 = vld [vmem:[#allocation6 + $0x608] sm:$0xff] }
 0x188   :  { %6910 = vmatpush1.bf16.msra.mxu0 %v11946_v12  ;;  %7238 = vmatpush1.bf16.msra.mxu1 %v11948_v13  ;;  %v869_v12 = vld [vmem:[#allocation6 + $0x5e8] sm:$0xff]  ;;  %v11995_v23 = vcombine.high %v864_v0, %v868_v1  ;;  %v14669_v1 = vsub.s32 2, %v14607_v44 }
 0x189   :  { %6911 = vmatprep.subr.bf16.mxu0 %v11955_v17  ;;  %7239 = vmatprep.subr.bf16.mxu1 %v11957_v18  ;;  %v11986_v17 = vcombine.low %v856_v52, %v860_v53  ;;  %v11988_v18 = vcombine.low %v857_v54, %v861_v58  ;;  %v11996_v27 = vcombine.low %v865_v8, %v869_v12  ;;  %v900_v58 = vld [vmem:[#allocation6 + $0x6e0] sm:$0xff]  ;;  %v901_v0 = vld [vmem:[#allocation6 + $0x6e8] sm:$0xff] }
 0x18c   :  { %6912 = vmatpush1.bf16.msra.mxu0 %v11954_v24  ;;  %7240 = vmatpush1.bf16.msra.mxu1 %v11956_v25  ;;  %v14644_v36 = vpop.f32.mrb[8].mxu0  ;;  %v11997_v24 = vcombine.high %v865_v8, %v869_v12  ;;  %v877_v25 = vld [vmem:[#allocation6 + $0x628] sm:$0xff]  ;;  %v215_v8 = vrot.slane %v14651_v55, %v14669_v1  ;;  %v219_v12 = vrot.slane %v14651_v55, %v14618_v48 }
 0x18d   :  { %6913 = vmatprep.subr.bf16.mxu0 %v11963_v28  ;;  %7241 = vmatprep.subr.bf16.mxu1 %v11965_v29  ;;  %v14646_v40 = vpop.f32.mrb[9].mxu0  ;;  %v880_v28 = vld [vmem:[#allocation6 + $0x640] sm:$0xff]  ;;  %v12004_v35 = vcombine.low %v873_v22, %v877_v25 }
 0x18e   :  { %v538_v42 = vpop.f32.mrb[10].mxu0  ;;  %v884_v29 = vld [vmem:[#allocation6 + $0x660] sm:$0xff] }
 0x18f   :  { %v539_v49 = vpop.f32.mrb[11].mxu0  ;;  %v12011_v41 = vcombine.high %v880_v28, %v884_v29  ;;  %v12010_v54 = vcombine.low %v880_v28, %v884_v29  ;;  %v916_v28 = vld [vmem:[#allocation6 + $0x760] sm:$0xff]  ;;  %v913_v29 = vld [vmem:[#allocation6 + $0x748] sm:$0xff] }
 0x190   :  { %6914 = vmatpush1.bf16.msra.mxu0 %v11962_v32  ;;  %7242 = vmatpush1.bf16.msra.mxu1 %v11964_v33  ;;  %v12005_v32 = vcombine.high %v873_v22, %v877_v25  ;;  %v885_v33 = vld [vmem:[#allocation6 + $0x668] sm:$0xff] }
 0x191   :  { %6915 = vmatprep.subr.bf16.mxu0 %v11971_v37  ;;  %7243 = vmatprep.subr.bf16.mxu1 %v11973_v38  ;;  %v888_v37 = vld [vmem:[#allocation6 + $0x680] sm:$0xff]  ;;  %v12013_v42 = vcombine.high %v881_v30, %v885_v33  ;;  %v889_v49 = vld [vmem:[#allocation6 + $0x688] sm:$0xff] }
 0x192   :  { %v892_v38 = vld [vmem:[#allocation6 + $0x6a0] sm:$0xff] }
 0x194   :  { %6916 = vmatpush1.bf16.msra.mxu0 %v11970_v50  ;;  %7244 = vmatpush1.bf16.msra.mxu1 %v11972_v51  ;;  %v616_v3 = vpop.f32.mrb[12].mxu0  ;;  %v14666_v50 = vpop.f32.mrb[5].mxu1  ;;  %v893_v51 = vld [vmem:[#allocation6 + $0x6a8] sm:$0xff] }
 0x195   :  { %6917 = vmatprep.subr.bf16.mxu0 %v11979_v56  ;;  %7245 = vmatprep.subr.bf16.mxu1 %v11981_v57  ;;  %v14660_v9 = vadd.f32 %v616_v3, %v223_v61  ;;  %v618_v10 = vpop.f32.mrb[13].mxu0  ;;  %v497_v52 = vpop.f32.mrb[6].mxu1  ;;  %v12012_v56 = vcombine.low %v881_v30, %v885_v33  ;;  %v896_v57 = vld [vmem:[#allocation6 + $0x6c0] sm:$0xff]  ;;  %v897_v61 = vld [vmem:[#allocation6 + $0x6c8] sm:$0xff]  ;;  %v12018_v3 = vcombine.low %v888_v37, %v892_v38  ;;  %v14680_v33 = vsub.s32 6, %v14607_v44 }
 0x196   :  { %v14662_v13 = vadd.f32 %v618_v10, %v227_v4  ;;  %v620_v14 = vpop.f32.mrb[14].mxu0  ;;  %v498_v53 = vpop.f32.mrb[7].mxu1  ;;  %v12020_v4 = vcombine.low %v889_v49, %v893_v51  ;;  %v12026_v25 = vcombine.low %v896_v57, %v900_v58  ;;  %v917_v30 = vld [vmem:[#allocation6 + $0x768] sm:$0xff] }
 0x197   :  { %v621_v15 = vpop.f32.mrb[15].mxu0  ;;  %v575_v10 = vpop.f32.mrb[8].mxu1  ;;  %v12027_v14 = vcombine.high %v896_v57, %v900_v58  ;;  %v12045_v53 = vcombine.high %v913_v29, %v917_v30 }
 0x198   :  { %6918 = vmatpush1.bf16.msra.mxu0 %v11978_v62  ;;  %7246 = vmatpush1.bf16.msra.mxu1 %v11980_v63  ;;  %v12019_v62 = vcombine.high %v888_v37, %v892_v38  ;;  %v12021_v63 = vcombine.high %v889_v49, %v893_v51  ;;  %v12029_v15 = vcombine.high %v897_v61, %v901_v0  ;;  %v920_v38 = vld [vmem:[#allocation6 + $0x780] sm:$0xff] }
 0x199   :  { %6919 = vmatprep.subr.bf16.mxu0 %v11987_v5  ;;  %7247 = vmatprep.subr.bf16.mxu1 %v11989_v6  ;;  %v904_v5 = vld [vmem:[#allocation6 + $0x700] sm:$0xff]  ;;  %v14675_v21 = vadd.f32 %v575_v10, %v215_v8  ;;  %v933_v8 = vld [vmem:[#allocation6 + $0x7e8] sm:$0xff]  ;;  %v183_v10 = vrot.slane %v14609_v45, %v14669_v1 }
 0x19a   :  { %v908_v6 = vld [vmem:[#allocation6 + $0x720] sm:$0xff] }
 0x19c   :  { %6920 = vmatpush1.bf16.msra.mxu0 %v11986_v17  ;;  %7248 = vmatpush1.bf16.msra.mxu1 %v11988_v18  ;;  %v905_v17 = vld [vmem:[#allocation6 + $0x708] sm:$0xff]  ;;  %v577_v18 = vpop.f32.mrb[9].mxu1 }
 0x19d   :  { %6921 = vmatprep.subr.bf16.mxu0 %v11995_v23  ;;  %7249 = vmatprep.subr.bf16.mxu1 %v11997_v24  ;;  %v14677_v22 = vadd.f32 %v577_v18, %v219_v12  ;;  %v579_v23 = vpop.f32.mrb[10].mxu1  ;;  %v12036_v37 = vcombine.low %v905_v17, %v909_v19  ;;  %v937_v18 = vld [vmem:[#allocation6 + $0x808] sm:$0xff] }
 0x19e   :  { %v580_v24 = vpop.f32.mrb[11].mxu1 }
 0x19f   :  { %v657_v49 = vpop.f32.mrb[12].mxu1  ;;  %v941_v24 = vld [vmem:[#allocation6 + $0x828] sm:$0xff] }
 0x1a0   :  { %6922 = vmatpush1.bf16.msra.mxu0 %v11994_v26  ;;  %7250 = vmatpush1.bf16.msra.mxu1 %v11996_v27  ;;  %v12028_v26 = vcombine.low %v897_v61, %v901_v0  ;;  %v912_v27 = vld [vmem:[#allocation6 + $0x740] sm:$0xff]  ;;  %v12044_v0 = vcombine.low %v913_v29, %v917_v30 }
 0x1a1   :  { %6923 = vmatprep.subr.bf16.mxu0 %v12003_v31  ;;  %7251 = vmatprep.subr.bf16.mxu1 %v12005_v32  ;;  %v12035_v31 = vcombine.high %v904_v5, %v908_v6  ;;  %v12037_v32 = vcombine.high %v905_v17, %v909_v19  ;;  %v12043_v52 = vcombine.high %v912_v27, %v916_v28  ;;  %v940_v17 = vld [vmem:[#allocation6 + $0x820] sm:$0xff] }
 0x1a2   :  { %v944_v29 = vld [vmem:[#allocation6 + $0x840] sm:$0xff] }
 0x1a3   :  { %v948_v30 = vld [vmem:[#allocation6 + $0x860] sm:$0xff] }
 0x1a4   :  { %6924 = vmatpush1.bf16.msra.mxu0 %v12002_v34  ;;  %7252 = vmatpush1.bf16.msra.mxu1 %v12004_v35  ;;  %v14683_v34 = vsub.s32 7, %v14607_v44  ;;  %v12034_v35 = vcombine.low %v904_v5, %v908_v6  ;;  %v659_v44 = vpop.f32.mrb[13].mxu1 }
 0x1a5   :  { %6925 = vmatprep.subr.bf16.mxu0 %v12011_v41  ;;  %7253 = vmatprep.subr.bf16.mxu1 %v12013_v42  ;;  %v924_v41 = vld [vmem:[#allocation6 + $0x7a0] sm:$0xff]  ;;  %v231_v42 = vrot.slane %v14651_v55, %v14680_v33  ;;  %v661_v61 = vpop.f32.mrb[14].mxu1 }
 0x1a6   :  { %v235_v51 = vrot.slane %v14651_v55, %v14683_v34  ;;  %v929_v55 = vld [vmem:[#allocation6 + $0x7c8] sm:$0xff]  ;;  %v12051_v5 = vcombine.high %v920_v38, %v924_v41  ;;  %v12050_v12 = vcombine.low %v920_v38, %v924_v41 }
 0x1a7   :  { %v14689_v57 = vadd.f32 %v657_v49, %v231_v42  ;;  %v12061_v23 = vcombine.high %v929_v55, %v933_v8  ;;  %v952_v42 = vld [vmem:[#allocation6 + $0x880] sm:$0xff] }
 0x1a8   :  { %6926 = vmatpush1.bf16.msra.mxu0 %v12010_v54  ;;  %7254 = vmatpush1.bf16.msra.mxu1 %v12012_v56  ;;  %v921_v54 = vld [vmem:[#allocation6 + $0x788] sm:$0xff]  ;;  %v14691_v58 = vadd.f32 %v659_v44, %v235_v51  ;;  %v956_v49 = vld [vmem:[#allocation6 + $0x8a0] sm:$0xff] }
 0x1a9   :  { %6927 = vmatprep.subr.bf16.mxu0 %v12019_v62  ;;  %7255 = vmatprep.subr.bf16.mxu1 %v12021_v63  ;;  %v925_v56 = vld [vmem:[#allocation6 + $0x7a8] sm:$0xff]  ;;  %v662_v62 = vpop.f32.mrb[15].mxu1  ;;  %v12042_v63 = vcombine.low %v912_v27, %v916_v28  ;;  %v12060_v28 = vcombine.low %v929_v55, %v933_v8  ;;  %v12083_v61 = vcombine.high %v952_v42, %v956_v49 }
 0x1aa   :  { %v12053_v6 = vcombine.high %v921_v54, %v925_v56  ;;  %v953_v51 = vld [vmem:[#allocation6 + $0x888] sm:$0xff]  ;;  %v12082_v55 = vcombine.low %v952_v42, %v956_v49 }
 0x1ac   :  { %6928 = vmatpush1.bf16.msra.mxu0 %v12018_v3  ;;  %7256 = vmatpush1.bf16.msra.mxu1 %v12020_v4  ;;  %v928_v3 = vld [vmem:[#allocation6 + $0x7c0] sm:$0xff] }
 0x1ad   :  { %6929 = vmatprep.subr.bf16.mxu0 %v12027_v14  ;;  %7257 = vmatprep.subr.bf16.mxu1 %v12029_v15  ;;  %v932_v4 = vld [vmem:[#allocation6 + $0x7e0] sm:$0xff]  ;;  %v12052_v14 = vcombine.low %v921_v54, %v925_v56  ;;  %v957_v54 = vld [vmem:[#allocation6 + $0x8a8] sm:$0xff] }
 0x1ae   :  { %v936_v15 = vld [vmem:[#allocation6 + $0x800] sm:$0xff]  ;;  %v12059_v19 = vcombine.high %v928_v3, %v932_v4  ;;  %v12058_v27 = vcombine.low %v928_v3, %v932_v4  ;;  %v12085_v62 = vcombine.high %v953_v51, %v957_v54  ;;  %v961_v3 = vld [vmem:[#allocation6 + $0x8c8] sm:$0xff] }
 0x1af   :  { %v965_v4 = vld [vmem:[#allocation6 + $0x8e8] sm:$0xff] }
 0x1b0   :  { %6930 = vmatpush1.bf16.msra.mxu0 %v12026_v25  ;;  %7258 = vmatpush1.bf16.msra.mxu1 %v12028_v26  ;;  %v195_v25 = vrot.slane %v14609_v45, %v14654_v60  ;;  %v412_v26 = vadd.f32 %v14626_v59, %v183_v10  ;;  %v12066_v45 = vcombine.low %v936_v15, %v940_v17  ;;  %v968_v10 = vld [vmem:[#allocation6 + $0x900] sm:$0xff] }
 0x1b1   :  { %6931 = vmatprep.subr.bf16.mxu0 %v12035_v31  ;;  %7259 = vmatprep.subr.bf16.mxu1 %v12037_v32  ;;  %v945_v31 = vld [vmem:[#allocation6 + $0x848] sm:$0xff]  ;;  %v12067_v32 = vcombine.high %v936_v15, %v940_v17  ;;  %v12068_v59 = vcombine.low %v937_v18, %v941_v24  ;;  %v12093_v8 = vcombine.high %v961_v3, %v965_v4 }
 0x1b2   :  { %v455_v38 = vadd.f32 %v14640_v20, %v195_v25  ;;  %v14699_v41 = vpack.c.bf16 %v412_v26, %v412_v26  ;;  %v12074_v20 = vcombine.low %v944_v29, %v948_v30  ;;  %v973_v15 = vld [vmem:[#allocation6 + $0x928] sm:$0xff]  ;;  %v980_v25 = vld [vmem:[#allocation6 + $0x960] sm:$0xff] }
 0x1b3   :  { %v977_v26 = vld [vmem:[#allocation6 + $0x948] sm:$0xff] }
 0x1b4   :  { %6932 = vmatpush1.bf16.msra.mxu0 %v12034_v35  ;;  %7260 = vmatpush1.bf16.msra.mxu1 %v12036_v37  ;;  %v12069_v35 = vcombine.high %v937_v18, %v941_v24  ;;  %v949_v37 = vld [vmem:[#allocation6 + $0x868] sm:$0xff]  ;;  %v14701_v44 = vpack.c.bf16 %v455_v38, %v455_v38  ;;  %v12092_v18 = vcombine.low %v961_v3, %v965_v4  ;;  %v976_v24 = vld [vmem:[#allocation6 + $0x940] sm:$0xff] }
 0x1b5   :  { %6933 = vmatprep.subr.bf16.mxu0 %v12043_v52  ;;  %7261 = vmatprep.subr.bf16.mxu1 %v12045_v53  ;;  %v12075_v52 = vcombine.high %v944_v29, %v948_v30  ;;  %v12077_v53 = vcombine.high %v945_v31, %v949_v37  ;;  %v12076_v56 = vcombine.low %v945_v31, %v949_v37  ;;  %v985_v37 = vld [vmem:[#allocation6 + $0x988] sm:$0xff] }
 0x1b6   :  { %v12107_v30 = vcombine.high %v976_v24, %v980_v25  ;;  %v989_v38 = vld [vmem:[#allocation6 + $0x9a8] sm:$0xff] }
 0x1b7   :  { %v12117_v49 = vcombine.high %v985_v37, %v989_v38  ;;  %v1001_v3 = vld [vmem:[#allocation6 + $0xa08] sm:$0xff] }
 0x1b8   :  { %6934 = vmatpush1.bf16.msra.mxu0 %v12042_v63  ;;  %7262 = vmatpush1.bf16.msra.mxu1 %v12044_v0  ;;  %v960_v63 = vld [vmem:[#allocation6 + $0x8c0] sm:$0xff]  ;;  %v1005_v4 = vld [vmem:[#allocation6 + $0xa28] sm:$0xff] }
 0x1b9   :  { %6935 = vmatprep.subr.bf16.mxu0 %v12051_v5  ;;  %7263 = vmatprep.subr.bf16.mxu1 %v12053_v6  ;;  %v964_v0 = vld [vmem:[#allocation6 + $0x8e0] sm:$0xff]  ;;  %v12084_v5 = vcombine.low %v953_v51, %v957_v54  ;;  %v997_v54 = vld [vmem:[#allocation6 + $0x9e8] sm:$0xff] }
 0x1ba   :  { %v12091_v6 = vcombine.high %v960_v63, %v964_v0  ;;  %v12090_v17 = vcombine.low %v960_v63, %v964_v0  ;;  %v992_v51 = vld [vmem:[#allocation6 + $0x9c0] sm:$0xff] }
 0x1bb   :  { %v1000_v63 = vld [vmem:[#allocation6 + $0xa00] sm:$0xff] }
 0x1bc   :  { %6936 = vmatpush1.bf16.msra.mxu0 %v12050_v12  ;;  %7264 = vmatpush1.bf16.msra.mxu1 %v12052_v14  ;;  %v972_v12 = vld [vmem:[#allocation6 + $0x920] sm:$0xff]  ;;  %v969_v14 = vld [vmem:[#allocation6 + $0x908] sm:$0xff] }
 0x1bd   :  { %6937 = vmatprep.subr.bf16.mxu0 %v12059_v19  ;;  %7265 = vmatprep.subr.bf16.mxu1 %v12061_v23  ;;  %v12099_v19 = vcombine.high %v968_v10, %v972_v12  ;;  %v12101_v23 = vcombine.high %v969_v14, %v973_v15  ;;  %v12100_v29 = vcombine.low %v969_v14, %v973_v15  ;;  %v1004_v0 = vld [vmem:[#allocation6 + $0xa20] sm:$0xff]  ;;  %v1009_v14 = vld [vmem:[#allocation6 + $0xa48] sm:$0xff] }
 0x1be   :  { %v1013_v15 = vld [vmem:[#allocation6 + $0xa68] sm:$0xff] }
 0x1c0   :  { %6938 = vmatpush1.bf16.msra.mxu0 %v12058_v27  ;;  %7266 = vmatpush1.bf16.msra.mxu1 %v12060_v28  ;;  %v981_v27 = vld [vmem:[#allocation6 + $0x968] sm:$0xff]  ;;  %v12098_v28 = vcombine.low %v968_v10, %v972_v12  ;;  %v1008_v10 = vld [vmem:[#allocation6 + $0xa40] sm:$0xff] }
 0x1c1   :  { %6948 = vmatprep.subr.bf16.mxu0 %v12067_v32  ;;  %7276 = vmatprep.subr.bf16.mxu1 %v12069_v35  ;;  %v12109_v31 = vcombine.high %v977_v26, %v981_v27  ;;  %v984_v32 = vld [vmem:[#allocation6 + $0x980] sm:$0xff] }
 0x1c2   :  { %v988_v35 = vld [vmem:[#allocation6 + $0x9a0] sm:$0xff] }
 0x1c3   :  { %6940 = vmatmul.mubr.bf16.vlgmr.msra.gmra.mrb[16].mxu0 %v14699_v41  ;;  %7268 = vmatmul.mubr.bf16.vlgmr.msra.gmra.mrb[16].mxu1 %v14699_v41  ;;  %v12115_v42 = vcombine.high %v984_v32, %v988_v35  ;;  %v1012_v12 = vld [vmem:[#allocation6 + $0xa60] sm:$0xff] }
 0x1c4   :  { %6949 = vmatpush1.bf16.msra.mxu0 %v12066_v45  ;;  %7277 = vmatpush1.bf16.msra.mxu1 %v12068_v59  ;;  %v12106_v45 = vcombine.low %v976_v24, %v980_v25  ;;  %v12108_v59 = vcombine.low %v977_v26, %v981_v27  ;;  %v1016_v24 = vld [vmem:[#allocation6 + $0xa80] sm:$0xff]  ;;  %v1017_v26 = vld [vmem:[#allocation6 + $0xa88] sm:$0xff] }
 0x1c5   :  { %6950 = vmatprep.subr.bf16.mxu0 %v12075_v52  ;;  %7278 = vmatprep.subr.bf16.mxu1 %v12077_v53  ;;  %v996_v52 = vld [vmem:[#allocation6 + $0x9e0] sm:$0xff]  ;;  %v993_v53 = vld [vmem:[#allocation6 + $0x9c8] sm:$0xff] }
 0x1c6   :  { %6980 = vmatprep.mubr.bf16.mxu0 %v14701_v44  ;;  %7308 = vmatprep.mubr.bf16.mxu1 %v14701_v44  ;;  %v1020_v25 = vld [vmem:[#allocation6 + $0xaa0] sm:$0xff]  ;;  %v1021_v27 = vld [vmem:[#allocation6 + $0xaa8] sm:$0xff] }
 0x1c8   :  { %6951 = vmatpush1.bf16.msra.mxu0 %v12074_v20  ;;  %7279 = vmatpush1.bf16.msra.mxu1 %v12076_v56  ;;  %v12114_v20 = vcombine.low %v984_v32, %v988_v35  ;;  %v12116_v56 = vcombine.low %v985_v37, %v989_v38  ;;  %v1024_v32 = vld [vmem:[#allocation6 + $0xac0] sm:$0xff]  ;;  %v1025_v37 = vld [vmem:[#allocation6 + $0xac8] sm:$0xff] }
 0x1c9   :  { %6952 = vmatprep.subr.bf16.mxu0 %v12083_v61  ;;  %7280 = vmatprep.subr.bf16.mxu1 %v12085_v62  ;;  %v12123_v61 = vcombine.high %v992_v51, %v996_v52  ;;  %v12125_v62 = vcombine.high %v993_v53, %v997_v54  ;;  %v1028_v35 = vld [vmem:[#allocation6 + $0xae0] sm:$0xff]  ;;  %v1029_v38 = vld [vmem:[#allocation6 + $0xae8] sm:$0xff] }
 0x1cc   :  { %6953 = vmatpush1.bf16.msra.mxu0 %v12082_v55  ;;  %7281 = vmatpush1.bf16.msra.mxu1 %v12084_v5  ;;  %v12122_v55 = vcombine.low %v992_v51, %v996_v52  ;;  %v12124_v5 = vcombine.low %v993_v53, %v997_v54  ;;  %v1032_v51 = vld [vmem:[#allocation6 + $0xb00] sm:$0xff]  ;;  %v1033_v53 = vld [vmem:[#allocation6 + $0xb08] sm:$0xff] }
 0x1cd   :  { %6954 = vmatprep.subr.bf16.mxu0 %v12091_v6  ;;  %7282 = vmatprep.subr.bf16.mxu1 %v12093_v8  ;;  %v12131_v6 = vcombine.high %v1000_v63, %v1004_v0  ;;  %v12133_v8 = vcombine.high %v1001_v3, %v1005_v4  ;;  %v1036_v52 = vld [vmem:[#allocation6 + $0xb20] sm:$0xff]  ;;  %v1037_v54 = vld [vmem:[#allocation6 + $0xb28] sm:$0xff] }
 0x1d0   :  { %6955 = vmatpush1.bf16.msra.mxu0 %v12090_v17  ;;  %7283 = vmatpush1.bf16.msra.mxu1 %v12092_v18  ;;  %v12130_v17 = vcombine.low %v1000_v63, %v1004_v0  ;;  %v12132_v18 = vcombine.low %v1001_v3, %v1005_v4  ;;  %v1040_v63 = vld [vmem:[#allocation6 + $0xb40] sm:$0xff]  ;;  %v1041_v3 = vld [vmem:[#allocation6 + $0xb48] sm:$0xff] }
 0x1d1   :  { %6956 = vmatprep.subr.bf16.mxu0 %v12099_v19  ;;  %7284 = vmatprep.subr.bf16.mxu1 %v12101_v23  ;;  %v12139_v19 = vcombine.high %v1008_v10, %v1012_v12  ;;  %v12141_v23 = vcombine.high %v1009_v14, %v1013_v15  ;;  %v1044_v0 = vld [vmem:[#allocation6 + $0xb60] sm:$0xff]  ;;  %v1045_v4 = vld [vmem:[#allocation6 + $0xb68] sm:$0xff] }
 0x1d4   :  { %6957 = vmatpush1.bf16.msra.mxu0 %v12098_v28  ;;  %7285 = vmatpush1.bf16.msra.mxu1 %v12100_v29  ;;  %v12138_v28 = vcombine.low %v1008_v10, %v1012_v12  ;;  %v12140_v29 = vcombine.low %v1009_v14, %v1013_v15  ;;  %v1048_v10 = vld [vmem:[#allocation6 + $0xb80] sm:$0xff]  ;;  %v1049_v14 = vld [vmem:[#allocation6 + $0xb88] sm:$0xff] }
 0x1d5   :  { %6958 = vmatprep.subr.bf16.mxu0 %v12107_v30  ;;  %7286 = vmatprep.subr.bf16.mxu1 %v12109_v31  ;;  %v12147_v30 = vcombine.high %v1016_v24, %v1020_v25  ;;  %v12149_v31 = vcombine.high %v1017_v26, %v1021_v27  ;;  %v1052_v12 = vld [vmem:[#allocation6 + $0xba0] sm:$0xff]  ;;  %v1053_v15 = vld [vmem:[#allocation6 + $0xba8] sm:$0xff] }
 0x1d8   :  { %6959 = vmatpush1.bf16.msra.mxu0 %v12106_v45  ;;  %7287 = vmatpush1.bf16.msra.mxu1 %v12108_v59  ;;  %v12146_v45 = vcombine.low %v1016_v24, %v1020_v25  ;;  %v12148_v59 = vcombine.low %v1017_v26, %v1021_v27  ;;  %v1056_v24 = vld [vmem:[#allocation6 + $0xbc0] sm:$0xff]  ;;  %v1057_v26 = vld [vmem:[#allocation6 + $0xbc8] sm:$0xff] }
 0x1d9   :  { %6960 = vmatprep.subr.bf16.mxu0 %v12115_v42  ;;  %7288 = vmatprep.subr.bf16.mxu1 %v12117_v49  ;;  %v12155_v42 = vcombine.high %v1024_v32, %v1028_v35  ;;  %v12157_v49 = vcombine.high %v1025_v37, %v1029_v38  ;;  %v1060_v25 = vld [vmem:[#allocation6 + $0xbe0] sm:$0xff]  ;;  %v1061_v27 = vld [vmem:[#allocation6 + $0xbe8] sm:$0xff] }
 0x1dc   :  { %6961 = vmatpush1.bf16.msra.mxu0 %v12114_v20  ;;  %7289 = vmatpush1.bf16.msra.mxu1 %v12116_v56  ;;  %v12154_v20 = vcombine.low %v1024_v32, %v1028_v35  ;;  %v12156_v56 = vcombine.low %v1025_v37, %v1029_v38  ;;  %v12187_v32 = vcombine.high %v1056_v24, %v1060_v25  ;;  %v1064_v37 = vld [vmem:[#allocation6 + $0xc00] sm:$0xff] }
 0x1dd   :  { %6962 = vmatprep.subr.bf16.mxu0 %v12123_v61  ;;  %7290 = vmatprep.subr.bf16.mxu1 %v12125_v62  ;;  %v12163_v61 = vcombine.high %v1032_v51, %v1036_v52  ;;  %v12165_v62 = vcombine.high %v1033_v53, %v1037_v54  ;;  %v12189_v35 = vcombine.high %v1057_v26, %v1061_v27  ;;  %v1068_v38 = vld [vmem:[#allocation6 + $0xc20] sm:$0xff] }
 0x1e0   :  { %6963 = vmatpush1.bf16.msra.mxu0 %v12122_v55  ;;  %7291 = vmatpush1.bf16.msra.mxu1 %v12124_v5  ;;  %v12162_v55 = vcombine.low %v1032_v51, %v1036_v52  ;;  %v12164_v5 = vcombine.low %v1033_v53, %v1037_v54  ;;  %v12186_v51 = vcombine.low %v1056_v24, %v1060_v25  ;;  %v1093_v24 = vld [vmem:[#allocation6 + $0xce8] sm:$0xff] }
 0x1e1   :  { %6964 = vmatprep.subr.bf16.mxu0 %v12131_v6  ;;  %7292 = vmatprep.subr.bf16.mxu1 %v12133_v8  ;;  %v12171_v6 = vcombine.high %v1040_v63, %v1044_v0  ;;  %v12173_v8 = vcombine.high %v1041_v3, %v1045_v4  ;;  %v12188_v52 = vcombine.low %v1057_v26, %v1061_v27 }
 0x1e2   :  { %v12195_v53 = vcombine.high %v1064_v37, %v1068_v38 }
 0x1e4   :  { %6965 = vmatpush1.bf16.msra.mxu0 %v12130_v17  ;;  %7293 = vmatpush1.bf16.msra.mxu1 %v12132_v18  ;;  %v12170_v17 = vcombine.low %v1040_v63, %v1044_v0  ;;  %v12172_v18 = vcombine.low %v1041_v3, %v1045_v4  ;;  %v12194_v3 = vcombine.low %v1064_v37, %v1068_v38 }
 0x1e5   :  { %6966 = vmatprep.subr.bf16.mxu0 %v12139_v19  ;;  %7294 = vmatprep.subr.bf16.mxu1 %v12141_v23  ;;  %v12179_v19 = vcombine.high %v1048_v10, %v1052_v12  ;;  %v12181_v23 = vcombine.high %v1049_v14, %v1053_v15 }
 0x1e8   :  { %6967 = vmatpush1.bf16.msra.mxu0 %v12138_v28  ;;  %7295 = vmatpush1.bf16.msra.mxu1 %v12140_v29  ;;  %v14707_v28 = vld [vmem:[#allocation4] sm:$0xff] }
 0x1e9   :  { %6968 = vmatprep.subr.bf16.mxu0 %v12147_v30  ;;  %7296 = vmatprep.subr.bf16.mxu1 %v12149_v31  ;;  %v191_v29 = vrot.slane %v14707_v28, %v14649_v43  ;;  %v12178_v30 = vcombine.low %v1048_v10, %v1052_v12  ;;  %v12180_v31 = vcombine.low %v1049_v14, %v1053_v15  ;;  %v1085_v10 = vld [vmem:[#allocation6 + $0xca8] sm:$0xff] }
 0x1ec   :  { %6969 = vmatpush1.bf16.msra.mxu0 %v12146_v45  ;;  %7297 = vmatpush1.bf16.msra.mxu1 %v12148_v59  ;;  %v1065_v45 = vld [vmem:[#allocation6 + $0xc08] sm:$0xff] }
 0x1ed   :  { %6970 = vmatprep.subr.bf16.mxu0 %v12155_v42  ;;  %7298 = vmatprep.subr.bf16.mxu1 %v12157_v49  ;;  %v1069_v59 = vld [vmem:[#allocation6 + $0xc28] sm:$0xff]  ;;  %v203_v42 = vrot.slane %v14707_v28, %v14683_v34  ;;  %v453_v49 = vadd.f32 %v14638_v16, %v191_v29 }
 0x1ee   :  { %v12197_v54 = vcombine.high %v1065_v45, %v1069_v59  ;;  %v12196_v16 = vcombine.low %v1065_v45, %v1069_v59 }
 0x1ef   :  { %v496_v63 = vadd.f32 %v14666_v50, %v203_v42  ;;  %v14715_v0 = vpack.c.bf16 %v453_v49, %v453_v49  ;;  %v1104_v42 = vld [vmem:[#allocation6 + $0xd40] sm:$0xff] }
 0x1f0   :  { %6971 = vmatpush1.bf16.msra.mxu0 %v12154_v20  ;;  %7299 = vmatpush1.bf16.msra.mxu1 %v12156_v56  ;;  %v1072_v20 = vld [vmem:[#allocation6 + $0xc40] sm:$0xff] }
 0x1f1   :  { %6972 = vmatprep.subr.bf16.mxu0 %v12163_v61  ;;  %7300 = vmatprep.subr.bf16.mxu1 %v12165_v62  ;;  %v1076_v56 = vld [vmem:[#allocation6 + $0xc60] sm:$0xff]  ;;  %v1073_v61 = vld [vmem:[#allocation6 + $0xc48] sm:$0xff]  ;;  %v14717_v12 = vpack.c.bf16 %v496_v63, %v496_v63 }
 0x1f2   :  { %v1077_v62 = vld [vmem:[#allocation6 + $0xc68] sm:$0xff]  ;;  %v12203_v4 = vcombine.high %v1072_v20, %v1076_v56  ;;  %v12202_v50 = vcombine.low %v1072_v20, %v1076_v56  ;;  %v1108_v49 = vld [vmem:[#allocation6 + $0xd60] sm:$0xff] }
 0x1f3   :  { %v12204_v14 = vcombine.low %v1073_v61, %v1077_v62  ;;  %v12235_v20 = vcombine.high %v1104_v42, %v1108_v49  ;;  %v1113_v63 = vld [vmem:[#allocation6 + $0xd88] sm:$0xff] }
 0x1f4   :  { %6973 = vmatpush1.bf16.msra.mxu0 %v12162_v55  ;;  %7301 = vmatpush1.bf16.msra.mxu1 %v12164_v5  ;;  %v12205_v55 = vcombine.high %v1073_v61, %v1077_v62  ;;  %v1080_v5 = vld [vmem:[#allocation6 + $0xc80] sm:$0xff] }
 0x1f5   :  { %6974 = vmatprep.subr.bf16.mxu0 %v12171_v6  ;;  %7302 = vmatprep.subr.bf16.mxu1 %v12173_v8  ;;  %v1084_v6 = vld [vmem:[#allocation6 + $0xca0] sm:$0xff]  ;;  %v1081_v8 = vld [vmem:[#allocation6 + $0xc88] sm:$0xff] }
 0x1f6   :  { %v12211_v15 = vcombine.high %v1080_v5, %v1084_v6  ;;  %v12210_v25 = vcombine.low %v1080_v5, %v1084_v6  ;;  %v12212_v26 = vcombine.low %v1081_v8, %v1085_v10  ;;  %v1112_v61 = vld [vmem:[#allocation6 + $0xd80] sm:$0xff] }
 0x1f7   :  { %v1116_v62 = vld [vmem:[#allocation6 + $0xda0] sm:$0xff] }
 0x1f8   :  { %6975 = vmatpush1.bf16.msra.mxu0 %v12170_v17  ;;  %7303 = vmatpush1.bf16.msra.mxu1 %v12172_v18  ;;  %v12213_v17 = vcombine.high %v1081_v8, %v1085_v10  ;;  %v1088_v18 = vld [vmem:[#allocation6 + $0xcc0] sm:$0xff]  ;;  %v1121_v10 = vld [vmem:[#allocation6 + $0xdc8] sm:$0xff] }
 0x1f9   :  { %6976 = vmatprep.subr.bf16.mxu0 %v12179_v19  ;;  %7304 = vmatprep.subr.bf16.mxu1 %v12181_v23  ;;  %v1092_v19 = vld [vmem:[#allocation6 + $0xce0] sm:$0xff]  ;;  %v1089_v23 = vld [vmem:[#allocation6 + $0xcc8] sm:$0xff] }
 0x1fa   :  { %v12219_v27 = vcombine.high %v1088_v18, %v1092_v19  ;;  %v12221_v29 = vcombine.high %v1089_v23, %v1093_v24  ;;  %v12218_v37 = vcombine.low %v1088_v18, %v1092_v19  ;;  %v12220_v38 = vcombine.low %v1089_v23, %v1093_v24  ;;  %v1120_v6 = vld [vmem:[#allocation6 + $0xdc0] sm:$0xff]  ;;  %v1129_v24 = vld [vmem:[#allocation6 + $0xe08] sm:$0xff] }
 0x1fb   :  { %v1124_v8 = vld [vmem:[#allocation6 + $0xde0] sm:$0xff] }
 0x1fc   :  { %6977 = vmatpush1.bf16.msra.mxu0 %v12178_v30  ;;  %7305 = vmatpush1.bf16.msra.mxu1 %v12180_v31  ;;  %v1096_v30 = vld [vmem:[#allocation6 + $0xd00] sm:$0xff] }
 0x1fd   :  { %6978 = vmatprep.subr.bf16.mxu0 %v12187_v32  ;;  %7306 = vmatprep.subr.bf16.mxu1 %v12189_v35  ;;  %v1100_v31 = vld [vmem:[#allocation6 + $0xd20] sm:$0xff]  ;;  %v1097_v32 = vld [vmem:[#allocation6 + $0xd08] sm:$0xff] }
 0x1fe   :  { %v1101_v35 = vld [vmem:[#allocation6 + $0xd28] sm:$0xff]  ;;  %v12227_v45 = vcombine.high %v1096_v30, %v1100_v31  ;;  %v1128_v19 = vld [vmem:[#allocation6 + $0xe00] sm:$0xff] }
 0x1ff   :  { %v12229_v59 = vcombine.high %v1097_v32, %v1101_v35  ;;  %v1132_v23 = vld [vmem:[#allocation6 + $0xe20] sm:$0xff] }
 0x200   :  { %6979 = vmatpush1.bf16.msra.mxu0 %v12186_v51  ;;  %7307 = vmatpush1.bf16.msra.mxu1 %v12188_v52  ;;  %v1105_v51 = vld [vmem:[#allocation6 + $0xd48] sm:$0xff] }
 0x201   :  { %6989 = vmatprep.subr.bf16.mxu0 %v12195_v53  ;;  %7317 = vmatprep.subr.bf16.mxu1 %v12197_v54  ;;  %v1109_v52 = vld [vmem:[#allocation6 + $0xd68] sm:$0xff]  ;;  %v12226_v53 = vcombine.low %v1096_v30, %v1100_v31  ;;  %v12228_v54 = vcombine.low %v1097_v32, %v1101_v35  ;;  %v1136_v31 = vld [vmem:[#allocation6 + $0xe40] sm:$0xff] }
 0x202   :  { %v12237_v56 = vcombine.high %v1105_v51, %v1109_v52  ;;  %v1140_v32 = vld [vmem:[#allocation6 + $0xe60] sm:$0xff]  ;;  %v1137_v35 = vld [vmem:[#allocation6 + $0xe48] sm:$0xff] }
 0x203   :  { %6981 = vmatmul.mubr.bf16.vlgmr.msra.gmra.mrb[16].mxu0 %v14715_v0  ;;  %7309 = vmatmul.mubr.bf16.vlgmr.msra.gmra.mrb[16].mxu1 %v14715_v0 }
 0x204   :  { %6990 = vmatpush1.bf16.msra.mxu0 %v12194_v3  ;;  %7318 = vmatpush1.bf16.msra.mxu1 %v12196_v16  ;;  %v1117_v3 = vld [vmem:[#allocation6 + $0xda8] sm:$0xff]  ;;  %v12234_v16 = vcombine.low %v1104_v42, %v1108_v49  ;;  %v1144_v49 = vld [vmem:[#allocation6 + $0xe80] sm:$0xff] }
 0x205   :  { %6991 = vmatprep.subr.bf16.mxu0 %v12203_v4  ;;  %7319 = vmatprep.subr.bf16.mxu1 %v12205_v55  ;;  %v12236_v4 = vcombine.low %v1105_v51, %v1109_v52  ;;  %v12243_v55 = vcombine.high %v1112_v61, %v1116_v62  ;;  %v12245_v5 = vcombine.high %v1113_v63, %v1117_v3  ;;  %v1148_v51 = vld [vmem:[#allocation6 + $0xea0] sm:$0xff]  ;;  %v1145_v52 = vld [vmem:[#allocation6 + $0xe88] sm:$0xff] }
 0x206   :  { %7021 = vmatprep.mubr.bf16.mxu0 %v14717_v12  ;;  %7349 = vmatprep.mubr.bf16.mxu1 %v14717_v12 }
 0x208   :  { %6992 = vmatpush1.bf16.msra.mxu0 %v12202_v50  ;;  %7320 = vmatpush1.bf16.msra.mxu1 %v12204_v14  ;;  %v1125_v50 = vld [vmem:[#allocation6 + $0xde8] sm:$0xff]  ;;  %v12242_v14 = vcombine.low %v1112_v61, %v1116_v62  ;;  %v1152_v62 = vld [vmem:[#allocation6 + $0xec0] sm:$0xff] }
 0x209   :  { %6993 = vmatprep.subr.bf16.mxu0 %v12211_v15  ;;  %7321 = vmatprep.subr.bf16.mxu1 %v12213_v17  ;;  %v12244_v15 = vcombine.low %v1113_v63, %v1117_v3  ;;  %v12251_v17 = vcombine.high %v1120_v6, %v1124_v8  ;;  %v12253_v18 = vcombine.high %v1121_v10, %v1125_v50  ;;  %v1156_v63 = vld [vmem:[#allocation6 + $0xee0] sm:$0xff]  ;;  %v1153_v3 = vld [vmem:[#allocation6 + $0xec8] sm:$0xff] }
 0x20c   :  { %6994 = vmatpush1.bf16.msra.mxu0 %v12210_v25  ;;  %7322 = vmatpush1.bf16.msra.mxu1 %v12212_v26  ;;  %v1133_v25 = vld [vmem:[#allocation6 + $0xe28] sm:$0xff]  ;;  %v12250_v26 = vcombine.low %v1120_v6, %v1124_v8  ;;  %v1160_v8 = vld [vmem:[#allocation6 + $0xf00] sm:$0xff] }
 0x20d   :  { %6995 = vmatprep.subr.bf16.mxu0 %v12219_v27  ;;  %7323 = vmatprep.subr.bf16.mxu1 %v12221_v29  ;;  %v12252_v27 = vcombine.low %v1121_v10, %v1125_v50  ;;  %v12259_v29 = vcombine.high %v1128_v19, %v1132_v23  ;;  %v12261_v30 = vcombine.high %v1129_v24, %v1133_v25  ;;  %v1164_v10 = vld [vmem:[#allocation6 + $0xf20] sm:$0xff]  ;;  %v1161_v50 = vld [vmem:[#allocation6 + $0xf08] sm:$0xff] }
 0x210   :  { %6996 = vmatpush1.bf16.msra.mxu0 %v12218_v37  ;;  %7324 = vmatpush1.bf16.msra.mxu1 %v12220_v38  ;;  %v1141_v37 = vld [vmem:[#allocation6 + $0xe68] sm:$0xff]  ;;  %v12258_v38 = vcombine.low %v1128_v19, %v1132_v23  ;;  %v1168_v23 = vld [vmem:[#allocation6 + $0xf40] sm:$0xff] }
 0x211   :  { %6997 = vmatprep.subr.bf16.mxu0 %v12227_v45  ;;  %7325 = vmatprep.subr.bf16.mxu1 %v12229_v59  ;;  %v12260_v45 = vcombine.low %v1129_v24, %v1133_v25  ;;  %v12267_v59 = vcombine.high %v1136_v31, %v1140_v32  ;;  %v12269_v42 = vcombine.high %v1137_v35, %v1141_v37  ;;  %v1172_v24 = vld [vmem:[#allocation6 + $0xf60] sm:$0xff]  ;;  %v1169_v25 = vld [vmem:[#allocation6 + $0xf48] sm:$0xff] }
 0x214   :  { %6998 = vmatpush1.bf16.msra.mxu0 %v12226_v53  ;;  %7326 = vmatpush1.bf16.msra.mxu1 %v12228_v54  ;;  %v1149_v53 = vld [vmem:[#allocation6 + $0xea8] sm:$0xff]  ;;  %v12266_v54 = vcombine.low %v1136_v31, %v1140_v32  ;;  %v1176_v32 = vld [vmem:[#allocation6 + $0xf80] sm:$0xff] }
 0x215   :  { %6999 = vmatprep.subr.bf16.mxu0 %v12235_v20  ;;  %7327 = vmatprep.subr.bf16.mxu1 %v12237_v56  ;;  %v12268_v20 = vcombine.low %v1137_v35, %v1141_v37  ;;  %v12275_v56 = vcombine.high %v1144_v49, %v1148_v51  ;;  %v12277_v61 = vcombine.high %v1145_v52, %v1149_v53  ;;  %v1180_v35 = vld [vmem:[#allocation6 + $0xfa0] sm:$0xff]  ;;  %v1177_v37 = vld [vmem:[#allocation6 + $0xf88] sm:$0xff] }
 0x218   :  { %7000 = vmatpush1.bf16.msra.mxu0 %v12234_v16  ;;  %7328 = vmatpush1.bf16.msra.mxu1 %v12236_v4  ;;  %v1157_v16 = vld [vmem:[#allocation6 + $0xee8] sm:$0xff]  ;;  %v12274_v4 = vcombine.low %v1144_v49, %v1148_v51  ;;  %v1184_v51 = vld [vmem:[#allocation6 + $0xfc0] sm:$0xff] }
 0x219   :  { %7001 = vmatprep.subr.bf16.mxu0 %v12243_v55  ;;  %7329 = vmatprep.subr.bf16.mxu1 %v12245_v5  ;;  %v12276_v55 = vcombine.low %v1145_v52, %v1149_v53  ;;  %v12283_v5 = vcombine.high %v1152_v62, %v1156_v63  ;;  %v12285_v6 = vcombine.high %v1153_v3, %v1157_v16  ;;  %v1188_v52 = vld [vmem:[#allocation6 + $0xfe0] sm:$0xff]  ;;  %v1185_v53 = vld [vmem:[#allocation6 + $0xfc8] sm:$0xff] }
 0x21c   :  { %7002 = vmatpush1.bf16.msra.mxu0 %v12242_v14  ;;  %7330 = vmatpush1.bf16.msra.mxu1 %v12244_v15  ;;  %v1165_v14 = vld [vmem:[#allocation6 + $0xf28] sm:$0xff]  ;;  %v12282_v15 = vcombine.low %v1152_v62, %v1156_v63  ;;  %v12315_v62 = vcombine.high %v1184_v51, %v1188_v52 }
 0x21d   :  { %7003 = vmatprep.subr.bf16.mxu0 %v12251_v17  ;;  %7331 = vmatprep.subr.bf16.mxu1 %v12253_v18  ;;  %v12284_v17 = vcombine.low %v1153_v3, %v1157_v16  ;;  %v12291_v18 = vcombine.high %v1160_v8, %v1164_v10  ;;  %v12293_v19 = vcombine.high %v1161_v50, %v1165_v14  ;;  %v1192_v3 = vld [vmem:[#allocation6 + $0x1000] sm:$0xff]  ;;  %v14725_v16 = vld [vmem:[#allocation4 + $0x8] sm:$0xff] }
 0x220   :  { %7004 = vmatpush1.bf16.msra.mxu0 %v12250_v26  ;;  %7332 = vmatpush1.bf16.msra.mxu1 %v12252_v27  ;;  %v1173_v26 = vld [vmem:[#allocation6 + $0xf68] sm:$0xff]  ;;  %v12290_v27 = vcombine.low %v1160_v8, %v1164_v10  ;;  %v12314_v8 = vcombine.low %v1184_v51, %v1188_v52 }
 0x221   :  { %7005 = vmatprep.subr.bf16.mxu0 %v12259_v29  ;;  %7333 = vmatprep.subr.bf16.mxu1 %v12261_v30  ;;  %v12292_v29 = vcombine.low %v1161_v50, %v1165_v14  ;;  %v12299_v30 = vcombine.high %v1168_v23, %v1172_v24  ;;  %v12301_v31 = vcombine.high %v1169_v25, %v1173_v26  ;;  %v1221_v51 = vld [vmem:[#allocation6 + $0x10e8] sm:$0xff] }
 0x224   :  { %7006 = vmatpush1.bf16.msra.mxu0 %v12258_v38  ;;  %7334 = vmatpush1.bf16.msra.mxu1 %v12260_v45  ;;  %v1181_v38 = vld [vmem:[#allocation6 + $0xfa8] sm:$0xff]  ;;  %v12298_v45 = vcombine.low %v1168_v23, %v1172_v24 }
 0x225   :  { %7007 = vmatprep.subr.bf16.mxu0 %v12267_v59  ;;  %7335 = vmatprep.subr.bf16.mxu1 %v12269_v42  ;;  %v12300_v59 = vcombine.low %v1169_v25, %v1173_v26  ;;  %v12307_v42 = vcombine.high %v1176_v32, %v1180_v35  ;;  %v12309_v49 = vcombine.high %v1177_v37, %v1181_v38  ;;  %v1205_v23 = vld [vmem:[#allocation6 + $0x1068] sm:$0xff] }
 0x228   :  { %7008 = vmatpush1.bf16.msra.mxu0 %v12266_v54  ;;  %7336 = vmatpush1.bf16.msra.mxu1 %v12268_v20  ;;  %v1189_v54 = vld [vmem:[#allocation6 + $0xfe8] sm:$0xff]  ;;  %v12306_v20 = vcombine.low %v1176_v32, %v1180_v35 }
 0x229   :  { %7009 = vmatprep.subr.bf16.mxu0 %v12275_v56  ;;  %7337 = vmatprep.subr.bf16.mxu1 %v12277_v61  ;;  %v12308_v56 = vcombine.low %v1177_v37, %v1181_v38  ;;  %v199_v61 = vrot.slane %v14707_v28, %v14680_v33  ;;  %v12317_v63 = vcombine.high %v1185_v53, %v1189_v54  ;;  %v1213_v32 = vld [vmem:[#allocation6 + $0x10a8] sm:$0xff] }
 0x22a   :  { %v12316_v10 = vcombine.low %v1185_v53, %v1189_v54 }
 0x22b   :  { %v494_v50 = vadd.f32 %v14664_v39, %v199_v61  ;;  %v1228_v61 = vld [vmem:[#allocation6 + $0x1120] sm:$0xff] }
 0x22c   :  { %7010 = vmatpush1.bf16.msra.mxu0 %v12274_v4  ;;  %7338 = vmatpush1.bf16.msra.mxu1 %v12276_v55  ;;  %v211_v4 = vrot.slane %v14725_v16, %v14615_v47  ;;  %v1196_v55 = vld [vmem:[#allocation6 + $0x1020] sm:$0xff] }
 0x22d   :  { %7011 = vmatprep.subr.bf16.mxu0 %v12283_v5  ;;  %7339 = vmatprep.subr.bf16.mxu1 %v12285_v6  ;;  %v1193_v5 = vld [vmem:[#allocation6 + $0x1008] sm:$0xff]  ;;  %v12323_v28 = vcombine.high %v1192_v3, %v1196_v55  ;;  %v12322_v24 = vcombine.low %v1192_v3, %v1196_v55  ;;  %v14731_v25 = vpack.c.bf16 %v494_v50, %v494_v50 }
 0x22e   :  { %v1197_v6 = vld [vmem:[#allocation6 + $0x1028] sm:$0xff] }
 0x22f   :  { %v12325_v14 = vcombine.high %v1193_v5, %v1197_v6  ;;  %v12324_v26 = vcombine.low %v1193_v5, %v1197_v6  ;;  %v1232_v6 = vld [vmem:[#allocation6 + $0x1140] sm:$0xff]  ;;  %v1237_v50 = vld [vmem:[#allocation6 + $0x1168] sm:$0xff] }
 0x230   :  { %7012 = vmatpush1.bf16.msra.mxu0 %v12282_v15  ;;  %7340 = vmatpush1.bf16.msra.mxu1 %v12284_v17  ;;  %v537_v15 = vadd.f32 %v14646_v40, %v211_v4  ;;  %v1200_v17 = vld [vmem:[#allocation6 + $0x1040] sm:$0xff]  ;;  %v1209_v40 = vld [vmem:[#allocation6 + $0x1088] sm:$0xff] }
 0x231   :  { %7013 = vmatprep.subr.bf16.mxu0 %v12291_v18  ;;  %7341 = vmatprep.subr.bf16.mxu1 %v12293_v19  ;;  %v1204_v18 = vld [vmem:[#allocation6 + $0x1060] sm:$0xff]  ;;  %v1201_v19 = vld [vmem:[#allocation6 + $0x1048] sm:$0xff]  ;;  %v12340_v53 = vcombine.low %v1209_v40, %v1213_v32 }
 0x232   :  { %v12331_v39 = vcombine.high %v1200_v17, %v1204_v18  ;;  %v12330_v35 = vcombine.low %v1200_v17, %v1204_v18  ;;  %v12332_v37 = vcombine.low %v1201_v19, %v1205_v23  ;;  %v1240_v18 = vld [vmem:[#allocation6 + $0x1180] sm:$0xff] }
 0x234   :  { %7014 = vmatpush1.bf16.msra.mxu0 %v12290_v27  ;;  %7342 = vmatpush1.bf16.msra.mxu1 %v12292_v29  ;;  %v14733_v27 = vpack.c.bf16 %v537_v15, %v537_v15  ;;  %v12333_v29 = vcombine.high %v1201_v19, %v1205_v23  ;;  %v1244_v19 = vld [vmem:[#allocation6 + $0x11a0] sm:$0xff]  ;;  %v1241_v23 = vld [vmem:[#allocation6 + $0x1188] sm:$0xff] }
 0x235   :  { %7015 = vmatprep.subr.bf16.mxu0 %v12299_v30  ;;  %7343 = vmatprep.subr.bf16.mxu1 %v12301_v31  ;;  %v1208_v30 = vld [vmem:[#allocation6 + $0x1080] sm:$0xff] }
 0x236   :  { %v1212_v31 = vld [vmem:[#allocation6 + $0x10a0] sm:$0xff] }
 0x237   :  { %v12339_v38 = vcombine.high %v1208_v30, %v1212_v31  ;;  %v12338_v52 = vcombine.low %v1208_v30, %v1212_v31  ;;  %v1248_v31 = vld [vmem:[#allocation6 + $0x11c0] sm:$0xff] }
 0x238   :  { %7016 = vmatpush1.bf16.msra.mxu0 %v12298_v45  ;;  %7344 = vmatpush1.bf16.msra.mxu1 %v12300_v59  ;;  %v12341_v45 = vcombine.high %v1209_v40, %v1213_v32  ;;  %v1216_v59 = vld [vmem:[#allocation6 + $0x10c0] sm:$0xff]  ;;  %v1249_v32 = vld [vmem:[#allocation6 + $0x11c8] sm:$0xff] }
 0x239   :  { %7017 = vmatprep.subr.bf16.mxu0 %v12307_v42  ;;  %7345 = vmatprep.subr.bf16.mxu1 %v12309_v49  ;;  %v1220_v42 = vld [vmem:[#allocation6 + $0x10e0] sm:$0xff]  ;;  %v1217_v49 = vld [vmem:[#allocation6 + $0x10c8] sm:$0xff] }
 0x23a   :  { %v12347_v54 = vcombine.high %v1216_v59, %v1220_v42  ;;  %v12346_v3 = vcombine.low %v1216_v59, %v1220_v42  ;;  %v12348_v4 = vcombine.low %v1217_v49, %v1221_v51  ;;  %v1252_v40 = vld [vmem:[#allocation6 + $0x11e0] sm:$0xff] }
 0x23b   :  { %v1256_v42 = vld [vmem:[#allocation6 + $0x1200] sm:$0xff] }
 0x23c   :  { %7018 = vmatpush1.bf16.msra.mxu0 %v12306_v20  ;;  %7346 = vmatpush1.bf16.msra.mxu1 %v12308_v56  ;;  %v12349_v20 = vcombine.high %v1217_v49, %v1221_v51  ;;  %v1224_v56 = vld [vmem:[#allocation6 + $0x1100] sm:$0xff]  ;;  %v1257_v51 = vld [vmem:[#allocation6 + $0x1208] sm:$0xff] }
 0x23d   :  { %7019 = vmatprep.subr.bf16.mxu0 %v12315_v62  ;;  %7347 = vmatprep.subr.bf16.mxu1 %v12317_v63  ;;  %v1225_v62 = vld [vmem:[#allocation6 + $0x1108] sm:$0xff]  ;;  %v12355_v55 = vcombine.high %v1224_v56, %v1228_v61  ;;  %v1260_v49 = vld [vmem:[#allocation6 + $0x1220] sm:$0xff] }
 0x23e   :  { %v1229_v63 = vld [vmem:[#allocation6 + $0x1128] sm:$0xff] }
 0x23f   :  { %v12357_v5 = vcombine.high %v1225_v62, %v1229_v63 }
 0x240   :  { %7020 = vmatpush1.bf16.msra.mxu0 %v12314_v8  ;;  %7348 = vmatpush1.bf16.msra.mxu1 %v12316_v10  ;;  %v1236_v8 = vld [vmem:[#allocation6 + $0x1160] sm:$0xff]  ;;  %v1233_v10 = vld [vmem:[#allocation6 + $0x1148] sm:$0xff] }
 0x241   :  { %7030 = vmatprep.subr.bf16.mxu0 %v12323_v28  ;;  %7358 = vmatprep.subr.bf16.mxu1 %v12325_v14  ;;  %v12354_v28 = vcombine.low %v1224_v56, %v1228_v61  ;;  %v12356_v14 = vcombine.low %v1225_v62, %v1229_v63  ;;  %v12363_v15 = vcombine.high %v1232_v6, %v1236_v8  ;;  %v1264_v61 = vld [vmem:[#allocation6 + $0x1240] sm:$0xff]  ;;  %v1265_v63 = vld [vmem:[#allocation6 + $0x1248] sm:$0xff] }
 0x242   :  { %v12365_v17 = vcombine.high %v1233_v10, %v1237_v50  ;;  %v1268_v62 = vld [vmem:[#allocation6 + $0x1260] sm:$0xff] }
 0x243   :  { %7022 = vmatmul.mubr.bf16.vlgmr.msra.gmra.mrb[16].mxu0 %v14731_v25  ;;  %7350 = vmatmul.mubr.bf16.vlgmr.msra.gmra.mrb[16].mxu1 %v14731_v25 }
 0x244   :  { %7031 = vmatpush1.bf16.msra.mxu0 %v12322_v24  ;;  %7062 = vmatprep.mubr.bf16.mxu0 %v14733_v27  ;;  %v1245_v24 = vld [vmem:[#allocation6 + $0x11a8] sm:$0xff] }
 0x245   :  { %7359 = vmatpush1.bf16.msra.mxu1 %v12324_v26  ;;  %7390 = vmatprep.mubr.bf16.mxu1 %v14733_v27  ;;  %v12362_v26 = vcombine.low %v1232_v6, %v1236_v8  ;;  %v12373_v30 = vcombine.high %v1241_v23, %v1245_v24  ;;  %v1272_v8 = vld [vmem:[#allocation6 + $0x1280] sm:$0xff] }
 0x246   :  { %7032 = vmatprep.subr.bf16.mxu0 %v12331_v39  ;;  %7360 = vmatprep.subr.bf16.mxu1 %v12333_v29  ;;  %v12364_v39 = vcombine.low %v1233_v10, %v1237_v50  ;;  %v12371_v29 = vcombine.high %v1240_v18, %v1244_v19  ;;  %v1276_v10 = vld [vmem:[#allocation6 + $0x12a0] sm:$0xff]  ;;  %v1273_v50 = vld [vmem:[#allocation6 + $0x1288] sm:$0xff] }
 0x248   :  { %7033 = vmatpush1.bf16.msra.mxu0 %v12330_v35  ;;  %v1253_v35 = vld [vmem:[#allocation6 + $0x11e8] sm:$0xff] }
 0x249   :  { %7361 = vmatpush1.bf16.msra.mxu1 %v12332_v37  ;;  %7034 = vmatprep.subr.bf16.mxu0 %v12339_v38  ;;  %v12370_v37 = vcombine.low %v1240_v18, %v1244_v19  ;;  %v12372_v38 = vcombine.low %v1241_v23, %v1245_v24  ;;  %v12381_v59 = vcombine.high %v1249_v32, %v1253_v35  ;;  %v1280_v19 = vld [vmem:[#allocation6 + $0x12c0] sm:$0xff]  ;;  %v1281_v24 = vld [vmem:[#allocation6 + $0x12c8] sm:$0xff] }
 0x24a   :  { %7362 = vmatprep.subr.bf16.mxu1 %v12341_v45  ;;  %v12379_v45 = vcombine.high %v1248_v31, %v1252_v40  ;;  %v1284_v23 = vld [vmem:[#allocation6 + $0x12e0] sm:$0xff] }
 0x24c   :  { %7035 = vmatpush1.bf16.msra.mxu0 %v12338_v52  ;;  %v1261_v52 = vld [vmem:[#allocation6 + $0x1228] sm:$0xff] }
 0x24d   :  { %7363 = vmatpush1.bf16.msra.mxu1 %v12340_v53  ;;  %7036 = vmatprep.subr.bf16.mxu0 %v12347_v54  ;;  %v12378_v53 = vcombine.low %v1248_v31, %v1252_v40  ;;  %v12380_v54 = vcombine.low %v1249_v32, %v1253_v35  ;;  %v12389_v56 = vcombine.high %v1257_v51, %v1261_v52  ;;  %v1288_v40 = vld [vmem:[#allocation6 + $0x1300] sm:$0xff]  ;;  %v1289_v35 = vld [vmem:[#allocation6 + $0x1308] sm:$0xff] }
 0x24e   :  { %7364 = vmatprep.subr.bf16.mxu1 %v12349_v20  ;;  %v12387_v20 = vcombine.high %v1256_v42, %v1260_v49  ;;  %v1292_v32 = vld [vmem:[#allocation6 + $0x1320] sm:$0xff] }
 0x250   :  { %7037 = vmatpush1.bf16.msra.mxu0 %v12346_v3  ;;  %v1269_v3 = vld [vmem:[#allocation6 + $0x1268] sm:$0xff] }
 0x251   :  { %7365 = vmatpush1.bf16.msra.mxu1 %v12348_v4  ;;  %7038 = vmatprep.subr.bf16.mxu0 %v12355_v55  ;;  %v12386_v4 = vcombine.low %v1256_v42, %v1260_v49  ;;  %v12388_v55 = vcombine.low %v1257_v51, %v1261_v52  ;;  %v12397_v6 = vcombine.high %v1265_v63, %v1269_v3  ;;  %v1296_v49 = vld [vmem:[#allocation6 + $0x1340] sm:$0xff]  ;;  %v1297_v52 = vld [vmem:[#allocation6 + $0x1348] sm:$0xff] }
 0x252   :  { %7366 = vmatprep.subr.bf16.mxu1 %v12357_v5  ;;  %v12395_v5 = vcombine.high %v1264_v61, %v1268_v62  ;;  %v1300_v51 = vld [vmem:[#allocation6 + $0x1360] sm:$0xff] }
 0x254   :  { %7039 = vmatpush1.bf16.msra.mxu0 %v12354_v28  ;;  %v1277_v28 = vld [vmem:[#allocation6 + $0x12a8] sm:$0xff] }
 0x255   :  { %7367 = vmatpush1.bf16.msra.mxu1 %v12356_v14  ;;  %7040 = vmatprep.subr.bf16.mxu0 %v12363_v15  ;;  %v12394_v14 = vcombine.low %v1264_v61, %v1268_v62  ;;  %v12396_v15 = vcombine.low %v1265_v63, %v1269_v3  ;;  %v12405_v18 = vcombine.high %v1273_v50, %v1277_v28  ;;  %v1304_v62 = vld [vmem:[#allocation6 + $0x1380] sm:$0xff]  ;;  %v1305_v3 = vld [vmem:[#allocation6 + $0x1388] sm:$0xff] }
 0x256   :  { %7368 = vmatprep.subr.bf16.mxu1 %v12365_v17  ;;  %v12403_v17 = vcombine.high %v1272_v8, %v1276_v10  ;;  %v1308_v63 = vld [vmem:[#allocation6 + $0x13a0] sm:$0xff] }
 0x258   :  { %7041 = vmatpush1.bf16.msra.mxu0 %v12362_v26  ;;  %v1285_v26 = vld [vmem:[#allocation6 + $0x12e8] sm:$0xff] }
 0x259   :  { %7369 = vmatpush1.bf16.msra.mxu1 %v12364_v39  ;;  %7042 = vmatprep.subr.bf16.mxu0 %v12371_v29  ;;  %v12402_v39 = vcombine.low %v1272_v8, %v1276_v10  ;;  %v12404_v29 = vcombine.low %v1273_v50, %v1277_v28  ;;  %v12413_v31 = vcombine.high %v1281_v24, %v1285_v26  ;;  %v1312_v10 = vld [vmem:[#allocation6 + $0x13c0] sm:$0xff]  ;;  %v1313_v28 = vld [vmem:[#allocation6 + $0x13c8] sm:$0xff] }
 0x25a   :  { %7370 = vmatprep.subr.bf16.mxu1 %v12373_v30  ;;  %v12411_v30 = vcombine.high %v1280_v19, %v1284_v23  ;;  %v1316_v50 = vld [vmem:[#allocation6 + $0x13e0] sm:$0xff] }
 0x25c   :  { %7043 = vmatpush1.bf16.msra.mxu0 %v12370_v37  ;;  %v1293_v37 = vld [vmem:[#allocation6 + $0x1328] sm:$0xff] }
 0x25d   :  { %7371 = vmatpush1.bf16.msra.mxu1 %v12372_v38  ;;  %7044 = vmatprep.subr.bf16.mxu0 %v12379_v45  ;;  %v12410_v38 = vcombine.low %v1280_v19, %v1284_v23  ;;  %v12412_v45 = vcombine.low %v1281_v24, %v1285_v26  ;;  %v12421_v42 = vcombine.high %v1289_v35, %v1293_v37  ;;  %v1320_v24 = vld [vmem:[#allocation6 + $0x1400] sm:$0xff] }
 0x25e   :  { %7372 = vmatprep.subr.bf16.mxu1 %v12381_v59  ;;  %v12419_v59 = vcombine.high %v1288_v40, %v1292_v32  ;;  %v12443_v19 = vcombine.high %v1312_v10, %v1316_v50  ;;  %v1324_v26 = vld [vmem:[#allocation6 + $0x1420] sm:$0xff] }
 0x260   :  { %7045 = vmatpush1.bf16.msra.mxu0 %v12378_v53  ;;  %v1301_v53 = vld [vmem:[#allocation6 + $0x1368] sm:$0xff] }
 0x261   :  { %7373 = vmatpush1.bf16.msra.mxu1 %v12380_v54  ;;  %7046 = vmatprep.subr.bf16.mxu0 %v12387_v20  ;;  %v12418_v54 = vcombine.low %v1288_v40, %v1292_v32  ;;  %v12420_v20 = vcombine.low %v1289_v35, %v1293_v37  ;;  %v12429_v61 = vcombine.high %v1297_v52, %v1301_v53  ;;  %v1328_v35 = vld [vmem:[#allocation6 + $0x1440] sm:$0xff] }
 0x262   :  { %7374 = vmatprep.subr.bf16.mxu1 %v12389_v56  ;;  %v12427_v56 = vcombine.high %v1296_v49, %v1300_v51  ;;  %v12451_v32 = vcombine.high %v1320_v24, %v1324_v26  ;;  %v1332_v37 = vld [vmem:[#allocation6 + $0x1460] sm:$0xff] }
 0x264   :  { %7047 = vmatpush1.bf16.msra.mxu0 %v12386_v4  ;;  %v1309_v4 = vld [vmem:[#allocation6 + $0x13a8] sm:$0xff] }
 0x265   :  { %7375 = vmatpush1.bf16.msra.mxu1 %v12388_v55  ;;  %7048 = vmatprep.subr.bf16.mxu0 %v12395_v5  ;;  %v12426_v55 = vcombine.low %v1296_v49, %v1300_v51  ;;  %v12428_v5 = vcombine.low %v1297_v52, %v1301_v53  ;;  %v12437_v8 = vcombine.high %v1305_v3, %v1309_v4  ;;  %v1340_v52 = vld [vmem:[#allocation6 + $0x14a0] sm:$0xff] }
 0x266   :  { %7376 = vmatprep.subr.bf16.mxu1 %v12397_v6  ;;  %v12435_v6 = vcombine.high %v1304_v62, %v1308_v63  ;;  %v12459_v51 = vcombine.high %v1328_v35, %v1332_v37  ;;  %v14746_v53 = vpack.c.bf16 %v14677_v22, %v14677_v22  ;;  %v1344_v22 = vld [vmem:[#allocation6 + $0x14c0] sm:$0xff] }
 0x268   :  { %7049 = vmatpush1.bf16.msra.mxu0 %v12394_v14  ;;  %v1317_v14 = vld [vmem:[#allocation6 + $0x13e8] sm:$0xff] }
 0x269   :  { %7377 = vmatpush1.bf16.msra.mxu1 %v12396_v15  ;;  %7050 = vmatprep.subr.bf16.mxu0 %v12403_v17  ;;  %v12434_v15 = vcombine.low %v1304_v62, %v1308_v63  ;;  %v207_v17 = vrot.slane %v14725_v16, %v14612_v46  ;;  %v12445_v23 = vcombine.high %v1313_v28, %v1317_v14 }
 0x26a   :  { %7378 = vmatprep.subr.bf16.mxu1 %v12405_v18  ;;  %v12436_v18 = vcombine.low %v1305_v3, %v1309_v4  ;;  %v12444_v40 = vcombine.low %v1313_v28, %v1317_v14  ;;  %v1348_v4 = vld [vmem:[#allocation6 + $0x14e0] sm:$0xff] }
 0x26b   :  { %v1352_v28 = vld [vmem:[#allocation6 + $0x1500] sm:$0xff] }
 0x26c   :  { %7051 = vmatpush1.bf16.msra.mxu0 %v12402_v39  ;;  %v1321_v39 = vld [vmem:[#allocation6 + $0x1408] sm:$0xff]  ;;  %v1356_v14 = vld [vmem:[#allocation6 + $0x1520] sm:$0xff] }
 0x26d   :  { %7379 = vmatpush1.bf16.msra.mxu1 %v12404_v29  ;;  %7052 = vmatprep.subr.bf16.mxu0 %v12411_v30  ;;  %v1325_v29 = vld [vmem:[#allocation6 + $0x1428] sm:$0xff]  ;;  %v12442_v30 = vcombine.low %v1312_v10, %v1316_v50  ;;  %v12475_v10 = vcombine.high %v1344_v22, %v1348_v4 }
 0x26e   :  { %7380 = vmatprep.subr.bf16.mxu1 %v12413_v31  ;;  %v535_v31 = vadd.f32 %v14644_v36, %v207_v17  ;;  %v12453_v16 = vcombine.high %v1321_v39, %v1325_v29  ;;  %v12452_v49 = vcombine.low %v1321_v39, %v1325_v29  ;;  %v1336_v36 = vld [vmem:[#allocation6 + $0x1480] sm:$0xff]  ;;  %v1357_v17 = vld [vmem:[#allocation6 + $0x1528] sm:$0xff] }
 0x26f   :  { %v12467_v63 = vcombine.high %v1336_v36, %v1340_v52  ;;  %v1364_v39 = vld [vmem:[#allocation6 + $0x1560] sm:$0xff]  ;;  %v1361_v29 = vld [vmem:[#allocation6 + $0x1548] sm:$0xff] }
 0x270   :  { %7053 = vmatpush1.bf16.msra.mxu0 %v12410_v38  ;;  %v12450_v38 = vcombine.low %v1320_v24, %v1324_v26  ;;  %v1360_v26 = vld [vmem:[#allocation6 + $0x1540] sm:$0xff] }
 0x271   :  { %7381 = vmatpush1.bf16.msra.mxu1 %v12412_v45  ;;  %7054 = vmatprep.subr.bf16.mxu0 %v12419_v59  ;;  %v1329_v45 = vld [vmem:[#allocation6 + $0x1448] sm:$0xff] }
 0x272   :  { %7382 = vmatprep.subr.bf16.mxu1 %v12421_v42  ;;  %v1333_v59 = vld [vmem:[#allocation6 + $0x1468] sm:$0xff]  ;;  %v14742_v42 = vpack.c.bf16 %v535_v31, %v535_v31  ;;  %v12482_v31 = vcombine.low %v1352_v28, %v1356_v14 }
 0x273   :  { %v12460_v62 = vcombine.low %v1329_v45, %v1333_v59 }
 0x274   :  { %7055 = vmatpush1.bf16.msra.mxu0 %v12418_v54  ;;  %v12461_v54 = vcombine.high %v1329_v45, %v1333_v59  ;;  %v1373_v45 = vld [vmem:[#allocation6 + $0x15a8] sm:$0xff]  ;;  %v12490_v59 = vcombine.low %v1360_v26, %v1364_v39 }
 0x275   :  { %7383 = vmatpush1.bf16.msra.mxu1 %v12420_v20  ;;  %7056 = vmatprep.subr.bf16.mxu0 %v12427_v56  ;;  %v1337_v20 = vld [vmem:[#allocation6 + $0x1488] sm:$0xff] }
 0x276   :  { %7384 = vmatprep.subr.bf16.mxu1 %v12429_v61  ;;  %v1341_v56 = vld [vmem:[#allocation6 + $0x14a8] sm:$0xff]  ;;  %v12458_v61 = vcombine.low %v1328_v35, %v1332_v37  ;;  %v1368_v35 = vld [vmem:[#allocation6 + $0x1580] sm:$0xff] }
 0x277   :  { %v12469_v3 = vcombine.high %v1337_v20, %v1341_v56  ;;  %v1372_v37 = vld [vmem:[#allocation6 + $0x15a0] sm:$0xff] }
 0x278   :  { %7057 = vmatpush1.bf16.msra.mxu0 %v12426_v55  ;;  %v1345_v55 = vld [vmem:[#allocation6 + $0x14c8] sm:$0xff] }
 0x279   :  { %7385 = vmatpush1.bf16.msra.mxu1 %v12428_v5  ;;  %7058 = vmatprep.subr.bf16.mxu0 %v12435_v6  ;;  %v1349_v5 = vld [vmem:[#allocation6 + $0x14e8] sm:$0xff]  ;;  %v12466_v6 = vcombine.low %v1336_v36, %v1340_v52  ;;  %v1376_v52 = vld [vmem:[#allocation6 + $0x15c0] sm:$0xff] }
 0x27a   :  { %7386 = vmatprep.subr.bf16.mxu1 %v12437_v8  ;;  %v12468_v8 = vcombine.low %v1337_v20, %v1341_v56  ;;  %v12477_v50 = vcombine.high %v1345_v55, %v1349_v5  ;;  %v1377_v20 = vld [vmem:[#allocation6 + $0x15c8] sm:$0xff] }
 0x27b   :  { %v1381_v56 = vld [vmem:[#allocation6 + $0x15e8] sm:$0xff] }
 0x27c   :  { %7059 = vmatpush1.bf16.msra.mxu0 %v12434_v15  ;;  %v1353_v15 = vld [vmem:[#allocation6 + $0x1508] sm:$0xff] }
 0x27d   :  { %7387 = vmatpush1.bf16.msra.mxu1 %v12436_v18  ;;  %7060 = vmatprep.subr.bf16.mxu0 %v12443_v19  ;;  %v12474_v18 = vcombine.low %v1344_v22, %v1348_v4  ;;  %v12476_v19 = vcombine.low %v1345_v55, %v1349_v5  ;;  %v12485_v24 = vcombine.high %v1353_v15, %v1357_v17  ;;  %v1384_v22 = vld [vmem:[#allocation6 + $0x1600] sm:$0xff]  ;;  %v1385_v55 = vld [vmem:[#allocation6 + $0x1608] sm:$0xff] }
 0x27e   :  { %7388 = vmatprep.subr.bf16.mxu1 %v12445_v23  ;;  %v12483_v23 = vcombine.high %v1352_v28, %v1356_v14  ;;  %v1388_v4 = vld [vmem:[#allocation6 + $0x1620] sm:$0xff]  ;;  %v1389_v5 = vld [vmem:[#allocation6 + $0x1628] sm:$0xff] }
 0x27f   :  { %v1392_v28 = vld [vmem:[#allocation6 + $0x1640] sm:$0xff] }
 0x280   :  { %7061 = vmatpush1.bf16.msra.mxu0 %v12442_v30  ;;  %v1365_v30 = vld [vmem:[#allocation6 + $0x1568] sm:$0xff]  ;;  %v1396_v14 = vld [vmem:[#allocation6 + $0x1660] sm:$0xff] }
 0x281   :  { %7389 = vmatpush1.bf16.msra.mxu1 %v12444_v40  ;;  %7071 = vmatprep.subr.bf16.mxu0 %v12451_v32  ;;  %v12484_v40 = vcombine.low %v1353_v15, %v1357_v17  ;;  %v12491_v32 = vcombine.high %v1360_v26, %v1364_v39  ;;  %v1393_v15 = vld [vmem:[#allocation6 + $0x1648] sm:$0xff]  ;;  %v1400_v26 = vld [vmem:[#allocation6 + $0x1680] sm:$0xff] }
 0x282   :  { %7399 = vmatprep.subr.bf16.mxu1 %v12453_v16  ;;  %v12493_v16 = vcombine.high %v1361_v29, %v1365_v30  ;;  %v1397_v17 = vld [vmem:[#allocation6 + $0x1668] sm:$0xff]  ;;  %v1404_v39 = vld [vmem:[#allocation6 + $0x16a0] sm:$0xff] }
 0x283   :  { %7063 = vmatmul.mubr.bf16.vlgmr.msra.gmra.mrb[16].mxu0 %v14742_v42 }
 0x284   :  { %7391 = vmatmul.mubr.bf16.vlgmr.msra.gmra.mrb[16].mxu1 %v14742_v42  ;;  %7072 = vmatpush1.bf16.msra.mxu0 %v12450_v38  ;;  %v1369_v38 = vld [vmem:[#allocation6 + $0x1588] sm:$0xff] }
 0x285   :  { %7103 = vmatprep.mubr.bf16.mxu0 %v14746_v53  ;;  %7400 = vmatpush1.bf16.msra.mxu1 %v12452_v49  ;;  %v12492_v49 = vcombine.low %v1361_v29, %v1365_v30  ;;  %v12501_v36 = vcombine.high %v1369_v38, %v1373_v45  ;;  %v1401_v29 = vld [vmem:[#allocation6 + $0x1688] sm:$0xff] }
 0x286   :  { %7431 = vmatprep.mubr.bf16.mxu1 %v14746_v53  ;;  %7073 = vmatprep.subr.bf16.mxu0 %v12459_v51  ;;  %v12499_v51 = vcombine.high %v1368_v35, %v1372_v37  ;;  %v1405_v30 = vld [vmem:[#allocation6 + $0x16a8] sm:$0xff] }
 0x287   :  { %7401 = vmatprep.subr.bf16.mxu1 %v12461_v54  ;;  %v1380_v54 = vld [vmem:[#allocation6 + $0x15e0] sm:$0xff] }
 0x288   :  { %7074 = vmatpush1.bf16.msra.mxu0 %v12458_v61  ;;  %v12498_v61 = vcombine.low %v1368_v35, %v1372_v37  ;;  %v1408_v35 = vld [vmem:[#allocation6 + $0x16c0] sm:$0xff] }
 0x289   :  { %7402 = vmatpush1.bf16.msra.mxu1 %v12460_v62  ;;  %7075 = vmatprep.subr.bf16.mxu0 %v12467_v63  ;;  %v12500_v62 = vcombine.low %v1369_v38, %v1373_v45  ;;  %v12507_v63 = vcombine.high %v1376_v52, %v1380_v54  ;;  %v1412_v37 = vld [vmem:[#allocation6 + $0x16e0] sm:$0xff]  ;;  %v1409_v38 = vld [vmem:[#allocation6 + $0x16c8] sm:$0xff] }
 0x28a   :  { %7403 = vmatprep.subr.bf16.mxu1 %v12469_v3  ;;  %v12509_v3 = vcombine.high %v1377_v20, %v1381_v56  ;;  %v1413_v45 = vld [vmem:[#allocation6 + $0x16e8] sm:$0xff] }
 0x28c   :  { %7076 = vmatpush1.bf16.msra.mxu0 %v12466_v6  ;;  %v12506_v6 = vcombine.low %v1376_v52, %v1380_v54  ;;  %v1416_v52 = vld [vmem:[#allocation6 + $0x1700] sm:$0xff] }
 0x28d   :  { %7404 = vmatpush1.bf16.msra.mxu1 %v12468_v8  ;;  %7077 = vmatprep.subr.bf16.mxu0 %v12475_v10  ;;  %v12508_v8 = vcombine.low %v1377_v20, %v1381_v56  ;;  %v12515_v10 = vcombine.high %v1384_v22, %v1388_v4  ;;  %v1420_v54 = vld [vmem:[#allocation6 + $0x1720] sm:$0xff]  ;;  %v1417_v20 = vld [vmem:[#allocation6 + $0x1708] sm:$0xff] }
 0x28e   :  { %7405 = vmatprep.subr.bf16.mxu1 %v12477_v50  ;;  %v12517_v50 = vcombine.high %v1385_v55, %v1389_v5  ;;  %v1421_v56 = vld [vmem:[#allocation6 + $0x1728] sm:$0xff] }
 0x290   :  { %7078 = vmatpush1.bf16.msra.mxu0 %v12474_v18  ;;  %v12514_v18 = vcombine.low %v1384_v22, %v1388_v4  ;;  %v1424_v22 = vld [vmem:[#allocation6 + $0x1740] sm:$0xff] }
 0x291   :  { %7406 = vmatpush1.bf16.msra.mxu1 %v12476_v19  ;;  %7079 = vmatprep.subr.bf16.mxu0 %v12483_v23  ;;  %v12516_v19 = vcombine.low %v1385_v55, %v1389_v5  ;;  %v12523_v23 = vcombine.high %v1392_v28, %v1396_v14  ;;  %v1428_v4 = vld [vmem:[#allocation6 + $0x1760] sm:$0xff]  ;;  %v1425_v55 = vld [vmem:[#allocation6 + $0x1748] sm:$0xff] }
 0x292   :  { %7407 = vmatprep.subr.bf16.mxu1 %v12485_v24  ;;  %v12525_v24 = vcombine.high %v1393_v15, %v1397_v17  ;;  %v1429_v5 = vld [vmem:[#allocation6 + $0x1768] sm:$0xff] }
 0x294   :  { %7080 = vmatpush1.bf16.msra.mxu0 %v12482_v31  ;;  %v12522_v31 = vcombine.low %v1392_v28, %v1396_v14  ;;  %v1432_v28 = vld [vmem:[#allocation6 + $0x1780] sm:$0xff] }
 0x295   :  { %7408 = vmatpush1.bf16.msra.mxu1 %v12484_v40  ;;  %7081 = vmatprep.subr.bf16.mxu0 %v12491_v32  ;;  %v12524_v40 = vcombine.low %v1393_v15, %v1397_v17  ;;  %v12531_v32 = vcombine.high %v1400_v26, %v1404_v39  ;;  %v1436_v14 = vld [vmem:[#allocation6 + $0x17a0] sm:$0xff]  ;;  %v1433_v15 = vld [vmem:[#allocation6 + $0x1788] sm:$0xff] }
 0x296   :  { %7409 = vmatprep.subr.bf16.mxu1 %v12493_v16  ;;  %v12533_v16 = vcombine.high %v1401_v29, %v1405_v30  ;;  %v1437_v17 = vld [vmem:[#allocation6 + $0x17a8] sm:$0xff] }
 0x298   :  { %7082 = vmatpush1.bf16.msra.mxu0 %v12490_v59  ;;  %v12530_v59 = vcombine.low %v1400_v26, %v1404_v39  ;;  %v1440_v26 = vld [vmem:[#allocation6 + $0x17c0] sm:$0xff] }
 0x299   :  { %7410 = vmatpush1.bf16.msra.mxu1 %v12492_v49  ;;  %7083 = vmatprep.subr.bf16.mxu0 %v12499_v51  ;;  %v12532_v49 = vcombine.low %v1401_v29, %v1405_v30  ;;  %v12539_v51 = vcombine.high %v1408_v35, %v1412_v37  ;;  %v1444_v39 = vld [vmem:[#allocation6 + $0x17e0] sm:$0xff]  ;;  %v1441_v29 = vld [vmem:[#allocation6 + $0x17c8] sm:$0xff] }
 0x29a   :  { %7411 = vmatprep.subr.bf16.mxu1 %v12501_v36  ;;  %v12541_v36 = vcombine.high %v1409_v38, %v1413_v45  ;;  %v1445_v30 = vld [vmem:[#allocation6 + $0x17e8] sm:$0xff] }
 0x29c   :  { %7084 = vmatpush1.bf16.msra.mxu0 %v12498_v61  ;;  %v12538_v61 = vcombine.low %v1408_v35, %v1412_v37  ;;  %v1448_v35 = vld [vmem:[#allocation6 + $0x1800] sm:$0xff] }
 0x29d   :  { %7412 = vmatpush1.bf16.msra.mxu1 %v12500_v62  ;;  %7085 = vmatprep.subr.bf16.mxu0 %v12507_v63  ;;  %v12540_v62 = vcombine.low %v1409_v38, %v1413_v45  ;;  %v12547_v63 = vcombine.high %v1416_v52, %v1420_v54  ;;  %v1452_v37 = vld [vmem:[#allocation6 + $0x1820] sm:$0xff]  ;;  %v1449_v38 = vld [vmem:[#allocation6 + $0x1808] sm:$0xff] }
 0x29e   :  { %7413 = vmatprep.subr.bf16.mxu1 %v12509_v3  ;;  %v12549_v3 = vcombine.high %v1417_v20, %v1421_v56  ;;  %v1453_v45 = vld [vmem:[#allocation6 + $0x1828] sm:$0xff] }
 0x2a0   :  { %7086 = vmatpush1.bf16.msra.mxu0 %v12506_v6  ;;  %v12546_v6 = vcombine.low %v1416_v52, %v1420_v54  ;;  %v1456_v52 = vld [vmem:[#allocation6 + $0x1840] sm:$0xff] }
 0x2a1   :  { %7414 = vmatpush1.bf16.msra.mxu1 %v12508_v8  ;;  %7087 = vmatprep.subr.bf16.mxu0 %v12515_v10  ;;  %v12548_v8 = vcombine.low %v1417_v20, %v1421_v56  ;;  %v12555_v10 = vcombine.high %v1424_v22, %v1428_v4  ;;  %v1460_v54 = vld [vmem:[#allocation6 + $0x1860] sm:$0xff]  ;;  %v12578_v20 = vcombine.low %v1448_v35, %v1452_v37  ;;  %v1457_v56 = vld [vmem:[#allocation6 + $0x1848] sm:$0xff] }
 0x2a2   :  { %7415 = vmatprep.subr.bf16.mxu1 %v12517_v50  ;;  %v12557_v50 = vcombine.high %v1425_v55, %v1429_v5 }
 0x2a4   :  { %7088 = vmatpush1.bf16.msra.mxu0 %v12514_v18  ;;  %v12554_v18 = vcombine.low %v1424_v22, %v1428_v4  ;;  %v1464_v22 = vld [vmem:[#allocation6 + $0x1880] sm:$0xff] }
 0x2a5   :  { %7416 = vmatpush1.bf16.msra.mxu1 %v12516_v19  ;;  %7089 = vmatprep.subr.bf16.mxu0 %v12523_v23  ;;  %v12556_v19 = vcombine.low %v1425_v55, %v1429_v5  ;;  %v12563_v23 = vcombine.high %v1432_v28, %v1436_v14  ;;  %v1468_v4 = vld [vmem:[#allocation6 + $0x18a0] sm:$0xff]  ;;  %v14758_v55 = vpack.c.bf16 %v14662_v13, %v14662_v13 }
 0x2a6   :  { %7417 = vmatprep.subr.bf16.mxu1 %v12525_v24  ;;  %v12565_v24 = vcombine.high %v1433_v15, %v1437_v17  ;;  %v1472_v13 = vld [vmem:[#allocation6 + $0x18c0] sm:$0xff] }
 0x2a8   :  { %7090 = vmatpush1.bf16.msra.mxu0 %v12522_v31  ;;  %v12562_v31 = vcombine.low %v1432_v28, %v1436_v14  ;;  %v1476_v14 = vld [vmem:[#allocation6 + $0x18e0] sm:$0xff] }
 0x2a9   :  { %7418 = vmatpush1.bf16.msra.mxu1 %v12524_v40  ;;  %7091 = vmatprep.subr.bf16.mxu0 %v12531_v32  ;;  %v12564_v40 = vcombine.low %v1433_v15, %v1437_v17  ;;  %v12571_v32 = vcombine.high %v1440_v26, %v1444_v39  ;;  %v1473_v15 = vld [vmem:[#allocation6 + $0x18c8] sm:$0xff] }
 0x2aa   :  { %7419 = vmatprep.subr.bf16.mxu1 %v12533_v16  ;;  %v12573_v16 = vcombine.high %v1441_v29, %v1445_v30  ;;  %v1477_v17 = vld [vmem:[#allocation6 + $0x18e8] sm:$0xff] }
 0x2ac   :  { %7092 = vmatpush1.bf16.msra.mxu0 %v12530_v59  ;;  %v12570_v59 = vcombine.low %v1440_v26, %v1444_v39  ;;  %v1480_v26 = vld [vmem:[#allocation6 + $0x1900] sm:$0xff] }
 0x2ad   :  { %7420 = vmatpush1.bf16.msra.mxu1 %v12532_v49  ;;  %7093 = vmatprep.subr.bf16.mxu0 %v12539_v51  ;;  %v12572_v49 = vcombine.low %v1441_v29, %v1445_v30  ;;  %v12579_v51 = vcombine.high %v1448_v35, %v1452_v37  ;;  %v1484_v39 = vld [vmem:[#allocation6 + $0x1920] sm:$0xff]  ;;  %v1481_v29 = vld [vmem:[#allocation6 + $0x1908] sm:$0xff] }
 0x2ae   :  { %7421 = vmatprep.subr.bf16.mxu1 %v12541_v36  ;;  %v12581_v36 = vcombine.high %v1449_v38, %v1453_v45  ;;  %v1485_v30 = vld [vmem:[#allocation6 + $0x1928] sm:$0xff]  ;;  %v1488_v35 = vld [vmem:[#allocation6 + $0x1940] sm:$0xff] }
 0x2af   :  { %v1492_v37 = vld [vmem:[#allocation6 + $0x1960] sm:$0xff] }
 0x2b0   :  { %7094 = vmatpush1.bf16.msra.mxu0 %v12538_v61  ;;  %v1461_v61 = vld [vmem:[#allocation6 + $0x1868] sm:$0xff] }
 0x2b1   :  { %7422 = vmatpush1.bf16.msra.mxu1 %v12540_v62  ;;  %7095 = vmatprep.subr.bf16.mxu0 %v12547_v63  ;;  %v14754_v62 = vpack.c.bf16 %v14675_v21, %v14675_v21  ;;  %v12580_v63 = vcombine.low %v1449_v38, %v1453_v45  ;;  %v12589_v5 = vcombine.high %v1457_v56, %v1461_v61  ;;  %v1489_v38 = vld [vmem:[#allocation6 + $0x1948] sm:$0xff] }
 0x2b2   :  { %7423 = vmatprep.subr.bf16.mxu1 %v12549_v3  ;;  %v12587_v3 = vcombine.high %v1456_v52, %v1460_v54  ;;  %v12586_v21 = vcombine.low %v1456_v52, %v1460_v54  ;;  %v1493_v45 = vld [vmem:[#allocation6 + $0x1968] sm:$0xff]  ;;  %v1496_v52 = vld [vmem:[#allocation6 + $0x1980] sm:$0xff] }
 0x2b3   :  { %v1500_v54 = vld [vmem:[#allocation6 + $0x19a0] sm:$0xff] }
 0x2b4   :  { %7096 = vmatpush1.bf16.msra.mxu0 %v12546_v6  ;;  %v1465_v6 = vld [vmem:[#allocation6 + $0x1888] sm:$0xff] }
 0x2b5   :  { %7424 = vmatpush1.bf16.msra.mxu1 %v12548_v8  ;;  %7097 = vmatprep.subr.bf16.mxu0 %v12555_v10  ;;  %v1469_v8 = vld [vmem:[#allocation6 + $0x18a8] sm:$0xff]  ;;  %v12588_v10 = vcombine.low %v1457_v56, %v1461_v61  ;;  %v12618_v61 = vcombine.low %v1488_v35, %v1492_v37 }
 0x2b6   :  { %7425 = vmatprep.subr.bf16.mxu1 %v12557_v50  ;;  %v12595_v50 = vcombine.high %v1464_v22, %v1468_v4  ;;  %v12597_v28 = vcombine.high %v1465_v6, %v1469_v8  ;;  %v1501_v56 = vld [vmem:[#allocation6 + $0x19a8] sm:$0xff] }
 0x2b8   :  { %7098 = vmatpush1.bf16.msra.mxu0 %v12554_v18  ;;  %v12594_v18 = vcombine.low %v1464_v22, %v1468_v4  ;;  %v1504_v4 = vld [vmem:[#allocation6 + $0x19c0] sm:$0xff] }
 0x2b9   :  { %7426 = vmatpush1.bf16.msra.mxu1 %v12556_v19  ;;  %7099 = vmatprep.subr.bf16.mxu0 %v12563_v23  ;;  %v12596_v19 = vcombine.low %v1465_v6, %v1469_v8  ;;  %v12603_v23 = vcombine.high %v1472_v13, %v1476_v14  ;;  %v1505_v6 = vld [vmem:[#allocation6 + $0x19c8] sm:$0xff] }
 0x2ba   :  { %7427 = vmatprep.subr.bf16.mxu1 %v12565_v24  ;;  %v12605_v24 = vcombine.high %v1473_v15, %v1477_v17  ;;  %v1509_v8 = vld [vmem:[#allocation6 + $0x19e8] sm:$0xff] }
 0x2bc   :  { %7100 = vmatpush1.bf16.msra.mxu0 %v12562_v31  ;;  %v12602_v31 = vcombine.low %v1472_v13, %v1476_v14  ;;  %v1512_v13 = vld [vmem:[#allocation6 + $0x1a00] sm:$0xff] }
 0x2bd   :  { %7428 = vmatpush1.bf16.msra.mxu1 %v12564_v40  ;;  %7101 = vmatprep.subr.bf16.mxu0 %v12571_v32  ;;  %v12604_v40 = vcombine.low %v1473_v15, %v1477_v17  ;;  %v12611_v32 = vcombine.high %v1480_v26, %v1484_v39  ;;  %v1516_v14 = vld [vmem:[#allocation6 + $0x1a20] sm:$0xff]  ;;  %v1513_v15 = vld [vmem:[#allocation6 + $0x1a08] sm:$0xff] }
 0x2be   :  { %7429 = vmatprep.subr.bf16.mxu1 %v12573_v16  ;;  %v12613_v16 = vcombine.high %v1481_v29, %v1485_v30  ;;  %v1517_v17 = vld [vmem:[#allocation6 + $0x1a28] sm:$0xff] }
 0x2c0   :  { %7102 = vmatpush1.bf16.msra.mxu0 %v12570_v59  ;;  %v12610_v59 = vcombine.low %v1480_v26, %v1484_v39  ;;  %v1520_v26 = vld [vmem:[#allocation6 + $0x1a40] sm:$0xff] }
 0x2c1   :  { %7430 = vmatpush1.bf16.msra.mxu1 %v12572_v49  ;;  %7112 = vmatprep.subr.bf16.mxu0 %v12579_v51  ;;  %v12612_v49 = vcombine.low %v1481_v29, %v1485_v30  ;;  %v12619_v51 = vcombine.high %v1488_v35, %v1492_v37  ;;  %v1524_v39 = vld [vmem:[#allocation6 + $0x1a60] sm:$0xff]  ;;  %v1521_v29 = vld [vmem:[#allocation6 + $0x1a48] sm:$0xff] }
 0x2c2   :  { %7440 = vmatprep.subr.bf16.mxu1 %v12581_v36  ;;  %v12621_v36 = vcombine.high %v1489_v38, %v1493_v45  ;;  %v1525_v30 = vld [vmem:[#allocation6 + $0x1a68] sm:$0xff]  ;;  %v1528_v35 = vld [vmem:[#allocation6 + $0x1a80] sm:$0xff] }
 0x2c3   :  { %7104 = vmatmul.mubr.bf16.vlgmr.msra.gmra.mrb[16].mxu0 %v14754_v62  ;;  %v1532_v37 = vld [vmem:[#allocation6 + $0x1aa0] sm:$0xff] }
 0x2c4   :  { %7432 = vmatmul.mubr.bf16.vlgmr.msra.gmra.mrb[16].mxu1 %v14754_v62  ;;  %7113 = vmatpush1.bf16.msra.mxu0 %v12578_v20  ;;  %v1497_v20 = vld [vmem:[#allocation6 + $0x1988] sm:$0xff] }
 0x2c5   :  { %7144 = vmatprep.mubr.bf16.mxu0 %v14758_v55  ;;  %7441 = vmatpush1.bf16.msra.mxu1 %v12580_v63  ;;  %v12620_v63 = vcombine.low %v1489_v38, %v1493_v45  ;;  %v12629_v22 = vcombine.high %v1497_v20, %v1501_v56  ;;  %v1529_v38 = vld [vmem:[#allocation6 + $0x1a88] sm:$0xff] }
 0x2c6   :  { %7472 = vmatprep.mubr.bf16.mxu1 %v14758_v55  ;;  %7114 = vmatprep.subr.bf16.mxu0 %v12587_v3  ;;  %v12627_v3 = vcombine.high %v1496_v52, %v1500_v54  ;;  %v1533_v45 = vld [vmem:[#allocation6 + $0x1aa8] sm:$0xff] }
 0x2c7   :  { %7442 = vmatprep.subr.bf16.mxu1 %v12589_v5  ;;  %v1508_v5 = vld [vmem:[#allocation6 + $0x19e0] sm:$0xff] }
 0x2c8   :  { %7115 = vmatpush1.bf16.msra.mxu0 %v12586_v21  ;;  %v12626_v21 = vcombine.low %v1496_v52, %v1500_v54  ;;  %v1536_v52 = vld [vmem:[#allocation6 + $0x1ac0] sm:$0xff] }
 0x2c9   :  { %7443 = vmatpush1.bf16.msra.mxu1 %v12588_v10  ;;  %7116 = vmatprep.subr.bf16.mxu0 %v12595_v50  ;;  %v12628_v10 = vcombine.low %v1497_v20, %v1501_v56  ;;  %v12635_v50 = vcombine.high %v1504_v4, %v1508_v5  ;;  %v1540_v54 = vld [vmem:[#allocation6 + $0x1ae0] sm:$0xff]  ;;  %v1537_v20 = vld [vmem:[#allocation6 + $0x1ac8] sm:$0xff] }
 0x2ca   :  { %7444 = vmatprep.subr.bf16.mxu1 %v12597_v28  ;;  %v12637_v28 = vcombine.high %v1505_v6, %v1509_v8  ;;  %v1541_v56 = vld [vmem:[#allocation6 + $0x1ae8] sm:$0xff] }
 0x2cc   :  { %7117 = vmatpush1.bf16.msra.mxu0 %v12594_v18  ;;  %v12634_v18 = vcombine.low %v1504_v4, %v1508_v5  ;;  %v1544_v4 = vld [vmem:[#allocation6 + $0x1b00] sm:$0xff] }
 0x2cd   :  { %7445 = vmatpush1.bf16.msra.mxu1 %v12596_v19  ;;  %7118 = vmatprep.subr.bf16.mxu0 %v12603_v23  ;;  %v12636_v19 = vcombine.low %v1505_v6, %v1509_v8  ;;  %v12643_v23 = vcombine.high %v1512_v13, %v1516_v14  ;;  %v1548_v5 = vld [vmem:[#allocation6 + $0x1b20] sm:$0xff]  ;;  %v1545_v6 = vld [vmem:[#allocation6 + $0x1b08] sm:$0xff] }
 0x2ce   :  { %7446 = vmatprep.subr.bf16.mxu1 %v12605_v24  ;;  %v12645_v24 = vcombine.high %v1513_v15, %v1517_v17  ;;  %v1549_v8 = vld [vmem:[#allocation6 + $0x1b28] sm:$0xff] }
 0x2d0   :  { %7119 = vmatpush1.bf16.msra.mxu0 %v12602_v31  ;;  %v12642_v31 = vcombine.low %v1512_v13, %v1516_v14  ;;  %v1552_v13 = vld [vmem:[#allocation6 + $0x1b40] sm:$0xff] }
 0x2d1   :  { %7447 = vmatpush1.bf16.msra.mxu1 %v12604_v40  ;;  %7120 = vmatprep.subr.bf16.mxu0 %v12611_v32  ;;  %v12644_v40 = vcombine.low %v1513_v15, %v1517_v17  ;;  %v12651_v32 = vcombine.high %v1520_v26, %v1524_v39  ;;  %v1556_v14 = vld [vmem:[#allocation6 + $0x1b60] sm:$0xff]  ;;  %v1553_v15 = vld [vmem:[#allocation6 + $0x1b48] sm:$0xff] }
 0x2d2   :  { %7448 = vmatprep.subr.bf16.mxu1 %v12613_v16  ;;  %v12653_v16 = vcombine.high %v1521_v29, %v1525_v30  ;;  %v1557_v17 = vld [vmem:[#allocation6 + $0x1b68] sm:$0xff] }
 0x2d4   :  { %7121 = vmatpush1.bf16.msra.mxu0 %v12610_v59  ;;  %v12650_v59 = vcombine.low %v1520_v26, %v1524_v39  ;;  %v1560_v26 = vld [vmem:[#allocation6 + $0x1b80] sm:$0xff] }
 0x2d5   :  { %7449 = vmatpush1.bf16.msra.mxu1 %v12612_v49  ;;  %7122 = vmatprep.subr.bf16.mxu0 %v12619_v51  ;;  %v12652_v49 = vcombine.low %v1521_v29, %v1525_v30  ;;  %v12659_v51 = vcombine.high %v1528_v35, %v1532_v37  ;;  %v1564_v39 = vld [vmem:[#allocation6 + $0x1ba0] sm:$0xff]  ;;  %v1561_v29 = vld [vmem:[#allocation6 + $0x1b88] sm:$0xff] }
 0x2d6   :  { %7450 = vmatprep.subr.bf16.mxu1 %v12621_v36  ;;  %v12661_v36 = vcombine.high %v1529_v38, %v1533_v45  ;;  %v1565_v30 = vld [vmem:[#allocation6 + $0x1ba8] sm:$0xff] }
 0x2d8   :  { %7123 = vmatpush1.bf16.msra.mxu0 %v12618_v61  ;;  %v12658_v61 = vcombine.low %v1528_v35, %v1532_v37  ;;  %v1568_v35 = vld [vmem:[#allocation6 + $0x1bc0] sm:$0xff] }
 0x2d9   :  { %7451 = vmatpush1.bf16.msra.mxu1 %v12620_v63  ;;  %7124 = vmatprep.subr.bf16.mxu0 %v12627_v3  ;;  %v12660_v63 = vcombine.low %v1529_v38, %v1533_v45  ;;  %v12667_v3 = vcombine.high %v1536_v52, %v1540_v54  ;;  %v1572_v37 = vld [vmem:[#allocation6 + $0x1be0] sm:$0xff]  ;;  %v1569_v38 = vld [vmem:[#allocation6 + $0x1bc8] sm:$0xff] }
 0x2da   :  { %7452 = vmatprep.subr.bf16.mxu1 %v12629_v22  ;;  %v12669_v22 = vcombine.high %v1537_v20, %v1541_v56  ;;  %v1573_v45 = vld [vmem:[#allocation6 + $0x1be8] sm:$0xff] }
 0x2dc   :  { %7125 = vmatpush1.bf16.msra.mxu0 %v12626_v21  ;;  %v12666_v21 = vcombine.low %v1536_v52, %v1540_v54  ;;  %v1576_v52 = vld [vmem:[#allocation6 + $0x1c00] sm:$0xff] }
 0x2dd   :  { %7453 = vmatpush1.bf16.msra.mxu1 %v12628_v10  ;;  %7126 = vmatprep.subr.bf16.mxu0 %v12635_v50  ;;  %v12668_v10 = vcombine.low %v1537_v20, %v1541_v56  ;;  %v12675_v50 = vcombine.high %v1544_v4, %v1548_v5  ;;  %v1580_v54 = vld [vmem:[#allocation6 + $0x1c20] sm:$0xff]  ;;  %v1577_v20 = vld [vmem:[#allocation6 + $0x1c08] sm:$0xff] }
 0x2de   :  { %7454 = vmatprep.subr.bf16.mxu1 %v12637_v28  ;;  %v12677_v28 = vcombine.high %v1545_v6, %v1549_v8  ;;  %v1581_v56 = vld [vmem:[#allocation6 + $0x1c28] sm:$0xff] }
 0x2e0   :  { %7127 = vmatpush1.bf16.msra.mxu0 %v12634_v18  ;;  %v12674_v18 = vcombine.low %v1544_v4, %v1548_v5  ;;  %v1584_v4 = vld [vmem:[#allocation6 + $0x1c40] sm:$0xff] }
 0x2e1   :  { %7455 = vmatpush1.bf16.msra.mxu1 %v12636_v19  ;;  %7128 = vmatprep.subr.bf16.mxu0 %v12643_v23  ;;  %v12676_v19 = vcombine.low %v1545_v6, %v1549_v8  ;;  %v12683_v23 = vcombine.high %v1552_v13, %v1556_v14  ;;  %v1588_v5 = vld [vmem:[#allocation6 + $0x1c60] sm:$0xff]  ;;  %v12706_v6 = vcombine.low %v1576_v52, %v1580_v54  ;;  %v1585_v8 = vld [vmem:[#allocation6 + $0x1c48] sm:$0xff] }
 0x2e2   :  { %7456 = vmatprep.subr.bf16.mxu1 %v12645_v24  ;;  %v12685_v24 = vcombine.high %v1553_v15, %v1557_v17 }
 0x2e4   :  { %7129 = vmatpush1.bf16.msra.mxu0 %v12642_v31  ;;  %v12682_v31 = vcombine.low %v1552_v13, %v1556_v14  ;;  %v1592_v13 = vld [vmem:[#allocation6 + $0x1c80] sm:$0xff] }
 0x2e5   :  { %7457 = vmatpush1.bf16.msra.mxu1 %v12644_v40  ;;  %7130 = vmatprep.subr.bf16.mxu0 %v12651_v32  ;;  %v12684_v40 = vcombine.low %v1553_v15, %v1557_v17  ;;  %v12691_v32 = vcombine.high %v1560_v26, %v1564_v39  ;;  %v1596_v14 = vld [vmem:[#allocation6 + $0x1ca0] sm:$0xff]  ;;  %v14770_v15 = vpack.c.bf16 %v14691_v58, %v14691_v58 }
 0x2e6   :  { %7458 = vmatprep.subr.bf16.mxu1 %v12653_v16  ;;  %v12693_v16 = vcombine.high %v1561_v29, %v1565_v30  ;;  %v1600_v58 = vld [vmem:[#allocation6 + $0x1cc0] sm:$0xff] }
 0x2e8   :  { %7131 = vmatpush1.bf16.msra.mxu0 %v12650_v59  ;;  %v12690_v59 = vcombine.low %v1560_v26, %v1564_v39  ;;  %v1604_v39 = vld [vmem:[#allocation6 + $0x1ce0] sm:$0xff] }
 0x2e9   :  { %7459 = vmatpush1.bf16.msra.mxu1 %v12652_v49  ;;  %7132 = vmatprep.subr.bf16.mxu0 %v12659_v51  ;;  %v12692_v49 = vcombine.low %v1561_v29, %v1565_v30  ;;  %v12699_v51 = vcombine.high %v1568_v35, %v1572_v37  ;;  %v1601_v29 = vld [vmem:[#allocation6 + $0x1cc8] sm:$0xff] }
 0x2ea   :  { %7460 = vmatprep.subr.bf16.mxu1 %v12661_v36  ;;  %v12701_v36 = vcombine.high %v1569_v38, %v1573_v45  ;;  %v1605_v30 = vld [vmem:[#allocation6 + $0x1ce8] sm:$0xff] }
 0x2ec   :  { %7133 = vmatpush1.bf16.msra.mxu0 %v12658_v61  ;;  %v12698_v61 = vcombine.low %v1568_v35, %v1572_v37  ;;  %v1608_v35 = vld [vmem:[#allocation6 + $0x1d00] sm:$0xff] }
 0x2ed   :  { %7461 = vmatpush1.bf16.msra.mxu1 %v12660_v63  ;;  %7134 = vmatprep.subr.bf16.mxu0 %v12667_v3  ;;  %v12700_v63 = vcombine.low %v1569_v38, %v1573_v45  ;;  %v12707_v3 = vcombine.high %v1576_v52, %v1580_v54  ;;  %v1612_v37 = vld [vmem:[#allocation6 + $0x1d20] sm:$0xff]  ;;  %v1609_v38 = vld [vmem:[#allocation6 + $0x1d08] sm:$0xff] }
 0x2ee   :  { %7462 = vmatprep.subr.bf16.mxu1 %v12669_v22  ;;  %v12709_v22 = vcombine.high %v1577_v20, %v1581_v56  ;;  %v1613_v45 = vld [vmem:[#allocation6 + $0x1d28] sm:$0xff]  ;;  %v1616_v52 = vld [vmem:[#allocation6 + $0x1d40] sm:$0xff] }
 0x2ef   :  { %v1620_v54 = vld [vmem:[#allocation6 + $0x1d60] sm:$0xff] }
 0x2f0   :  { %7135 = vmatpush1.bf16.msra.mxu0 %v12666_v21  ;;  %v1589_v21 = vld [vmem:[#allocation6 + $0x1c68] sm:$0xff] }
 0x2f1   :  { %7463 = vmatpush1.bf16.msra.mxu1 %v12668_v10  ;;  %7136 = vmatprep.subr.bf16.mxu0 %v12675_v50  ;;  %v14766_v10 = vpack.c.bf16 %v14660_v9, %v14660_v9  ;;  %v12708_v50 = vcombine.low %v1577_v20, %v1581_v56  ;;  %v12717_v17 = vcombine.high %v1585_v8, %v1589_v21  ;;  %v1617_v20 = vld [vmem:[#allocation6 + $0x1d48] sm:$0xff] }
 0x2f2   :  { %7464 = vmatprep.subr.bf16.mxu1 %v12677_v28  ;;  %v12715_v28 = vcombine.high %v1584_v4, %v1588_v5  ;;  %v12714_v9 = vcombine.low %v1584_v4, %v1588_v5  ;;  %v1621_v56 = vld [vmem:[#allocation6 + $0x1d68] sm:$0xff]  ;;  %v1624_v4 = vld [vmem:[#allocation6 + $0x1d80] sm:$0xff] }
 0x2f3   :  { %v1628_v5 = vld [vmem:[#allocation6 + $0x1da0] sm:$0xff] }
 0x2f4   :  { %7137 = vmatpush1.bf16.msra.mxu0 %v12674_v18  ;;  %v1593_v18 = vld [vmem:[#allocation6 + $0x1c88] sm:$0xff] }
 0x2f5   :  { %7465 = vmatpush1.bf16.msra.mxu1 %v12676_v19  ;;  %7138 = vmatprep.subr.bf16.mxu0 %v12683_v23  ;;  %v1597_v19 = vld [vmem:[#allocation6 + $0x1ca8] sm:$0xff]  ;;  %v12716_v23 = vcombine.low %v1585_v8, %v1589_v21  ;;  %v12746_v21 = vcombine.low %v1616_v52, %v1620_v54 }
 0x2f6   :  { %7466 = vmatprep.subr.bf16.mxu1 %v12685_v24  ;;  %v12723_v24 = vcombine.high %v1592_v13, %v1596_v14  ;;  %v12725_v26 = vcombine.high %v1593_v18, %v1597_v19  ;;  %v1629_v8 = vld [vmem:[#allocation6 + $0x1da8] sm:$0xff] }
 0x2f8   :  { %7139 = vmatpush1.bf16.msra.mxu0 %v12682_v31  ;;  %v12722_v31 = vcombine.low %v1592_v13, %v1596_v14  ;;  %v1632_v14 = vld [vmem:[#allocation6 + $0x1dc0] sm:$0xff] }
 0x2f9   :  { %7467 = vmatpush1.bf16.msra.mxu1 %v12684_v40  ;;  %7140 = vmatprep.subr.bf16.mxu0 %v12691_v32  ;;  %v12724_v40 = vcombine.low %v1593_v18, %v1597_v19  ;;  %v12731_v32 = vcombine.high %v1600_v58, %v1604_v39  ;;  %v1633_v18 = vld [vmem:[#allocation6 + $0x1dc8] sm:$0xff] }
 0x2fa   :  { %7468 = vmatprep.subr.bf16.mxu1 %v12693_v16  ;;  %v12733_v16 = vcombine.high %v1601_v29, %v1605_v30  ;;  %v1637_v19 = vld [vmem:[#allocation6 + $0x1de8] sm:$0xff] }
 0x2fc   :  { %7141 = vmatpush1.bf16.msra.mxu0 %v12690_v59  ;;  %v12730_v59 = vcombine.low %v1600_v58, %v1604_v39  ;;  %v1640_v58 = vld [vmem:[#allocation6 + $0x1e00] sm:$0xff] }
 0x2fd   :  { %7469 = vmatpush1.bf16.msra.mxu1 %v12692_v49  ;;  %7142 = vmatprep.subr.bf16.mxu0 %v12699_v51  ;;  %v12732_v49 = vcombine.low %v1601_v29, %v1605_v30  ;;  %v12739_v51 = vcombine.high %v1608_v35, %v1612_v37  ;;  %v1644_v39 = vld [vmem:[#allocation6 + $0x1e20] sm:$0xff]  ;;  %v1641_v29 = vld [vmem:[#allocation6 + $0x1e08] sm:$0xff] }
 0x2fe   :  { %7470 = vmatprep.subr.bf16.mxu1 %v12701_v36  ;;  %v12741_v36 = vcombine.high %v1609_v38, %v1613_v45  ;;  %v1645_v30 = vld [vmem:[#allocation6 + $0x1e28] sm:$0xff] }
 0x300   :  { %7143 = vmatpush1.bf16.msra.mxu0 %v12698_v61  ;;  %v12738_v61 = vcombine.low %v1608_v35, %v1612_v37  ;;  %v1648_v35 = vld [vmem:[#allocation6 + $0x1e40] sm:$0xff] }
 0x301   :  { %7471 = vmatpush1.bf16.msra.mxu1 %v12700_v63  ;;  %7153 = vmatprep.subr.bf16.mxu0 %v12707_v3  ;;  %v12740_v63 = vcombine.low %v1609_v38, %v1613_v45  ;;  %v12747_v3 = vcombine.high %v1616_v52, %v1620_v54  ;;  %v1652_v37 = vld [vmem:[#allocation6 + $0x1e60] sm:$0xff]  ;;  %v1649_v38 = vld [vmem:[#allocation6 + $0x1e48] sm:$0xff] }
 0x302   :  { %7481 = vmatprep.subr.bf16.mxu1 %v12709_v22  ;;  %v12749_v22 = vcombine.high %v1617_v20, %v1621_v56  ;;  %v1653_v45 = vld [vmem:[#allocation6 + $0x1e68] sm:$0xff]  ;;  %v1656_v52 = vld [vmem:[#allocation6 + $0x1e80] sm:$0xff] }
 0x303   :  { %7145 = vmatmul.mubr.bf16.vlgmr.msra.gmra.mrb[16].mxu0 %v14766_v10  ;;  %v1660_v54 = vld [vmem:[#allocation6 + $0x1ea0] sm:$0xff] }
 0x304   :  { %7473 = vmatmul.mubr.bf16.vlgmr.msra.gmra.mrb[16].mxu1 %v14766_v10  ;;  %7154 = vmatpush1.bf16.msra.mxu0 %v12706_v6  ;;  %v1625_v6 = vld [vmem:[#allocation6 + $0x1d88] sm:$0xff] }
 0x305   :  { %7185 = vmatprep.mubr.bf16.mxu0 %v14770_v15  ;;  %7482 = vmatpush1.bf16.msra.mxu1 %v12708_v50  ;;  %v12748_v50 = vcombine.low %v1617_v20, %v1621_v56  ;;  %v12757_v13 = vcombine.high %v1625_v6, %v1629_v8  ;;  %v1657_v20 = vld [vmem:[#allocation6 + $0x1e88] sm:$0xff] }
 0x306   :  { %7513 = vmatprep.mubr.bf16.mxu1 %v14770_v15  ;;  %7155 = vmatprep.subr.bf16.mxu0 %v12715_v28  ;;  %v12755_v28 = vcombine.high %v1624_v4, %v1628_v5  ;;  %v1661_v56 = vld [vmem:[#allocation6 + $0x1ea8] sm:$0xff] }
 0x307   :  { %7483 = vmatprep.subr.bf16.mxu1 %v12717_v17  ;;  %v1636_v17 = vld [vmem:[#allocation6 + $0x1de0] sm:$0xff] }
 0x308   :  { %7156 = vmatpush1.bf16.msra.mxu0 %v12714_v9  ;;  %v12754_v9 = vcombine.low %v1624_v4, %v1628_v5  ;;  %v1664_v4 = vld [vmem:[#allocation6 + $0x1ec0] sm:$0xff] }
 0x309   :  { %7484 = vmatpush1.bf16.msra.mxu1 %v12716_v23  ;;  %7157 = vmatprep.subr.bf16.mxu0 %v12723_v24  ;;  %v12756_v23 = vcombine.low %v1625_v6, %v1629_v8  ;;  %v12763_v24 = vcombine.high %v1632_v14, %v1636_v17  ;;  %v1668_v5 = vld [vmem:[#allocation6 + $0x1ee0] sm:$0xff]  ;;  %v1665_v6 = vld [vmem:[#allocation6 + $0x1ec8] sm:$0xff] }
 0x30a   :  { %7485 = vmatprep.subr.bf16.mxu1 %v12725_v26  ;;  %v12765_v26 = vcombine.high %v1633_v18, %v1637_v19  ;;  %v1669_v8 = vld [vmem:[#allocation6 + $0x1ee8] sm:$0xff] }
 0x30c   :  { %7158 = vmatpush1.bf16.msra.mxu0 %v12722_v31  ;;  %v12762_v31 = vcombine.low %v1632_v14, %v1636_v17  ;;  %v1672_v14 = vld [vmem:[#allocation6 + $0x1f00] sm:$0xff] }
 0x30d   :  { %7486 = vmatpush1.bf16.msra.mxu1 %v12724_v40  ;;  %7159 = vmatprep.subr.bf16.mxu0 %v12731_v32  ;;  %v12764_v40 = vcombine.low %v1633_v18, %v1637_v19  ;;  %v12771_v32 = vcombine.high %v1640_v58, %v1644_v39  ;;  %v1676_v17 = vld [vmem:[#allocation6 + $0x1f20] sm:$0xff]  ;;  %v1673_v18 = vld [vmem:[#allocation6 + $0x1f08] sm:$0xff] }
 0x30e   :  { %7487 = vmatprep.subr.bf16.mxu1 %v12733_v16  ;;  %v12773_v16 = vcombine.high %v1641_v29, %v1645_v30  ;;  %v1677_v19 = vld [vmem:[#allocation6 + $0x1f28] sm:$0xff] }
 0x310   :  { %7160 = vmatpush1.bf16.msra.mxu0 %v12730_v59  ;;  %v12770_v59 = vcombine.low %v1640_v58, %v1644_v39  ;;  %v1680_v58 = vld [vmem:[#allocation6 + $0x1f40] sm:$0xff] }
 0x311   :  { %7488 = vmatpush1.bf16.msra.mxu1 %v12732_v49  ;;  %7161 = vmatprep.subr.bf16.mxu0 %v12739_v51  ;;  %v12772_v49 = vcombine.low %v1641_v29, %v1645_v30  ;;  %v12779_v51 = vcombine.high %v1648_v35, %v1652_v37  ;;  %v1684_v39 = vld [vmem:[#allocation6 + $0x1f60] sm:$0xff]  ;;  %v1681_v29 = vld [vmem:[#allocation6 + $0x1f48] sm:$0xff] }
 0x312   :  { %7489 = vmatprep.subr.bf16.mxu1 %v12741_v36  ;;  %v12781_v36 = vcombine.high %v1649_v38, %v1653_v45  ;;  %v1685_v30 = vld [vmem:[#allocation6 + $0x1f68] sm:$0xff] }
 0x314   :  { %7162 = vmatpush1.bf16.msra.mxu0 %v12738_v61  ;;  %v12778_v61 = vcombine.low %v1648_v35, %v1652_v37  ;;  %v1688_v35 = vld [vmem:[#allocation6 + $0x1f80] sm:$0xff] }
 0x315   :  { %7490 = vmatpush1.bf16.msra.mxu1 %v12740_v63  ;;  %7163 = vmatprep.subr.bf16.mxu0 %v12747_v3  ;;  %v12780_v63 = vcombine.low %v1649_v38, %v1653_v45  ;;  %v12787_v3 = vcombine.high %v1656_v52, %v1660_v54  ;;  %v1692_v37 = vld [vmem:[#allocation6 + $0x1fa0] sm:$0xff]  ;;  %v1689_v38 = vld [vmem:[#allocation6 + $0x1f88] sm:$0xff] }
 0x316   :  { %7491 = vmatprep.subr.bf16.mxu1 %v12749_v22  ;;  %v12789_v22 = vcombine.high %v1657_v20, %v1661_v56  ;;  %v1693_v45 = vld [vmem:[#allocation6 + $0x1fa8] sm:$0xff] }
 0x318   :  { %7164 = vmatpush1.bf16.msra.mxu0 %v12746_v21  ;;  %v12786_v21 = vcombine.low %v1656_v52, %v1660_v54  ;;  %v1696_v52 = vld [vmem:[#allocation6 + $0x1fc0] sm:$0xff] }
 0x319   :  { %7492 = vmatpush1.bf16.msra.mxu1 %v12748_v50  ;;  %7165 = vmatprep.subr.bf16.mxu0 %v12755_v28  ;;  %v12788_v50 = vcombine.low %v1657_v20, %v1661_v56  ;;  %v12795_v28 = vcombine.high %v1664_v4, %v1668_v5  ;;  %v1700_v54 = vld [vmem:[#allocation6 + $0x1fe0] sm:$0xff]  ;;  %v1697_v20 = vld [vmem:[#allocation6 + $0x1fc8] sm:$0xff] }
 0x31a   :  { %7493 = vmatprep.subr.bf16.mxu1 %v12757_v13  ;;  %v12797_v13 = vcombine.high %v1665_v6, %v1669_v8  ;;  %v1701_v56 = vld [vmem:[#allocation6 + $0x1fe8] sm:$0xff] }
 0x31c   :  { %7166 = vmatpush1.bf16.msra.mxu0 %v12754_v9  ;;  %v12794_v9 = vcombine.low %v1664_v4, %v1668_v5  ;;  %v682_v4 = vld [vmem:[#allocation6 + $0x10] sm:$0xff] }
 0x31d   :  { %7494 = vmatpush1.bf16.msra.mxu1 %v12756_v23  ;;  %7167 = vmatprep.subr.bf16.mxu0 %v12763_v24  ;;  %v12796_v23 = vcombine.low %v1665_v6, %v1669_v8  ;;  %v12803_v24 = vcombine.high %v1672_v14, %v1676_v17  ;;  %v686_v5 = vld [vmem:[#allocation6 + $0x30] sm:$0xff]  ;;  %v683_v6 = vld [vmem:[#allocation6 + $0x18] sm:$0xff] }
 0x31e   :  { %7495 = vmatprep.subr.bf16.mxu1 %v12765_v26  ;;  %v12805_v26 = vcombine.high %v1673_v18, %v1677_v19  ;;  %v687_v8 = vld [vmem:[#allocation6 + $0x38] sm:$0xff] }
 0x320   :  { %7168 = vmatpush1.bf16.msra.mxu0 %v12762_v31  ;;  %v12802_v31 = vcombine.low %v1672_v14, %v1676_v17  ;;  %v690_v14 = vld [vmem:[#allocation6 + $0x50] sm:$0xff] }
 0x321   :  { %7496 = vmatpush1.bf16.msra.mxu1 %v12764_v40  ;;  %7169 = vmatprep.subr.bf16.mxu0 %v12771_v32  ;;  %v12804_v40 = vcombine.low %v1673_v18, %v1677_v19  ;;  %v12811_v32 = vcombine.high %v1680_v58, %v1684_v39  ;;  %v694_v17 = vld [vmem:[#allocation6 + $0x70] sm:$0xff]  ;;  %v11814_v18 = vcombine.low %v682_v4, %v686_v5  ;;  %v691_v19 = vld [vmem:[#allocation6 + $0x58] sm:$0xff] }
 0x322   :  { %7497 = vmatprep.subr.bf16.mxu1 %v12773_v16  ;;  %v12813_v16 = vcombine.high %v1681_v29, %v1685_v30 }
 0x324   :  { %7170 = vmatpush1.bf16.msra.mxu0 %v12770_v59  ;;  %v12810_v59 = vcombine.low %v1680_v58, %v1684_v39  ;;  %v698_v58 = vld [vmem:[#allocation6 + $0x90] sm:$0xff] }
 0x325   :  { %7498 = vmatpush1.bf16.msra.mxu1 %v12772_v49  ;;  %7171 = vmatprep.subr.bf16.mxu0 %v12779_v51  ;;  %v12812_v49 = vcombine.low %v1681_v29, %v1685_v30  ;;  %v12819_v51 = vcombine.high %v1688_v35, %v1692_v37  ;;  %v702_v39 = vld [vmem:[#allocation6 + $0xb0] sm:$0xff]  ;;  %v699_v30 = vld [vmem:[#allocation6 + $0x98] sm:$0xff] }
 0x326   :  { %7499 = vmatprep.subr.bf16.mxu1 %v12781_v36  ;;  %v12821_v36 = vcombine.high %v1689_v38, %v1693_v45 }
 0x328   :  { %7172 = vmatpush1.bf16.msra.mxu0 %v12778_v61  ;;  %v12818_v61 = vcombine.low %v1688_v35, %v1692_v37  ;;  %v706_v35 = vld [vmem:[#allocation6 + $0xd0] sm:$0xff] }
 0x329   :  { %7500 = vmatpush1.bf16.msra.mxu1 %v12780_v63  ;;  %7173 = vmatprep.subr.bf16.mxu0 %v12787_v3  ;;  %v12820_v63 = vcombine.low %v1689_v38, %v1693_v45  ;;  %v12827_v3 = vcombine.high %v1696_v52, %v1700_v54  ;;  %v710_v37 = vld [vmem:[#allocation6 + $0xf0] sm:$0xff]  ;;  %v707_v38 = vld [vmem:[#allocation6 + $0xd8] sm:$0xff] }
 0x32a   :  { %7501 = vmatprep.subr.bf16.mxu1 %v12789_v22  ;;  %v12829_v22 = vcombine.high %v1697_v20, %v1701_v56  ;;  %v711_v45 = vld [vmem:[#allocation6 + $0xf8] sm:$0xff] }
 0x32c   :  { %7174 = vmatpush1.bf16.msra.mxu0 %v12786_v21  ;;  %v12826_v21 = vcombine.low %v1696_v52, %v1700_v54  ;;  %v714_v52 = vld [vmem:[#allocation6 + $0x110] sm:$0xff] }
 0x32d   :  { %7502 = vmatpush1.bf16.msra.mxu1 %v12788_v50  ;;  %7175 = vmatprep.subr.bf16.mxu0 %v12795_v28  ;;  %v12828_v50 = vcombine.low %v1697_v20, %v1701_v56  ;;  %v11815_v28 = vcombine.high %v682_v4, %v686_v5  ;;  %v718_v54 = vld [vmem:[#allocation6 + $0x130] sm:$0xff]  ;;  %v715_v20 = vld [vmem:[#allocation6 + $0x118] sm:$0xff] }
 0x32e   :  { %7503 = vmatprep.subr.bf16.mxu1 %v12797_v13  ;;  %v11817_v13 = vcombine.high %v683_v6, %v687_v8  ;;  %v719_v56 = vld [vmem:[#allocation6 + $0x138] sm:$0xff]  ;;  %v722_v4 = vld [vmem:[#allocation6 + $0x150] sm:$0xff] }
 0x32f   :  { %v726_v5 = vld [vmem:[#allocation6 + $0x170] sm:$0xff] }
 0x330   :  { %7176 = vmatpush1.bf16.msra.mxu0 %v12794_v9  ;;  %v695_v9 = vld [vmem:[#allocation6 + $0x78] sm:$0xff] }
 0x331   :  { %7504 = vmatpush1.bf16.msra.mxu1 %v12796_v23  ;;  %7177 = vmatprep.subr.bf16.mxu0 %v12803_v24  ;;  %v14778_v23 = vpack.c.bf16 %v14689_v57, %v14689_v57  ;;  %v11816_v24 = vcombine.low %v683_v6, %v687_v8  ;;  %v11825_v29 = vcombine.high %v691_v19, %v695_v9  ;;  %v723_v6 = vld [vmem:[#allocation6 + $0x158] sm:$0xff] }
 0x332   :  { %7505 = vmatprep.subr.bf16.mxu1 %v12805_v26  ;;  %v11823_v26 = vcombine.high %v690_v14, %v694_v17  ;;  %v11824_v57 = vcombine.low %v691_v19, %v695_v9  ;;  %v727_v8 = vld [vmem:[#allocation6 + $0x178] sm:$0xff]  ;;  %v11854_v9 = vcombine.low %v722_v4, %v726_v5 }
 0x333   :  { %v735_v19 = vld [vmem:[#allocation6 + $0x1b8] sm:$0xff] }
 0x334   :  { %7178 = vmatpush1.bf16.msra.mxu0 %v12802_v31  ;;  %v703_v31 = vld [vmem:[#allocation6 + $0xb8] sm:$0xff] }
 0x335   :  { %7506 = vmatpush1.bf16.msra.mxu1 %v12804_v40  ;;  %7179 = vmatprep.subr.bf16.mxu0 %v12811_v32  ;;  %v11822_v40 = vcombine.low %v690_v14, %v694_v17  ;;  %v11831_v32 = vcombine.high %v698_v58, %v702_v39  ;;  %v730_v14 = vld [vmem:[#allocation6 + $0x190] sm:$0xff] }
 0x336   :  { %7507 = vmatprep.subr.bf16.mxu1 %v12813_v16  ;;  %v11833_v16 = vcombine.high %v699_v30, %v703_v31  ;;  %v734_v17 = vld [vmem:[#allocation6 + $0x1b0] sm:$0xff] }
 0x338   :  { %7180 = vmatpush1.bf16.msra.mxu0 %v12810_v59  ;;  %v11830_v59 = vcombine.low %v698_v58, %v702_v39  ;;  %v738_v39 = vld [vmem:[#allocation6 + $0x1d0] sm:$0xff] }
 0x339   :  { %7508 = vmatpush1.bf16.msra.mxu1 %v12812_v49  ;;  %7181 = vmatprep.subr.bf16.mxu0 %v12819_v51  ;;  %v11832_v49 = vcombine.low %v699_v30, %v703_v31  ;;  %v11839_v51 = vcombine.high %v706_v35, %v710_v37  ;;  %v739_v30 = vld [vmem:[#allocation6 + $0x1d8] sm:$0xff] }
 0x33a   :  { %7509 = vmatprep.subr.bf16.mxu1 %v12821_v36  ;;  %v11841_v36 = vcombine.high %v707_v38, %v711_v45  ;;  %v743_v31 = vld [vmem:[#allocation6 + $0x1f8] sm:$0xff] }
 0x33c   :  { %7182 = vmatpush1.bf16.msra.mxu0 %v12818_v61  ;;  %v11838_v61 = vcombine.low %v706_v35, %v710_v37  ;;  %v746_v35 = vld [vmem:[#allocation6 + $0x210] sm:$0xff] }
 0x33d   :  { %7510 = vmatpush1.bf16.msra.mxu1 %v12820_v63  ;;  %7183 = vmatprep.subr.bf16.mxu0 %v12827_v3  ;;  %v11840_v63 = vcombine.low %v707_v38, %v711_v45  ;;  %v11847_v3 = vcombine.high %v714_v52, %v718_v54  ;;  %v750_v37 = vld [vmem:[#allocation6 + $0x230] sm:$0xff]  ;;  %v747_v38 = vld [vmem:[#allocation6 + $0x218] sm:$0xff] }
 0x33e   :  { %7511 = vmatprep.subr.bf16.mxu1 %v12829_v22  ;;  %v11849_v22 = vcombine.high %v715_v20, %v719_v56  ;;  %v751_v45 = vld [vmem:[#allocation6 + $0x238] sm:$0xff] }
 0x340   :  { %7184 = vmatpush1.bf16.msra.mxu0 %v12826_v21  ;;  %v11846_v21 = vcombine.low %v714_v52, %v718_v54  ;;  %v754_v52 = vld [vmem:[#allocation6 + $0x250] sm:$0xff] }
 0x341   :  { %7512 = vmatpush1.bf16.msra.mxu1 %v12828_v50  ;;  %7522 = vmatprep.subr.bf16.mxu0 %v11815_v28  ;;  %v11848_v50 = vcombine.low %v715_v20, %v719_v56  ;;  %v11855_v28 = vcombine.high %v722_v4, %v726_v5  ;;  %v758_v54 = vld [vmem:[#allocation6 + $0x270] sm:$0xff]  ;;  %v755_v20 = vld [vmem:[#allocation6 + $0x258] sm:$0xff] }
 0x342   :  { %7850 = vmatprep.subr.bf16.mxu1 %v11817_v13  ;;  %v11857_v13 = vcombine.high %v723_v6, %v727_v8  ;;  %v759_v56 = vld [vmem:[#allocation6 + $0x278] sm:$0xff]  ;;  %v762_v4 = vld [vmem:[#allocation6 + $0x290] sm:$0xff] }
 0x343   :  { %7186 = vmatmul.mubr.bf16.vlgmr.msra.gmra.mrb[16].mxu0 %v14778_v23  ;;  %v766_v5 = vld [vmem:[#allocation6 + $0x2b0] sm:$0xff] }
 0x344   :  { %7514 = vmatmul.mubr.bf16.vlgmr.msra.gmra.mrb[16].mxu1 %v14778_v23  ;;  %7523 = vmatpush1.bf16.msra.mxu0 %v11814_v18  ;;  %v731_v18 = vld [vmem:[#allocation6 + $0x198] sm:$0xff] }
 0x345   :  { %7554 = vmatprep.mubr.bf16.mxu0 %v14628_v2  ;;  %7851 = vmatpush1.bf16.msra.mxu1 %v11816_v24  ;;  %v11856_v24 = vcombine.low %v723_v6, %v727_v8  ;;  %v11865_v58 = vcombine.high %v731_v18, %v735_v19  ;;  %v763_v6 = vld [vmem:[#allocation6 + $0x298] sm:$0xff] }
 0x346   :  { %7882 = vmatprep.mubr.bf16.mxu1 %v14628_v2  ;;  %7524 = vmatprep.subr.bf16.mxu0 %v11823_v26  ;;  %v11863_v26 = vcombine.high %v730_v14, %v734_v17  ;;  %v767_v8 = vld [vmem:[#allocation6 + $0x2b8] sm:$0xff] }
 0x347   :  { %7852 = vmatprep.subr.bf16.mxu1 %v11825_v29  ;;  %v742_v29 = vld [vmem:[#allocation6 + $0x1f0] sm:$0xff] }
 0x348   :  { %7525 = vmatpush1.bf16.msra.mxu0 %v11822_v40  ;;  %v11862_v40 = vcombine.low %v730_v14, %v734_v17  ;;  %v770_v14 = vld [vmem:[#allocation6 + $0x2d0] sm:$0xff] }
 0x349   :  { %7853 = vmatpush1.bf16.msra.mxu1 %v11824_v57  ;;  %7526 = vmatprep.subr.bf16.mxu0 %v11831_v32  ;;  %v11864_v57 = vcombine.low %v731_v18, %v735_v19  ;;  %v11871_v32 = vcombine.high %v738_v39, %v742_v29  ;;  %v774_v17 = vld [vmem:[#allocation6 + $0x2f0] sm:$0xff]  ;;  %v771_v18 = vld [vmem:[#allocation6 + $0x2d8] sm:$0xff] }
 0x34a   :  { %7854 = vmatprep.subr.bf16.mxu1 %v11833_v16  ;;  %v11873_v16 = vcombine.high %v739_v30, %v743_v31  ;;  %v775_v19 = vld [vmem:[#allocation6 + $0x2f8] sm:$0xff] }
 0x34c   :  { %7527 = vmatpush1.bf16.msra.mxu0 %v11830_v59  ;;  %v11870_v59 = vcombine.low %v738_v39, %v742_v29  ;;  %v778_v39 = vld [vmem:[#allocation6 + $0x310] sm:$0xff] }
 0x34d   :  { %7855 = vmatpush1.bf16.msra.mxu1 %v11832_v49  ;;  %7528 = vmatprep.subr.bf16.mxu0 %v11839_v51  ;;  %v11872_v49 = vcombine.low %v739_v30, %v743_v31  ;;  %v11879_v51 = vcombine.high %v746_v35, %v750_v37  ;;  %v782_v29 = vld [vmem:[#allocation6 + $0x330] sm:$0xff]  ;;  %v779_v30 = vld [vmem:[#allocation6 + $0x318] sm:$0xff] }
 0x34e   :  { %7856 = vmatprep.subr.bf16.mxu1 %v11841_v36  ;;  %v11881_v36 = vcombine.high %v747_v38, %v751_v45  ;;  %v783_v31 = vld [vmem:[#allocation6 + $0x338] sm:$0xff] }
 0x350   :  { %7529 = vmatpush1.bf16.msra.mxu0 %v11838_v61  ;;  %v11878_v61 = vcombine.low %v746_v35, %v750_v37  ;;  %v786_v35 = vld [vmem:[#allocation6 + $0x350] sm:$0xff] }
 0x351   :  { %7857 = vmatpush1.bf16.msra.mxu1 %v11840_v63  ;;  %7530 = vmatprep.subr.bf16.mxu0 %v11847_v3  ;;  %v11880_v63 = vcombine.low %v747_v38, %v751_v45  ;;  %v11887_v3 = vcombine.high %v754_v52, %v758_v54  ;;  %v790_v37 = vld [vmem:[#allocation6 + $0x370] sm:$0xff]  ;;  %v787_v38 = vld [vmem:[#allocation6 + $0x358] sm:$0xff] }
 0x352   :  { %7858 = vmatprep.subr.bf16.mxu1 %v11849_v22  ;;  %v11889_v22 = vcombine.high %v755_v20, %v759_v56  ;;  %v791_v45 = vld [vmem:[#allocation6 + $0x378] sm:$0xff] }
 0x354   :  { %7531 = vmatpush1.bf16.msra.mxu0 %v11846_v21  ;;  %v11886_v21 = vcombine.low %v754_v52, %v758_v54  ;;  %v794_v52 = vld [vmem:[#allocation6 + $0x390] sm:$0xff] }
 0x355   :  { %7859 = vmatpush1.bf16.msra.mxu1 %v11848_v50  ;;  %7532 = vmatprep.subr.bf16.mxu0 %v11855_v28  ;;  %v11888_v50 = vcombine.low %v755_v20, %v759_v56  ;;  %v11895_v28 = vcombine.high %v762_v4, %v766_v5  ;;  %v798_v54 = vld [vmem:[#allocation6 + $0x3b0] sm:$0xff]  ;;  %v795_v20 = vld [vmem:[#allocation6 + $0x398] sm:$0xff] }
 0x356   :  { %7860 = vmatprep.subr.bf16.mxu1 %v11857_v13  ;;  %v11897_v13 = vcombine.high %v763_v6, %v767_v8  ;;  %v799_v56 = vld [vmem:[#allocation6 + $0x3b8] sm:$0xff] }
 0x358   :  { %7533 = vmatpush1.bf16.msra.mxu0 %v11854_v9  ;;  %v11894_v9 = vcombine.low %v762_v4, %v766_v5  ;;  %v802_v4 = vld [vmem:[#allocation6 + $0x3d0] sm:$0xff] }
 0x359   :  { %7861 = vmatpush1.bf16.msra.mxu1 %v11856_v24  ;;  %7534 = vmatprep.subr.bf16.mxu0 %v11863_v26  ;;  %v11896_v24 = vcombine.low %v763_v6, %v767_v8  ;;  %v11903_v26 = vcombine.high %v770_v14, %v774_v17  ;;  %v806_v5 = vld [vmem:[#allocation6 + $0x3f0] sm:$0xff]  ;;  %v803_v6 = vld [vmem:[#allocation6 + $0x3d8] sm:$0xff] }
 0x35a   :  { %7862 = vmatprep.subr.bf16.mxu1 %v11865_v58  ;;  %v11905_v58 = vcombine.high %v771_v18, %v775_v19  ;;  %v807_v8 = vld [vmem:[#allocation6 + $0x3f8] sm:$0xff] }
 0x35c   :  { %7535 = vmatpush1.bf16.msra.mxu0 %v11862_v40  ;;  %v11902_v40 = vcombine.low %v770_v14, %v774_v17  ;;  %v810_v14 = vld [vmem:[#allocation6 + $0x410] sm:$0xff] }
 0x35d   :  { %7863 = vmatpush1.bf16.msra.mxu1 %v11864_v57  ;;  %7536 = vmatprep.subr.bf16.mxu0 %v11871_v32  ;;  %v11904_v57 = vcombine.low %v771_v18, %v775_v19  ;;  %v11911_v32 = vcombine.high %v778_v39, %v782_v29  ;;  %v814_v17 = vld [vmem:[#allocation6 + $0x430] sm:$0xff]  ;;  %v811_v18 = vld [vmem:[#allocation6 + $0x418] sm:$0xff] }
 0x35e   :  { %7864 = vmatprep.subr.bf16.mxu1 %v11873_v16  ;;  %v11913_v16 = vcombine.high %v779_v30, %v783_v31  ;;  %v815_v19 = vld [vmem:[#allocation6 + $0x438] sm:$0xff] }
 0x360   :  { %7537 = vmatpush1.bf16.msra.mxu0 %v11870_v59  ;;  %v11910_v59 = vcombine.low %v778_v39, %v782_v29  ;;  %v818_v39 = vld [vmem:[#allocation6 + $0x450] sm:$0xff] }
 0x361   :  { %7865 = vmatpush1.bf16.msra.mxu1 %v11872_v49  ;;  %7538 = vmatprep.subr.bf16.mxu0 %v11879_v51  ;;  %v11912_v49 = vcombine.low %v779_v30, %v783_v31  ;;  %v11919_v51 = vcombine.high %v786_v35, %v790_v37  ;;  %v822_v29 = vld [vmem:[#allocation6 + $0x470] sm:$0xff]  ;;  %v11942_v30 = vcombine.low %v810_v14, %v814_v17  ;;  %v819_v31 = vld [vmem:[#allocation6 + $0x458] sm:$0xff] }
 0x362   :  { %7866 = vmatprep.subr.bf16.mxu1 %v11881_v36  ;;  %v11921_v36 = vcombine.high %v787_v38, %v791_v45 }
 0x364   :  { %7539 = vmatpush1.bf16.msra.mxu0 %v11878_v61  ;;  %v11918_v61 = vcombine.low %v786_v35, %v790_v37  ;;  %v830_v35 = vld [vmem:[#allocation6 + $0x4b0] sm:$0xff] }
 0x365   :  { %7867 = vmatpush1.bf16.msra.mxu1 %v11880_v63  ;;  %7540 = vmatprep.subr.bf16.mxu0 %v11887_v3  ;;  %v11920_v63 = vcombine.low %v787_v38, %v791_v45  ;;  %v11927_v3 = vcombine.high %v794_v52, %v798_v54  ;;  %v827_v38 = vld [vmem:[#allocation6 + $0x498] sm:$0xff] }
 0x366   :  { %7868 = vmatprep.subr.bf16.mxu1 %v11889_v22  ;;  %v11929_v22 = vcombine.high %v795_v20, %v799_v56  ;;  %v831_v45 = vld [vmem:[#allocation6 + $0x4b8] sm:$0xff] }
 0x368   :  { %7541 = vmatpush1.bf16.msra.mxu0 %v11886_v21  ;;  %v11926_v21 = vcombine.low %v794_v52, %v798_v54  ;;  %v834_v52 = vld [vmem:[#allocation6 + $0x4d0] sm:$0xff] }
 0x369   :  { %7869 = vmatpush1.bf16.msra.mxu1 %v11888_v50  ;;  %7542 = vmatprep.subr.bf16.mxu0 %v11895_v28  ;;  %v11928_v50 = vcombine.low %v795_v20, %v799_v56  ;;  %v11935_v28 = vcombine.high %v802_v4, %v806_v5  ;;  %v838_v54 = vld [vmem:[#allocation6 + $0x4f0] sm:$0xff]  ;;  %v835_v20 = vld [vmem:[#allocation6 + $0x4d8] sm:$0xff] }
 0x36a   :  { %7870 = vmatprep.subr.bf16.mxu1 %v11897_v13  ;;  %v11937_v13 = vcombine.high %v803_v6, %v807_v8  ;;  %v839_v56 = vld [vmem:[#allocation6 + $0x4f8] sm:$0xff] }
 0x36c   :  { %7543 = vmatpush1.bf16.msra.mxu0 %v11894_v9  ;;  %v11934_v9 = vcombine.low %v802_v4, %v806_v5  ;;  %v842_v4 = vld [vmem:[#allocation6 + $0x510] sm:$0xff] }
 0x36d   :  { %7871 = vmatpush1.bf16.msra.mxu1 %v11896_v24  ;;  %7544 = vmatprep.subr.bf16.mxu0 %v11903_v26  ;;  %v11936_v24 = vcombine.low %v803_v6, %v807_v8  ;;  %v11943_v26 = vcombine.high %v810_v14, %v814_v17  ;;  %v846_v5 = vld [vmem:[#allocation6 + $0x530] sm:$0xff]  ;;  %v843_v6 = vld [vmem:[#allocation6 + $0x518] sm:$0xff] }
 0x36e   :  { %7872 = vmatprep.subr.bf16.mxu1 %v11905_v58  ;;  %v11945_v58 = vcombine.high %v811_v18, %v815_v19  ;;  %v847_v8 = vld [vmem:[#allocation6 + $0x538] sm:$0xff]  ;;  %v850_v14 = vld [vmem:[#allocation6 + $0x550] sm:$0xff] }
 0x36f   :  { %v854_v17 = vld [vmem:[#allocation6 + $0x570] sm:$0xff] }
 0x370   :  { %7545 = vmatpush1.bf16.msra.mxu0 %v11902_v40  ;;  %v823_v40 = vld [vmem:[#allocation6 + $0x478] sm:$0xff] }
 0x371   :  { %7873 = vmatpush1.bf16.msra.mxu1 %v11904_v57  ;;  %7546 = vmatprep.subr.bf16.mxu0 %v11911_v32  ;;  %v11944_v57 = vcombine.low %v811_v18, %v815_v19  ;;  %v11951_v32 = vcombine.high %v818_v39, %v822_v29  ;;  %v11953_v37 = vcombine.high %v819_v31, %v823_v40  ;;  %v851_v18 = vld [vmem:[#allocation6 + $0x558] sm:$0xff] }
 0x372   :  { %7874 = vmatprep.subr.bf16.mxu1 %v11913_v16  ;;  %v826_v16 = vld [vmem:[#allocation6 + $0x490] sm:$0xff]  ;;  %v855_v19 = vld [vmem:[#allocation6 + $0x578] sm:$0xff] }
 0x374   :  { %7547 = vmatpush1.bf16.msra.mxu0 %v11910_v59  ;;  %v11950_v59 = vcombine.low %v818_v39, %v822_v29  ;;  %v858_v39 = vld [vmem:[#allocation6 + $0x590] sm:$0xff] }
 0x375   :  { %7875 = vmatpush1.bf16.msra.mxu1 %v11912_v49  ;;  %7548 = vmatprep.subr.bf16.mxu0 %v11919_v51  ;;  %v11952_v49 = vcombine.low %v819_v31, %v823_v40  ;;  %v11959_v51 = vcombine.high %v826_v16, %v830_v35  ;;  %v862_v29 = vld [vmem:[#allocation6 + $0x5b0] sm:$0xff]  ;;  %v863_v31 = vld [vmem:[#allocation6 + $0x5b8] sm:$0xff]  ;;  %v11982_v40 = vcombine.low %v850_v14, %v854_v17 }
 0x376   :  { %7876 = vmatprep.subr.bf16.mxu1 %v11921_v36  ;;  %v11961_v36 = vcombine.high %v827_v38, %v831_v45 }
 0x378   :  { %7549 = vmatpush1.bf16.msra.mxu0 %v11918_v61  ;;  %v11958_v61 = vcombine.low %v826_v16, %v830_v35  ;;  %v866_v35 = vld [vmem:[#allocation6 + $0x5d0] sm:$0xff] }
 0x379   :  { %7877 = vmatpush1.bf16.msra.mxu1 %v11920_v63  ;;  %7550 = vmatprep.subr.bf16.mxu0 %v11927_v3  ;;  %v11960_v63 = vcombine.low %v827_v38, %v831_v45  ;;  %v11967_v3 = vcombine.high %v834_v52, %v838_v54  ;;  %v867_v38 = vld [vmem:[#allocation6 + $0x5d8] sm:$0xff] }
 0x37a   :  { %7878 = vmatprep.subr.bf16.mxu1 %v11929_v22  ;;  %v11969_v22 = vcombine.high %v835_v20, %v839_v56  ;;  %v871_v45 = vld [vmem:[#allocation6 + $0x5f8] sm:$0xff] }
 0x37c   :  { %7551 = vmatpush1.bf16.msra.mxu0 %v11926_v21  ;;  %v11966_v21 = vcombine.low %v834_v52, %v838_v54  ;;  %v874_v52 = vld [vmem:[#allocation6 + $0x610] sm:$0xff] }
 0x37d   :  { %7879 = vmatpush1.bf16.msra.mxu1 %v11928_v50  ;;  %7552 = vmatprep.subr.bf16.mxu0 %v11935_v28  ;;  %v11968_v50 = vcombine.low %v835_v20, %v839_v56  ;;  %v11975_v28 = vcombine.high %v842_v4, %v846_v5  ;;  %v878_v54 = vld [vmem:[#allocation6 + $0x630] sm:$0xff]  ;;  %v875_v20 = vld [vmem:[#allocation6 + $0x618] sm:$0xff] }
 0x37e   :  { %7880 = vmatprep.subr.bf16.mxu1 %v11937_v13  ;;  %v11977_v13 = vcombine.high %v843_v6, %v847_v8  ;;  %v879_v56 = vld [vmem:[#allocation6 + $0x638] sm:$0xff] }
 0x380   :  { %7553 = vmatpush1.bf16.msra.mxu0 %v11934_v9  ;;  %v11974_v9 = vcombine.low %v842_v4, %v846_v5  ;;  %v882_v4 = vld [vmem:[#allocation6 + $0x650] sm:$0xff] }
 0x381   :  { %7881 = vmatpush1.bf16.msra.mxu1 %v11936_v24  ;;  %7563 = vmatprep.subr.bf16.mxu0 %v11943_v26  ;;  %v11976_v24 = vcombine.low %v843_v6, %v847_v8  ;;  %v11983_v26 = vcombine.high %v850_v14, %v854_v17  ;;  %v886_v5 = vld [vmem:[#allocation6 + $0x670] sm:$0xff]  ;;  %v883_v6 = vld [vmem:[#allocation6 + $0x658] sm:$0xff] }
 0x382   :  { %7891 = vmatprep.subr.bf16.mxu1 %v11945_v58  ;;  %v11985_v58 = vcombine.high %v851_v18, %v855_v19  ;;  %v887_v8 = vld [vmem:[#allocation6 + $0x678] sm:$0xff]  ;;  %v890_v14 = vld [vmem:[#allocation6 + $0x690] sm:$0xff] }
 0x383   :  { %7555 = vmatmul.mubr.bf16.vlgmr.msra.gmra.mrb[20].mxu0 %v14630_v7  ;;  %v894_v17 = vld [vmem:[#allocation6 + $0x6b0] sm:$0xff] }
 0x384   :  { %7883 = vmatmul.mubr.bf16.vlgmr.msra.gmra.mrb[20].mxu1 %v14630_v7  ;;  %7564 = vmatpush1.bf16.msra.mxu0 %v11942_v30  ;;  %v859_v30 = vld [vmem:[#allocation6 + $0x598] sm:$0xff] }
 0x385   :  { %7595 = vmatprep.mubr.bf16.mxu0 %v14634_v11  ;;  %7892 = vmatpush1.bf16.msra.mxu1 %v11944_v57  ;;  %v11984_v57 = vcombine.low %v851_v18, %v855_v19  ;;  %v11993_v16 = vcombine.high %v859_v30, %v863_v31  ;;  %v891_v18 = vld [vmem:[#allocation6 + $0x698] sm:$0xff] }
 0x386   :  { %7923 = vmatprep.mubr.bf16.mxu1 %v14634_v11  ;;  %7565 = vmatprep.subr.bf16.mxu0 %v11951_v32  ;;  %v11991_v32 = vcombine.high %v858_v39, %v862_v29  ;;  %v895_v19 = vld [vmem:[#allocation6 + $0x6b8] sm:$0xff] }
 0x387   :  { %7893 = vmatprep.subr.bf16.mxu1 %v11953_v37  ;;  %v870_v37 = vld [vmem:[#allocation6 + $0x5f0] sm:$0xff] }
 0x388   :  { %7566 = vmatpush1.bf16.msra.mxu0 %v11950_v59  ;;  %v11990_v59 = vcombine.low %v858_v39, %v862_v29  ;;  %v898_v39 = vld [vmem:[#allocation6 + $0x6d0] sm:$0xff] }
 0x389   :  { %7894 = vmatpush1.bf16.msra.mxu1 %v11952_v49  ;;  %7567 = vmatprep.subr.bf16.mxu0 %v11959_v51  ;;  %v11992_v49 = vcombine.low %v859_v30, %v863_v31  ;;  %v11999_v51 = vcombine.high %v866_v35, %v870_v37  ;;  %v902_v29 = vld [vmem:[#allocation6 + $0x6f0] sm:$0xff]  ;;  %v899_v30 = vld [vmem:[#allocation6 + $0x6d8] sm:$0xff] }
 0x38a   :  { %7895 = vmatprep.subr.bf16.mxu1 %v11961_v36  ;;  %v12001_v36 = vcombine.high %v867_v38, %v871_v45  ;;  %v903_v31 = vld [vmem:[#allocation6 + $0x6f8] sm:$0xff] }
 0x38c   :  { %7568 = vmatpush1.bf16.msra.mxu0 %v11958_v61  ;;  %v11998_v61 = vcombine.low %v866_v35, %v870_v37  ;;  %v906_v35 = vld [vmem:[#allocation6 + $0x710] sm:$0xff] }
 0x38d   :  { %7896 = vmatpush1.bf16.msra.mxu1 %v11960_v63  ;;  %7569 = vmatprep.subr.bf16.mxu0 %v11967_v3  ;;  %v12000_v63 = vcombine.low %v867_v38, %v871_v45  ;;  %v12007_v3 = vcombine.high %v874_v52, %v878_v54  ;;  %v910_v37 = vld [vmem:[#allocation6 + $0x730] sm:$0xff]  ;;  %v907_v38 = vld [vmem:[#allocation6 + $0x718] sm:$0xff] }
 0x38e   :  { %7897 = vmatprep.subr.bf16.mxu1 %v11969_v22  ;;  %v12009_v22 = vcombine.high %v875_v20, %v879_v56  ;;  %v911_v45 = vld [vmem:[#allocation6 + $0x738] sm:$0xff] }
 0x390   :  { %7570 = vmatpush1.bf16.msra.mxu0 %v11966_v21  ;;  %v12006_v21 = vcombine.low %v874_v52, %v878_v54  ;;  %v914_v52 = vld [vmem:[#allocation6 + $0x750] sm:$0xff] }
 0x391   :  { %7898 = vmatpush1.bf16.msra.mxu1 %v11968_v50  ;;  %7571 = vmatprep.subr.bf16.mxu0 %v11975_v28  ;;  %v12008_v50 = vcombine.low %v875_v20, %v879_v56  ;;  %v12015_v28 = vcombine.high %v882_v4, %v886_v5  ;;  %v918_v54 = vld [vmem:[#allocation6 + $0x770] sm:$0xff]  ;;  %v915_v20 = vld [vmem:[#allocation6 + $0x758] sm:$0xff] }
 0x392   :  { %7899 = vmatprep.subr.bf16.mxu1 %v11977_v13  ;;  %v12017_v13 = vcombine.high %v883_v6, %v887_v8  ;;  %v919_v56 = vld [vmem:[#allocation6 + $0x778] sm:$0xff] }
 0x394   :  { %7572 = vmatpush1.bf16.msra.mxu0 %v11974_v9  ;;  %v12014_v9 = vcombine.low %v882_v4, %v886_v5  ;;  %v922_v4 = vld [vmem:[#allocation6 + $0x790] sm:$0xff] }
 0x395   :  { %7900 = vmatpush1.bf16.msra.mxu1 %v11976_v24  ;;  %7573 = vmatprep.subr.bf16.mxu0 %v11983_v26  ;;  %v12016_v24 = vcombine.low %v883_v6, %v887_v8  ;;  %v12023_v26 = vcombine.high %v890_v14, %v894_v17  ;;  %v926_v5 = vld [vmem:[#allocation6 + $0x7b0] sm:$0xff]  ;;  %v923_v6 = vld [vmem:[#allocation6 + $0x798] sm:$0xff] }
 0x396   :  { %7901 = vmatprep.subr.bf16.mxu1 %v11985_v58  ;;  %v12025_v58 = vcombine.high %v891_v18, %v895_v19  ;;  %v927_v8 = vld [vmem:[#allocation6 + $0x7b8] sm:$0xff] }
 0x398   :  { %7574 = vmatpush1.bf16.msra.mxu0 %v11982_v40  ;;  %v12022_v40 = vcombine.low %v890_v14, %v894_v17  ;;  %v930_v14 = vld [vmem:[#allocation6 + $0x7d0] sm:$0xff] }
 0x399   :  { %7902 = vmatpush1.bf16.msra.mxu1 %v11984_v57  ;;  %7575 = vmatprep.subr.bf16.mxu0 %v11991_v32  ;;  %v12024_v57 = vcombine.low %v891_v18, %v895_v19  ;;  %v12031_v32 = vcombine.high %v898_v39, %v902_v29  ;;  %v934_v17 = vld [vmem:[#allocation6 + $0x7f0] sm:$0xff]  ;;  %v931_v18 = vld [vmem:[#allocation6 + $0x7d8] sm:$0xff] }
 0x39a   :  { %7903 = vmatprep.subr.bf16.mxu1 %v11993_v16  ;;  %v12033_v16 = vcombine.high %v899_v30, %v903_v31  ;;  %v935_v19 = vld [vmem:[#allocation6 + $0x7f8] sm:$0xff] }
 0x39c   :  { %7576 = vmatpush1.bf16.msra.mxu0 %v11990_v59  ;;  %v12030_v59 = vcombine.low %v898_v39, %v902_v29  ;;  %v938_v39 = vld [vmem:[#allocation6 + $0x810] sm:$0xff] }
 0x39d   :  { %7904 = vmatpush1.bf16.msra.mxu1 %v11992_v49  ;;  %7577 = vmatprep.subr.bf16.mxu0 %v11999_v51  ;;  %v12032_v49 = vcombine.low %v899_v30, %v903_v31  ;;  %v12039_v51 = vcombine.high %v906_v35, %v910_v37  ;;  %v942_v29 = vld [vmem:[#allocation6 + $0x830] sm:$0xff]  ;;  %v939_v30 = vld [vmem:[#allocation6 + $0x818] sm:$0xff] }
 0x39e   :  { %7905 = vmatprep.subr.bf16.mxu1 %v12001_v36  ;;  %v12041_v36 = vcombine.high %v907_v38, %v911_v45  ;;  %v943_v31 = vld [vmem:[#allocation6 + $0x838] sm:$0xff] }
 0x3a0   :  { %7578 = vmatpush1.bf16.msra.mxu0 %v11998_v61  ;;  %v12038_v61 = vcombine.low %v906_v35, %v910_v37  ;;  %v946_v35 = vld [vmem:[#allocation6 + $0x850] sm:$0xff] }
 0x3a1   :  { %7906 = vmatpush1.bf16.msra.mxu1 %v12000_v63  ;;  %7579 = vmatprep.subr.bf16.mxu0 %v12007_v3  ;;  %v12040_v63 = vcombine.low %v907_v38, %v911_v45  ;;  %v12047_v3 = vcombine.high %v914_v52, %v918_v54  ;;  %v950_v37 = vld [vmem:[#allocation6 + $0x870] sm:$0xff]  ;;  %v12070_v38 = vcombine.low %v938_v39, %v942_v29  ;;  %v947_v45 = vld [vmem:[#allocation6 + $0x858] sm:$0xff] }
 0x3a2   :  { %7907 = vmatprep.subr.bf16.mxu1 %v12009_v22  ;;  %v12049_v22 = vcombine.high %v915_v20, %v919_v56 }
 0x3a4   :  { %7580 = vmatpush1.bf16.msra.mxu0 %v12006_v21  ;;  %v12046_v21 = vcombine.low %v914_v52, %v918_v54  ;;  %v958_v52 = vld [vmem:[#allocation6 + $0x8b0] sm:$0xff] }
 0x3a5   :  { %7908 = vmatpush1.bf16.msra.mxu1 %v12008_v50  ;;  %7581 = vmatprep.subr.bf16.mxu0 %v12015_v28  ;;  %v12048_v50 = vcombine.low %v915_v20, %v919_v56  ;;  %v12055_v28 = vcombine.high %v922_v4, %v926_v5  ;;  %v955_v20 = vld [vmem:[#allocation6 + $0x898] sm:$0xff] }
 0x3a6   :  { %7909 = vmatprep.subr.bf16.mxu1 %v12017_v13  ;;  %v12057_v13 = vcombine.high %v923_v6, %v927_v8  ;;  %v959_v56 = vld [vmem:[#allocation6 + $0x8b8] sm:$0xff] }
 0x3a8   :  { %7582 = vmatpush1.bf16.msra.mxu0 %v12014_v9  ;;  %v12054_v9 = vcombine.low %v922_v4, %v926_v5  ;;  %v962_v4 = vld [vmem:[#allocation6 + $0x8d0] sm:$0xff] }
 0x3a9   :  { %7910 = vmatpush1.bf16.msra.mxu1 %v12016_v24  ;;  %7583 = vmatprep.subr.bf16.mxu0 %v12023_v26  ;;  %v12056_v24 = vcombine.low %v923_v6, %v927_v8  ;;  %v12063_v26 = vcombine.high %v930_v14, %v934_v17  ;;  %v966_v5 = vld [vmem:[#allocation6 + $0x8f0] sm:$0xff]  ;;  %v963_v6 = vld [vmem:[#allocation6 + $0x8d8] sm:$0xff] }
 0x3aa   :  { %7911 = vmatprep.subr.bf16.mxu1 %v12025_v58  ;;  %v12065_v58 = vcombine.high %v931_v18, %v935_v19  ;;  %v967_v8 = vld [vmem:[#allocation6 + $0x8f8] sm:$0xff] }
 0x3ac   :  { %7584 = vmatpush1.bf16.msra.mxu0 %v12022_v40  ;;  %v12062_v40 = vcombine.low %v930_v14, %v934_v17  ;;  %v970_v14 = vld [vmem:[#allocation6 + $0x910] sm:$0xff] }
 0x3ad   :  { %7912 = vmatpush1.bf16.msra.mxu1 %v12024_v57  ;;  %7585 = vmatprep.subr.bf16.mxu0 %v12031_v32  ;;  %v12064_v57 = vcombine.low %v931_v18, %v935_v19  ;;  %v12071_v32 = vcombine.high %v938_v39, %v942_v29  ;;  %v974_v17 = vld [vmem:[#allocation6 + $0x930] sm:$0xff]  ;;  %v971_v18 = vld [vmem:[#allocation6 + $0x918] sm:$0xff] }
 0x3ae   :  { %7913 = vmatprep.subr.bf16.mxu1 %v12033_v16  ;;  %v12073_v16 = vcombine.high %v939_v30, %v943_v31  ;;  %v975_v19 = vld [vmem:[#allocation6 + $0x938] sm:$0xff]  ;;  %v978_v39 = vld [vmem:[#allocation6 + $0x950] sm:$0xff] }
 0x3af   :  { %v982_v29 = vld [vmem:[#allocation6 + $0x970] sm:$0xff] }
 0x3b0   :  { %7586 = vmatpush1.bf16.msra.mxu0 %v12030_v59  ;;  %v951_v59 = vld [vmem:[#allocation6 + $0x878] sm:$0xff] }
 0x3b1   :  { %7914 = vmatpush1.bf16.msra.mxu1 %v12032_v49  ;;  %7587 = vmatprep.subr.bf16.mxu0 %v12039_v51  ;;  %v12072_v49 = vcombine.low %v939_v30, %v943_v31  ;;  %v12079_v51 = vcombine.high %v946_v35, %v950_v37  ;;  %v12081_v54 = vcombine.high %v947_v45, %v951_v59  ;;  %v979_v30 = vld [vmem:[#allocation6 + $0x958] sm:$0xff] }
 0x3b2   :  { %7915 = vmatprep.subr.bf16.mxu1 %v12041_v36  ;;  %v954_v36 = vld [vmem:[#allocation6 + $0x890] sm:$0xff]  ;;  %v983_v31 = vld [vmem:[#allocation6 + $0x978] sm:$0xff] }
 0x3b4   :  { %7588 = vmatpush1.bf16.msra.mxu0 %v12038_v61  ;;  %v12078_v61 = vcombine.low %v946_v35, %v950_v37  ;;  %v986_v35 = vld [vmem:[#allocation6 + $0x990] sm:$0xff] }
 0x3b5   :  { %7916 = vmatpush1.bf16.msra.mxu1 %v12040_v63  ;;  %7589 = vmatprep.subr.bf16.mxu0 %v12047_v3  ;;  %v12080_v63 = vcombine.low %v947_v45, %v951_v59  ;;  %v12087_v3 = vcombine.high %v954_v36, %v958_v52  ;;  %v990_v37 = vld [vmem:[#allocation6 + $0x9b0] sm:$0xff]  ;;  %v991_v45 = vld [vmem:[#allocation6 + $0x9b8] sm:$0xff]  ;;  %v12110_v59 = vcombine.low %v978_v39, %v982_v29 }
 0x3b6   :  { %7917 = vmatprep.subr.bf16.mxu1 %v12049_v22  ;;  %v12089_v22 = vcombine.high %v955_v20, %v959_v56 }
 0x3b8   :  { %7590 = vmatpush1.bf16.msra.mxu0 %v12046_v21  ;;  %v12086_v21 = vcombine.low %v954_v36, %v958_v52  ;;  %v994_v52 = vld [vmem:[#allocation6 + $0x9d0] sm:$0xff] }
 0x3b9   :  { %7918 = vmatpush1.bf16.msra.mxu1 %v12048_v50  ;;  %7591 = vmatprep.subr.bf16.mxu0 %v12055_v28  ;;  %v12088_v50 = vcombine.low %v955_v20, %v959_v56  ;;  %v12095_v28 = vcombine.high %v962_v4, %v966_v5  ;;  %v995_v20 = vld [vmem:[#allocation6 + $0x9d8] sm:$0xff] }
 0x3ba   :  { %7919 = vmatprep.subr.bf16.mxu1 %v12057_v13  ;;  %v12097_v13 = vcombine.high %v963_v6, %v967_v8  ;;  %v999_v56 = vld [vmem:[#allocation6 + $0x9f8] sm:$0xff] }
 0x3bc   :  { %7592 = vmatpush1.bf16.msra.mxu0 %v12054_v9  ;;  %v12094_v9 = vcombine.low %v962_v4, %v966_v5  ;;  %v1002_v4 = vld [vmem:[#allocation6 + $0xa10] sm:$0xff] }
 0x3bd   :  { %7920 = vmatpush1.bf16.msra.mxu1 %v12056_v24  ;;  %7593 = vmatprep.subr.bf16.mxu0 %v12063_v26  ;;  %v12096_v24 = vcombine.low %v963_v6, %v967_v8  ;;  %v12103_v26 = vcombine.high %v970_v14, %v974_v17  ;;  %v1006_v5 = vld [vmem:[#allocation6 + $0xa30] sm:$0xff]  ;;  %v1003_v6 = vld [vmem:[#allocation6 + $0xa18] sm:$0xff] }
 0x3be   :  { %7921 = vmatprep.subr.bf16.mxu1 %v12065_v58  ;;  %v12105_v58 = vcombine.high %v971_v18, %v975_v19  ;;  %v1007_v8 = vld [vmem:[#allocation6 + $0xa38] sm:$0xff] }
 0x3c0   :  { %7594 = vmatpush1.bf16.msra.mxu0 %v12062_v40  ;;  %v12102_v40 = vcombine.low %v970_v14, %v974_v17  ;;  %v1010_v14 = vld [vmem:[#allocation6 + $0xa50] sm:$0xff] }
 0x3c1   :  { %7922 = vmatpush1.bf16.msra.mxu1 %v12064_v57  ;;  %7604 = vmatprep.subr.bf16.mxu0 %v12071_v32  ;;  %v12104_v57 = vcombine.low %v971_v18, %v975_v19  ;;  %v12111_v32 = vcombine.high %v978_v39, %v982_v29  ;;  %v1014_v17 = vld [vmem:[#allocation6 + $0xa70] sm:$0xff]  ;;  %v1011_v18 = vld [vmem:[#allocation6 + $0xa58] sm:$0xff] }
 0x3c2   :  { %7932 = vmatprep.subr.bf16.mxu1 %v12073_v16  ;;  %v12113_v16 = vcombine.high %v979_v30, %v983_v31  ;;  %v1015_v19 = vld [vmem:[#allocation6 + $0xa78] sm:$0xff]  ;;  %v1018_v39 = vld [vmem:[#allocation6 + $0xa90] sm:$0xff] }
 0x3c3   :  { %7596 = vmatmul.mubr.bf16.vlgmr.msra.gmra.mrb[20].mxu0 %v14699_v41  ;;  %v1022_v29 = vld [vmem:[#allocation6 + $0xab0] sm:$0xff] }
 0x3c4   :  { %7924 = vmatmul.mubr.bf16.vlgmr.msra.gmra.mrb[20].mxu1 %v14699_v41  ;;  %7605 = vmatpush1.bf16.msra.mxu0 %v12070_v38  ;;  %v987_v38 = vld [vmem:[#allocation6 + $0x998] sm:$0xff] }
 0x3c5   :  { %7636 = vmatprep.mubr.bf16.mxu0 %v14701_v44  ;;  %7933 = vmatpush1.bf16.msra.mxu1 %v12072_v49  ;;  %v12112_v49 = vcombine.low %v979_v30, %v983_v31  ;;  %v12121_v36 = vcombine.high %v987_v38, %v991_v45  ;;  %v1019_v30 = vld [vmem:[#allocation6 + $0xa98] sm:$0xff] }
 0x3c6   :  { %7964 = vmatprep.mubr.bf16.mxu1 %v14701_v44  ;;  %7606 = vmatprep.subr.bf16.mxu0 %v12079_v51  ;;  %v12119_v51 = vcombine.high %v986_v35, %v990_v37  ;;  %v1023_v31 = vld [vmem:[#allocation6 + $0xab8] sm:$0xff] }
 0x3c7   :  { %7934 = vmatprep.subr.bf16.mxu1 %v12081_v54  ;;  %v998_v54 = vld [vmem:[#allocation6 + $0x9f0] sm:$0xff] }
 0x3c8   :  { %7607 = vmatpush1.bf16.msra.mxu0 %v12078_v61  ;;  %v12118_v61 = vcombine.low %v986_v35, %v990_v37  ;;  %v1026_v35 = vld [vmem:[#allocation6 + $0xad0] sm:$0xff] }
 0x3c9   :  { %7935 = vmatpush1.bf16.msra.mxu1 %v12080_v63  ;;  %7608 = vmatprep.subr.bf16.mxu0 %v12087_v3  ;;  %v12120_v63 = vcombine.low %v987_v38, %v991_v45  ;;  %v12127_v3 = vcombine.high %v994_v52, %v998_v54  ;;  %v1030_v37 = vld [vmem:[#allocation6 + $0xaf0] sm:$0xff]  ;;  %v1027_v38 = vld [vmem:[#allocation6 + $0xad8] sm:$0xff] }
 0x3ca   :  { %7936 = vmatprep.subr.bf16.mxu1 %v12089_v22  ;;  %v12129_v22 = vcombine.high %v995_v20, %v999_v56  ;;  %v1031_v45 = vld [vmem:[#allocation6 + $0xaf8] sm:$0xff] }
 0x3cc   :  { %7609 = vmatpush1.bf16.msra.mxu0 %v12086_v21  ;;  %v12126_v21 = vcombine.low %v994_v52, %v998_v54  ;;  %v1034_v52 = vld [vmem:[#allocation6 + $0xb10] sm:$0xff] }
 0x3cd   :  { %7937 = vmatpush1.bf16.msra.mxu1 %v12088_v50  ;;  %7610 = vmatprep.subr.bf16.mxu0 %v12095_v28  ;;  %v12128_v50 = vcombine.low %v995_v20, %v999_v56  ;;  %v12135_v28 = vcombine.high %v1002_v4, %v1006_v5  ;;  %v1038_v54 = vld [vmem:[#allocation6 + $0xb30] sm:$0xff]  ;;  %v1035_v20 = vld [vmem:[#allocation6 + $0xb18] sm:$0xff] }
 0x3ce   :  { %7938 = vmatprep.subr.bf16.mxu1 %v12097_v13  ;;  %v12137_v13 = vcombine.high %v1003_v6, %v1007_v8  ;;  %v1039_v56 = vld [vmem:[#allocation6 + $0xb38] sm:$0xff] }
 0x3d0   :  { %7611 = vmatpush1.bf16.msra.mxu0 %v12094_v9  ;;  %v12134_v9 = vcombine.low %v1002_v4, %v1006_v5  ;;  %v1042_v4 = vld [vmem:[#allocation6 + $0xb50] sm:$0xff] }
 0x3d1   :  { %7939 = vmatpush1.bf16.msra.mxu1 %v12096_v24  ;;  %7612 = vmatprep.subr.bf16.mxu0 %v12103_v26  ;;  %v12136_v24 = vcombine.low %v1003_v6, %v1007_v8  ;;  %v12143_v26 = vcombine.high %v1010_v14, %v1014_v17  ;;  %v1046_v5 = vld [vmem:[#allocation6 + $0xb70] sm:$0xff]  ;;  %v1043_v6 = vld [vmem:[#allocation6 + $0xb58] sm:$0xff] }
 0x3d2   :  { %7940 = vmatprep.subr.bf16.mxu1 %v12105_v58  ;;  %v12145_v58 = vcombine.high %v1011_v18, %v1015_v19  ;;  %v1047_v8 = vld [vmem:[#allocation6 + $0xb78] sm:$0xff] }
 0x3d4   :  { %7613 = vmatpush1.bf16.msra.mxu0 %v12102_v40  ;;  %v12142_v40 = vcombine.low %v1010_v14, %v1014_v17  ;;  %v1050_v14 = vld [vmem:[#allocation6 + $0xb90] sm:$0xff] }
 0x3d5   :  { %7941 = vmatpush1.bf16.msra.mxu1 %v12104_v57  ;;  %7614 = vmatprep.subr.bf16.mxu0 %v12111_v32  ;;  %v12144_v57 = vcombine.low %v1011_v18, %v1015_v19  ;;  %v12151_v32 = vcombine.high %v1018_v39, %v1022_v29  ;;  %v1054_v17 = vld [vmem:[#allocation6 + $0xbb0] sm:$0xff]  ;;  %v1051_v18 = vld [vmem:[#allocation6 + $0xb98] sm:$0xff] }
 0x3d6   :  { %7942 = vmatprep.subr.bf16.mxu1 %v12113_v16  ;;  %v12153_v16 = vcombine.high %v1019_v30, %v1023_v31  ;;  %v1055_v19 = vld [vmem:[#allocation6 + $0xbb8] sm:$0xff] }
 0x3d8   :  { %7615 = vmatpush1.bf16.msra.mxu0 %v12110_v59  ;;  %v12150_v59 = vcombine.low %v1018_v39, %v1022_v29  ;;  %v1058_v39 = vld [vmem:[#allocation6 + $0xbd0] sm:$0xff] }
 0x3d9   :  { %7943 = vmatpush1.bf16.msra.mxu1 %v12112_v49  ;;  %7616 = vmatprep.subr.bf16.mxu0 %v12119_v51  ;;  %v12152_v49 = vcombine.low %v1019_v30, %v1023_v31  ;;  %v12159_v51 = vcombine.high %v1026_v35, %v1030_v37  ;;  %v1062_v29 = vld [vmem:[#allocation6 + $0xbf0] sm:$0xff]  ;;  %v1059_v30 = vld [vmem:[#allocation6 + $0xbd8] sm:$0xff] }
 0x3da   :  { %7944 = vmatprep.subr.bf16.mxu1 %v12121_v36  ;;  %v12161_v36 = vcombine.high %v1027_v38, %v1031_v45  ;;  %v1063_v31 = vld [vmem:[#allocation6 + $0xbf8] sm:$0xff] }
 0x3dc   :  { %7617 = vmatpush1.bf16.msra.mxu0 %v12118_v61  ;;  %v12158_v61 = vcombine.low %v1026_v35, %v1030_v37  ;;  %v1066_v35 = vld [vmem:[#allocation6 + $0xc10] sm:$0xff] }
 0x3dd   :  { %7945 = vmatpush1.bf16.msra.mxu1 %v12120_v63  ;;  %7618 = vmatprep.subr.bf16.mxu0 %v12127_v3  ;;  %v12160_v63 = vcombine.low %v1027_v38, %v1031_v45  ;;  %v12167_v3 = vcombine.high %v1034_v52, %v1038_v54  ;;  %v1070_v37 = vld [vmem:[#allocation6 + $0xc30] sm:$0xff]  ;;  %v1067_v38 = vld [vmem:[#allocation6 + $0xc18] sm:$0xff] }
 0x3de   :  { %7946 = vmatprep.subr.bf16.mxu1 %v12129_v22  ;;  %v12169_v22 = vcombine.high %v1035_v20, %v1039_v56  ;;  %v1071_v45 = vld [vmem:[#allocation6 + $0xc38] sm:$0xff] }
 0x3e0   :  { %7619 = vmatpush1.bf16.msra.mxu0 %v12126_v21  ;;  %v12166_v21 = vcombine.low %v1034_v52, %v1038_v54  ;;  %v1074_v52 = vld [vmem:[#allocation6 + $0xc50] sm:$0xff] }
 0x3e1   :  { %7947 = vmatpush1.bf16.msra.mxu1 %v12128_v50  ;;  %7620 = vmatprep.subr.bf16.mxu0 %v12135_v28  ;;  %v12168_v50 = vcombine.low %v1035_v20, %v1039_v56  ;;  %v12175_v28 = vcombine.high %v1042_v4, %v1046_v5  ;;  %v1078_v54 = vld [vmem:[#allocation6 + $0xc70] sm:$0xff]  ;;  %v12198_v20 = vcombine.low %v1066_v35, %v1070_v37  ;;  %v1075_v56 = vld [vmem:[#allocation6 + $0xc58] sm:$0xff] }
 0x3e2   :  { %7948 = vmatprep.subr.bf16.mxu1 %v12137_v13  ;;  %v12177_v13 = vcombine.high %v1043_v6, %v1047_v8 }
 0x3e4   :  { %7621 = vmatpush1.bf16.msra.mxu0 %v12134_v9  ;;  %v12174_v9 = vcombine.low %v1042_v4, %v1046_v5  ;;  %v1086_v4 = vld [vmem:[#allocation6 + $0xcb0] sm:$0xff] }
 0x3e5   :  { %7949 = vmatpush1.bf16.msra.mxu1 %v12136_v24  ;;  %7622 = vmatprep.subr.bf16.mxu0 %v12143_v26  ;;  %v12176_v24 = vcombine.low %v1043_v6, %v1047_v8  ;;  %v12183_v26 = vcombine.high %v1050_v14, %v1054_v17  ;;  %v1083_v6 = vld [vmem:[#allocation6 + $0xc98] sm:$0xff] }
 0x3e6   :  { %7950 = vmatprep.subr.bf16.mxu1 %v12145_v58  ;;  %v12185_v58 = vcombine.high %v1051_v18, %v1055_v19  ;;  %v1087_v8 = vld [vmem:[#allocation6 + $0xcb8] sm:$0xff] }
 0x3e8   :  { %7623 = vmatpush1.bf16.msra.mxu0 %v12142_v40  ;;  %v12182_v40 = vcombine.low %v1050_v14, %v1054_v17  ;;  %v1090_v14 = vld [vmem:[#allocation6 + $0xcd0] sm:$0xff] }
 0x3e9   :  { %7951 = vmatpush1.bf16.msra.mxu1 %v12144_v57  ;;  %7624 = vmatprep.subr.bf16.mxu0 %v12151_v32  ;;  %v12184_v57 = vcombine.low %v1051_v18, %v1055_v19  ;;  %v12191_v32 = vcombine.high %v1058_v39, %v1062_v29  ;;  %v1094_v17 = vld [vmem:[#allocation6 + $0xcf0] sm:$0xff]  ;;  %v1091_v18 = vld [vmem:[#allocation6 + $0xcd8] sm:$0xff] }
 0x3ea   :  { %7952 = vmatprep.subr.bf16.mxu1 %v12153_v16  ;;  %v12193_v16 = vcombine.high %v1059_v30, %v1063_v31  ;;  %v1095_v19 = vld [vmem:[#allocation6 + $0xcf8] sm:$0xff] }
 0x3ec   :  { %7625 = vmatpush1.bf16.msra.mxu0 %v12150_v59  ;;  %v12190_v59 = vcombine.low %v1058_v39, %v1062_v29  ;;  %v1098_v39 = vld [vmem:[#allocation6 + $0xd10] sm:$0xff] }
 0x3ed   :  { %7953 = vmatpush1.bf16.msra.mxu1 %v12152_v49  ;;  %7626 = vmatprep.subr.bf16.mxu0 %v12159_v51  ;;  %v12192_v49 = vcombine.low %v1059_v30, %v1063_v31  ;;  %v12199_v51 = vcombine.high %v1066_v35, %v1070_v37  ;;  %v1102_v29 = vld [vmem:[#allocation6 + $0xd30] sm:$0xff]  ;;  %v1099_v30 = vld [vmem:[#allocation6 + $0xd18] sm:$0xff] }
 0x3ee   :  { %7954 = vmatprep.subr.bf16.mxu1 %v12161_v36  ;;  %v12201_v36 = vcombine.high %v1067_v38, %v1071_v45  ;;  %v1103_v31 = vld [vmem:[#allocation6 + $0xd38] sm:$0xff]  ;;  %v1106_v35 = vld [vmem:[#allocation6 + $0xd50] sm:$0xff] }
 0x3ef   :  { %v1110_v37 = vld [vmem:[#allocation6 + $0xd70] sm:$0xff] }
 0x3f0   :  { %7627 = vmatpush1.bf16.msra.mxu0 %v12158_v61  ;;  %v1079_v61 = vld [vmem:[#allocation6 + $0xc78] sm:$0xff] }
 0x3f1   :  { %7955 = vmatpush1.bf16.msra.mxu1 %v12160_v63  ;;  %7628 = vmatprep.subr.bf16.mxu0 %v12167_v3  ;;  %v12200_v63 = vcombine.low %v1067_v38, %v1071_v45  ;;  %v12207_v3 = vcombine.high %v1074_v52, %v1078_v54  ;;  %v12209_v5 = vcombine.high %v1075_v56, %v1079_v61  ;;  %v1107_v38 = vld [vmem:[#allocation6 + $0xd58] sm:$0xff] }
 0x3f2   :  { %7956 = vmatprep.subr.bf16.mxu1 %v12169_v22  ;;  %v1082_v22 = vld [vmem:[#allocation6 + $0xc90] sm:$0xff]  ;;  %v1111_v45 = vld [vmem:[#allocation6 + $0xd78] sm:$0xff] }
 0x3f4   :  { %7629 = vmatpush1.bf16.msra.mxu0 %v12166_v21  ;;  %v12206_v21 = vcombine.low %v1074_v52, %v1078_v54  ;;  %v1114_v52 = vld [vmem:[#allocation6 + $0xd90] sm:$0xff] }
 0x3f5   :  { %7957 = vmatpush1.bf16.msra.mxu1 %v12168_v50  ;;  %7630 = vmatprep.subr.bf16.mxu0 %v12175_v28  ;;  %v12208_v50 = vcombine.low %v1075_v56, %v1079_v61  ;;  %v12215_v28 = vcombine.high %v1082_v22, %v1086_v4  ;;  %v1118_v54 = vld [vmem:[#allocation6 + $0xdb0] sm:$0xff]  ;;  %v1119_v56 = vld [vmem:[#allocation6 + $0xdb8] sm:$0xff]  ;;  %v12238_v61 = vcombine.low %v1106_v35, %v1110_v37 }
 0x3f6   :  { %7958 = vmatprep.subr.bf16.mxu1 %v12177_v13  ;;  %v12217_v13 = vcombine.high %v1083_v6, %v1087_v8 }
 0x3f8   :  { %7631 = vmatpush1.bf16.msra.mxu0 %v12174_v9  ;;  %v12214_v9 = vcombine.low %v1082_v22, %v1086_v4 }
 0x3f9   :  { %7959 = vmatpush1.bf16.msra.mxu1 %v12176_v24  ;;  %7632 = vmatprep.subr.bf16.mxu0 %v12183_v26  ;;  %v12216_v24 = vcombine.low %v1083_v6, %v1087_v8  ;;  %v12223_v26 = vcombine.high %v1090_v14, %v1094_v17  ;;  %v1126_v6 = vld [vmem:[#allocation6 + $0xdf0] sm:$0xff] }
 0x3fa   :  { %7960 = vmatprep.subr.bf16.mxu1 %v12185_v58  ;;  %v12225_v58 = vcombine.high %v1091_v18, %v1095_v19 }
 0x3fc   :  { %7633 = vmatpush1.bf16.msra.mxu0 %v12182_v40  ;;  %v12222_v40 = vcombine.low %v1090_v14, %v1094_v17  ;;  %v12246_v17 = vcombine.low %v1114_v52, %v1118_v54 }
 0x3fd   :  { %7961 = vmatpush1.bf16.msra.mxu1 %v12184_v57  ;;  %7634 = vmatprep.subr.bf16.mxu0 %v12191_v32  ;;  %v12224_v57 = vcombine.low %v1091_v18, %v1095_v19  ;;  %v12231_v32 = vcombine.high %v1098_v39, %v1102_v29 }
 0x3fe   :  { %7962 = vmatprep.subr.bf16.mxu1 %v12193_v16  ;;  %v12233_v16 = vcombine.high %v1099_v30, %v1103_v31 }
 0x400   :  { %7635 = vmatpush1.bf16.msra.mxu0 %v12190_v59  ;;  %v12230_v59 = vcombine.low %v1098_v39, %v1102_v29  ;;  %v1130_v39 = vld [vmem:[#allocation6 + $0xe10] sm:$0xff] }
 0x401   :  { %7963 = vmatpush1.bf16.msra.mxu1 %v12192_v49  ;;  %7645 = vmatprep.subr.bf16.mxu0 %v12199_v51  ;;  %v12232_v49 = vcombine.low %v1099_v30, %v1103_v31  ;;  %v12239_v51 = vcombine.high %v1106_v35, %v1110_v37  ;;  %v1134_v29 = vld [vmem:[#allocation6 + $0xe30] sm:$0xff]  ;;  %v1131_v30 = vld [vmem:[#allocation6 + $0xe18] sm:$0xff] }
 0x402   :  { %7973 = vmatprep.subr.bf16.mxu1 %v12201_v36  ;;  %v12241_v36 = vcombine.high %v1107_v38, %v1111_v45  ;;  %v1135_v31 = vld [vmem:[#allocation6 + $0xe38] sm:$0xff]  ;;  %v1138_v35 = vld [vmem:[#allocation6 + $0xe50] sm:$0xff] }
 0x403   :  { %7637 = vmatmul.mubr.bf16.vlgmr.msra.gmra.mrb[20].mxu0 %v14715_v0  ;;  %v1142_v37 = vld [vmem:[#allocation6 + $0xe70] sm:$0xff] }
 0x404   :  { %7965 = vmatmul.mubr.bf16.vlgmr.msra.gmra.mrb[20].mxu1 %v14715_v0  ;;  %7646 = vmatpush1.bf16.msra.mxu0 %v12198_v20  ;;  %v1115_v20 = vld [vmem:[#allocation6 + $0xd98] sm:$0xff] }
 0x405   :  { %7677 = vmatprep.mubr.bf16.mxu0 %v14717_v12  ;;  %7974 = vmatpush1.bf16.msra.mxu1 %v12200_v63  ;;  %v12240_v63 = vcombine.low %v1107_v38, %v1111_v45  ;;  %v12249_v4 = vcombine.high %v1115_v20, %v1119_v56  ;;  %v1139_v38 = vld [vmem:[#allocation6 + $0xe58] sm:$0xff] }
 0x406   :  { %8005 = vmatprep.mubr.bf16.mxu1 %v14717_v12  ;;  %7647 = vmatprep.subr.bf16.mxu0 %v12207_v3  ;;  %v12247_v3 = vcombine.high %v1114_v52, %v1118_v54  ;;  %v1143_v45 = vld [vmem:[#allocation6 + $0xe78] sm:$0xff]  ;;  %v1146_v52 = vld [vmem:[#allocation6 + $0xe90] sm:$0xff] }
 0x407   :  { %7975 = vmatprep.subr.bf16.mxu1 %v12209_v5  ;;  %v1122_v5 = vld [vmem:[#allocation6 + $0xdd0] sm:$0xff] }
 0x408   :  { %7648 = vmatpush1.bf16.msra.mxu0 %v12206_v21  ;;  %v1150_v54 = vld [vmem:[#allocation6 + $0xeb0] sm:$0xff] }
 0x409   :  { %7976 = vmatpush1.bf16.msra.mxu1 %v12208_v50  ;;  %7649 = vmatprep.subr.bf16.mxu0 %v12215_v28  ;;  %v1123_v50 = vld [vmem:[#allocation6 + $0xdd8] sm:$0xff] }
 0x40a   :  { %7977 = vmatprep.subr.bf16.mxu1 %v12217_v13  ;;  %v1127_v28 = vld [vmem:[#allocation6 + $0xdf8] sm:$0xff] }
 0x40c   :  { %7650 = vmatpush1.bf16.msra.mxu0 %v12214_v9  ;;  %v12248_v9 = vcombine.low %v1115_v20, %v1119_v56  ;;  %v1147_v20 = vld [vmem:[#allocation6 + $0xe98] sm:$0xff] }
 0x40d   :  { %7978 = vmatpush1.bf16.msra.mxu1 %v12216_v24  ;;  %7651 = vmatprep.subr.bf16.mxu0 %v12223_v26  ;;  %v12255_v24 = vcombine.high %v1122_v5, %v1126_v6  ;;  %v1151_v56 = vld [vmem:[#allocation6 + $0xeb8] sm:$0xff] }
 0x40e   :  { %7979 = vmatprep.subr.bf16.mxu1 %v12225_v58  ;;  %v12257_v58 = vcombine.high %v1123_v50, %v1127_v28 }
 0x410   :  { %7652 = vmatpush1.bf16.msra.mxu0 %v12222_v40  ;;  %v12254_v40 = vcombine.low %v1122_v5, %v1126_v6  ;;  %v1154_v5 = vld [vmem:[#allocation6 + $0xed0] sm:$0xff] }
 0x411   :  { %7980 = vmatpush1.bf16.msra.mxu1 %v12224_v57  ;;  %7653 = vmatprep.subr.bf16.mxu0 %v12231_v32  ;;  %v12256_v57 = vcombine.low %v1123_v50, %v1127_v28  ;;  %v12263_v32 = vcombine.high %v1130_v39, %v1134_v29  ;;  %v1158_v6 = vld [vmem:[#allocation6 + $0xef0] sm:$0xff]  ;;  %v1155_v50 = vld [vmem:[#allocation6 + $0xed8] sm:$0xff] }
 0x412   :  { %7981 = vmatprep.subr.bf16.mxu1 %v12233_v16  ;;  %v12265_v16 = vcombine.high %v1131_v30, %v1135_v31  ;;  %v1159_v28 = vld [vmem:[#allocation6 + $0xef8] sm:$0xff] }
 0x414   :  { %7654 = vmatpush1.bf16.msra.mxu0 %v12230_v59  ;;  %v12262_v59 = vcombine.low %v1130_v39, %v1134_v29  ;;  %v12286_v39 = vcombine.low %v1154_v5, %v1158_v6  ;;  %v12288_v29 = vcombine.low %v1155_v50, %v1159_v28 }
 0x415   :  { %7982 = vmatpush1.bf16.msra.mxu1 %v12232_v49  ;;  %7655 = vmatprep.subr.bf16.mxu0 %v12239_v51  ;;  %v12264_v49 = vcombine.low %v1131_v30, %v1135_v31  ;;  %v12271_v51 = vcombine.high %v1138_v35, %v1142_v37 }
 0x416   :  { %v14796_v22 = vpop.f32.mrb[16].mxu0  ;;  %7983 = vmatprep.subr.bf16.mxu1 %v12241_v36  ;;  %v12273_v36 = vcombine.high %v1139_v38, %v1143_v45 }
 0x417   :  { %v14798_v8 = vpop.f32.mrb[16].mxu1  ;;  %v14800_v21 = vpop.f32.mrb[17].mxu0 }
 0x418   :  { %v14802_v13 = vpop.f32.mrb[17].mxu1  ;;  %v7191_v14 = vpop.f32.mrb[18].mxu0  ;;  %7656 = vmatpush1.bf16.msra.mxu0 %v12238_v61  ;;  %v12270_v61 = vcombine.low %v1138_v35, %v1142_v37 }
 0x419   :  { %v7519_v18 = vpop.f32.mrb[18].mxu1  ;;  %7984 = vmatpush1.bf16.msra.mxu1 %v12240_v63  ;;  %v7192_v19 = vpop.f32.mrb[19].mxu0  ;;  %7657 = vmatprep.subr.bf16.mxu0 %v12247_v3  ;;  %v12272_v63 = vcombine.low %v1139_v38, %v1143_v45  ;;  %v12279_v3 = vcombine.high %v1146_v52, %v1150_v54  ;;  %v12278_v14 = vcombine.low %v1146_v52, %v1150_v54 }
 0x41a   :  { %v7520_v26 = vpop.f32.mrb[19].mxu1  ;;  %7985 = vmatprep.subr.bf16.mxu1 %v12249_v4  ;;  %v12281_v4 = vcombine.high %v1147_v20, %v1151_v56  ;;  %v12287_v18 = vcombine.high %v1154_v5, %v1158_v6  ;;  %v12289_v19 = vcombine.high %v1155_v50, %v1159_v28 }
 0x41b   :  { %v1163_v26 = vld [vmem:[#allocation6 + $0xf18] sm:$0xff] }
 0x41c   :  { %7658 = vmatpush1.bf16.msra.mxu0 %v12246_v17  ;;  %v12280_v17 = vcombine.low %v1147_v20, %v1151_v56 }
 0x41d   :  { %7986 = vmatpush1.bf16.msra.mxu1 %v12248_v9  ;;  %7659 = vmatprep.subr.bf16.mxu0 %v12255_v24  ;;  %v1162_v9 = vld [vmem:[#allocation6 + $0xf10] sm:$0xff] }
 0x41e   :  { %7987 = vmatprep.subr.bf16.mxu1 %v12257_v58  ;;  %v1166_v24 = vld [vmem:[#allocation6 + $0xf30] sm:$0xff]  ;;  %v1167_v58 = vld [vmem:[#allocation6 + $0xf38] sm:$0xff] }
 0x41f   :  { %v12295_v30 = vcombine.high %v1162_v9, %v1166_v24  ;;  %v12297_v31 = vcombine.high %v1163_v26, %v1167_v58  ;;  %v12294_v35 = vcombine.low %v1162_v9, %v1166_v24  ;;  %v12296_v37 = vcombine.low %v1163_v26, %v1167_v58 }
 0x420   :  { %7660 = vmatpush1.bf16.msra.mxu0 %v12254_v40  ;;  %v1170_v40 = vld [vmem:[#allocation6 + $0xf50] sm:$0xff] }
 0x421   :  { %7988 = vmatpush1.bf16.msra.mxu1 %v12256_v57  ;;  %7661 = vmatprep.subr.bf16.mxu0 %v12263_v32  ;;  %v1174_v57 = vld [vmem:[#allocation6 + $0xf70] sm:$0xff]  ;;  %v1171_v32 = vld [vmem:[#allocation6 + $0xf58] sm:$0xff] }
 0x422   :  { %7989 = vmatprep.subr.bf16.mxu1 %v12265_v16  ;;  %v1175_v16 = vld [vmem:[#allocation6 + $0xf78] sm:$0xff]  ;;  %v12303_v38 = vcombine.high %v1170_v40, %v1174_v57  ;;  %v12302_v52 = vcombine.low %v1170_v40, %v1174_v57 }
 0x423   :  { %v12305_v45 = vcombine.high %v1171_v32, %v1175_v16  ;;  %v12304_v54 = vcombine.low %v1171_v32, %v1175_v16  ;;  %v1207_v40 = vld [vmem:[#allocation6 + $0x1078] sm:$0xff]  ;;  %v1210_v16 = vld [vmem:[#allocation6 + $0x1090] sm:$0xff] }
 0x424   :  { %7662 = vmatpush1.bf16.msra.mxu0 %v12262_v59  ;;  %v1178_v59 = vld [vmem:[#allocation6 + $0xf90] sm:$0xff] }
 0x425   :  { %7990 = vmatpush1.bf16.msra.mxu1 %v12264_v49  ;;  %7663 = vmatprep.subr.bf16.mxu0 %v12271_v51  ;;  %v1182_v49 = vld [vmem:[#allocation6 + $0xfb0] sm:$0xff]  ;;  %v1179_v51 = vld [vmem:[#allocation6 + $0xf98] sm:$0xff] }
 0x426   :  { %7991 = vmatprep.subr.bf16.mxu1 %v12273_v36  ;;  %v1183_v36 = vld [vmem:[#allocation6 + $0xfb8] sm:$0xff]  ;;  %v12311_v20 = vcombine.high %v1178_v59, %v1182_v49  ;;  %v12310_v5 = vcombine.low %v1178_v59, %v1182_v49 }
 0x427   :  { %v12313_v56 = vcombine.high %v1179_v51, %v1183_v36  ;;  %v12312_v6 = vcombine.low %v1179_v51, %v1183_v36 }
 0x428   :  { %7664 = vmatpush1.bf16.msra.mxu0 %v12270_v61  ;;  %v1186_v61 = vld [vmem:[#allocation6 + $0xfd0] sm:$0xff] }
 0x429   :  { %7992 = vmatpush1.bf16.msra.mxu1 %v12272_v63  ;;  %7665 = vmatprep.subr.bf16.mxu0 %v12279_v3  ;;  %v1190_v63 = vld [vmem:[#allocation6 + $0xff0] sm:$0xff]  ;;  %v1187_v3 = vld [vmem:[#allocation6 + $0xfd8] sm:$0xff] }
 0x42a   :  { %7993 = vmatprep.subr.bf16.mxu1 %v12281_v4  ;;  %v1191_v4 = vld [vmem:[#allocation6 + $0xff8] sm:$0xff]  ;;  %v12319_v50 = vcombine.high %v1186_v61, %v1190_v63  ;;  %v12318_v9 = vcombine.low %v1186_v61, %v1190_v63 }
 0x42b   :  { %v12321_v28 = vcombine.high %v1187_v3, %v1191_v4  ;;  %v12320_v24 = vcombine.low %v1187_v3, %v1191_v4 }
 0x42c   :  { %7666 = vmatpush1.bf16.msra.mxu0 %v12278_v14  ;;  %v1194_v14 = vld [vmem:[#allocation6 + $0x1010] sm:$0xff] }
 0x42d   :  { %7994 = vmatpush1.bf16.msra.mxu1 %v12280_v17  ;;  %7667 = vmatprep.subr.bf16.mxu0 %v12287_v18  ;;  %v1198_v17 = vld [vmem:[#allocation6 + $0x1030] sm:$0xff]  ;;  %v1195_v18 = vld [vmem:[#allocation6 + $0x1018] sm:$0xff] }
 0x42e   :  { %7995 = vmatprep.subr.bf16.mxu1 %v12289_v19  ;;  %v1199_v19 = vld [vmem:[#allocation6 + $0x1038] sm:$0xff]  ;;  %v12327_v26 = vcombine.high %v1194_v14, %v1198_v17 }
 0x42f   :  { %v12329_v58 = vcombine.high %v1195_v18, %v1199_v19  ;;  %v12328_v57 = vcombine.low %v1195_v18, %v1199_v19 }
 0x430   :  { %7668 = vmatpush1.bf16.msra.mxu0 %v12286_v39  ;;  %v1202_v39 = vld [vmem:[#allocation6 + $0x1050] sm:$0xff] }
 0x431   :  { %7996 = vmatpush1.bf16.msra.mxu1 %v12288_v29  ;;  %7669 = vmatprep.subr.bf16.mxu0 %v12295_v30  ;;  %v1206_v29 = vld [vmem:[#allocation6 + $0x1070] sm:$0xff]  ;;  %v12326_v30 = vcombine.low %v1194_v14, %v1198_v17 }
 0x432   :  { %7997 = vmatprep.subr.bf16.mxu1 %v12297_v31  ;;  %v1203_v31 = vld [vmem:[#allocation6 + $0x1058] sm:$0xff]  ;;  %v12335_v32 = vcombine.high %v1202_v39, %v1206_v29  ;;  %v12334_v59 = vcombine.low %v1202_v39, %v1206_v29 }
 0x433   :  { %v12336_v49 = vcombine.low %v1203_v31, %v1207_v40 }
 0x434   :  { %7670 = vmatpush1.bf16.msra.mxu0 %v12294_v35  ;;  %v1214_v35 = vld [vmem:[#allocation6 + $0x10b0] sm:$0xff] }
 0x435   :  { %7998 = vmatpush1.bf16.msra.mxu1 %v12296_v37  ;;  %7671 = vmatprep.subr.bf16.mxu0 %v12303_v38  ;;  %v12337_v37 = vcombine.high %v1203_v31, %v1207_v40  ;;  %v1211_v38 = vld [vmem:[#allocation6 + $0x1098] sm:$0xff]  ;;  %v12343_v51 = vcombine.high %v1210_v16, %v1214_v35  ;;  %v12342_v61 = vcombine.low %v1210_v16, %v1214_v35  ;;  %v1242_v40 = vld [vmem:[#allocation6 + $0x1190] sm:$0xff] }
 0x436   :  { %7999 = vmatprep.subr.bf16.mxu1 %v12305_v45  ;;  %v1215_v45 = vld [vmem:[#allocation6 + $0x10b8] sm:$0xff] }
 0x437   :  { %v12345_v36 = vcombine.high %v1211_v38, %v1215_v45  ;;  %v12344_v63 = vcombine.low %v1211_v38, %v1215_v45  ;;  %v1247_v16 = vld [vmem:[#allocation6 + $0x11b8] sm:$0xff] }
 0x438   :  { %7672 = vmatpush1.bf16.msra.mxu0 %v12302_v52  ;;  %v1218_v52 = vld [vmem:[#allocation6 + $0x10d0] sm:$0xff] }
 0x439   :  { %8000 = vmatpush1.bf16.msra.mxu1 %v12304_v54  ;;  %7673 = vmatprep.subr.bf16.mxu0 %v12311_v20  ;;  %v1222_v54 = vld [vmem:[#allocation6 + $0x10f0] sm:$0xff]  ;;  %v1219_v20 = vld [vmem:[#allocation6 + $0x10d8] sm:$0xff] }
 0x43a   :  { %8001 = vmatprep.subr.bf16.mxu1 %v12313_v56  ;;  %v1223_v56 = vld [vmem:[#allocation6 + $0x10f8] sm:$0xff]  ;;  %v12351_v3 = vcombine.high %v1218_v52, %v1222_v54  ;;  %v12350_v14 = vcombine.low %v1218_v52, %v1222_v54 }
 0x43b   :  { %v12353_v4 = vcombine.high %v1219_v20, %v1223_v56  ;;  %v12352_v17 = vcombine.low %v1219_v20, %v1223_v56 }
 0x43c   :  { %7674 = vmatpush1.bf16.msra.mxu0 %v12310_v5  ;;  %v1226_v5 = vld [vmem:[#allocation6 + $0x1110] sm:$0xff] }
 0x43d   :  { %8002 = vmatpush1.bf16.msra.mxu1 %v12312_v6  ;;  %7675 = vmatprep.subr.bf16.mxu0 %v12319_v50  ;;  %v1230_v6 = vld [vmem:[#allocation6 + $0x1130] sm:$0xff]  ;;  %v1227_v50 = vld [vmem:[#allocation6 + $0x1118] sm:$0xff] }
 0x43e   :  { %8003 = vmatprep.subr.bf16.mxu1 %v12321_v28  ;;  %v1231_v28 = vld [vmem:[#allocation6 + $0x1138] sm:$0xff]  ;;  %v12359_v18 = vcombine.high %v1226_v5, %v1230_v6  ;;  %v12358_v39 = vcombine.low %v1226_v5, %v1230_v6 }
 0x43f   :  { %v12361_v19 = vcombine.high %v1227_v50, %v1231_v28  ;;  %v12360_v29 = vcombine.low %v1227_v50, %v1231_v28 }
 0x440   :  { %7676 = vmatpush1.bf16.msra.mxu0 %v12318_v9  ;;  %v1234_v9 = vld [vmem:[#allocation6 + $0x1150] sm:$0xff] }
 0x441   :  { %8004 = vmatpush1.bf16.msra.mxu1 %v12320_v24  ;;  %7686 = vmatprep.subr.bf16.mxu0 %v12327_v26  ;;  %v1238_v24 = vld [vmem:[#allocation6 + $0x1170] sm:$0xff]  ;;  %v1235_v26 = vld [vmem:[#allocation6 + $0x1158] sm:$0xff] }
 0x442   :  { %8014 = vmatprep.subr.bf16.mxu1 %v12329_v58  ;;  %v1239_v58 = vld [vmem:[#allocation6 + $0x1178] sm:$0xff]  ;;  %v12366_v35 = vcombine.low %v1234_v9, %v1238_v24 }
 0x443   :  { %7678 = vmatmul.mubr.bf16.vlgmr.msra.gmra.mrb[20].mxu0 %v14731_v25  ;;  %v12369_v31 = vcombine.high %v1235_v26, %v1239_v58 }
 0x444   :  { %8006 = vmatmul.mubr.bf16.vlgmr.msra.gmra.mrb[20].mxu1 %v14731_v25  ;;  %7687 = vmatpush1.bf16.msra.mxu0 %v12326_v30  ;;  %v12367_v30 = vcombine.high %v1234_v9, %v1238_v24 }
 0x445   :  { %7718 = vmatprep.mubr.bf16.mxu0 %v14733_v27  ;;  %8015 = vmatpush1.bf16.msra.mxu1 %v12328_v57  ;;  %v1246_v57 = vld [vmem:[#allocation6 + $0x11b0] sm:$0xff] }
 0x446   :  { %8046 = vmatprep.mubr.bf16.mxu1 %v14733_v27  ;;  %7688 = vmatprep.subr.bf16.mxu0 %v12335_v32  ;;  %v1243_v32 = vld [vmem:[#allocation6 + $0x1198] sm:$0xff]  ;;  %v12375_v38 = vcombine.high %v1242_v40, %v1246_v57  ;;  %v12374_v52 = vcombine.low %v1242_v40, %v1246_v57 }
 0x447   :  { %8016 = vmatprep.subr.bf16.mxu1 %v12337_v37  ;;  %v12368_v37 = vcombine.low %v1235_v26, %v1239_v58  ;;  %v12377_v45 = vcombine.high %v1243_v32, %v1247_v16  ;;  %v12376_v54 = vcombine.low %v1243_v32, %v1247_v16 }
 0x448   :  { %7689 = vmatpush1.bf16.msra.mxu0 %v12334_v59  ;;  %v1250_v59 = vld [vmem:[#allocation6 + $0x11d0] sm:$0xff] }
 0x449   :  { %8017 = vmatpush1.bf16.msra.mxu1 %v12336_v49  ;;  %7690 = vmatprep.subr.bf16.mxu0 %v12343_v51  ;;  %v1254_v49 = vld [vmem:[#allocation6 + $0x11f0] sm:$0xff]  ;;  %v1251_v51 = vld [vmem:[#allocation6 + $0x11d8] sm:$0xff] }
 0x44a   :  { %8018 = vmatprep.subr.bf16.mxu1 %v12345_v36  ;;  %v1255_v36 = vld [vmem:[#allocation6 + $0x11f8] sm:$0xff]  ;;  %v12383_v20 = vcombine.high %v1250_v59, %v1254_v49  ;;  %v12382_v5 = vcombine.low %v1250_v59, %v1254_v49 }
 0x44b   :  { %v12385_v56 = vcombine.high %v1251_v51, %v1255_v36  ;;  %v12384_v6 = vcombine.low %v1251_v51, %v1255_v36 }
 0x44c   :  { %7691 = vmatpush1.bf16.msra.mxu0 %v12342_v61  ;;  %v1258_v61 = vld [vmem:[#allocation6 + $0x1210] sm:$0xff] }
 0x44d   :  { %8019 = vmatpush1.bf16.msra.mxu1 %v12344_v63  ;;  %7692 = vmatprep.subr.bf16.mxu0 %v12351_v3  ;;  %v1262_v63 = vld [vmem:[#allocation6 + $0x1230] sm:$0xff]  ;;  %v1259_v3 = vld [vmem:[#allocation6 + $0x1218] sm:$0xff] }
 0x44e   :  { %8020 = vmatprep.subr.bf16.mxu1 %v12353_v4  ;;  %v1263_v4 = vld [vmem:[#allocation6 + $0x1238] sm:$0xff]  ;;  %v12391_v50 = vcombine.high %v1258_v61, %v1262_v63  ;;  %v12390_v9 = vcombine.low %v1258_v61, %v1262_v63 }
 0x44f   :  { %v12393_v28 = vcombine.high %v1259_v3, %v1263_v4  ;;  %v12392_v24 = vcombine.low %v1259_v3, %v1263_v4 }
 0x450   :  { %7693 = vmatpush1.bf16.msra.mxu0 %v12350_v14  ;;  %v1266_v14 = vld [vmem:[#allocation6 + $0x1250] sm:$0xff] }
 0x451   :  { %8021 = vmatpush1.bf16.msra.mxu1 %v12352_v17  ;;  %7694 = vmatprep.subr.bf16.mxu0 %v12359_v18  ;;  %v1270_v17 = vld [vmem:[#allocation6 + $0x1270] sm:$0xff]  ;;  %v1267_v18 = vld [vmem:[#allocation6 + $0x1258] sm:$0xff] }
 0x452   :  { %8022 = vmatprep.subr.bf16.mxu1 %v12361_v19  ;;  %v1271_v19 = vld [vmem:[#allocation6 + $0x1278] sm:$0xff]  ;;  %v12399_v26 = vcombine.high %v1266_v14, %v1270_v17  ;;  %v12398_v40 = vcombine.low %v1266_v14, %v1270_v17 }
 0x453   :  { %v12401_v58 = vcombine.high %v1267_v18, %v1271_v19  ;;  %v12400_v57 = vcombine.low %v1267_v18, %v1271_v19 }
 0x454   :  { %7695 = vmatpush1.bf16.msra.mxu0 %v12358_v39  ;;  %v1274_v39 = vld [vmem:[#allocation6 + $0x1290] sm:$0xff] }
 0x455   :  { %8023 = vmatpush1.bf16.msra.mxu1 %v12360_v29  ;;  %7696 = vmatprep.subr.bf16.mxu0 %v12367_v30  ;;  %v1278_v29 = vld [vmem:[#allocation6 + $0x12b0] sm:$0xff]  ;;  %v1275_v30 = vld [vmem:[#allocation6 + $0x1298] sm:$0xff] }
 0x456   :  { %8024 = vmatprep.subr.bf16.mxu1 %v12369_v31  ;;  %v1279_v31 = vld [vmem:[#allocation6 + $0x12b8] sm:$0xff]  ;;  %v12407_v32 = vcombine.high %v1274_v39, %v1278_v29  ;;  %v12406_v59 = vcombine.low %v1274_v39, %v1278_v29 }
 0x457   :  { %v12409_v16 = vcombine.high %v1275_v30, %v1279_v31  ;;  %v12408_v49 = vcombine.low %v1275_v30, %v1279_v31 }
 0x458   :  { %7697 = vmatpush1.bf16.msra.mxu0 %v12366_v35  ;;  %v1282_v35 = vld [vmem:[#allocation6 + $0x12d0] sm:$0xff] }
 0x459   :  { %8025 = vmatpush1.bf16.msra.mxu1 %v12368_v37  ;;  %7698 = vmatprep.subr.bf16.mxu0 %v12375_v38  ;;  %v1286_v37 = vld [vmem:[#allocation6 + $0x12f0] sm:$0xff]  ;;  %v1283_v38 = vld [vmem:[#allocation6 + $0x12d8] sm:$0xff] }
 0x45a   :  { %8026 = vmatprep.subr.bf16.mxu1 %v12377_v45  ;;  %v1287_v45 = vld [vmem:[#allocation6 + $0x12f8] sm:$0xff]  ;;  %v12415_v51 = vcombine.high %v1282_v35, %v1286_v37  ;;  %v12414_v61 = vcombine.low %v1282_v35, %v1286_v37 }
 0x45b   :  { %v12417_v36 = vcombine.high %v1283_v38, %v1287_v45  ;;  %v12416_v63 = vcombine.low %v1283_v38, %v1287_v45 }
 0x45c   :  { %7699 = vmatpush1.bf16.msra.mxu0 %v12374_v52  ;;  %v1290_v52 = vld [vmem:[#allocation6 + $0x1310] sm:$0xff] }
 0x45d   :  { %8027 = vmatpush1.bf16.msra.mxu1 %v12376_v54  ;;  %7700 = vmatprep.subr.bf16.mxu0 %v12383_v20  ;;  %v1294_v54 = vld [vmem:[#allocation6 + $0x1330] sm:$0xff]  ;;  %v1291_v20 = vld [vmem:[#allocation6 + $0x1318] sm:$0xff] }
 0x45e   :  { %8028 = vmatprep.subr.bf16.mxu1 %v12385_v56  ;;  %v1295_v56 = vld [vmem:[#allocation6 + $0x1338] sm:$0xff]  ;;  %v12423_v3 = vcombine.high %v1290_v52, %v1294_v54  ;;  %v12422_v14 = vcombine.low %v1290_v52, %v1294_v54 }
 0x45f   :  { %v12425_v4 = vcombine.high %v1291_v20, %v1295_v56  ;;  %v12424_v17 = vcombine.low %v1291_v20, %v1295_v56 }
 0x460   :  { %7701 = vmatpush1.bf16.msra.mxu0 %v12382_v5  ;;  %v1298_v5 = vld [vmem:[#allocation6 + $0x1350] sm:$0xff] }
 0x461   :  { %8029 = vmatpush1.bf16.msra.mxu1 %v12384_v6  ;;  %7702 = vmatprep.subr.bf16.mxu0 %v12391_v50  ;;  %v1302_v6 = vld [vmem:[#allocation6 + $0x1370] sm:$0xff]  ;;  %v1299_v50 = vld [vmem:[#allocation6 + $0x1358] sm:$0xff] }
 0x462   :  { %8030 = vmatprep.subr.bf16.mxu1 %v12393_v28  ;;  %v1303_v28 = vld [vmem:[#allocation6 + $0x1378] sm:$0xff]  ;;  %v12431_v18 = vcombine.high %v1298_v5, %v1302_v6  ;;  %v12430_v39 = vcombine.low %v1298_v5, %v1302_v6 }
 0x463   :  { %v12433_v19 = vcombine.high %v1299_v50, %v1303_v28  ;;  %v12432_v29 = vcombine.low %v1299_v50, %v1303_v28  ;;  %v1335_v5 = vld [vmem:[#allocation6 + $0x1478] sm:$0xff]  ;;  %v1338_v28 = vld [vmem:[#allocation6 + $0x1490] sm:$0xff] }
 0x464   :  { %7703 = vmatpush1.bf16.msra.mxu0 %v12390_v9  ;;  %v1306_v9 = vld [vmem:[#allocation6 + $0x1390] sm:$0xff] }
 0x465   :  { %8031 = vmatpush1.bf16.msra.mxu1 %v12392_v24  ;;  %7704 = vmatprep.subr.bf16.mxu0 %v12399_v26  ;;  %v1310_v24 = vld [vmem:[#allocation6 + $0x13b0] sm:$0xff]  ;;  %v1307_v26 = vld [vmem:[#allocation6 + $0x1398] sm:$0xff] }
 0x466   :  { %8032 = vmatprep.subr.bf16.mxu1 %v12401_v58  ;;  %v1311_v58 = vld [vmem:[#allocation6 + $0x13b8] sm:$0xff]  ;;  %v12439_v30 = vcombine.high %v1306_v9, %v1310_v24  ;;  %v12438_v35 = vcombine.low %v1306_v9, %v1310_v24 }
 0x467   :  { %v12441_v31 = vcombine.high %v1307_v26, %v1311_v58  ;;  %v12440_v37 = vcombine.low %v1307_v26, %v1311_v58 }
 0x468   :  { %7705 = vmatpush1.bf16.msra.mxu0 %v12398_v40  ;;  %v1314_v40 = vld [vmem:[#allocation6 + $0x13d0] sm:$0xff] }
 0x469   :  { %8033 = vmatpush1.bf16.msra.mxu1 %v12400_v57  ;;  %7706 = vmatprep.subr.bf16.mxu0 %v12407_v32  ;;  %v1318_v57 = vld [vmem:[#allocation6 + $0x13f0] sm:$0xff]  ;;  %v1315_v32 = vld [vmem:[#allocation6 + $0x13d8] sm:$0xff] }
 0x46a   :  { %8034 = vmatprep.subr.bf16.mxu1 %v12409_v16  ;;  %v1319_v16 = vld [vmem:[#allocation6 + $0x13f8] sm:$0xff]  ;;  %v12447_v38 = vcombine.high %v1314_v40, %v1318_v57  ;;  %v12446_v52 = vcombine.low %v1314_v40, %v1318_v57 }
 0x46b   :  { %v12449_v45 = vcombine.high %v1315_v32, %v1319_v16  ;;  %v12448_v54 = vcombine.low %v1315_v32, %v1319_v16 }
 0x46c   :  { %7707 = vmatpush1.bf16.msra.mxu0 %v12406_v59  ;;  %v1322_v59 = vld [vmem:[#allocation6 + $0x1410] sm:$0xff] }
 0x46d   :  { %8035 = vmatpush1.bf16.msra.mxu1 %v12408_v49  ;;  %7708 = vmatprep.subr.bf16.mxu0 %v12415_v51  ;;  %v1326_v49 = vld [vmem:[#allocation6 + $0x1430] sm:$0xff]  ;;  %v1323_v51 = vld [vmem:[#allocation6 + $0x1418] sm:$0xff] }
 0x46e   :  { %8036 = vmatprep.subr.bf16.mxu1 %v12417_v36  ;;  %v1327_v36 = vld [vmem:[#allocation6 + $0x1438] sm:$0xff]  ;;  %v12455_v20 = vcombine.high %v1322_v59, %v1326_v49 }
 0x46f   :  { %v12457_v56 = vcombine.high %v1323_v51, %v1327_v36  ;;  %v12456_v6 = vcombine.low %v1323_v51, %v1327_v36 }
 0x470   :  { %7709 = vmatpush1.bf16.msra.mxu0 %v12414_v61  ;;  %v1330_v61 = vld [vmem:[#allocation6 + $0x1450] sm:$0xff] }
 0x471   :  { %8037 = vmatpush1.bf16.msra.mxu1 %v12416_v63  ;;  %7710 = vmatprep.subr.bf16.mxu0 %v12423_v3  ;;  %v1334_v63 = vld [vmem:[#allocation6 + $0x1470] sm:$0xff]  ;;  %v12454_v3 = vcombine.low %v1322_v59, %v1326_v49 }
 0x472   :  { %8038 = vmatprep.subr.bf16.mxu1 %v12425_v4  ;;  %v1331_v4 = vld [vmem:[#allocation6 + $0x1458] sm:$0xff]  ;;  %v12463_v50 = vcombine.high %v1330_v61, %v1334_v63  ;;  %v12462_v9 = vcombine.low %v1330_v61, %v1334_v63 }
 0x473   :  { %v12464_v24 = vcombine.low %v1331_v4, %v1335_v5 }
 0x474   :  { %7711 = vmatpush1.bf16.msra.mxu0 %v12422_v14  ;;  %v1342_v14 = vld [vmem:[#allocation6 + $0x14b0] sm:$0xff] }
 0x475   :  { %8039 = vmatpush1.bf16.msra.mxu1 %v12424_v17  ;;  %7712 = vmatprep.subr.bf16.mxu0 %v12431_v18  ;;  %v12465_v17 = vcombine.high %v1331_v4, %v1335_v5  ;;  %v1339_v18 = vld [vmem:[#allocation6 + $0x1498] sm:$0xff]  ;;  %v12471_v26 = vcombine.high %v1338_v28, %v1342_v14  ;;  %v12470_v40 = vcombine.low %v1338_v28, %v1342_v14  ;;  %v1370_v5 = vld [vmem:[#allocation6 + $0x1590] sm:$0xff] }
 0x476   :  { %8040 = vmatprep.subr.bf16.mxu1 %v12433_v19  ;;  %v1343_v19 = vld [vmem:[#allocation6 + $0x14b8] sm:$0xff] }
 0x477   :  { %v12473_v58 = vcombine.high %v1339_v18, %v1343_v19  ;;  %v12472_v57 = vcombine.low %v1339_v18, %v1343_v19  ;;  %v1375_v28 = vld [vmem:[#allocation6 + $0x15b8] sm:$0xff] }
 0x478   :  { %7713 = vmatpush1.bf16.msra.mxu0 %v12430_v39  ;;  %v1346_v39 = vld [vmem:[#allocation6 + $0x14d0] sm:$0xff] }
 0x479   :  { %8041 = vmatpush1.bf16.msra.mxu1 %v12432_v29  ;;  %7714 = vmatprep.subr.bf16.mxu0 %v12439_v30  ;;  %v1350_v29 = vld [vmem:[#allocation6 + $0x14f0] sm:$0xff]  ;;  %v1347_v30 = vld [vmem:[#allocation6 + $0x14d8] sm:$0xff] }
 0x47a   :  { %8042 = vmatprep.subr.bf16.mxu1 %v12441_v31  ;;  %v1351_v31 = vld [vmem:[#allocation6 + $0x14f8] sm:$0xff]  ;;  %v12479_v32 = vcombine.high %v1346_v39, %v1350_v29  ;;  %v12478_v59 = vcombine.low %v1346_v39, %v1350_v29 }
 0x47b   :  { %v12481_v16 = vcombine.high %v1347_v30, %v1351_v31  ;;  %v12480_v49 = vcombine.low %v1347_v30, %v1351_v31 }
 0x47c   :  { %7715 = vmatpush1.bf16.msra.mxu0 %v12438_v35  ;;  %v1354_v35 = vld [vmem:[#allocation6 + $0x1510] sm:$0xff] }
 0x47d   :  { %8043 = vmatpush1.bf16.msra.mxu1 %v12440_v37  ;;  %7716 = vmatprep.subr.bf16.mxu0 %v12447_v38  ;;  %v1358_v37 = vld [vmem:[#allocation6 + $0x1530] sm:$0xff]  ;;  %v1355_v38 = vld [vmem:[#allocation6 + $0x1518] sm:$0xff] }
 0x47e   :  { %8044 = vmatprep.subr.bf16.mxu1 %v12449_v45  ;;  %v1359_v45 = vld [vmem:[#allocation6 + $0x1538] sm:$0xff]  ;;  %v12487_v51 = vcombine.high %v1354_v35, %v1358_v37  ;;  %v12486_v61 = vcombine.low %v1354_v35, %v1358_v37 }
 0x47f   :  { %v12489_v36 = vcombine.high %v1355_v38, %v1359_v45  ;;  %v12488_v63 = vcombine.low %v1355_v38, %v1359_v45 }
 0x480   :  { %7717 = vmatpush1.bf16.msra.mxu0 %v12446_v52  ;;  %v1362_v52 = vld [vmem:[#allocation6 + $0x1550] sm:$0xff] }
 0x481   :  { %8045 = vmatpush1.bf16.msra.mxu1 %v12448_v54  ;;  %7727 = vmatprep.subr.bf16.mxu0 %v12455_v20  ;;  %v1366_v54 = vld [vmem:[#allocation6 + $0x1570] sm:$0xff]  ;;  %v1363_v20 = vld [vmem:[#allocation6 + $0x1558] sm:$0xff] }
 0x482   :  { %8055 = vmatprep.subr.bf16.mxu1 %v12457_v56  ;;  %v1367_v56 = vld [vmem:[#allocation6 + $0x1578] sm:$0xff]  ;;  %v12494_v14 = vcombine.low %v1362_v52, %v1366_v54 }
 0x483   :  { %7719 = vmatmul.mubr.bf16.vlgmr.msra.gmra.mrb[20].mxu0 %v14742_v42  ;;  %v12497_v4 = vcombine.high %v1363_v20, %v1367_v56 }
 0x484   :  { %8047 = vmatmul.mubr.bf16.vlgmr.msra.gmra.mrb[20].mxu1 %v14742_v42  ;;  %7728 = vmatpush1.bf16.msra.mxu0 %v12454_v3  ;;  %v12495_v3 = vcombine.high %v1362_v52, %v1366_v54 }
 0x485   :  { %7759 = vmatprep.mubr.bf16.mxu0 %v14746_v53  ;;  %8056 = vmatpush1.bf16.msra.mxu1 %v12456_v6  ;;  %v1374_v6 = vld [vmem:[#allocation6 + $0x15b0] sm:$0xff] }
 0x486   :  { %8087 = vmatprep.mubr.bf16.mxu1 %v14746_v53  ;;  %7729 = vmatprep.subr.bf16.mxu0 %v12463_v50  ;;  %v1371_v50 = vld [vmem:[#allocation6 + $0x1598] sm:$0xff]  ;;  %v12503_v18 = vcombine.high %v1370_v5, %v1374_v6  ;;  %v12502_v39 = vcombine.low %v1370_v5, %v1374_v6 }
 0x487   :  { %8057 = vmatprep.subr.bf16.mxu1 %v12465_v17  ;;  %v12496_v17 = vcombine.low %v1363_v20, %v1367_v56  ;;  %v12505_v19 = vcombine.high %v1371_v50, %v1375_v28  ;;  %v12504_v29 = vcombine.low %v1371_v50, %v1375_v28 }
 0x488   :  { %7730 = vmatpush1.bf16.msra.mxu0 %v12462_v9  ;;  %v1378_v9 = vld [vmem:[#allocation6 + $0x15d0] sm:$0xff] }
 0x489   :  { %8058 = vmatpush1.bf16.msra.mxu1 %v12464_v24  ;;  %7731 = vmatprep.subr.bf16.mxu0 %v12471_v26  ;;  %v1382_v24 = vld [vmem:[#allocation6 + $0x15f0] sm:$0xff]  ;;  %v1379_v26 = vld [vmem:[#allocation6 + $0x15d8] sm:$0xff] }
 0x48a   :  { %8059 = vmatprep.subr.bf16.mxu1 %v12473_v58  ;;  %v1383_v58 = vld [vmem:[#allocation6 + $0x15f8] sm:$0xff]  ;;  %v12511_v30 = vcombine.high %v1378_v9, %v1382_v24  ;;  %v12510_v35 = vcombine.low %v1378_v9, %v1382_v24 }
 0x48b   :  { %v12513_v31 = vcombine.high %v1379_v26, %v1383_v58  ;;  %v12512_v37 = vcombine.low %v1379_v26, %v1383_v58 }
 0x48c   :  { %7732 = vmatpush1.bf16.msra.mxu0 %v12470_v40  ;;  %v1386_v40 = vld [vmem:[#allocation6 + $0x1610] sm:$0xff] }
 0x48d   :  { %8060 = vmatpush1.bf16.msra.mxu1 %v12472_v57  ;;  %7733 = vmatprep.subr.bf16.mxu0 %v12479_v32  ;;  %v1390_v57 = vld [vmem:[#allocation6 + $0x1630] sm:$0xff]  ;;  %v1387_v32 = vld [vmem:[#allocation6 + $0x1618] sm:$0xff] }
 0x48e   :  { %8061 = vmatprep.subr.bf16.mxu1 %v12481_v16  ;;  %v1391_v16 = vld [vmem:[#allocation6 + $0x1638] sm:$0xff]  ;;  %v12519_v38 = vcombine.high %v1386_v40, %v1390_v57  ;;  %v12518_v52 = vcombine.low %v1386_v40, %v1390_v57 }
 0x48f   :  { %v12521_v45 = vcombine.high %v1387_v32, %v1391_v16  ;;  %v12520_v54 = vcombine.low %v1387_v32, %v1391_v16 }
 0x490   :  { %7734 = vmatpush1.bf16.msra.mxu0 %v12478_v59  ;;  %v1394_v59 = vld [vmem:[#allocation6 + $0x1650] sm:$0xff] }
 0x491   :  { %8062 = vmatpush1.bf16.msra.mxu1 %v12480_v49  ;;  %7735 = vmatprep.subr.bf16.mxu0 %v12487_v51  ;;  %v1398_v49 = vld [vmem:[#allocation6 + $0x1670] sm:$0xff]  ;;  %v1395_v51 = vld [vmem:[#allocation6 + $0x1658] sm:$0xff] }
 0x492   :  { %8063 = vmatprep.subr.bf16.mxu1 %v12489_v36  ;;  %v1399_v36 = vld [vmem:[#allocation6 + $0x1678] sm:$0xff]  ;;  %v12527_v20 = vcombine.high %v1394_v59, %v1398_v49  ;;  %v12526_v5 = vcombine.low %v1394_v59, %v1398_v49 }
 0x493   :  { %v12529_v56 = vcombine.high %v1395_v51, %v1399_v36  ;;  %v12528_v6 = vcombine.low %v1395_v51, %v1399_v36 }
 0x494   :  { %7736 = vmatpush1.bf16.msra.mxu0 %v12486_v61  ;;  %v1402_v61 = vld [vmem:[#allocation6 + $0x1690] sm:$0xff] }
 0x495   :  { %8064 = vmatpush1.bf16.msra.mxu1 %v12488_v63  ;;  %7737 = vmatprep.subr.bf16.mxu0 %v12495_v3  ;;  %v1406_v63 = vld [vmem:[#allocation6 + $0x16b0] sm:$0xff]  ;;  %v1403_v3 = vld [vmem:[#allocation6 + $0x1698] sm:$0xff] }
 0x496   :  { %8065 = vmatprep.subr.bf16.mxu1 %v12497_v4  ;;  %v1407_v4 = vld [vmem:[#allocation6 + $0x16b8] sm:$0xff]  ;;  %v12535_v50 = vcombine.high %v1402_v61, %v1406_v63  ;;  %v12534_v9 = vcombine.low %v1402_v61, %v1406_v63 }
 0x497   :  { %v12537_v28 = vcombine.high %v1403_v3, %v1407_v4  ;;  %v12536_v24 = vcombine.low %v1403_v3, %v1407_v4 }
 0x498   :  { %7738 = vmatpush1.bf16.msra.mxu0 %v12494_v14  ;;  %v1410_v14 = vld [vmem:[#allocation6 + $0x16d0] sm:$0xff] }
 0x499   :  { %8066 = vmatpush1.bf16.msra.mxu1 %v12496_v17  ;;  %7739 = vmatprep.subr.bf16.mxu0 %v12503_v18  ;;  %v1414_v17 = vld [vmem:[#allocation6 + $0x16f0] sm:$0xff]  ;;  %v1411_v18 = vld [vmem:[#allocation6 + $0x16d8] sm:$0xff] }
 0x49a   :  { %8067 = vmatprep.subr.bf16.mxu1 %v12505_v19  ;;  %v1415_v19 = vld [vmem:[#allocation6 + $0x16f8] sm:$0xff]  ;;  %v12543_v26 = vcombine.high %v1410_v14, %v1414_v17  ;;  %v12542_v40 = vcombine.low %v1410_v14, %v1414_v17 }
 0x49b   :  { %v12545_v58 = vcombine.high %v1411_v18, %v1415_v19  ;;  %v12544_v57 = vcombine.low %v1411_v18, %v1415_v19 }
 0x49c   :  { %7740 = vmatpush1.bf16.msra.mxu0 %v12502_v39  ;;  %v1418_v39 = vld [vmem:[#allocation6 + $0x1710] sm:$0xff] }
 0x49d   :  { %8068 = vmatpush1.bf16.msra.mxu1 %v12504_v29  ;;  %7741 = vmatprep.subr.bf16.mxu0 %v12511_v30  ;;  %v1422_v29 = vld [vmem:[#allocation6 + $0x1730] sm:$0xff]  ;;  %v1419_v30 = vld [vmem:[#allocation6 + $0x1718] sm:$0xff] }
 0x49e   :  { %8069 = vmatprep.subr.bf16.mxu1 %v12513_v31  ;;  %v1423_v31 = vld [vmem:[#allocation6 + $0x1738] sm:$0xff]  ;;  %v12551_v32 = vcombine.high %v1418_v39, %v1422_v29  ;;  %v12550_v59 = vcombine.low %v1418_v39, %v1422_v29 }
 0x49f   :  { %v12553_v16 = vcombine.high %v1419_v30, %v1423_v31  ;;  %v12552_v49 = vcombine.low %v1419_v30, %v1423_v31 }
 0x4a0   :  { %7742 = vmatpush1.bf16.msra.mxu0 %v12510_v35  ;;  %v1426_v35 = vld [vmem:[#allocation6 + $0x1750] sm:$0xff] }
 0x4a1   :  { %8070 = vmatpush1.bf16.msra.mxu1 %v12512_v37  ;;  %7743 = vmatprep.subr.bf16.mxu0 %v12519_v38  ;;  %v1430_v37 = vld [vmem:[#allocation6 + $0x1770] sm:$0xff]  ;;  %v1427_v38 = vld [vmem:[#allocation6 + $0x1758] sm:$0xff] }
 0x4a2   :  { %8071 = vmatprep.subr.bf16.mxu1 %v12521_v45  ;;  %v1431_v45 = vld [vmem:[#allocation6 + $0x1778] sm:$0xff]  ;;  %v12559_v51 = vcombine.high %v1426_v35, %v1430_v37  ;;  %v12558_v61 = vcombine.low %v1426_v35, %v1430_v37 }
 0x4a3   :  { %v12561_v36 = vcombine.high %v1427_v38, %v1431_v45  ;;  %v12560_v63 = vcombine.low %v1427_v38, %v1431_v45  ;;  %v1463_v35 = vld [vmem:[#allocation6 + $0x1878] sm:$0xff]  ;;  %v1466_v45 = vld [vmem:[#allocation6 + $0x1890] sm:$0xff] }
 0x4a4   :  { %7744 = vmatpush1.bf16.msra.mxu0 %v12518_v52  ;;  %v1434_v52 = vld [vmem:[#allocation6 + $0x1790] sm:$0xff] }
 0x4a5   :  { %8072 = vmatpush1.bf16.msra.mxu1 %v12520_v54  ;;  %7745 = vmatprep.subr.bf16.mxu0 %v12527_v20  ;;  %v1438_v54 = vld [vmem:[#allocation6 + $0x17b0] sm:$0xff]  ;;  %v1435_v20 = vld [vmem:[#allocation6 + $0x1798] sm:$0xff] }
 0x4a6   :  { %8073 = vmatprep.subr.bf16.mxu1 %v12529_v56  ;;  %v1439_v56 = vld [vmem:[#allocation6 + $0x17b8] sm:$0xff]  ;;  %v12567_v3 = vcombine.high %v1434_v52, %v1438_v54  ;;  %v12566_v14 = vcombine.low %v1434_v52, %v1438_v54 }
 0x4a7   :  { %v12569_v4 = vcombine.high %v1435_v20, %v1439_v56  ;;  %v12568_v17 = vcombine.low %v1435_v20, %v1439_v56 }
 0x4a8   :  { %7746 = vmatpush1.bf16.msra.mxu0 %v12526_v5  ;;  %v1442_v5 = vld [vmem:[#allocation6 + $0x17d0] sm:$0xff] }
 0x4a9   :  { %8074 = vmatpush1.bf16.msra.mxu1 %v12528_v6  ;;  %7747 = vmatprep.subr.bf16.mxu0 %v12535_v50  ;;  %v1446_v6 = vld [vmem:[#allocation6 + $0x17f0] sm:$0xff]  ;;  %v1443_v50 = vld [vmem:[#allocation6 + $0x17d8] sm:$0xff] }
 0x4aa   :  { %8075 = vmatprep.subr.bf16.mxu1 %v12537_v28  ;;  %v1447_v28 = vld [vmem:[#allocation6 + $0x17f8] sm:$0xff]  ;;  %v12575_v18 = vcombine.high %v1442_v5, %v1446_v6  ;;  %v12574_v39 = vcombine.low %v1442_v5, %v1446_v6 }
 0x4ab   :  { %v12577_v19 = vcombine.high %v1443_v50, %v1447_v28  ;;  %v12576_v29 = vcombine.low %v1443_v50, %v1447_v28 }
 0x4ac   :  { %7748 = vmatpush1.bf16.msra.mxu0 %v12534_v9  ;;  %v1450_v9 = vld [vmem:[#allocation6 + $0x1810] sm:$0xff] }
 0x4ad   :  { %8076 = vmatpush1.bf16.msra.mxu1 %v12536_v24  ;;  %7749 = vmatprep.subr.bf16.mxu0 %v12543_v26  ;;  %v1454_v24 = vld [vmem:[#allocation6 + $0x1830] sm:$0xff]  ;;  %v1451_v26 = vld [vmem:[#allocation6 + $0x1818] sm:$0xff] }
 0x4ae   :  { %8077 = vmatprep.subr.bf16.mxu1 %v12545_v58  ;;  %v1455_v58 = vld [vmem:[#allocation6 + $0x1838] sm:$0xff]  ;;  %v12583_v30 = vcombine.high %v1450_v9, %v1454_v24 }
 0x4af   :  { %v12585_v31 = vcombine.high %v1451_v26, %v1455_v58  ;;  %v12584_v37 = vcombine.low %v1451_v26, %v1455_v58 }
 0x4b0   :  { %7750 = vmatpush1.bf16.msra.mxu0 %v12542_v40  ;;  %v1458_v40 = vld [vmem:[#allocation6 + $0x1850] sm:$0xff] }
 0x4b1   :  { %8078 = vmatpush1.bf16.msra.mxu1 %v12544_v57  ;;  %7751 = vmatprep.subr.bf16.mxu0 %v12551_v32  ;;  %v1462_v57 = vld [vmem:[#allocation6 + $0x1870] sm:$0xff]  ;;  %v12582_v32 = vcombine.low %v1450_v9, %v1454_v24 }
 0x4b2   :  { %8079 = vmatprep.subr.bf16.mxu1 %v12553_v16  ;;  %v1459_v16 = vld [vmem:[#allocation6 + $0x1858] sm:$0xff]  ;;  %v12591_v38 = vcombine.high %v1458_v40, %v1462_v57  ;;  %v12590_v52 = vcombine.low %v1458_v40, %v1462_v57 }
 0x4b3   :  { %v12592_v54 = vcombine.low %v1459_v16, %v1463_v35 }
 0x4b4   :  { %7752 = vmatpush1.bf16.msra.mxu0 %v12550_v59  ;;  %v1470_v59 = vld [vmem:[#allocation6 + $0x18b0] sm:$0xff] }
 0x4b5   :  { %8080 = vmatpush1.bf16.msra.mxu1 %v12552_v49  ;;  %7753 = vmatprep.subr.bf16.mxu0 %v12559_v51  ;;  %v12593_v49 = vcombine.high %v1459_v16, %v1463_v35  ;;  %v1467_v51 = vld [vmem:[#allocation6 + $0x1898] sm:$0xff]  ;;  %v12599_v20 = vcombine.high %v1466_v45, %v1470_v59  ;;  %v12598_v5 = vcombine.low %v1466_v45, %v1470_v59  ;;  %v1498_v35 = vld [vmem:[#allocation6 + $0x1990] sm:$0xff] }
 0x4b6   :  { %8081 = vmatprep.subr.bf16.mxu1 %v12561_v36  ;;  %v1471_v36 = vld [vmem:[#allocation6 + $0x18b8] sm:$0xff] }
 0x4b7   :  { %v12601_v56 = vcombine.high %v1467_v51, %v1471_v36  ;;  %v12600_v6 = vcombine.low %v1467_v51, %v1471_v36  ;;  %v1503_v45 = vld [vmem:[#allocation6 + $0x19b8] sm:$0xff] }
 0x4b8   :  { %7754 = vmatpush1.bf16.msra.mxu0 %v12558_v61  ;;  %v1474_v61 = vld [vmem:[#allocation6 + $0x18d0] sm:$0xff] }
 0x4b9   :  { %8082 = vmatpush1.bf16.msra.mxu1 %v12560_v63  ;;  %7755 = vmatprep.subr.bf16.mxu0 %v12567_v3  ;;  %v1478_v63 = vld [vmem:[#allocation6 + $0x18f0] sm:$0xff]  ;;  %v1475_v3 = vld [vmem:[#allocation6 + $0x18d8] sm:$0xff] }
 0x4ba   :  { %8083 = vmatprep.subr.bf16.mxu1 %v12569_v4  ;;  %v1479_v4 = vld [vmem:[#allocation6 + $0x18f8] sm:$0xff]  ;;  %v12607_v50 = vcombine.high %v1474_v61, %v1478_v63  ;;  %v12606_v9 = vcombine.low %v1474_v61, %v1478_v63 }
 0x4bb   :  { %v12609_v28 = vcombine.high %v1475_v3, %v1479_v4  ;;  %v12608_v24 = vcombine.low %v1475_v3, %v1479_v4 }
 0x4bc   :  { %7756 = vmatpush1.bf16.msra.mxu0 %v12566_v14  ;;  %v1482_v14 = vld [vmem:[#allocation6 + $0x1910] sm:$0xff] }
 0x4bd   :  { %8084 = vmatpush1.bf16.msra.mxu1 %v12568_v17  ;;  %7757 = vmatprep.subr.bf16.mxu0 %v12575_v18  ;;  %v1486_v17 = vld [vmem:[#allocation6 + $0x1930] sm:$0xff]  ;;  %v1483_v18 = vld [vmem:[#allocation6 + $0x1918] sm:$0xff] }
 0x4be   :  { %8085 = vmatprep.subr.bf16.mxu1 %v12577_v19  ;;  %v1487_v19 = vld [vmem:[#allocation6 + $0x1938] sm:$0xff]  ;;  %v12615_v26 = vcombine.high %v1482_v14, %v1486_v17  ;;  %v12614_v40 = vcombine.low %v1482_v14, %v1486_v17 }
 0x4bf   :  { %v12617_v58 = vcombine.high %v1483_v18, %v1487_v19  ;;  %v12616_v57 = vcombine.low %v1483_v18, %v1487_v19 }
 0x4c0   :  { %7758 = vmatpush1.bf16.msra.mxu0 %v12574_v39  ;;  %v1490_v39 = vld [vmem:[#allocation6 + $0x1950] sm:$0xff] }
 0x4c1   :  { %8086 = vmatpush1.bf16.msra.mxu1 %v12576_v29  ;;  %7768 = vmatprep.subr.bf16.mxu0 %v12583_v30  ;;  %v1494_v29 = vld [vmem:[#allocation6 + $0x1970] sm:$0xff]  ;;  %v1491_v30 = vld [vmem:[#allocation6 + $0x1958] sm:$0xff] }
 0x4c2   :  { %8096 = vmatprep.subr.bf16.mxu1 %v12585_v31  ;;  %v1495_v31 = vld [vmem:[#allocation6 + $0x1978] sm:$0xff]  ;;  %v12622_v59 = vcombine.low %v1490_v39, %v1494_v29 }
 0x4c3   :  { %7760 = vmatmul.mubr.bf16.vlgmr.msra.gmra.mrb[20].mxu0 %v14754_v62  ;;  %v12625_v16 = vcombine.high %v1491_v30, %v1495_v31 }
 0x4c4   :  { %8088 = vmatmul.mubr.bf16.vlgmr.msra.gmra.mrb[20].mxu1 %v14754_v62  ;;  %7769 = vmatpush1.bf16.msra.mxu0 %v12582_v32  ;;  %v12623_v32 = vcombine.high %v1490_v39, %v1494_v29 }
 0x4c5   :  { %7800 = vmatprep.mubr.bf16.mxu0 %v14758_v55  ;;  %8097 = vmatpush1.bf16.msra.mxu1 %v12584_v37  ;;  %v1502_v37 = vld [vmem:[#allocation6 + $0x19b0] sm:$0xff] }
 0x4c6   :  { %8128 = vmatprep.mubr.bf16.mxu1 %v14758_v55  ;;  %7770 = vmatprep.subr.bf16.mxu0 %v12591_v38  ;;  %v1499_v38 = vld [vmem:[#allocation6 + $0x1998] sm:$0xff]  ;;  %v12631_v51 = vcombine.high %v1498_v35, %v1502_v37  ;;  %v12630_v61 = vcombine.low %v1498_v35, %v1502_v37 }
 0x4c7   :  { %8098 = vmatprep.subr.bf16.mxu1 %v12593_v49  ;;  %v12624_v49 = vcombine.low %v1491_v30, %v1495_v31  ;;  %v12633_v36 = vcombine.high %v1499_v38, %v1503_v45  ;;  %v12632_v63 = vcombine.low %v1499_v38, %v1503_v45 }
 0x4c8   :  { %7771 = vmatpush1.bf16.msra.mxu0 %v12590_v52  ;;  %v1506_v52 = vld [vmem:[#allocation6 + $0x19d0] sm:$0xff] }
 0x4c9   :  { %8099 = vmatpush1.bf16.msra.mxu1 %v12592_v54  ;;  %7772 = vmatprep.subr.bf16.mxu0 %v12599_v20  ;;  %v1510_v54 = vld [vmem:[#allocation6 + $0x19f0] sm:$0xff]  ;;  %v1507_v20 = vld [vmem:[#allocation6 + $0x19d8] sm:$0xff] }
 0x4ca   :  { %8100 = vmatprep.subr.bf16.mxu1 %v12601_v56  ;;  %v1511_v56 = vld [vmem:[#allocation6 + $0x19f8] sm:$0xff]  ;;  %v12639_v3 = vcombine.high %v1506_v52, %v1510_v54  ;;  %v12638_v14 = vcombine.low %v1506_v52, %v1510_v54 }
 0x4cb   :  { %v12641_v4 = vcombine.high %v1507_v20, %v1511_v56  ;;  %v12640_v17 = vcombine.low %v1507_v20, %v1511_v56 }
 0x4cc   :  { %7773 = vmatpush1.bf16.msra.mxu0 %v12598_v5  ;;  %v1514_v5 = vld [vmem:[#allocation6 + $0x1a10] sm:$0xff] }
 0x4cd   :  { %8101 = vmatpush1.bf16.msra.mxu1 %v12600_v6  ;;  %7774 = vmatprep.subr.bf16.mxu0 %v12607_v50  ;;  %v1518_v6 = vld [vmem:[#allocation6 + $0x1a30] sm:$0xff]  ;;  %v1515_v50 = vld [vmem:[#allocation6 + $0x1a18] sm:$0xff] }
 0x4ce   :  { %8102 = vmatprep.subr.bf16.mxu1 %v12609_v28  ;;  %v1519_v28 = vld [vmem:[#allocation6 + $0x1a38] sm:$0xff]  ;;  %v12647_v18 = vcombine.high %v1514_v5, %v1518_v6  ;;  %v12646_v39 = vcombine.low %v1514_v5, %v1518_v6 }
 0x4cf   :  { %v12649_v19 = vcombine.high %v1515_v50, %v1519_v28  ;;  %v12648_v29 = vcombine.low %v1515_v50, %v1519_v28 }
 0x4d0   :  { %7775 = vmatpush1.bf16.msra.mxu0 %v12606_v9  ;;  %v1522_v9 = vld [vmem:[#allocation6 + $0x1a50] sm:$0xff] }
 0x4d1   :  { %8103 = vmatpush1.bf16.msra.mxu1 %v12608_v24  ;;  %7776 = vmatprep.subr.bf16.mxu0 %v12615_v26  ;;  %v1526_v24 = vld [vmem:[#allocation6 + $0x1a70] sm:$0xff]  ;;  %v1523_v26 = vld [vmem:[#allocation6 + $0x1a58] sm:$0xff] }
 0x4d2   :  { %8104 = vmatprep.subr.bf16.mxu1 %v12617_v58  ;;  %v1527_v58 = vld [vmem:[#allocation6 + $0x1a78] sm:$0xff]  ;;  %v12655_v30 = vcombine.high %v1522_v9, %v1526_v24  ;;  %v12654_v35 = vcombine.low %v1522_v9, %v1526_v24 }
 0x4d3   :  { %v12657_v31 = vcombine.high %v1523_v26, %v1527_v58  ;;  %v12656_v37 = vcombine.low %v1523_v26, %v1527_v58 }
 0x4d4   :  { %7777 = vmatpush1.bf16.msra.mxu0 %v12614_v40  ;;  %v1530_v40 = vld [vmem:[#allocation6 + $0x1a90] sm:$0xff] }
 0x4d5   :  { %8105 = vmatpush1.bf16.msra.mxu1 %v12616_v57  ;;  %7778 = vmatprep.subr.bf16.mxu0 %v12623_v32  ;;  %v1534_v57 = vld [vmem:[#allocation6 + $0x1ab0] sm:$0xff]  ;;  %v1531_v32 = vld [vmem:[#allocation6 + $0x1a98] sm:$0xff] }
 0x4d6   :  { %8106 = vmatprep.subr.bf16.mxu1 %v12625_v16  ;;  %v1535_v16 = vld [vmem:[#allocation6 + $0x1ab8] sm:$0xff]  ;;  %v12663_v38 = vcombine.high %v1530_v40, %v1534_v57  ;;  %v12662_v52 = vcombine.low %v1530_v40, %v1534_v57 }
 0x4d7   :  { %v12665_v45 = vcombine.high %v1531_v32, %v1535_v16  ;;  %v12664_v54 = vcombine.low %v1531_v32, %v1535_v16 }
 0x4d8   :  { %7779 = vmatpush1.bf16.msra.mxu0 %v12622_v59  ;;  %v1538_v59 = vld [vmem:[#allocation6 + $0x1ad0] sm:$0xff] }
 0x4d9   :  { %8107 = vmatpush1.bf16.msra.mxu1 %v12624_v49  ;;  %7780 = vmatprep.subr.bf16.mxu0 %v12631_v51  ;;  %v1542_v49 = vld [vmem:[#allocation6 + $0x1af0] sm:$0xff]  ;;  %v1539_v51 = vld [vmem:[#allocation6 + $0x1ad8] sm:$0xff] }
 0x4da   :  { %8108 = vmatprep.subr.bf16.mxu1 %v12633_v36  ;;  %v1543_v36 = vld [vmem:[#allocation6 + $0x1af8] sm:$0xff]  ;;  %v12671_v20 = vcombine.high %v1538_v59, %v1542_v49  ;;  %v12670_v5 = vcombine.low %v1538_v59, %v1542_v49 }
 0x4db   :  { %v12673_v56 = vcombine.high %v1539_v51, %v1543_v36  ;;  %v12672_v6 = vcombine.low %v1539_v51, %v1543_v36 }
 0x4dc   :  { %7781 = vmatpush1.bf16.msra.mxu0 %v12630_v61  ;;  %v1546_v61 = vld [vmem:[#allocation6 + $0x1b10] sm:$0xff] }
 0x4dd   :  { %8109 = vmatpush1.bf16.msra.mxu1 %v12632_v63  ;;  %7782 = vmatprep.subr.bf16.mxu0 %v12639_v3  ;;  %v1550_v63 = vld [vmem:[#allocation6 + $0x1b30] sm:$0xff]  ;;  %v1547_v3 = vld [vmem:[#allocation6 + $0x1b18] sm:$0xff] }
 0x4de   :  { %8110 = vmatprep.subr.bf16.mxu1 %v12641_v4  ;;  %v1551_v4 = vld [vmem:[#allocation6 + $0x1b38] sm:$0xff]  ;;  %v12679_v50 = vcombine.high %v1546_v61, %v1550_v63  ;;  %v12678_v9 = vcombine.low %v1546_v61, %v1550_v63 }
 0x4df   :  { %v12681_v28 = vcombine.high %v1547_v3, %v1551_v4  ;;  %v12680_v24 = vcombine.low %v1547_v3, %v1551_v4 }
 0x4e0   :  { %7783 = vmatpush1.bf16.msra.mxu0 %v12638_v14  ;;  %v1554_v14 = vld [vmem:[#allocation6 + $0x1b50] sm:$0xff] }
 0x4e1   :  { %8111 = vmatpush1.bf16.msra.mxu1 %v12640_v17  ;;  %7784 = vmatprep.subr.bf16.mxu0 %v12647_v18  ;;  %v1558_v17 = vld [vmem:[#allocation6 + $0x1b70] sm:$0xff]  ;;  %v1555_v18 = vld [vmem:[#allocation6 + $0x1b58] sm:$0xff] }
 0x4e2   :  { %8112 = vmatprep.subr.bf16.mxu1 %v12649_v19  ;;  %v1559_v19 = vld [vmem:[#allocation6 + $0x1b78] sm:$0xff]  ;;  %v12687_v26 = vcombine.high %v1554_v14, %v1558_v17  ;;  %v12686_v40 = vcombine.low %v1554_v14, %v1558_v17 }
 0x4e3   :  { %v12689_v58 = vcombine.high %v1555_v18, %v1559_v19  ;;  %v12688_v57 = vcombine.low %v1555_v18, %v1559_v19  ;;  %v1591_v14 = vld [vmem:[#allocation6 + $0x1c78] sm:$0xff]  ;;  %v1594_v19 = vld [vmem:[#allocation6 + $0x1c90] sm:$0xff] }
 0x4e4   :  { %7785 = vmatpush1.bf16.msra.mxu0 %v12646_v39  ;;  %v1562_v39 = vld [vmem:[#allocation6 + $0x1b90] sm:$0xff] }
 0x4e5   :  { %8113 = vmatpush1.bf16.msra.mxu1 %v12648_v29  ;;  %7786 = vmatprep.subr.bf16.mxu0 %v12655_v30  ;;  %v1566_v29 = vld [vmem:[#allocation6 + $0x1bb0] sm:$0xff]  ;;  %v1563_v30 = vld [vmem:[#allocation6 + $0x1b98] sm:$0xff] }
 0x4e6   :  { %8114 = vmatprep.subr.bf16.mxu1 %v12657_v31  ;;  %v1567_v31 = vld [vmem:[#allocation6 + $0x1bb8] sm:$0xff]  ;;  %v12695_v32 = vcombine.high %v1562_v39, %v1566_v29  ;;  %v12694_v59 = vcombine.low %v1562_v39, %v1566_v29 }
 0x4e7   :  { %v12697_v16 = vcombine.high %v1563_v30, %v1567_v31  ;;  %v12696_v49 = vcombine.low %v1563_v30, %v1567_v31 }
 0x4e8   :  { %7787 = vmatpush1.bf16.msra.mxu0 %v12654_v35  ;;  %v1570_v35 = vld [vmem:[#allocation6 + $0x1bd0] sm:$0xff] }
 0x4e9   :  { %8115 = vmatpush1.bf16.msra.mxu1 %v12656_v37  ;;  %7788 = vmatprep.subr.bf16.mxu0 %v12663_v38  ;;  %v1574_v37 = vld [vmem:[#allocation6 + $0x1bf0] sm:$0xff]  ;;  %v1571_v38 = vld [vmem:[#allocation6 + $0x1bd8] sm:$0xff] }
 0x4ea   :  { %8116 = vmatprep.subr.bf16.mxu1 %v12665_v45  ;;  %v1575_v45 = vld [vmem:[#allocation6 + $0x1bf8] sm:$0xff]  ;;  %v12703_v51 = vcombine.high %v1570_v35, %v1574_v37  ;;  %v12702_v61 = vcombine.low %v1570_v35, %v1574_v37 }
 0x4eb   :  { %v12705_v36 = vcombine.high %v1571_v38, %v1575_v45  ;;  %v12704_v63 = vcombine.low %v1571_v38, %v1575_v45 }
 0x4ec   :  { %7789 = vmatpush1.bf16.msra.mxu0 %v12662_v52  ;;  %v1578_v52 = vld [vmem:[#allocation6 + $0x1c10] sm:$0xff] }
 0x4ed   :  { %8117 = vmatpush1.bf16.msra.mxu1 %v12664_v54  ;;  %7790 = vmatprep.subr.bf16.mxu0 %v12671_v20  ;;  %v1582_v54 = vld [vmem:[#allocation6 + $0x1c30] sm:$0xff]  ;;  %v1579_v20 = vld [vmem:[#allocation6 + $0x1c18] sm:$0xff] }
 0x4ee   :  { %8118 = vmatprep.subr.bf16.mxu1 %v12673_v56  ;;  %v1583_v56 = vld [vmem:[#allocation6 + $0x1c38] sm:$0xff]  ;;  %v12711_v3 = vcombine.high %v1578_v52, %v1582_v54 }
 0x4ef   :  { %v12713_v4 = vcombine.high %v1579_v20, %v1583_v56  ;;  %v12712_v17 = vcombine.low %v1579_v20, %v1583_v56 }
 0x4f0   :  { %7791 = vmatpush1.bf16.msra.mxu0 %v12670_v5  ;;  %v1586_v5 = vld [vmem:[#allocation6 + $0x1c50] sm:$0xff] }
 0x4f1   :  { %8119 = vmatpush1.bf16.msra.mxu1 %v12672_v6  ;;  %7792 = vmatprep.subr.bf16.mxu0 %v12679_v50  ;;  %v1590_v6 = vld [vmem:[#allocation6 + $0x1c70] sm:$0xff]  ;;  %v12710_v50 = vcombine.low %v1578_v52, %v1582_v54 }
 0x4f2   :  { %8120 = vmatprep.subr.bf16.mxu1 %v12681_v28  ;;  %v1587_v28 = vld [vmem:[#allocation6 + $0x1c58] sm:$0xff]  ;;  %v12719_v18 = vcombine.high %v1586_v5, %v1590_v6  ;;  %v12718_v39 = vcombine.low %v1586_v5, %v1590_v6 }
 0x4f3   :  { %v12720_v29 = vcombine.low %v1587_v28, %v1591_v14 }
 0x4f4   :  { %7793 = vmatpush1.bf16.msra.mxu0 %v12678_v9  ;;  %v1598_v9 = vld [vmem:[#allocation6 + $0x1cb0] sm:$0xff] }
 0x4f5   :  { %8121 = vmatpush1.bf16.msra.mxu1 %v12680_v24  ;;  %7794 = vmatprep.subr.bf16.mxu0 %v12687_v26  ;;  %v12721_v24 = vcombine.high %v1587_v28, %v1591_v14  ;;  %v1595_v26 = vld [vmem:[#allocation6 + $0x1c98] sm:$0xff]  ;;  %v12727_v30 = vcombine.high %v1594_v19, %v1598_v9  ;;  %v12726_v35 = vcombine.low %v1594_v19, %v1598_v9  ;;  %v1626_v14 = vld [vmem:[#allocation6 + $0x1d90] sm:$0xff] }
 0x4f6   :  { %8122 = vmatprep.subr.bf16.mxu1 %v12689_v58  ;;  %v1599_v58 = vld [vmem:[#allocation6 + $0x1cb8] sm:$0xff] }
 0x4f7   :  { %v12729_v31 = vcombine.high %v1595_v26, %v1599_v58  ;;  %v12728_v37 = vcombine.low %v1595_v26, %v1599_v58  ;;  %v1631_v19 = vld [vmem:[#allocation6 + $0x1db8] sm:$0xff] }
 0x4f8   :  { %7795 = vmatpush1.bf16.msra.mxu0 %v12686_v40  ;;  %v1602_v40 = vld [vmem:[#allocation6 + $0x1cd0] sm:$0xff] }
 0x4f9   :  { %8123 = vmatpush1.bf16.msra.mxu1 %v12688_v57  ;;  %7796 = vmatprep.subr.bf16.mxu0 %v12695_v32  ;;  %v1606_v57 = vld [vmem:[#allocation6 + $0x1cf0] sm:$0xff]  ;;  %v1603_v32 = vld [vmem:[#allocation6 + $0x1cd8] sm:$0xff] }
 0x4fa   :  { %8124 = vmatprep.subr.bf16.mxu1 %v12697_v16  ;;  %v1607_v16 = vld [vmem:[#allocation6 + $0x1cf8] sm:$0xff]  ;;  %v12735_v38 = vcombine.high %v1602_v40, %v1606_v57  ;;  %v12734_v52 = vcombine.low %v1602_v40, %v1606_v57 }
 0x4fb   :  { %v12737_v45 = vcombine.high %v1603_v32, %v1607_v16  ;;  %v12736_v54 = vcombine.low %v1603_v32, %v1607_v16 }
 0x4fc   :  { %7797 = vmatpush1.bf16.msra.mxu0 %v12694_v59  ;;  %v1610_v59 = vld [vmem:[#allocation6 + $0x1d10] sm:$0xff] }
 0x4fd   :  { %8125 = vmatpush1.bf16.msra.mxu1 %v12696_v49  ;;  %7798 = vmatprep.subr.bf16.mxu0 %v12703_v51  ;;  %v1614_v49 = vld [vmem:[#allocation6 + $0x1d30] sm:$0xff]  ;;  %v1611_v51 = vld [vmem:[#allocation6 + $0x1d18] sm:$0xff] }
 0x4fe   :  { %8126 = vmatprep.subr.bf16.mxu1 %v12705_v36  ;;  %v1615_v36 = vld [vmem:[#allocation6 + $0x1d38] sm:$0xff]  ;;  %v12743_v20 = vcombine.high %v1610_v59, %v1614_v49  ;;  %v12742_v5 = vcombine.low %v1610_v59, %v1614_v49 }
 0x4ff   :  { %v12745_v56 = vcombine.high %v1611_v51, %v1615_v36  ;;  %v12744_v6 = vcombine.low %v1611_v51, %v1615_v36 }
 0x500   :  { %7799 = vmatpush1.bf16.msra.mxu0 %v12702_v61  ;;  %v1618_v61 = vld [vmem:[#allocation6 + $0x1d50] sm:$0xff] }
 0x501   :  { %8127 = vmatpush1.bf16.msra.mxu1 %v12704_v63  ;;  %7809 = vmatprep.subr.bf16.mxu0 %v12711_v3  ;;  %v1622_v63 = vld [vmem:[#allocation6 + $0x1d70] sm:$0xff]  ;;  %v1619_v3 = vld [vmem:[#allocation6 + $0x1d58] sm:$0xff] }
 0x502   :  { %8137 = vmatprep.subr.bf16.mxu1 %v12713_v4  ;;  %v1623_v4 = vld [vmem:[#allocation6 + $0x1d78] sm:$0xff]  ;;  %v12750_v9 = vcombine.low %v1618_v61, %v1622_v63 }
 0x503   :  { %7801 = vmatmul.mubr.bf16.vlgmr.msra.gmra.mrb[20].mxu0 %v14766_v10  ;;  %v12753_v28 = vcombine.high %v1619_v3, %v1623_v4 }
 0x504   :  { %8129 = vmatmul.mubr.bf16.vlgmr.msra.gmra.mrb[20].mxu1 %v14766_v10  ;;  %7810 = vmatpush1.bf16.msra.mxu0 %v12710_v50  ;;  %v12751_v50 = vcombine.high %v1618_v61, %v1622_v63 }
 0x505   :  { %7841 = vmatprep.mubr.bf16.mxu0 %v14770_v15  ;;  %8138 = vmatpush1.bf16.msra.mxu1 %v12712_v17  ;;  %v1630_v17 = vld [vmem:[#allocation6 + $0x1db0] sm:$0xff] }
 0x506   :  { %8169 = vmatprep.mubr.bf16.mxu1 %v14770_v15  ;;  %7811 = vmatprep.subr.bf16.mxu0 %v12719_v18  ;;  %v1627_v18 = vld [vmem:[#allocation6 + $0x1d98] sm:$0xff]  ;;  %v12759_v26 = vcombine.high %v1626_v14, %v1630_v17  ;;  %v12758_v40 = vcombine.low %v1626_v14, %v1630_v17 }
 0x507   :  { %8139 = vmatprep.subr.bf16.mxu1 %v12721_v24  ;;  %v12752_v24 = vcombine.low %v1619_v3, %v1623_v4  ;;  %v12761_v58 = vcombine.high %v1627_v18, %v1631_v19  ;;  %v12760_v57 = vcombine.low %v1627_v18, %v1631_v19 }
 0x508   :  { %7812 = vmatpush1.bf16.msra.mxu0 %v12718_v39  ;;  %v1634_v39 = vld [vmem:[#allocation6 + $0x1dd0] sm:$0xff] }
 0x509   :  { %8140 = vmatpush1.bf16.msra.mxu1 %v12720_v29  ;;  %7813 = vmatprep.subr.bf16.mxu0 %v12727_v30  ;;  %v1638_v29 = vld [vmem:[#allocation6 + $0x1df0] sm:$0xff]  ;;  %v1635_v30 = vld [vmem:[#allocation6 + $0x1dd8] sm:$0xff] }
 0x50a   :  { %8141 = vmatprep.subr.bf16.mxu1 %v12729_v31  ;;  %v1639_v31 = vld [vmem:[#allocation6 + $0x1df8] sm:$0xff]  ;;  %v12767_v32 = vcombine.high %v1634_v39, %v1638_v29  ;;  %v12766_v59 = vcombine.low %v1634_v39, %v1638_v29 }
 0x50b   :  { %v12769_v16 = vcombine.high %v1635_v30, %v1639_v31  ;;  %v12768_v49 = vcombine.low %v1635_v30, %v1639_v31 }
 0x50c   :  { %7814 = vmatpush1.bf16.msra.mxu0 %v12726_v35  ;;  %v1642_v35 = vld [vmem:[#allocation6 + $0x1e10] sm:$0xff] }
 0x50d   :  { %8142 = vmatpush1.bf16.msra.mxu1 %v12728_v37  ;;  %7815 = vmatprep.subr.bf16.mxu0 %v12735_v38  ;;  %v1646_v37 = vld [vmem:[#allocation6 + $0x1e30] sm:$0xff]  ;;  %v1643_v38 = vld [vmem:[#allocation6 + $0x1e18] sm:$0xff] }
 0x50e   :  { %8143 = vmatprep.subr.bf16.mxu1 %v12737_v45  ;;  %v1647_v45 = vld [vmem:[#allocation6 + $0x1e38] sm:$0xff]  ;;  %v12775_v51 = vcombine.high %v1642_v35, %v1646_v37  ;;  %v12774_v61 = vcombine.low %v1642_v35, %v1646_v37 }
 0x50f   :  { %v12777_v36 = vcombine.high %v1643_v38, %v1647_v45  ;;  %v12776_v63 = vcombine.low %v1643_v38, %v1647_v45 }
 0x510   :  { %7816 = vmatpush1.bf16.msra.mxu0 %v12734_v52  ;;  %v1650_v52 = vld [vmem:[#allocation6 + $0x1e50] sm:$0xff] }
 0x511   :  { %8144 = vmatpush1.bf16.msra.mxu1 %v12736_v54  ;;  %7817 = vmatprep.subr.bf16.mxu0 %v12743_v20  ;;  %v1654_v54 = vld [vmem:[#allocation6 + $0x1e70] sm:$0xff]  ;;  %v1651_v20 = vld [vmem:[#allocation6 + $0x1e58] sm:$0xff] }
 0x512   :  { %8145 = vmatprep.subr.bf16.mxu1 %v12745_v56  ;;  %v1655_v56 = vld [vmem:[#allocation6 + $0x1e78] sm:$0xff]  ;;  %v12783_v3 = vcombine.high %v1650_v52, %v1654_v54  ;;  %v12782_v14 = vcombine.low %v1650_v52, %v1654_v54 }
 0x513   :  { %v12785_v4 = vcombine.high %v1651_v20, %v1655_v56  ;;  %v12784_v17 = vcombine.low %v1651_v20, %v1655_v56 }
 0x514   :  { %7818 = vmatpush1.bf16.msra.mxu0 %v12742_v5  ;;  %v1658_v5 = vld [vmem:[#allocation6 + $0x1e90] sm:$0xff] }
 0x515   :  { %8146 = vmatpush1.bf16.msra.mxu1 %v12744_v6  ;;  %7819 = vmatprep.subr.bf16.mxu0 %v12751_v50  ;;  %v1662_v6 = vld [vmem:[#allocation6 + $0x1eb0] sm:$0xff]  ;;  %v1659_v50 = vld [vmem:[#allocation6 + $0x1e98] sm:$0xff] }
 0x516   :  { %8147 = vmatprep.subr.bf16.mxu1 %v12753_v28  ;;  %v1663_v28 = vld [vmem:[#allocation6 + $0x1eb8] sm:$0xff]  ;;  %v12791_v18 = vcombine.high %v1658_v5, %v1662_v6  ;;  %v12790_v39 = vcombine.low %v1658_v5, %v1662_v6  ;;  %v14820_v5 = vld [vmem:[#allocation7] sm:$0xff] }
 0x517   :  { %v12793_v19 = vcombine.high %v1659_v50, %v1663_v28  ;;  %v12792_v29 = vcombine.low %v1659_v50, %v1663_v28 }
 0x518   :  { %7820 = vmatpush1.bf16.msra.mxu0 %v12750_v9  ;;  %v1666_v9 = vld [vmem:[#allocation6 + $0x1ed0] sm:$0xff] }
 0x519   :  { %8148 = vmatpush1.bf16.msra.mxu1 %v12752_v24  ;;  %7821 = vmatprep.subr.bf16.mxu0 %v12759_v26  ;;  %v1670_v24 = vld [vmem:[#allocation6 + $0x1ef0] sm:$0xff]  ;;  %v1667_v26 = vld [vmem:[#allocation6 + $0x1ed8] sm:$0xff] }
 0x51a   :  { %8149 = vmatprep.subr.bf16.mxu1 %v12761_v58  ;;  %v1671_v58 = vld [vmem:[#allocation6 + $0x1ef8] sm:$0xff]  ;;  %v12799_v30 = vcombine.high %v1666_v9, %v1670_v24  ;;  %v12798_v35 = vcombine.low %v1666_v9, %v1670_v24 }
 0x51b   :  { %v12801_v31 = vcombine.high %v1667_v26, %v1671_v58  ;;  %v12800_v37 = vcombine.low %v1667_v26, %v1671_v58  ;;  %v1699_v9 = vld [vmem:[#allocation6 + $0x1fd8] sm:$0xff] }
 0x51c   :  { %7822 = vmatpush1.bf16.msra.mxu0 %v12758_v40  ;;  %v1674_v40 = vld [vmem:[#allocation6 + $0x1f10] sm:$0xff]  ;;  %v1703_v24 = vld [vmem:[#allocation6 + $0x1ff8] sm:$0xff] }
 0x51d   :  { %8150 = vmatpush1.bf16.msra.mxu1 %v12760_v57  ;;  %7823 = vmatprep.subr.bf16.mxu0 %v12767_v32  ;;  %v1678_v57 = vld [vmem:[#allocation6 + $0x1f30] sm:$0xff]  ;;  %v1675_v32 = vld [vmem:[#allocation6 + $0x1f18] sm:$0xff] }
 0x51e   :  { %8151 = vmatprep.subr.bf16.mxu1 %v12769_v16  ;;  %v1679_v16 = vld [vmem:[#allocation6 + $0x1f38] sm:$0xff]  ;;  %v12807_v38 = vcombine.high %v1674_v40, %v1678_v57  ;;  %v12806_v52 = vcombine.low %v1674_v40, %v1678_v57  ;;  %v12832_v40 = vcombine.low %v1699_v9, %v1703_v24 }
 0x51f   :  { %v12809_v45 = vcombine.high %v1675_v32, %v1679_v16  ;;  %v12808_v54 = vcombine.low %v1675_v32, %v1679_v16  ;;  %v13638_v57 = vld [vmem:[#allocation9 + $0x4] ss:$16 sps:$4 sm:$0xff]   ;;  %v13641_v32 = vld [vmem:[#allocation9 + $0xc] ss:$16 sps:$4 sm:$0xff]  }
 0x520   :  { %7824 = vmatpush1.bf16.msra.mxu0 %v12766_v59  ;;  %v1682_v59 = vld [vmem:[#allocation6 + $0x1f50] sm:$0xff] }
 0x521   :  { %8152 = vmatpush1.bf16.msra.mxu1 %v12768_v49  ;;  %7825 = vmatprep.subr.bf16.mxu0 %v12775_v51  ;;  %v1686_v49 = vld [vmem:[#allocation6 + $0x1f70] sm:$0xff]  ;;  %v1683_v51 = vld [vmem:[#allocation6 + $0x1f58] sm:$0xff] }
 0x522   :  { %8153 = vmatprep.subr.bf16.mxu1 %v12777_v36  ;;  %v1687_v36 = vld [vmem:[#allocation6 + $0x1f78] sm:$0xff]  ;;  %v12815_v20 = vcombine.high %v1682_v59, %v1686_v49  ;;  %v12814_v6 = vcombine.low %v1682_v59, %v1686_v49  ;;  %v13645_v49 = vld [vmem:[#allocation9 + $0x28] ss:$16 sps:$4 sm:$0xff]  }
 0x523   :  { %v12817_v56 = vcombine.high %v1683_v51, %v1687_v36  ;;  %v12816_v50 = vcombine.low %v1683_v51, %v1687_v36  ;;  %v13642_v59 = vld [vmem:[#allocation9 + $0x20] ss:$16 sps:$4 sm:$0xff]   ;;  %v13650_v51 = vld [vmem:[#allocation9 + $0x44] ss:$16 sps:$4 sm:$0xff]   ;;  %v13653_v36 = vld [vmem:[#allocation9 + $0x4c] ss:$16 sps:$4 sm:$0xff]  }
 0x524   :  { %7826 = vmatpush1.bf16.msra.mxu0 %v12774_v61  ;;  %v1690_v61 = vld [vmem:[#allocation6 + $0x1f90] sm:$0xff] }
 0x525   :  { %8154 = vmatpush1.bf16.msra.mxu1 %v12776_v63  ;;  %7827 = vmatprep.subr.bf16.mxu0 %v12783_v3  ;;  %v1694_v63 = vld [vmem:[#allocation6 + $0x1fb0] sm:$0xff]  ;;  %v1691_v3 = vld [vmem:[#allocation6 + $0x1f98] sm:$0xff] }
 0x526   :  { %8155 = vmatprep.subr.bf16.mxu1 %v12785_v4  ;;  %v1695_v4 = vld [vmem:[#allocation6 + $0x1fb8] sm:$0xff]  ;;  %v12823_v28 = vcombine.high %v1690_v61, %v1694_v63  ;;  %v12822_v26 = vcombine.low %v1690_v61, %v1694_v63  ;;  %v13657_v63 = vld [vmem:[#allocation9 + $0x68] ss:$16 sps:$4 sm:$0xff]  }
 0x527   :  { %v12824_v58 = vcombine.low %v1691_v3, %v1695_v4  ;;  %v13654_v61 = vld [vmem:[#allocation9 + $0x60] ss:$16 sps:$4 sm:$0xff]  }
 0x528   :  { %7828 = vmatpush1.bf16.msra.mxu0 %v12782_v14  ;;  %v12825_v14 = vcombine.high %v1691_v3, %v1695_v4  ;;  %v13662_v3 = vld [vmem:[#allocation9 + $0x84] ss:$16 sps:$4 sm:$0xff]   ;;  %v13665_v4 = vld [vmem:[#allocation9 + $0x8c] ss:$16 sps:$4 sm:$0xff]  }
 0x529   :  { %8156 = vmatpush1.bf16.msra.mxu1 %v12784_v17  ;;  %7829 = vmatprep.subr.bf16.mxu0 %v12791_v18  ;;  %v1698_v17 = vld [vmem:[#allocation6 + $0x1fd0] sm:$0xff] }
 0x52a   :  { %8157 = vmatprep.subr.bf16.mxu1 %v12793_v19  ;;  %v1702_v18 = vld [vmem:[#allocation6 + $0x1ff0] sm:$0xff]  ;;  %v1713_v19 = vrot.slane %v14820_v5, %v14615_v47 }
 0x52c   :  { %7830 = vmatpush1.bf16.msra.mxu0 %v12790_v39  ;;  %v12831_v39 = vcombine.high %v1698_v17, %v1702_v18 }
 0x52d   :  { %8158 = vmatpush1.bf16.msra.mxu1 %v12792_v29  ;;  %7831 = vmatprep.subr.bf16.mxu0 %v12799_v30  ;;  %v12833_v29 = vcombine.high %v1699_v9, %v1703_v24  ;;  %v13472_v30 = vadd.f32 %v14800_v21, %v1713_v19  ;;  %v13647_v21 = vld [vmem:[#allocation9 + $0x2c] ss:$16 sps:$4 sm:$0xff]   ;;  %v13674_v19 = vld [vmem:[#allocation9 + $0xc4] ss:$16 sps:$4 sm:$0xff]   ;;  %v13672_v24 = vld [vmem:[#allocation9 + $0xc0] ss:$16 sps:$4 sm:$0xff]  }
 0x52e   :  { %8159 = vmatprep.subr.bf16.mxu1 %v12801_v31  ;;  %v12830_v31 = vcombine.low %v1698_v17, %v1702_v18  ;;  %v13666_v17 = vld [vmem:[#allocation9 + $0xa0] ss:$16 sps:$4 sm:$0xff]   ;;  %v13669_v18 = vld [vmem:[#allocation9 + $0xa8] ss:$16 sps:$4 sm:$0xff]   ;;  %v13677_v9 = vld [vmem:[#allocation9 + $0xcc] ss:$16 sps:$4 sm:$0xff]  }
 0x52f   :  { %v8179_v16 = vmax.f32 %v13472_v30, 0.0  ;;  %v13681_v30 = vld [vmem:[#allocation9 + $0xe8] ss:$16 sps:$4 sm:$0xff]  }
 0x530   :  { %7832 = vmatpush1.bf16.msra.mxu0 %v12798_v35  ;;  %v13636_v35 = vld [vmem:[#allocation9] ss:$16 sps:$4 sm:$0xff]  }
 0x531   :  { %8160 = vmatpush1.bf16.msra.mxu1 %v12800_v37  ;;  %7833 = vmatprep.subr.bf16.mxu0 %v12807_v38  ;;  %v13639_v37 = vld [vmem:[#allocation9 + $0x8] ss:$16 sps:$4 sm:$0xff]   ;;  %v13644_v38 = vld [vmem:[#allocation9 + $0x24] ss:$16 sps:$4 sm:$0xff]  }
 0x532   :  { %8161 = vmatprep.subr.bf16.mxu1 %v12809_v45  ;;  %v8187_v45 = vpack.c.bf16 %v8179_v16, %v8179_v16  ;;  %v13692_v16 = vld [vmem:[#allocation9 + $0x124] ss:$16 sps:$4 sm:$0xff]  }
 0x534   :  { %7834 = vmatpush1.bf16.msra.mxu0 %v12806_v52  ;;  %v13648_v52 = vld [vmem:[#allocation9 + $0x40] ss:$16 sps:$4 sm:$0xff]  }
 0x535   :  { %8162 = vmatpush1.bf16.msra.mxu1 %v12808_v54  ;;  %7835 = vmatprep.subr.bf16.mxu0 %v12815_v20  ;;  %v13651_v54 = vld [vmem:[#allocation9 + $0x48] ss:$16 sps:$4 sm:$0xff]   ;;  %v13656_v20 = vld [vmem:[#allocation9 + $0x64] ss:$16 sps:$4 sm:$0xff]  }
 0x536   :  { %8163 = vmatprep.subr.bf16.mxu1 %v12817_v56  ;;  %v13659_v56 = vld [vmem:[#allocation9 + $0x6c] ss:$16 sps:$4 sm:$0xff]  }
 0x538   :  { %7836 = vmatpush1.bf16.msra.mxu0 %v12814_v6  ;;  %v13660_v6 = vld [vmem:[#allocation9 + $0x80] ss:$16 sps:$4 sm:$0xff]  }
 0x539   :  { %8164 = vmatpush1.bf16.msra.mxu1 %v12816_v50  ;;  %7837 = vmatprep.subr.bf16.mxu0 %v12823_v28  ;;  %v13663_v50 = vld [vmem:[#allocation9 + $0x88] ss:$16 sps:$4 sm:$0xff]   ;;  %v13668_v28 = vld [vmem:[#allocation9 + $0xa4] ss:$16 sps:$4 sm:$0xff]  }
 0x53a   :  { %8165 = vmatprep.subr.bf16.mxu1 %v12825_v14  ;;  %v13671_v14 = vld [vmem:[#allocation9 + $0xac] ss:$16 sps:$4 sm:$0xff]  }
 0x53c   :  { %7838 = vmatpush1.bf16.msra.mxu0 %v12822_v26  ;;  %v13675_v26 = vld [vmem:[#allocation9 + $0xc8] ss:$16 sps:$4 sm:$0xff]  }
 0x53d   :  { %8166 = vmatpush1.bf16.msra.mxu1 %v12824_v58  ;;  %7839 = vmatprep.subr.bf16.mxu0 %v12831_v39  ;;  %v13680_v58 = vld [vmem:[#allocation9 + $0xe4] ss:$16 sps:$4 sm:$0xff]   ;;  %v13683_v39 = vld [vmem:[#allocation9 + $0xec] ss:$16 sps:$4 sm:$0xff]  }
 0x53e   :  { %8167 = vmatprep.subr.bf16.mxu1 %v12833_v29  ;;  %v13678_v29 = vld [vmem:[#allocation9 + $0xe0] ss:$16 sps:$4 sm:$0xff]  }
 0x540   :  { %7840 = vmatpush1.bf16.msra.mxu0 %v12830_v31  ;;  %v13686_v31 = vld [vmem:[#allocation9 + $0x104] ss:$16 sps:$4 sm:$0xff]  }
 0x541   :  { %8168 = vmatpush1.bf16.msra.mxu1 %v12832_v40  ;;  %9752 = vmatprep.subr.bf16.mxu0 %v13638_v57  ;;  %v13689_v40 = vld [vmem:[#allocation9 + $0x10c] ss:$16 sps:$4 sm:$0xff]   ;;  %v13684_v57 = vld [vmem:[#allocation9 + $0x100] ss:$16 sps:$4 sm:$0xff]  }
 0x542   :  { %9916 = vmatprep.subr.bf16.mxu1 %v13641_v32  ;;  %v13687_v32 = vld [vmem:[#allocation9 + $0x108] ss:$16 sps:$4 sm:$0xff]  }
 0x543   :  { %7842 = vmatmul.mubr.bf16.vlgmr.msra.gmra.mrb[20].mxu0 %v14778_v23 }
 0x544   :  { %8170 = vmatmul.mubr.bf16.vlgmr.msra.gmra.mrb[20].mxu1 %v14778_v23  ;;  %9753 = vmatpush1.bf16.msra.mxu0 %v13636_v35  ;;  %v13695_v35 = vld [vmem:[#allocation9 + $0x12c] ss:$16 sps:$4 sm:$0xff]  }
 0x545   :  { %9784 = vmatprep.mubr.bf16.mxu0 %v8187_v45  ;;  %9917 = vmatpush1.bf16.msra.mxu1 %v13639_v37  ;;  %v13690_v37 = vld [vmem:[#allocation9 + $0x120] ss:$16 sps:$4 sm:$0xff]  }
 0x546   :  { %9948 = vmatprep.mubr.bf16.mxu1 %v8187_v45  ;;  %9754 = vmatprep.subr.bf16.mxu0 %v13644_v38  ;;  %v13693_v38 = vld [vmem:[#allocation9 + $0x128] ss:$16 sps:$4 sm:$0xff]   ;;  %v13698_v45 = vld [vmem:[#allocation9 + $0x144] ss:$16 sps:$4 sm:$0xff]  }
 0x547   :  { %9918 = vmatprep.subr.bf16.mxu1 %v13647_v21  ;;  %v13701_v21 = vld [vmem:[#allocation9 + $0x14c] ss:$16 sps:$4 sm:$0xff]  }
 0x548   :  { %9755 = vmatpush1.bf16.msra.mxu0 %v13642_v59  ;;  %v13696_v59 = vld [vmem:[#allocation9 + $0x140] ss:$16 sps:$4 sm:$0xff]  }
 0x549   :  { %9919 = vmatpush1.bf16.msra.mxu1 %v13645_v49  ;;  %9756 = vmatprep.subr.bf16.mxu0 %v13650_v51  ;;  %v13699_v49 = vld [vmem:[#allocation9 + $0x148] ss:$16 sps:$4 sm:$0xff]   ;;  %v13704_v51 = vld [vmem:[#allocation9 + $0x164] ss:$16 sps:$4 sm:$0xff]  }
 0x54a   :  { %9920 = vmatprep.subr.bf16.mxu1 %v13653_v36  ;;  %v13707_v36 = vld [vmem:[#allocation9 + $0x16c] ss:$16 sps:$4 sm:$0xff]  }
 0x54c   :  { %9757 = vmatpush1.bf16.msra.mxu0 %v13648_v52  ;;  %v13702_v52 = vld [vmem:[#allocation9 + $0x160] ss:$16 sps:$4 sm:$0xff]  }
 0x54d   :  { %9921 = vmatpush1.bf16.msra.mxu1 %v13651_v54  ;;  %9758 = vmatprep.subr.bf16.mxu0 %v13656_v20  ;;  %v13705_v54 = vld [vmem:[#allocation9 + $0x168] ss:$16 sps:$4 sm:$0xff]   ;;  %v13710_v20 = vld [vmem:[#allocation9 + $0x184] ss:$16 sps:$4 sm:$0xff]  }
 0x54e   :  { %9922 = vmatprep.subr.bf16.mxu1 %v13659_v56  ;;  %v13713_v56 = vld [vmem:[#allocation9 + $0x18c] ss:$16 sps:$4 sm:$0xff]  }
 0x550   :  { %9759 = vmatpush1.bf16.msra.mxu0 %v13654_v61  ;;  %v13708_v61 = vld [vmem:[#allocation9 + $0x180] ss:$16 sps:$4 sm:$0xff]  }
 0x551   :  { %9923 = vmatpush1.bf16.msra.mxu1 %v13657_v63  ;;  %9760 = vmatprep.subr.bf16.mxu0 %v13662_v3  ;;  %v13711_v63 = vld [vmem:[#allocation9 + $0x188] ss:$16 sps:$4 sm:$0xff]   ;;  %v13716_v3 = vld [vmem:[#allocation9 + $0x1a4] ss:$16 sps:$4 sm:$0xff]  }
 0x552   :  { %9924 = vmatprep.subr.bf16.mxu1 %v13665_v4  ;;  %v13719_v4 = vld [vmem:[#allocation9 + $0x1ac] ss:$16 sps:$4 sm:$0xff]  }
 0x554   :  { %9761 = vmatpush1.bf16.msra.mxu0 %v13660_v6  ;;  %v13714_v6 = vld [vmem:[#allocation9 + $0x1a0] ss:$16 sps:$4 sm:$0xff]  }
 0x555   :  { %9925 = vmatpush1.bf16.msra.mxu1 %v13663_v50  ;;  %9762 = vmatprep.subr.bf16.mxu0 %v13668_v28  ;;  %v1709_v50 = vrot.slane %v14820_v5, %v14612_v46  ;;  %v13717_v28 = vld [vmem:[#allocation9 + $0x1a8] ss:$16 sps:$4 sm:$0xff]  }
 0x556   :  { %9926 = vmatprep.subr.bf16.mxu1 %v13671_v14  ;;  %v13722_v14 = vld [vmem:[#allocation9 + $0x1c4] ss:$16 sps:$4 sm:$0xff]  }
 0x558   :  { %9763 = vmatpush1.bf16.msra.mxu0 %v13666_v17  ;;  %v13725_v17 = vld [vmem:[#allocation9 + $0x1cc] ss:$16 sps:$4 sm:$0xff]  }
 0x559   :  { %9927 = vmatpush1.bf16.msra.mxu1 %v13669_v18  ;;  %9764 = vmatprep.subr.bf16.mxu0 %v13674_v19  ;;  %v1721_v18 = vrot.slane %v14820_v5, %v14618_v48  ;;  %v13720_v19 = vld [vmem:[#allocation9 + $0x1c0] ss:$16 sps:$4 sm:$0xff]  }
 0x55a   :  { %9928 = vmatprep.subr.bf16.mxu1 %v13677_v9  ;;  %v13471_v9 = vadd.f32 %v14796_v22, %v1709_v50  ;;  %v13732_v22 = vld [vmem:[#allocation9 + $0x200] ss:$16 sps:$4 sm:$0xff]   ;;  %v13767_v50 = vld [vmem:[#allocation9 + $0x2ac] ss:$16 sps:$4 sm:$0xff]  }
 0x55c   :  { %9765 = vmatpush1.bf16.msra.mxu0 %v13672_v24  ;;  %v13723_v24 = vld [vmem:[#allocation9 + $0x1c8] ss:$16 sps:$4 sm:$0xff]  }
 0x55d   :  { %9929 = vmatpush1.bf16.msra.mxu1 %v13675_v26  ;;  %9766 = vmatprep.subr.bf16.mxu0 %v13680_v58  ;;  %v13728_v26 = vld [vmem:[#allocation9 + $0x1e4] ss:$16 sps:$4 sm:$0xff]   ;;  %v13731_v58 = vld [vmem:[#allocation9 + $0x1ec] ss:$16 sps:$4 sm:$0xff]  }
 0x55e   :  { %9930 = vmatprep.subr.bf16.mxu1 %v13683_v39  ;;  %v13474_v39 = vadd.f32 %v14802_v13, %v1721_v18  ;;  %v13743_v13 = vld [vmem:[#allocation9 + $0x22c] ss:$16 sps:$4 sm:$0xff]  }
 0x55f   :  { %v13773_v18 = vld [vmem:[#allocation9 + $0x2cc] ss:$16 sps:$4 sm:$0xff]  }
 0x560   :  { %9767 = vmatpush1.bf16.msra.mxu0 %v13678_v29  ;;  %v13726_v29 = vld [vmem:[#allocation9 + $0x1e0] ss:$16 sps:$4 sm:$0xff]  }
 0x561   :  { %9931 = vmatpush1.bf16.msra.mxu1 %v13681_v30  ;;  %9768 = vmatprep.subr.bf16.mxu0 %v13686_v31  ;;  %v8178_v30 = vmax.f32 %v13471_v9, 0.0  ;;  %v13729_v31 = vld [vmem:[#allocation9 + $0x1e8] ss:$16 sps:$4 sm:$0xff]  }
 0x562   :  { %9932 = vmatprep.subr.bf16.mxu1 %v13689_v40  ;;  %v13734_v40 = vld [vmem:[#allocation9 + $0x204] ss:$16 sps:$4 sm:$0xff]   ;;  %v13771_v9 = vld [vmem:[#allocation9 + $0x2c8] ss:$16 sps:$4 sm:$0xff]  }
 0x564   :  { %9769 = vmatpush1.bf16.msra.mxu0 %v13684_v57  ;;  %v13737_v57 = vld [vmem:[#allocation9 + $0x20c] ss:$16 sps:$4 sm:$0xff]  }
 0x565   :  { %9933 = vmatpush1.bf16.msra.mxu1 %v13687_v32  ;;  %9770 = vmatprep.subr.bf16.mxu0 %v13692_v16  ;;  %v8181_v32 = vmax.f32 %v13474_v39, 0.0  ;;  %v8186_v16 = vpack.c.bf16 %v8178_v30, %v8178_v30  ;;  %v13777_v39 = vld [vmem:[#allocation9 + $0x2e8] ss:$16 sps:$4 sm:$0xff]   ;;  %v13785_v30 = vld [vmem:[#allocation9 + $0x30c] ss:$16 sps:$4 sm:$0xff]  }
 0x566   :  { %9934 = vmatprep.subr.bf16.mxu1 %v13695_v35  ;;  %v13735_v35 = vld [vmem:[#allocation9 + $0x208] ss:$16 sps:$4 sm:$0xff]  }
 0x568   :  { %9771 = vmatpush1.bf16.msra.mxu0 %v13690_v37  ;;  %v13740_v37 = vld [vmem:[#allocation9 + $0x224] ss:$16 sps:$4 sm:$0xff]  }
 0x569   :  { %9935 = vmatpush1.bf16.msra.mxu1 %v13693_v38  ;;  %9772 = vmatprep.subr.bf16.mxu0 %v13698_v45  ;;  %v8189_v38 = vpack.c.bf16 %v8181_v32, %v8181_v32  ;;  %v13738_v45 = vld [vmem:[#allocation9 + $0x220] ss:$16 sps:$4 sm:$0xff]   ;;  %v13791_v32 = vld [vmem:[#allocation9 + $0x32c] ss:$16 sps:$4 sm:$0xff]  }
 0x56a   :  { %9936 = vmatprep.subr.bf16.mxu1 %v13701_v21  ;;  %v13741_v21 = vld [vmem:[#allocation9 + $0x228] ss:$16 sps:$4 sm:$0xff]  }
 0x56c   :  { %9773 = vmatpush1.bf16.msra.mxu0 %v13696_v59  ;;  %v13746_v59 = vld [vmem:[#allocation9 + $0x244] ss:$16 sps:$4 sm:$0xff]  }
 0x56d   :  { %9937 = vmatpush1.bf16.msra.mxu1 %v13699_v49  ;;  %9774 = vmatprep.subr.bf16.mxu0 %v13704_v51  ;;  %v13749_v49 = vld [vmem:[#allocation9 + $0x24c] ss:$16 sps:$4 sm:$0xff]   ;;  %v13744_v51 = vld [vmem:[#allocation9 + $0x240] ss:$16 sps:$4 sm:$0xff]  }
 0x56e   :  { %9938 = vmatprep.subr.bf16.mxu1 %v13707_v36  ;;  %v13747_v36 = vld [vmem:[#allocation9 + $0x248] ss:$16 sps:$4 sm:$0xff]  }
 0x570   :  { %9775 = vmatpush1.bf16.msra.mxu0 %v13702_v52  ;;  %v13752_v52 = vld [vmem:[#allocation9 + $0x264] ss:$16 sps:$4 sm:$0xff]  }
 0x571   :  { %9939 = vmatpush1.bf16.msra.mxu1 %v13705_v54  ;;  %9776 = vmatprep.subr.bf16.mxu0 %v13710_v20  ;;  %v13755_v54 = vld [vmem:[#allocation9 + $0x26c] ss:$16 sps:$4 sm:$0xff]   ;;  %v13750_v20 = vld [vmem:[#allocation9 + $0x260] ss:$16 sps:$4 sm:$0xff]  }
 0x572   :  { %9940 = vmatprep.subr.bf16.mxu1 %v13713_v56  ;;  %v13753_v56 = vld [vmem:[#allocation9 + $0x268] ss:$16 sps:$4 sm:$0xff]  }
 0x574   :  { %9777 = vmatpush1.bf16.msra.mxu0 %v13708_v61  ;;  %v13758_v61 = vld [vmem:[#allocation9 + $0x284] ss:$16 sps:$4 sm:$0xff]  }
 0x575   :  { %9941 = vmatpush1.bf16.msra.mxu1 %v13711_v63  ;;  %9778 = vmatprep.subr.bf16.mxu0 %v13716_v3  ;;  %v13761_v63 = vld [vmem:[#allocation9 + $0x28c] ss:$16 sps:$4 sm:$0xff]   ;;  %v13756_v3 = vld [vmem:[#allocation9 + $0x280] ss:$16 sps:$4 sm:$0xff]  }
 0x576   :  { %9942 = vmatprep.subr.bf16.mxu1 %v13719_v4  ;;  %v13759_v4 = vld [vmem:[#allocation9 + $0x288] ss:$16 sps:$4 sm:$0xff]  }
 0x578   :  { %9779 = vmatpush1.bf16.msra.mxu0 %v13714_v6  ;;  %v13764_v6 = vld [vmem:[#allocation9 + $0x2a4] ss:$16 sps:$4 sm:$0xff]  }
 0x579   :  { %9943 = vmatpush1.bf16.msra.mxu1 %v13717_v28  ;;  %9780 = vmatprep.subr.bf16.mxu0 %v13722_v14  ;;  %v13762_v28 = vld [vmem:[#allocation9 + $0x2a0] ss:$16 sps:$4 sm:$0xff]   ;;  %v13765_v14 = vld [vmem:[#allocation9 + $0x2a8] ss:$16 sps:$4 sm:$0xff]  }
 0x57a   :  { %9944 = vmatprep.subr.bf16.mxu1 %v13725_v17  ;;  %v13770_v17 = vld [vmem:[#allocation9 + $0x2c4] ss:$16 sps:$4 sm:$0xff]  }
 0x57c   :  { %9781 = vmatpush1.bf16.msra.mxu0 %v13720_v19  ;;  %v13768_v19 = vld [vmem:[#allocation9 + $0x2c0] ss:$16 sps:$4 sm:$0xff]  }
 0x57d   :  { %9945 = vmatpush1.bf16.msra.mxu1 %v13723_v24  ;;  %9782 = vmatprep.subr.bf16.mxu0 %v13728_v26  ;;  %v13776_v24 = vld [vmem:[#allocation9 + $0x2e4] ss:$16 sps:$4 sm:$0xff]   ;;  %v13779_v26 = vld [vmem:[#allocation9 + $0x2ec] ss:$16 sps:$4 sm:$0xff]  }
 0x57e   :  { %9946 = vmatprep.subr.bf16.mxu1 %v13731_v58  ;;  %v13774_v58 = vld [vmem:[#allocation9 + $0x2e0] ss:$16 sps:$4 sm:$0xff]  }
 0x580   :  { %9783 = vmatpush1.bf16.msra.mxu0 %v13726_v29  ;;  %v13782_v29 = vld [vmem:[#allocation9 + $0x304] ss:$16 sps:$4 sm:$0xff]  }
 0x581   :  { %9947 = vmatpush1.bf16.msra.mxu1 %v13729_v31  ;;  %9793 = vmatprep.subr.bf16.mxu0 %v13734_v40  ;;  %v13780_v31 = vld [vmem:[#allocation9 + $0x300] ss:$16 sps:$4 sm:$0xff]   ;;  %v13783_v40 = vld [vmem:[#allocation9 + $0x308] ss:$16 sps:$4 sm:$0xff]  }
 0x582   :  { %9957 = vmatprep.subr.bf16.mxu1 %v13737_v57  ;;  %v13788_v57 = vld [vmem:[#allocation9 + $0x324] ss:$16 sps:$4 sm:$0xff]  }
 0x583   :  { %9785 = vmatmul.mubr.bf16.vlgmr.msra.gmra.mrb[24].mxu0 %v8186_v16 }
 0x584   :  { %9949 = vmatmul.mubr.bf16.vlgmr.msra.gmra.mrb[24].mxu1 %v8186_v16  ;;  %9794 = vmatpush1.bf16.msra.mxu0 %v13732_v22  ;;  %v13786_v22 = vld [vmem:[#allocation9 + $0x320] ss:$16 sps:$4 sm:$0xff]   ;;  %v13789_v16 = vld [vmem:[#allocation9 + $0x328] ss:$16 sps:$4 sm:$0xff]  }
 0x585   :  { %9825 = vmatprep.mubr.bf16.mxu0 %v8189_v38  ;;  %9958 = vmatpush1.bf16.msra.mxu1 %v13735_v35  ;;  %v13794_v35 = vld [vmem:[#allocation9 + $0x344] ss:$16 sps:$4 sm:$0xff]  }
 0x586   :  { %9989 = vmatprep.mubr.bf16.mxu1 %v8189_v38  ;;  %9795 = vmatprep.subr.bf16.mxu0 %v13740_v37  ;;  %v13797_v37 = vld [vmem:[#allocation9 + $0x34c] ss:$16 sps:$4 sm:$0xff]   ;;  %v13792_v38 = vld [vmem:[#allocation9 + $0x340] ss:$16 sps:$4 sm:$0xff]  }
 0x587   :  { %9959 = vmatprep.subr.bf16.mxu1 %v13743_v13  ;;  %v13795_v13 = vld [vmem:[#allocation9 + $0x348] ss:$16 sps:$4 sm:$0xff]  }
 0x588   :  { %9796 = vmatpush1.bf16.msra.mxu0 %v13738_v45  ;;  %v13800_v45 = vld [vmem:[#allocation9 + $0x364] ss:$16 sps:$4 sm:$0xff]  }
 0x589   :  { %9960 = vmatpush1.bf16.msra.mxu1 %v13741_v21  ;;  %9797 = vmatprep.subr.bf16.mxu0 %v13746_v59  ;;  %v13803_v21 = vld [vmem:[#allocation9 + $0x36c] ss:$16 sps:$4 sm:$0xff]   ;;  %v13798_v59 = vld [vmem:[#allocation9 + $0x360] ss:$16 sps:$4 sm:$0xff]  }
 0x58a   :  { %9961 = vmatprep.subr.bf16.mxu1 %v13749_v49  ;;  %v13801_v49 = vld [vmem:[#allocation9 + $0x368] ss:$16 sps:$4 sm:$0xff]  }
 0x58c   :  { %9798 = vmatpush1.bf16.msra.mxu0 %v13744_v51  ;;  %v13806_v51 = vld [vmem:[#allocation9 + $0x384] ss:$16 sps:$4 sm:$0xff]  }
 0x58d   :  { %9962 = vmatpush1.bf16.msra.mxu1 %v13747_v36  ;;  %9799 = vmatprep.subr.bf16.mxu0 %v13752_v52  ;;  %v13809_v36 = vld [vmem:[#allocation9 + $0x38c] ss:$16 sps:$4 sm:$0xff]   ;;  %v13804_v52 = vld [vmem:[#allocation9 + $0x380] ss:$16 sps:$4 sm:$0xff]  }
 0x58e   :  { %9963 = vmatprep.subr.bf16.mxu1 %v13755_v54  ;;  %v13807_v54 = vld [vmem:[#allocation9 + $0x388] ss:$16 sps:$4 sm:$0xff]  }
 0x590   :  { %9800 = vmatpush1.bf16.msra.mxu0 %v13750_v20  ;;  %v13812_v20 = vld [vmem:[#allocation9 + $0x3a4] ss:$16 sps:$4 sm:$0xff]  }
 0x591   :  { %9964 = vmatpush1.bf16.msra.mxu1 %v13753_v56  ;;  %9801 = vmatprep.subr.bf16.mxu0 %v13758_v61  ;;  %v13815_v56 = vld [vmem:[#allocation9 + $0x3ac] ss:$16 sps:$4 sm:$0xff]   ;;  %v13810_v61 = vld [vmem:[#allocation9 + $0x3a0] ss:$16 sps:$4 sm:$0xff]  }
 0x592   :  { %9965 = vmatprep.subr.bf16.mxu1 %v13761_v63  ;;  %v1717_v63 = vrot.slane %v14820_v5, %v14669_v1 }
 0x594   :  { %9802 = vmatpush1.bf16.msra.mxu0 %v13756_v3  ;;  %v13813_v3 = vld [vmem:[#allocation9 + $0x3a8] ss:$16 sps:$4 sm:$0xff]  }
 0x595   :  { %9966 = vmatpush1.bf16.msra.mxu1 %v13759_v4  ;;  %9803 = vmatprep.subr.bf16.mxu0 %v13764_v6  ;;  %v13818_v4 = vld [vmem:[#allocation9 + $0x3c4] ss:$16 sps:$4 sm:$0xff]   ;;  %v13821_v6 = vld [vmem:[#allocation9 + $0x3cc] ss:$16 sps:$4 sm:$0xff]  }
 0x596   :  { %9967 = vmatprep.subr.bf16.mxu1 %v13767_v50  ;;  %v13816_v50 = vld [vmem:[#allocation9 + $0x3c0] ss:$16 sps:$4 sm:$0xff]  }
 0x598   :  { %9804 = vmatpush1.bf16.msra.mxu0 %v13762_v28  ;;  %v13473_v28 = vadd.f32 %v14798_v8, %v1717_v63  ;;  %v13831_v8 = vld [vmem:[#allocation9 + $0x408] ss:$16 sps:$4 sm:$0xff]   ;;  %v13864_v63 = vld [vmem:[#allocation9 + $0x4c0] ss:$16 sps:$4 sm:$0xff]  }
 0x599   :  { %9968 = vmatpush1.bf16.msra.mxu1 %v13765_v14  ;;  %9805 = vmatprep.subr.bf16.mxu0 %v13770_v17  ;;  %v13819_v14 = vld [vmem:[#allocation9 + $0x3c8] ss:$16 sps:$4 sm:$0xff]   ;;  %v13824_v17 = vld [vmem:[#allocation9 + $0x3e4] ss:$16 sps:$4 sm:$0xff]  }
 0x59a   :  { %9969 = vmatprep.subr.bf16.mxu1 %v13773_v18  ;;  %v13827_v18 = vld [vmem:[#allocation9 + $0x3ec] ss:$16 sps:$4 sm:$0xff]  }
 0x59c   :  { %9806 = vmatpush1.bf16.msra.mxu0 %v13768_v19  ;;  %v13822_v19 = vld [vmem:[#allocation9 + $0x3e0] ss:$16 sps:$4 sm:$0xff]  }
 0x59d   :  { %9970 = vmatpush1.bf16.msra.mxu1 %v13771_v9  ;;  %9807 = vmatprep.subr.bf16.mxu0 %v13776_v24  ;;  %v8180_v9 = vmax.f32 %v13473_v28, 0.0  ;;  %v13825_v24 = vld [vmem:[#allocation9 + $0x3e8] ss:$16 sps:$4 sm:$0xff]  }
 0x59e   :  { %9971 = vmatprep.subr.bf16.mxu1 %v13779_v26  ;;  %v13830_v26 = vld [vmem:[#allocation9 + $0x404] ss:$16 sps:$4 sm:$0xff]   ;;  %v13873_v28 = vld [vmem:[#allocation9 + $0x4e8] ss:$16 sps:$4 sm:$0xff]  }
 0x5a0   :  { %9808 = vmatpush1.bf16.msra.mxu0 %v13774_v58  ;;  %v13833_v58 = vld [vmem:[#allocation9 + $0x40c] ss:$16 sps:$4 sm:$0xff]  }
 0x5a1   :  { %9972 = vmatpush1.bf16.msra.mxu1 %v13777_v39  ;;  %9809 = vmatprep.subr.bf16.mxu0 %v13782_v29  ;;  %v13828_v39 = vld [vmem:[#allocation9 + $0x400] ss:$16 sps:$4 sm:$0xff]   ;;  %v8188_v29 = vpack.c.bf16 %v8180_v9, %v8180_v9  ;;  %v13884_v9 = vld [vmem:[#allocation9 + $0x524] ss:$16 sps:$4 sm:$0xff]  }
 0x5a2   :  { %9973 = vmatprep.subr.bf16.mxu1 %v13785_v30  ;;  %v13836_v30 = vld [vmem:[#allocation9 + $0x424] ss:$16 sps:$4 sm:$0xff]  }
 0x5a4   :  { %9810 = vmatpush1.bf16.msra.mxu0 %v13780_v31  ;;  %v13839_v31 = vld [vmem:[#allocation9 + $0x42c] ss:$16 sps:$4 sm:$0xff]  }
 0x5a5   :  { %9974 = vmatpush1.bf16.msra.mxu1 %v13783_v40  ;;  %9811 = vmatprep.subr.bf16.mxu0 %v13788_v57  ;;  %v13834_v40 = vld [vmem:[#allocation9 + $0x420] ss:$16 sps:$4 sm:$0xff]   ;;  %v13837_v57 = vld [vmem:[#allocation9 + $0x428] ss:$16 sps:$4 sm:$0xff]  }
 0x5a6   :  { %9975 = vmatprep.subr.bf16.mxu1 %v13791_v32  ;;  %v13842_v32 = vld [vmem:[#allocation9 + $0x444] ss:$16 sps:$4 sm:$0xff]  }
 0x5a8   :  { %9812 = vmatpush1.bf16.msra.mxu0 %v13786_v22  ;;  %v13845_v22 = vld [vmem:[#allocation9 + $0x44c] ss:$16 sps:$4 sm:$0xff]  }
 0x5a9   :  { %9976 = vmatpush1.bf16.msra.mxu1 %v13789_v16  ;;  %9813 = vmatprep.subr.bf16.mxu0 %v13794_v35  ;;  %v13840_v16 = vld [vmem:[#allocation9 + $0x440] ss:$16 sps:$4 sm:$0xff]   ;;  %v13843_v35 = vld [vmem:[#allocation9 + $0x448] ss:$16 sps:$4 sm:$0xff]  }
 0x5aa   :  { %9977 = vmatprep.subr.bf16.mxu1 %v13797_v37  ;;  %v13848_v37 = vld [vmem:[#allocation9 + $0x464] ss:$16 sps:$4 sm:$0xff]  }
 0x5ac   :  { %9814 = vmatpush1.bf16.msra.mxu0 %v13792_v38  ;;  %v13851_v38 = vld [vmem:[#allocation9 + $0x46c] ss:$16 sps:$4 sm:$0xff]  }
 0x5ad   :  { %9978 = vmatpush1.bf16.msra.mxu1 %v13795_v13  ;;  %9815 = vmatprep.subr.bf16.mxu0 %v13800_v45  ;;  %v13846_v13 = vld [vmem:[#allocation9 + $0x460] ss:$16 sps:$4 sm:$0xff]   ;;  %v13849_v45 = vld [vmem:[#allocation9 + $0x468] ss:$16 sps:$4 sm:$0xff]  }
 0x5ae   :  { %9979 = vmatprep.subr.bf16.mxu1 %v13803_v21  ;;  %v13854_v21 = vld [vmem:[#allocation9 + $0x484] ss:$16 sps:$4 sm:$0xff]  }
 0x5b0   :  { %9816 = vmatpush1.bf16.msra.mxu0 %v13798_v59  ;;  %v13857_v59 = vld [vmem:[#allocation9 + $0x48c] ss:$16 sps:$4 sm:$0xff]  }
 0x5b1   :  { %9980 = vmatpush1.bf16.msra.mxu1 %v13801_v49  ;;  %9817 = vmatprep.subr.bf16.mxu0 %v13806_v51  ;;  %v13852_v49 = vld [vmem:[#allocation9 + $0x480] ss:$16 sps:$4 sm:$0xff]   ;;  %v13855_v51 = vld [vmem:[#allocation9 + $0x488] ss:$16 sps:$4 sm:$0xff]  }
 0x5b2   :  { %9981 = vmatprep.subr.bf16.mxu1 %v13809_v36  ;;  %v13860_v36 = vld [vmem:[#allocation9 + $0x4a4] ss:$16 sps:$4 sm:$0xff]  }
 0x5b4   :  { %9818 = vmatpush1.bf16.msra.mxu0 %v13804_v52  ;;  %v13863_v52 = vld [vmem:[#allocation9 + $0x4ac] ss:$16 sps:$4 sm:$0xff]  }
 0x5b5   :  { %9982 = vmatpush1.bf16.msra.mxu1 %v13807_v54  ;;  %9819 = vmatprep.subr.bf16.mxu0 %v13812_v20  ;;  %v13858_v54 = vld [vmem:[#allocation9 + $0x4a0] ss:$16 sps:$4 sm:$0xff]   ;;  %v13861_v20 = vld [vmem:[#allocation9 + $0x4a8] ss:$16 sps:$4 sm:$0xff]  }
 0x5b6   :  { %9983 = vmatprep.subr.bf16.mxu1 %v13815_v56  ;;  %v13866_v56 = vld [vmem:[#allocation9 + $0x4c4] ss:$16 sps:$4 sm:$0xff]  }
 0x5b8   :  { %9820 = vmatpush1.bf16.msra.mxu0 %v13810_v61  ;;  %v13869_v61 = vld [vmem:[#allocation9 + $0x4cc] ss:$16 sps:$4 sm:$0xff]  }
 0x5b9   :  { %9984 = vmatpush1.bf16.msra.mxu1 %v13813_v3  ;;  %9821 = vmatprep.subr.bf16.mxu0 %v13818_v4  ;;  %v13867_v3 = vld [vmem:[#allocation9 + $0x4c8] ss:$16 sps:$4 sm:$0xff]   ;;  %v13872_v4 = vld [vmem:[#allocation9 + $0x4e4] ss:$16 sps:$4 sm:$0xff]  }
 0x5ba   :  { %9985 = vmatprep.subr.bf16.mxu1 %v13821_v6  ;;  %v13875_v6 = vld [vmem:[#allocation9 + $0x4ec] ss:$16 sps:$4 sm:$0xff]  }
 0x5bc   :  { %9822 = vmatpush1.bf16.msra.mxu0 %v13816_v50  ;;  %v13870_v50 = vld [vmem:[#allocation9 + $0x4e0] ss:$16 sps:$4 sm:$0xff]  }
 0x5bd   :  { %9986 = vmatpush1.bf16.msra.mxu1 %v13819_v14  ;;  %9823 = vmatprep.subr.bf16.mxu0 %v13824_v17  ;;  %v13878_v14 = vld [vmem:[#allocation9 + $0x504] ss:$16 sps:$4 sm:$0xff]   ;;  %v13881_v17 = vld [vmem:[#allocation9 + $0x50c] ss:$16 sps:$4 sm:$0xff]  }
 0x5be   :  { %9987 = vmatprep.subr.bf16.mxu1 %v13827_v18  ;;  %v13876_v18 = vld [vmem:[#allocation9 + $0x500] ss:$16 sps:$4 sm:$0xff]  }
 0x5c0   :  { %9824 = vmatpush1.bf16.msra.mxu0 %v13822_v19  ;;  %v13879_v19 = vld [vmem:[#allocation9 + $0x508] ss:$16 sps:$4 sm:$0xff]  }
 0x5c1   :  { %9988 = vmatpush1.bf16.msra.mxu1 %v13825_v24  ;;  %9834 = vmatprep.subr.bf16.mxu0 %v13830_v26  ;;  %v13887_v24 = vld [vmem:[#allocation9 + $0x52c] ss:$16 sps:$4 sm:$0xff]   ;;  %v13882_v26 = vld [vmem:[#allocation9 + $0x520] ss:$16 sps:$4 sm:$0xff]  }
 0x5c2   :  { %9998 = vmatprep.subr.bf16.mxu1 %v13833_v58  ;;  %v13885_v58 = vld [vmem:[#allocation9 + $0x528] ss:$16 sps:$4 sm:$0xff]  }
 0x5c3   :  { %9826 = vmatmul.mubr.bf16.vlgmr.msra.gmra.mrb[24].mxu0 %v8188_v29 }
 0x5c4   :  { %9990 = vmatmul.mubr.bf16.vlgmr.msra.gmra.mrb[24].mxu1 %v8188_v29  ;;  %9835 = vmatpush1.bf16.msra.mxu0 %v13828_v39  ;;  %v13890_v39 = vld [vmem:[#allocation9 + $0x544] ss:$16 sps:$4 sm:$0xff]   ;;  %v13893_v29 = vld [vmem:[#allocation9 + $0x54c] ss:$16 sps:$4 sm:$0xff]  }
 0x5c5   :  { %9999 = vmatpush1.bf16.msra.mxu1 %v13831_v8  ;;  %9836 = vmatprep.subr.bf16.mxu0 %v13836_v30  ;;  %v13888_v8 = vld [vmem:[#allocation9 + $0x540] ss:$16 sps:$4 sm:$0xff]   ;;  %v13891_v30 = vld [vmem:[#allocation9 + $0x548] ss:$16 sps:$4 sm:$0xff]  }
 0x5c6   :  { %10000 = vmatprep.subr.bf16.mxu1 %v13839_v31  ;;  %v13896_v31 = vld [vmem:[#allocation9 + $0x564] ss:$16 sps:$4 sm:$0xff]  }
 0x5c8   :  { %9837 = vmatpush1.bf16.msra.mxu0 %v13834_v40  ;;  %v13899_v40 = vld [vmem:[#allocation9 + $0x56c] ss:$16 sps:$4 sm:$0xff]  }
 0x5c9   :  { %10001 = vmatpush1.bf16.msra.mxu1 %v13837_v57  ;;  %9838 = vmatprep.subr.bf16.mxu0 %v13842_v32  ;;  %v13894_v57 = vld [vmem:[#allocation9 + $0x560] ss:$16 sps:$4 sm:$0xff]   ;;  %v13897_v32 = vld [vmem:[#allocation9 + $0x568] ss:$16 sps:$4 sm:$0xff]  }
 0x5ca   :  { %10002 = vmatprep.subr.bf16.mxu1 %v13845_v22  ;;  %v13902_v22 = vld [vmem:[#allocation9 + $0x584] ss:$16 sps:$4 sm:$0xff]  }
 0x5cc   :  { %9839 = vmatpush1.bf16.msra.mxu0 %v13840_v16  ;;  %v13905_v16 = vld [vmem:[#allocation9 + $0x58c] ss:$16 sps:$4 sm:$0xff]  }
 0x5cd   :  { %10003 = vmatpush1.bf16.msra.mxu1 %v13843_v35  ;;  %9840 = vmatprep.subr.bf16.mxu0 %v13848_v37  ;;  %v13900_v35 = vld [vmem:[#allocation9 + $0x580] ss:$16 sps:$4 sm:$0xff]   ;;  %v13903_v37 = vld [vmem:[#allocation9 + $0x588] ss:$16 sps:$4 sm:$0xff]  }
 0x5ce   :  { %10004 = vmatprep.subr.bf16.mxu1 %v13851_v38  ;;  %v13908_v38 = vld [vmem:[#allocation9 + $0x5a4] ss:$16 sps:$4 sm:$0xff]  }
 0x5d0   :  { %9841 = vmatpush1.bf16.msra.mxu0 %v13846_v13  ;;  %v13911_v13 = vld [vmem:[#allocation9 + $0x5ac] ss:$16 sps:$4 sm:$0xff]  }
 0x5d1   :  { %10005 = vmatpush1.bf16.msra.mxu1 %v13849_v45  ;;  %9842 = vmatprep.subr.bf16.mxu0 %v13854_v21  ;;  %v13906_v45 = vld [vmem:[#allocation9 + $0x5a0] ss:$16 sps:$4 sm:$0xff]   ;;  %v13909_v21 = vld [vmem:[#allocation9 + $0x5a8] ss:$16 sps:$4 sm:$0xff]  }
 0x5d2   :  { %10006 = vmatprep.subr.bf16.mxu1 %v13857_v59  ;;  %v13914_v59 = vld [vmem:[#allocation9 + $0x5c4] ss:$16 sps:$4 sm:$0xff]  }
 0x5d4   :  { %9843 = vmatpush1.bf16.msra.mxu0 %v13852_v49  ;;  %v13917_v49 = vld [vmem:[#allocation9 + $0x5cc] ss:$16 sps:$4 sm:$0xff]  }
 0x5d5   :  { %10007 = vmatpush1.bf16.msra.mxu1 %v13855_v51  ;;  %9844 = vmatprep.subr.bf16.mxu0 %v13860_v36  ;;  %v13912_v51 = vld [vmem:[#allocation9 + $0x5c0] ss:$16 sps:$4 sm:$0xff]   ;;  %v13915_v36 = vld [vmem:[#allocation9 + $0x5c8] ss:$16 sps:$4 sm:$0xff]  }
 0x5d6   :  { %10008 = vmatprep.subr.bf16.mxu1 %v13863_v52  ;;  %v13920_v52 = vld [vmem:[#allocation9 + $0x5e4] ss:$16 sps:$4 sm:$0xff]  }
 0x5d8   :  { %9845 = vmatpush1.bf16.msra.mxu0 %v13858_v54  ;;  %v13923_v54 = vld [vmem:[#allocation9 + $0x5ec] ss:$16 sps:$4 sm:$0xff]  }
 0x5d9   :  { %10009 = vmatpush1.bf16.msra.mxu1 %v13861_v20  ;;  %9846 = vmatprep.subr.bf16.mxu0 %v13866_v56  ;;  %v13918_v20 = vld [vmem:[#allocation9 + $0x5e0] ss:$16 sps:$4 sm:$0xff]   ;;  %v13921_v56 = vld [vmem:[#allocation9 + $0x5e8] ss:$16 sps:$4 sm:$0xff]  }
 0x5da   :  { %10010 = vmatprep.subr.bf16.mxu1 %v13869_v61  ;;  %v13926_v61 = vld [vmem:[#allocation9 + $0x604] ss:$16 sps:$4 sm:$0xff]  }
 0x5dc   :  { %9847 = vmatpush1.bf16.msra.mxu0 %v13864_v63  ;;  %v13929_v63 = vld [vmem:[#allocation9 + $0x60c] ss:$16 sps:$4 sm:$0xff]  }
 0x5dd   :  { %10011 = vmatpush1.bf16.msra.mxu1 %v13867_v3  ;;  %9848 = vmatprep.subr.bf16.mxu0 %v13872_v4  ;;  %v1725_v3 = vrot.slane %v14820_v5, %v14649_v43  ;;  %v1729_v4 = vrot.slane %v14820_v5, %v14654_v60  ;;  %v13924_v60 = vld [vmem:[#allocation9 + $0x600] ss:$16 sps:$4 sm:$0xff]  }
 0x5de   :  { %10012 = vmatprep.subr.bf16.mxu1 %v13875_v6  ;;  %v1737_v6 = vrot.slane %v14820_v5, %v14683_v34  ;;  %v13932_v34 = vld [vmem:[#allocation9 + $0x624] ss:$16 sps:$4 sm:$0xff]   ;;  %v13935_v5 = vld [vmem:[#allocation9 + $0x62c] ss:$16 sps:$4 sm:$0xff]  }
 0x5e0   :  { %9849 = vmatpush1.bf16.msra.mxu0 %v13870_v50 }
 0x5e1   :  { %10013 = vmatpush1.bf16.msra.mxu1 %v13873_v28  ;;  %9850 = vmatprep.subr.bf16.mxu0 %v13878_v14 }
 0x5e2   :  { %10014 = vmatprep.subr.bf16.mxu1 %v13881_v17 }
 0x5e4   :  { %9851 = vmatpush1.bf16.msra.mxu0 %v13876_v18 }
 0x5e5   :  { %10015 = vmatpush1.bf16.msra.mxu1 %v13879_v19  ;;  %9852 = vmatprep.subr.bf16.mxu0 %v13884_v9 }
 0x5e6   :  { %10016 = vmatprep.subr.bf16.mxu1 %v13887_v24 }
 0x5e8   :  { %9853 = vmatpush1.bf16.msra.mxu0 %v13882_v26 }
 0x5e9   :  { %10017 = vmatpush1.bf16.msra.mxu1 %v13885_v58  ;;  %9854 = vmatprep.subr.bf16.mxu0 %v13890_v39 }
 0x5ea   :  { %10018 = vmatprep.subr.bf16.mxu1 %v13893_v29 }
 0x5ec   :  { %9855 = vmatpush1.bf16.msra.mxu0 %v13888_v8 }
 0x5ed   :  { %10019 = vmatpush1.bf16.msra.mxu1 %v13891_v30  ;;  %9856 = vmatprep.subr.bf16.mxu0 %v13896_v31  ;;  %v13927_v31 = vld [vmem:[#allocation9 + $0x608] ss:$16 sps:$4 sm:$0xff]  }
 0x5ee   :  { %10020 = vmatprep.subr.bf16.mxu1 %v13899_v40 }
 0x5f0   :  { %9857 = vmatpush1.bf16.msra.mxu0 %v13894_v57 }
 0x5f1   :  { %10021 = vmatpush1.bf16.msra.mxu1 %v13897_v32  ;;  %9858 = vmatprep.subr.bf16.mxu0 %v13902_v22  ;;  %v13930_v32 = vld [vmem:[#allocation9 + $0x620] ss:$16 sps:$4 sm:$0xff]   ;;  %v13933_v22 = vld [vmem:[#allocation9 + $0x628] ss:$16 sps:$4 sm:$0xff]  }
 0x5f2   :  { %10022 = vmatprep.subr.bf16.mxu1 %v13905_v16  ;;  %v13938_v16 = vld [vmem:[#allocation9 + $0x644] ss:$16 sps:$4 sm:$0xff]  }
 0x5f4   :  { %9859 = vmatpush1.bf16.msra.mxu0 %v13900_v35  ;;  %v13941_v35 = vld [vmem:[#allocation9 + $0x64c] ss:$16 sps:$4 sm:$0xff]  }
 0x5f5   :  { %10023 = vmatpush1.bf16.msra.mxu1 %v13903_v37  ;;  %9860 = vmatprep.subr.bf16.mxu0 %v13908_v38  ;;  %v13936_v37 = vld [vmem:[#allocation9 + $0x640] ss:$16 sps:$4 sm:$0xff]   ;;  %v13939_v38 = vld [vmem:[#allocation9 + $0x648] ss:$16 sps:$4 sm:$0xff]  }
 0x5f6   :  { %10024 = vmatprep.subr.bf16.mxu1 %v13911_v13  ;;  %v13944_v13 = vld [vmem:[#allocation9 + $0x664] ss:$16 sps:$4 sm:$0xff]  }
 0x5f8   :  { %9861 = vmatpush1.bf16.msra.mxu0 %v13906_v45  ;;  %v13947_v45 = vld [vmem:[#allocation9 + $0x66c] ss:$16 sps:$4 sm:$0xff]  }
 0x5f9   :  { %10025 = vmatpush1.bf16.msra.mxu1 %v13909_v21  ;;  %9862 = vmatprep.subr.bf16.mxu0 %v13914_v59  ;;  %v13942_v21 = vld [vmem:[#allocation9 + $0x660] ss:$16 sps:$4 sm:$0xff]   ;;  %v13945_v59 = vld [vmem:[#allocation9 + $0x668] ss:$16 sps:$4 sm:$0xff]  }
 0x5fa   :  { %10026 = vmatprep.subr.bf16.mxu1 %v13917_v49  ;;  %v13950_v49 = vld [vmem:[#allocation9 + $0x684] ss:$16 sps:$4 sm:$0xff]  }
 0x5fc   :  { %9863 = vmatpush1.bf16.msra.mxu0 %v13912_v51  ;;  %v13953_v51 = vld [vmem:[#allocation9 + $0x68c] ss:$16 sps:$4 sm:$0xff]  }
 0x5fd   :  { %10027 = vmatpush1.bf16.msra.mxu1 %v13915_v36  ;;  %9864 = vmatprep.subr.bf16.mxu0 %v13920_v52  ;;  %v13948_v36 = vld [vmem:[#allocation9 + $0x680] ss:$16 sps:$4 sm:$0xff]   ;;  %v13951_v52 = vld [vmem:[#allocation9 + $0x688] ss:$16 sps:$4 sm:$0xff]  }
 0x5fe   :  { %10028 = vmatprep.subr.bf16.mxu1 %v13923_v54  ;;  %v13956_v54 = vld [vmem:[#allocation9 + $0x6a4] ss:$16 sps:$4 sm:$0xff]  }
 0x600   :  { %9865 = vmatpush1.bf16.msra.mxu0 %v13918_v20  ;;  %v13959_v20 = vld [vmem:[#allocation9 + $0x6ac] ss:$16 sps:$4 sm:$0xff]  }
 0x601   :  { %10029 = vmatpush1.bf16.msra.mxu1 %v13921_v56  ;;  %9875 = vmatprep.subr.bf16.mxu0 %v13926_v61  ;;  %v13954_v56 = vld [vmem:[#allocation9 + $0x6a0] ss:$16 sps:$4 sm:$0xff]   ;;  %v13957_v61 = vld [vmem:[#allocation9 + $0x6a8] ss:$16 sps:$4 sm:$0xff]  }
 0x602   :  { %10039 = vmatprep.subr.bf16.mxu1 %v13929_v63  ;;  %v13962_v63 = vld [vmem:[#allocation9 + $0x6c4] ss:$16 sps:$4 sm:$0xff]  }
 0x616   :  { %v7843_v50 = vpop.f32.mrb[20].mxu0 }
 0x617   :  { %v13475_v28 = vadd.f32 %v7843_v50, %v1725_v3  ;;  %v14842_v14 = vpop.f32.mrb[20].mxu1  ;;  %v7845_v17 = vpop.f32.mrb[21].mxu0  ;;  %v13965_v3 = vld [vmem:[#allocation9 + $0x6cc] ss:$16 sps:$4 sm:$0xff]   ;;  %v13968_v50 = vld [vmem:[#allocation9 + $0x6e4] ss:$16 sps:$4 sm:$0xff]  }
 0x618   :  { %v13476_v18 = vadd.f32 %v7845_v17, %v1729_v4  ;;  %v8173_v19 = vpop.f32.mrb[21].mxu1  ;;  %v7847_v9 = vpop.f32.mrb[22].mxu0  ;;  %v13960_v4 = vld [vmem:[#allocation9 + $0x6c0] ss:$16 sps:$4 sm:$0xff]  }
 0x619   :  { %v8182_v24 = vmax.f32 %v13475_v28, 0.0  ;;  %v13478_v26 = vadd.f32 %v8173_v19, %v1737_v6  ;;  %v8175_v58 = vpop.f32.mrb[22].mxu1  ;;  %v7848_v39 = vpop.f32.mrb[23].mxu0  ;;  %v13963_v6 = vld [vmem:[#allocation9 + $0x6c8] ss:$16 sps:$4 sm:$0xff]  }
 0x61a   :  { %v8183_v29 = vmax.f32 %v13476_v18, 0.0  ;;  %v8176_v43 = vpop.f32.mrb[23].mxu1  ;;  %v13971_v28 = vld [vmem:[#allocation9 + $0x6ec] ss:$16 sps:$4 sm:$0xff]   ;;  %v13966_v17 = vld [vmem:[#allocation9 + $0x6e0] ss:$16 sps:$4 sm:$0xff]  }
 0x61b   :  { %v8185_v8 = vmax.f32 %v13478_v26, 0.0  ;;  %v8190_v40 = vpack.c.bf16 %v8182_v24, %v8182_v24  ;;  %v13969_v18 = vld [vmem:[#allocation9 + $0x6e8] ss:$16 sps:$4 sm:$0xff]   ;;  %v13974_v19 = vld [vmem:[#allocation9 + $0x704] ss:$16 sps:$4 sm:$0xff]  }
 0x61c   :  { %v8191_v30 = vpack.c.bf16 %v8183_v29, %v8183_v29  ;;  %v13977_v9 = vld [vmem:[#allocation9 + $0x70c] ss:$16 sps:$4 sm:$0xff]   ;;  %v13972_v24 = vld [vmem:[#allocation9 + $0x700] ss:$16 sps:$4 sm:$0xff]   ;;  %v13975_v26 = vld [vmem:[#allocation9 + $0x708] ss:$16 sps:$4 sm:$0xff]  }
 0x61d   :  { %v8193_v57 = vpack.c.bf16 %v8185_v8, %v8185_v8  ;;  %v13980_v58 = vld [vmem:[#allocation9 + $0x724] ss:$16 sps:$4 sm:$0xff]   ;;  %v13983_v39 = vld [vmem:[#allocation9 + $0x72c] ss:$16 sps:$4 sm:$0xff]   ;;  %v13978_v29 = vld [vmem:[#allocation9 + $0x720] ss:$16 sps:$4 sm:$0xff]  }
 0x61e   :  { %9866 = vmatprep.mubr.bf16.mxu0 %v8191_v30  ;;  %10030 = vmatprep.mubr.bf16.mxu1 %v8191_v30  ;;  %v13981_v43 = vld [vmem:[#allocation9 + $0x728] ss:$16 sps:$4 sm:$0xff]   ;;  %v13986_v8 = vld [vmem:[#allocation9 + $0x744] ss:$16 sps:$4 sm:$0xff]   ;;  %v13989_v30 = vld [vmem:[#allocation9 + $0x74c] ss:$16 sps:$4 sm:$0xff]  }
 0x61f   :  { %9867 = vmatmul.mubr.bf16.vlgmr.msra.gmra.mrb[24].mxu0 %v8190_v40  ;;  %10031 = vmatmul.mubr.bf16.vlgmr.msra.gmra.mrb[24].mxu1 %v8190_v40  ;;  %v13992_v40 = vld [vmem:[#allocation9 + $0x764] ss:$16 sps:$4 sm:$0xff]  }
 0x620   :  { %9876 = vmatpush1.bf16.msra.mxu0 %v13924_v60  ;;  %10040 = vmatpush1.bf16.msra.mxu1 %v13927_v31  ;;  %v13984_v60 = vld [vmem:[#allocation9 + $0x740] ss:$16 sps:$4 sm:$0xff]   ;;  %v13987_v31 = vld [vmem:[#allocation9 + $0x748] ss:$16 sps:$4 sm:$0xff]  }
 0x621   :  { %9907 = vmatprep.mubr.bf16.mxu0 %v8193_v57  ;;  %10071 = vmatprep.mubr.bf16.mxu1 %v8193_v57  ;;  %v13993_v57 = vld [vmem:[#allocation9 + $0x768] ss:$16 sps:$4 sm:$0xff]  }
 0x622   :  { %9877 = vmatprep.subr.bf16.mxu0 %v13932_v34  ;;  %10041 = vmatprep.subr.bf16.mxu1 %v13935_v5  ;;  %v13995_v34 = vld [vmem:[#allocation9 + $0x76c] ss:$16 sps:$4 sm:$0xff]   ;;  %v13990_v5 = vld [vmem:[#allocation9 + $0x760] ss:$16 sps:$4 sm:$0xff]  }
 0x624   :  { %9878 = vmatpush1.bf16.msra.mxu0 %v13930_v32  ;;  %10042 = vmatpush1.bf16.msra.mxu1 %v13933_v22  ;;  %v13998_v32 = vld [vmem:[#allocation9 + $0x784] ss:$16 sps:$4 sm:$0xff]   ;;  %v14001_v22 = vld [vmem:[#allocation9 + $0x78c] ss:$16 sps:$4 sm:$0xff]  }
 0x625   :  { %9879 = vmatprep.subr.bf16.mxu0 %v13938_v16  ;;  %10043 = vmatprep.subr.bf16.mxu1 %v13941_v35  ;;  %v13996_v16 = vld [vmem:[#allocation9 + $0x780] ss:$16 sps:$4 sm:$0xff]   ;;  %v13999_v35 = vld [vmem:[#allocation9 + $0x788] ss:$16 sps:$4 sm:$0xff]  }
 0x628   :  { %9880 = vmatpush1.bf16.msra.mxu0 %v13936_v37  ;;  %10044 = vmatpush1.bf16.msra.mxu1 %v13939_v38  ;;  %v14004_v37 = vld [vmem:[#allocation9 + $0x7a4] ss:$16 sps:$4 sm:$0xff]   ;;  %v14007_v38 = vld [vmem:[#allocation9 + $0x7ac] ss:$16 sps:$4 sm:$0xff]  }
 0x629   :  { %9881 = vmatprep.subr.bf16.mxu0 %v13944_v13  ;;  %10045 = vmatprep.subr.bf16.mxu1 %v13947_v45  ;;  %v14002_v13 = vld [vmem:[#allocation9 + $0x7a0] ss:$16 sps:$4 sm:$0xff]   ;;  %v14005_v45 = vld [vmem:[#allocation9 + $0x7a8] ss:$16 sps:$4 sm:$0xff]  }
 0x62c   :  { %9882 = vmatpush1.bf16.msra.mxu0 %v13942_v21  ;;  %10046 = vmatpush1.bf16.msra.mxu1 %v13945_v59  ;;  %v14182_v21 = vld [vmem:[#allocation7] sm:$0xff] }
 0x62d   :  { %9883 = vmatprep.subr.bf16.mxu0 %v13950_v49  ;;  %10047 = vmatprep.subr.bf16.mxu1 %v13953_v51  ;;  %v1733_v59 = vrot.slane %v14182_v21, %v14680_v33  ;;  %v14010_v49 = vld [vmem:[#allocation9 + $0x7c4] ss:$16 sps:$4 sm:$0xff]   ;;  %v14013_v51 = vld [vmem:[#allocation9 + $0x7cc] ss:$16 sps:$4 sm:$0xff]  }
 0x62e   :  { %v14020_v33 = vld [vmem:[#allocation13 + $0x40] sm:$0xff]   ;;  %v14051_v21 = vld [vmem:[#allocation13 + $0xb8] sm:$0xff]  }
 0x630   :  { %9884 = vmatpush1.bf16.msra.mxu0 %v13948_v36  ;;  %10048 = vmatpush1.bf16.msra.mxu1 %v13951_v52  ;;  %v14008_v36 = vld [vmem:[#allocation9 + $0x7c0] ss:$16 sps:$4 sm:$0xff]   ;;  %v14011_v52 = vld [vmem:[#allocation9 + $0x7c8] ss:$16 sps:$4 sm:$0xff]  }
 0x631   :  { %9885 = vmatprep.subr.bf16.mxu0 %v13956_v54  ;;  %10049 = vmatprep.subr.bf16.mxu1 %v13959_v20  ;;  %v13477_v54 = vadd.f32 %v14842_v14, %v1733_v59  ;;  %v14016_v20 = vld [vmem:[#allocation9 + $0x7e4] ss:$16 sps:$4 sm:$0xff]   ;;  %v14024_v14 = vld [vmem:[#allocation13 + $0x48] sm:$0xff]  }
 0x632   :  { %v14052_v59 = vld [vmem:[#allocation12 + $0x40] sm:$0xff]  }
 0x634   :  { %9886 = vmatpush1.bf16.msra.mxu0 %v13954_v56  ;;  %10050 = vmatpush1.bf16.msra.mxu1 %v13957_v61  ;;  %v14019_v56 = vld [vmem:[#allocation9 + $0x7ec] ss:$16 sps:$4 sm:$0xff]   ;;  %v14014_v61 = vld [vmem:[#allocation9 + $0x7e0] ss:$16 sps:$4 sm:$0xff]  }
 0x635   :  { %9887 = vmatprep.subr.bf16.mxu0 %v13962_v63  ;;  %10051 = vmatprep.subr.bf16.mxu1 %v13965_v3  ;;  %v14017_v63 = vld [vmem:[#allocation9 + $0x7e8] ss:$16 sps:$4 sm:$0xff]   ;;  %v8184_v3 = vmax.f32 %v13477_v54, 0.0 }
 0x638   :  { %9888 = vmatpush1.bf16.msra.mxu0 %v13960_v4  ;;  %10052 = vmatpush1.bf16.msra.mxu1 %v13963_v6  ;;  %v14021_v4 = vld [vmem:[#allocation13 + $0xc0] sm:$0xff]  }
 0x639   :  { %9889 = vmatprep.subr.bf16.mxu0 %v13968_v50  ;;  %10053 = vmatprep.subr.bf16.mxu1 %v13971_v28  ;;  %v14022_v6 = vld [vmem:[#allocation13] sm:$0xff]   ;;  %v8192_v28 = vpack.c.bf16 %v8184_v3, %v8184_v3 }
 0x63a   :  { %v14023_v50 = vld [vmem:[#allocation13 + $0x80] sm:$0xff]  }
 0x63c   :  { %9890 = vmatpush1.bf16.msra.mxu0 %v13966_v17  ;;  %10054 = vmatpush1.bf16.msra.mxu1 %v13969_v18  ;;  %v14025_v17 = vld [vmem:[#allocation13 + $0xc8] sm:$0xff]  }
 0x63d   :  { %9891 = vmatprep.subr.bf16.mxu0 %v13974_v19  ;;  %10055 = vmatprep.subr.bf16.mxu1 %v13977_v9  ;;  %v14026_v18 = vld [vmem:[#allocation13 + $0x8] sm:$0xff]   ;;  %v14028_v9 = vld [vmem:[#allocation13 + $0x50] sm:$0xff]  }
 0x63e   :  { %v14027_v19 = vld [vmem:[#allocation13 + $0x88] sm:$0xff]  }
 0x640   :  { %9892 = vmatpush1.bf16.msra.mxu0 %v13972_v24  ;;  %10056 = vmatpush1.bf16.msra.mxu1 %v13975_v26  ;;  %v14029_v24 = vld [vmem:[#allocation13 + $0xd0] sm:$0xff]  }
 0x641   :  { %9893 = vmatprep.subr.bf16.mxu0 %v13980_v58  ;;  %10057 = vmatprep.subr.bf16.mxu1 %v13983_v39  ;;  %v14030_v26 = vld [vmem:[#allocation13 + $0x10] sm:$0xff]   ;;  %v14032_v39 = vld [vmem:[#allocation13 + $0x58] sm:$0xff]  }
 0x642   :  { %v14031_v58 = vld [vmem:[#allocation13 + $0x90] sm:$0xff]  }
 0x644   :  { %9894 = vmatpush1.bf16.msra.mxu0 %v13978_v29  ;;  %10058 = vmatpush1.bf16.msra.mxu1 %v13981_v43  ;;  %v14033_v29 = vld [vmem:[#allocation13 + $0xd8] sm:$0xff]  }
 0x645   :  { %9895 = vmatprep.subr.bf16.mxu0 %v13986_v8  ;;  %10059 = vmatprep.subr.bf16.mxu1 %v13989_v30  ;;  %v14034_v43 = vld [vmem:[#allocation13 + $0x18] sm:$0xff]   ;;  %v14036_v30 = vld [vmem:[#allocation13 + $0x60] sm:$0xff]  }
 0x646   :  { %v14035_v8 = vld [vmem:[#allocation13 + $0x98] sm:$0xff]  }
 0x648   :  { %9896 = vmatpush1.bf16.msra.mxu0 %v13984_v60  ;;  %10060 = vmatpush1.bf16.msra.mxu1 %v13987_v31  ;;  %v14037_v60 = vld [vmem:[#allocation13 + $0xe0] sm:$0xff]  }
 0x649   :  { %9897 = vmatprep.subr.bf16.mxu0 %v13992_v40  ;;  %10061 = vmatprep.subr.bf16.mxu1 %v13995_v34  ;;  %v14038_v31 = vld [vmem:[#allocation13 + $0x20] sm:$0xff]   ;;  %v14040_v34 = vld [vmem:[#allocation13 + $0x68] sm:$0xff]  }
 0x64a   :  { %v14039_v40 = vld [vmem:[#allocation13 + $0xa0] sm:$0xff]  }
 0x64c   :  { %9898 = vmatpush1.bf16.msra.mxu0 %v13990_v5  ;;  %10062 = vmatpush1.bf16.msra.mxu1 %v13993_v57  ;;  %v14041_v5 = vld [vmem:[#allocation13 + $0xe8] sm:$0xff]  }
 0x64d   :  { %9899 = vmatprep.subr.bf16.mxu0 %v13998_v32  ;;  %10063 = vmatprep.subr.bf16.mxu1 %v14001_v22  ;;  %v14042_v57 = vld [vmem:[#allocation13 + $0x28] sm:$0xff]   ;;  %v14044_v22 = vld [vmem:[#allocation13 + $0x70] sm:$0xff]  }
 0x64e   :  { %v14043_v32 = vld [vmem:[#allocation13 + $0xa8] sm:$0xff]  }
 0x650   :  { %9900 = vmatpush1.bf16.msra.mxu0 %v13996_v16  ;;  %10064 = vmatpush1.bf16.msra.mxu1 %v13999_v35  ;;  %v14045_v16 = vld [vmem:[#allocation13 + $0xf0] sm:$0xff]  }
 0x651   :  { %9901 = vmatprep.subr.bf16.mxu0 %v14004_v37  ;;  %10065 = vmatprep.subr.bf16.mxu1 %v14007_v38  ;;  %v14046_v35 = vld [vmem:[#allocation13 + $0x30] sm:$0xff]   ;;  %v14048_v38 = vld [vmem:[#allocation13 + $0x78] sm:$0xff]  }
 0x652   :  { %v14047_v37 = vld [vmem:[#allocation13 + $0xb0] sm:$0xff]  }
 0x654   :  { %9902 = vmatpush1.bf16.msra.mxu0 %v14002_v13  ;;  %10066 = vmatpush1.bf16.msra.mxu1 %v14005_v45  ;;  %v14049_v13 = vld [vmem:[#allocation13 + $0xf8] sm:$0xff]  }
 0x655   :  { %9903 = vmatprep.subr.bf16.mxu0 %v14010_v49  ;;  %10067 = vmatprep.subr.bf16.mxu1 %v14013_v51  ;;  %v14050_v45 = vld [vmem:[#allocation13 + $0x38] sm:$0xff]   ;;  %v14053_v49 = vld [vmem:[#allocation12 + $0xc0] sm:$0xff]  }
 0x656   :  { %v8450_v51 = vld [vmem:[#allocation10] sm:$0xf] }
 0x657   :  { %v8459_v54 = vrot.slane %v8450_v51, %v14615_v47 }
 0x658   :  { %9904 = vmatpush1.bf16.msra.mxu0 %v14008_v36  ;;  %10068 = vmatpush1.bf16.msra.mxu1 %v14011_v52  ;;  %v8455_v36 = vrot.slane %v8450_v51, %v14612_v46  ;;  %v8463_v52 = vrot.slane %v8450_v51, %v14669_v1 }
 0x659   :  { %9905 = vmatprep.subr.bf16.mxu0 %v14016_v20  ;;  %10069 = vmatprep.subr.bf16.mxu1 %v14019_v56  ;;  %v8467_v20 = vrot.slane %v8450_v51, %v14618_v48  ;;  %v14055_v48 = vld [vmem:[#allocation12 + $0x80] sm:$0xff]   ;;  %v14079_v51 = vld [vmem:[#allocation12 + $0xb0] sm:$0xff]  }
 0x65c   :  { %9906 = vmatpush1.bf16.msra.mxu0 %v14014_v61  ;;  %10070 = vmatpush1.bf16.msra.mxu1 %v14017_v63 }
 0x65d   :  { %13251 = vmatprep.subr.bf16.mxu0 %v14020_v33  ;;  %13273 = vmatprep.subr.bf16.mxu1 %v14021_v4 }
 0x65f   :  { %9908 = vmatmul.mubr.bf16.vlgmr.msra.gmra.mrb[24].mxu0 %v8192_v28  ;;  %10072 = vmatmul.mubr.bf16.vlgmr.msra.gmra.mrb[24].mxu1 %v8192_v28 }
 0x660   :  { %13252 = vmatpush3.bf16.msra.mxu0 %v14022_v6  ;;  %13274 = vmatpush3.bf16.msra.mxu1 %v14023_v50 }
 0x661   :  { %13253 = vmatprep.subr.bf16.mxu0 %v14024_v14  ;;  %13275 = vmatprep.subr.bf16.mxu1 %v14025_v17 }
 0x664   :  { %13254 = vmatpush3.bf16.msra.mxu0 %v14026_v18  ;;  %13276 = vmatpush3.bf16.msra.mxu1 %v14027_v19 }
 0x665   :  { %13255 = vmatprep.subr.bf16.mxu0 %v14028_v9  ;;  %13277 = vmatprep.subr.bf16.mxu1 %v14029_v24 }
 0x668   :  { %13256 = vmatpush3.bf16.msra.mxu0 %v14030_v26  ;;  %13278 = vmatpush3.bf16.msra.mxu1 %v14031_v58  ;;  %v14054_v26 = vld [vmem:[#allocation12] sm:$0xff]  }
 0x669   :  { %13257 = vmatprep.subr.bf16.mxu0 %v14032_v39  ;;  %13279 = vmatprep.subr.bf16.mxu1 %v14033_v29  ;;  %v14056_v29 = vld [vmem:[#allocation12 + $0x48] sm:$0xff]  }
 0x66c   :  { %13258 = vmatpush3.bf16.msra.mxu0 %v14034_v43  ;;  %13280 = vmatpush3.bf16.msra.mxu1 %v14035_v8  ;;  %v14057_v43 = vld [vmem:[#allocation12 + $0xc8] sm:$0xff]  }
 0x66d   :  { %13259 = vmatprep.subr.bf16.mxu0 %v14036_v30  ;;  %13281 = vmatprep.subr.bf16.mxu1 %v14037_v60  ;;  %v14058_v8 = vld [vmem:[#allocation12 + $0x8] sm:$0xff]   ;;  %v14060_v60 = vld [vmem:[#allocation12 + $0x50] sm:$0xff]  }
 0x66e   :  { %v14059_v30 = vld [vmem:[#allocation12 + $0x88] sm:$0xff]  }
 0x670   :  { %13260 = vmatpush3.bf16.msra.mxu0 %v14038_v31  ;;  %13282 = vmatpush3.bf16.msra.mxu1 %v14039_v40  ;;  %v14061_v31 = vld [vmem:[#allocation12 + $0xd0] sm:$0xff]  }
 0x671   :  { %13261 = vmatprep.subr.bf16.mxu0 %v14040_v34  ;;  %13283 = vmatprep.subr.bf16.mxu1 %v14041_v5  ;;  %v14062_v40 = vld [vmem:[#allocation12 + $0x10] sm:$0xff]   ;;  %v14064_v5 = vld [vmem:[#allocation12 + $0x58] sm:$0xff]  }
 0x672   :  { %v14063_v34 = vld [vmem:[#allocation12 + $0x90] sm:$0xff]  }
 0x674   :  { %13262 = vmatpush3.bf16.msra.mxu0 %v14042_v57  ;;  %13284 = vmatpush3.bf16.msra.mxu1 %v14043_v32  ;;  %v14065_v57 = vld [vmem:[#allocation12 + $0xd8] sm:$0xff]  }
 0x675   :  { %13263 = vmatprep.subr.bf16.mxu0 %v14044_v22  ;;  %13285 = vmatprep.subr.bf16.mxu1 %v14045_v16  ;;  %v14066_v32 = vld [vmem:[#allocation12 + $0x18] sm:$0xff]   ;;  %v14070_v16 = vld [vmem:[#allocation12 + $0x20] sm:$0xff]  }
 0x676   :  { %v14067_v22 = vld [vmem:[#allocation12 + $0x98] sm:$0xff]  }
 0x678   :  { %13264 = vmatpush3.bf16.msra.mxu0 %v14046_v35  ;;  %13286 = vmatpush3.bf16.msra.mxu1 %v14047_v37  ;;  %v14071_v35 = vld [vmem:[#allocation12 + $0xa0] sm:$0xff]   ;;  %v14072_v37 = vld [vmem:[#allocation12 + $0x68] sm:$0xff]  }
 0x679   :  { %13265 = vmatprep.subr.bf16.mxu0 %v14048_v38  ;;  %13287 = vmatprep.subr.bf16.mxu1 %v14049_v13  ;;  %v14073_v38 = vld [vmem:[#allocation12 + $0xe8] sm:$0xff]  }
 0x67a   :  { %v14074_v13 = vld [vmem:[#allocation12 + $0x28] sm:$0xff]  }
 0x67c   :  { %13266 = vmatpush3.bf16.msra.mxu0 %v14050_v45  ;;  %13288 = vmatpush3.bf16.msra.mxu1 %v14051_v21  ;;  %v14075_v45 = vld [vmem:[#allocation12 + $0xa8] sm:$0xff]   ;;  %v14076_v21 = vld [vmem:[#allocation12 + $0x70] sm:$0xff]  }
 0x67d   :  { %13295 = vmatprep.subr.bf16.mxu0 %v14052_v59  ;;  %13317 = vmatprep.subr.bf16.mxu1 %v14053_v49  ;;  %v14077_v59 = vld [vmem:[#allocation12 + $0xf0] sm:$0xff]  }
 0x67e   :  { %v14078_v49 = vld [vmem:[#allocation12 + $0x30] sm:$0xff]  }
 0x732   :  { %v9909_v56 = vpop.f32.mrb[24].mxu0  ;;  %v10073_v61 = vpop.f32.mrb[24].mxu1 }
 0x733   :  { %v13479_v63 = vadd.f32 %v9909_v56, %v8455_v36  ;;  %v13481_v3 = vadd.f32 %v10073_v61, %v8463_v52  ;;  %v9911_v33 = vpop.f32.mrb[25].mxu0  ;;  %v10075_v4 = vpop.f32.mrb[25].mxu1  ;;  %v14080_v36 = vld [vmem:[#allocation12 + $0x78] sm:$0xff]   ;;  %v14084_v56 = vld [vmem:[#allocation12 + $0x140] sm:$0xff]  }
 0x734   :  { %v13480_v6 = vadd.f32 %v9911_v33, %v8459_v54  ;;  %v13482_v50 = vadd.f32 %v10075_v4, %v8467_v20  ;;  %v9913_v28 = vpop.f32.mrb[26].mxu0  ;;  %v10077_v14 = vpop.f32.mrb[26].mxu1  ;;  %v14081_v52 = vld [vmem:[#allocation12 + $0xf8] sm:$0xff]   ;;  %v14085_v61 = vld [vmem:[#allocation12 + $0x1c0] sm:$0xff]   ;;  %v14088_v33 = vld [vmem:[#allocation12 + $0x148] sm:$0xff]  }
 0x735   :  { %v10080_v17 = vmax.f32 %v13479_v63, 0.0  ;;  %v10082_v18 = vmax.f32 %v13481_v3, 0.0  ;;  %v9914_v19 = vpop.f32.mrb[27].mxu0  ;;  %v10078_v46 = vpop.f32.mrb[27].mxu1  ;;  %v14082_v54 = vld [vmem:[#allocation12 + $0x38] sm:$0xff]   ;;  %v14086_v63 = vld [vmem:[#allocation12 + $0x100] sm:$0xff]  }
 0x736   :  { %v10081_v9 = vmax.f32 %v13480_v6, 0.0  ;;  %v10083_v1 = vmax.f32 %v13482_v50, 0.0  ;;  %v14083_v20 = vld [vmem:[#allocation12 + $0xb8] sm:$0xff]   ;;  %v14087_v3 = vld [vmem:[#allocation12 + $0x180] sm:$0xff]   ;;  %v14089_v4 = vld [vmem:[#allocation12 + $0x1c8] sm:$0xff]  }
 0x737   :  { %v10084_v58 = vpack.c.bf16 %v10080_v17, %v10080_v17  ;;  %v10086_v39 = vpack.c.bf16 %v10082_v18, %v10082_v18  ;;  %v14090_v6 = vld [vmem:[#allocation12 + $0x108] sm:$0xff]   ;;  %v14092_v28 = vld [vmem:[#allocation12 + $0x150] sm:$0xff]   ;;  %v14098_v19 = vld [vmem:[#allocation12 + $0x118] sm:$0xff]  }
 0x738   :  { %v10085_v24 = vpack.c.bf16 %v10081_v9, %v10081_v9  ;;  %v10087_v47 = vpack.c.bf16 %v10083_v1, %v10083_v1  ;;  %v14091_v50 = vld [vmem:[#allocation12 + $0x188] sm:$0xff]   ;;  %v14093_v14 = vld [vmem:[#allocation12 + $0x1d0] sm:$0xff]   ;;  %v14100_v46 = vld [vmem:[#allocation12 + $0x160] sm:$0xff]  }
 0x739   :  { %v14094_v17 = vld [vmem:[#allocation12 + $0x110] sm:$0xff]   ;;  %v14102_v9 = vld [vmem:[#allocation12 + $0x120] sm:$0xff]  }
 0x73a   :  { %10632 = vmatprep.mubr.bf16.mxu0 %v10085_v24  ;;  %10672 = vmatprep.mubr.bf16.mxu1 %v10087_v47  ;;  %v14095_v18 = vld [vmem:[#allocation12 + $0x190] sm:$0xff]   ;;  %v14103_v1 = vld [vmem:[#allocation12 + $0x1a0] sm:$0xff]   ;;  %v14104_v24 = vld [vmem:[#allocation12 + $0x168] sm:$0xff]  }
 0x73b   :  { %10633 = vmatmul.mubr.bf16.vlgmr.msra.gmra.mrb[28].mxu0 %v10084_v58  ;;  %10673 = vmatmul.mubr.bf16.vlgmr.msra.gmra.mrb[28].mxu1 %v10086_v39  ;;  %v14105_v47 = vld [vmem:[#allocation12 + $0x1e8] sm:$0xff]   ;;  %v14108_v58 = vld [vmem:[#allocation12 + $0x170] sm:$0xff]  }
 0x73c   :  { %13296 = vmatpush3.bf16.msra.mxu0 %v14054_v26  ;;  %13318 = vmatpush3.bf16.msra.mxu1 %v14055_v48  ;;  %v14106_v26 = vld [vmem:[#allocation12 + $0x128] sm:$0xff]   ;;  %v14109_v39 = vld [vmem:[#allocation12 + $0x1f0] sm:$0xff]  }
 0x73d   :  { %11480 = vmatprep.mubr.bf16.mxu0 %v14628_v2  ;;  %11520 = vmatprep.mubr.bf16.mxu1 %v14634_v11  ;;  %v14068_v2 = vld [vmem:[#allocation12 + $0x60] sm:$0xff]   ;;  %v14107_v48 = vld [vmem:[#allocation12 + $0x1a8] sm:$0xff]  }
 0x73e   :  { %13297 = vmatprep.subr.bf16.mxu0 %v14056_v29  ;;  %13319 = vmatprep.subr.bf16.mxu1 %v14057_v43  ;;  %v14069_v11 = vld [vmem:[#allocation12 + $0xe0] sm:$0xff]   ;;  %v14110_v29 = vld [vmem:[#allocation12 + $0x130] sm:$0xff]  }
 0x73f   :  { %v14111_v43 = vld [vmem:[#allocation12 + $0x1b0] sm:$0xff]  }
 0x740   :  { %13298 = vmatpush3.bf16.msra.mxu0 %v14058_v8  ;;  %13320 = vmatpush3.bf16.msra.mxu1 %v14059_v30  ;;  %v14112_v8 = vld [vmem:[#allocation12 + $0x178] sm:$0xff]  }
 0x741   :  { %13299 = vmatprep.subr.bf16.mxu0 %v14060_v60  ;;  %13321 = vmatprep.subr.bf16.mxu1 %v14061_v31  ;;  %v14113_v30 = vld [vmem:[#allocation12 + $0x1f8] sm:$0xff]  }
 0x742   :  { %v14114_v60 = vld [vmem:[#allocation12 + $0x138] sm:$0xff]  }
 0x743   :  { %v14115_v31 = vld [vmem:[#allocation12 + $0x1b8] sm:$0xff]  }
 0x744   :  { %13300 = vmatpush3.bf16.msra.mxu0 %v14062_v40  ;;  %13322 = vmatpush3.bf16.msra.mxu1 %v14063_v34  ;;  %v14116_v40 = vld [vmem:[#allocation12 + $0x240] sm:$0xff]  }
 0x745   :  { %13301 = vmatprep.subr.bf16.mxu0 %v14064_v5  ;;  %13323 = vmatprep.subr.bf16.mxu1 %v14065_v57  ;;  %v14117_v34 = vld [vmem:[#allocation12 + $0x2c0] sm:$0xff]  }
 0x746   :  { %v14118_v5 = vld [vmem:[#allocation12 + $0x200] sm:$0xff]  }
 0x747   :  { %v14119_v57 = vld [vmem:[#allocation12 + $0x280] sm:$0xff]  }
 0x748   :  { %13302 = vmatpush3.bf16.msra.mxu0 %v14066_v32  ;;  %13324 = vmatpush3.bf16.msra.mxu1 %v14067_v22  ;;  %v14120_v32 = vld [vmem:[#allocation12 + $0x248] sm:$0xff]  }
 0x749   :  { %13303 = vmatprep.subr.bf16.mxu0 %v14068_v2  ;;  %13325 = vmatprep.subr.bf16.mxu1 %v14069_v11  ;;  %v14121_v22 = vld [vmem:[#allocation12 + $0x2c8] sm:$0xff]  }
 0x74a   :  { %v14122_v2 = vld [vmem:[#allocation12 + $0x208] sm:$0xff]  }
 0x74b   :  { %v14123_v11 = vld [vmem:[#allocation12 + $0x288] sm:$0xff]  }
 0x74c   :  { %13304 = vmatpush3.bf16.msra.mxu0 %v14070_v16  ;;  %13326 = vmatpush3.bf16.msra.mxu1 %v14071_v35  ;;  %v14124_v16 = vld [vmem:[#allocation12 + $0x250] sm:$0xff]  }
 0x74d   :  { %13305 = vmatprep.subr.bf16.mxu0 %v14072_v37  ;;  %13327 = vmatprep.subr.bf16.mxu1 %v14073_v38  ;;  %v14125_v35 = vld [vmem:[#allocation12 + $0x2d0] sm:$0xff]   ;;  %v14128_v38 = vld [vmem:[#allocation12 + $0x258] sm:$0xff]  }
 0x74e   :  { %v14126_v37 = vld [vmem:[#allocation12 + $0x210] sm:$0xff]  }
 0x750   :  { %13306 = vmatpush3.bf16.msra.mxu0 %v14074_v13  ;;  %13328 = vmatpush3.bf16.msra.mxu1 %v14075_v45  ;;  %v14130_v13 = vld [vmem:[#allocation12 + $0x218] sm:$0xff]   ;;  %v14132_v45 = vld [vmem:[#allocation12 + $0x260] sm:$0xff]  }
 0x751   :  { %13307 = vmatprep.subr.bf16.mxu0 %v14076_v21  ;;  %13329 = vmatprep.subr.bf16.mxu1 %v14077_v59  ;;  %v14133_v21 = vld [vmem:[#allocation12 + $0x2e0] sm:$0xff]  }
 0x752   :  { %v14135_v59 = vld [vmem:[#allocation12 + $0x2a0] sm:$0xff]  }
 0x754   :  { %13308 = vmatpush3.bf16.msra.mxu0 %v14078_v49  ;;  %13330 = vmatpush3.bf16.msra.mxu1 %v14079_v51  ;;  %v14136_v49 = vld [vmem:[#allocation12 + $0x268] sm:$0xff]  }
 0x755   :  { %13309 = vmatprep.subr.bf16.mxu0 %v14080_v36  ;;  %13331 = vmatprep.subr.bf16.mxu1 %v14081_v52  ;;  %v14137_v51 = vld [vmem:[#allocation12 + $0x2e8] sm:$0xff]  }
 0x756   :  { %v14138_v36 = vld [vmem:[#allocation12 + $0x228] sm:$0xff]  }
 0x757   :  { %v14139_v52 = vld [vmem:[#allocation12 + $0x2a8] sm:$0xff]  }
 0x758   :  { %13310 = vmatpush3.bf16.msra.mxu0 %v14082_v54  ;;  %13332 = vmatpush3.bf16.msra.mxu1 %v14083_v20  ;;  %v14140_v54 = vld [vmem:[#allocation12 + $0x270] sm:$0xff]  }
 0x759   :  { %13339 = vmatprep.subr.bf16.mxu0 %v14084_v56  ;;  %13361 = vmatprep.subr.bf16.mxu1 %v14085_v61  ;;  %v14141_v20 = vld [vmem:[#allocation12 + $0x2f0] sm:$0xff]  }
 0x75a   :  { %v14142_v56 = vld [vmem:[#allocation12 + $0x230] sm:$0xff]  }
 0x75b   :  { %11481 = vmatmul.mubr.bf16.vlgmr.msra.gmra.mrb[32].mxu0 %v14630_v7  ;;  %11521 = vmatmul.mubr.bf16.vlgmr.msra.gmra.mrb[32].mxu1 %v14699_v41  ;;  %v14096_v7 = vld [vmem:[#allocation12 + $0x158] sm:$0xff]   ;;  %v14143_v61 = vld [vmem:[#allocation12 + $0x2b0] sm:$0xff]  }
 0x75c   :  { %13340 = vmatpush3.bf16.msra.mxu0 %v14086_v63  ;;  %11560 = vmatprep.mubr.bf16.mxu0 %v14701_v44  ;;  %v14097_v41 = vld [vmem:[#allocation12 + $0x1d8] sm:$0xff]  }
 0x75d   :  { %13362 = vmatpush3.bf16.msra.mxu1 %v14087_v3  ;;  %11600 = vmatprep.mubr.bf16.mxu1 %v14717_v12  ;;  %v14099_v44 = vld [vmem:[#allocation12 + $0x198] sm:$0xff]   ;;  %v14101_v12 = vld [vmem:[#allocation12 + $0x1e0] sm:$0xff]  }
 0x75e   :  { %13341 = vmatprep.subr.bf16.mxu0 %v14088_v33  ;;  %13363 = vmatprep.subr.bf16.mxu1 %v14089_v4  ;;  %v14144_v63 = vld [vmem:[#allocation12 + $0x278] sm:$0xff]  }
 0x75f   :  { %v14145_v3 = vld [vmem:[#allocation12 + $0x2f8] sm:$0xff]  }
 0x760   :  { %13342 = vmatpush3.bf16.msra.mxu0 %v14090_v6  ;;  %v14146_v33 = vld [vmem:[#allocation12 + $0x238] sm:$0xff]   ;;  %v14148_v6 = vld [vmem:[#allocation12 + $0x340] sm:$0xff]  }
 0x761   :  { %13364 = vmatpush3.bf16.msra.mxu1 %v14091_v50  ;;  %13343 = vmatprep.subr.bf16.mxu0 %v14092_v28  ;;  %v14147_v4 = vld [vmem:[#allocation12 + $0x2b8] sm:$0xff]   ;;  %v14149_v50 = vld [vmem:[#allocation12 + $0x3c0] sm:$0xff]  }
 0x762   :  { %13365 = vmatprep.subr.bf16.mxu1 %v14093_v14  ;;  %v14150_v28 = vld [vmem:[#allocation12 + $0x300] sm:$0xff]  }
 0x763   :  { %v14151_v14 = vld [vmem:[#allocation12 + $0x380] sm:$0xff]  }
 0x764   :  { %13344 = vmatpush3.bf16.msra.mxu0 %v14094_v17  ;;  %v14152_v17 = vld [vmem:[#allocation12 + $0x348] sm:$0xff]  }
 0x765   :  { %13366 = vmatpush3.bf16.msra.mxu1 %v14095_v18  ;;  %13345 = vmatprep.subr.bf16.mxu0 %v14096_v7  ;;  %v14153_v18 = vld [vmem:[#allocation12 + $0x3c8] sm:$0xff]  }
 0x766   :  { %13367 = vmatprep.subr.bf16.mxu1 %v14097_v41  ;;  %v14154_v7 = vld [vmem:[#allocation12 + $0x308] sm:$0xff]  }
 0x767   :  { %v14155_v41 = vld [vmem:[#allocation12 + $0x388] sm:$0xff]  }
 0x768   :  { %13346 = vmatpush3.bf16.msra.mxu0 %v14098_v19  ;;  %v14156_v19 = vld [vmem:[#allocation12 + $0x350] sm:$0xff]  }
 0x769   :  { %13368 = vmatpush3.bf16.msra.mxu1 %v14099_v44  ;;  %13347 = vmatprep.subr.bf16.mxu0 %v14100_v46  ;;  %v14157_v44 = vld [vmem:[#allocation12 + $0x3d0] sm:$0xff]  }
 0x76a   :  { %13369 = vmatprep.subr.bf16.mxu1 %v14101_v12  ;;  %v14158_v46 = vld [vmem:[#allocation12 + $0x310] sm:$0xff]   ;;  %v14160_v12 = vld [vmem:[#allocation12 + $0x358] sm:$0xff]  }
 0x76c   :  { %13348 = vmatpush3.bf16.msra.mxu0 %v14102_v9  ;;  %v14162_v9 = vld [vmem:[#allocation12 + $0x318] sm:$0xff]  }
 0x76d   :  { %13370 = vmatpush3.bf16.msra.mxu1 %v14103_v1  ;;  %13349 = vmatprep.subr.bf16.mxu0 %v14104_v24  ;;  %v14164_v1 = vld [vmem:[#allocation12 + $0x360] sm:$0xff]  }
 0x76e   :  { %13371 = vmatprep.subr.bf16.mxu1 %v14105_v47  ;;  %v14165_v24 = vld [vmem:[#allocation12 + $0x3e0] sm:$0xff]  }
 0x76f   :  { %v14167_v47 = vld [vmem:[#allocation12 + $0x3a0] sm:$0xff]  }
 0x770   :  { %13350 = vmatpush3.bf16.msra.mxu0 %v14106_v26  ;;  %v14168_v26 = vld [vmem:[#allocation12 + $0x368] sm:$0xff]  }
 0x771   :  { %13372 = vmatpush3.bf16.msra.mxu1 %v14107_v48  ;;  %13351 = vmatprep.subr.bf16.mxu0 %v14108_v58  ;;  %v14169_v48 = vld [vmem:[#allocation12 + $0x3e8] sm:$0xff]  }
 0x772   :  { %13373 = vmatprep.subr.bf16.mxu1 %v14109_v39  ;;  %v14170_v58 = vld [vmem:[#allocation12 + $0x328] sm:$0xff]  }
 0x773   :  { %v14171_v39 = vld [vmem:[#allocation12 + $0x3a8] sm:$0xff]  }
 0x774   :  { %13352 = vmatpush3.bf16.msra.mxu0 %v14110_v29  ;;  %v14172_v29 = vld [vmem:[#allocation12 + $0x370] sm:$0xff]  }
 0x775   :  { %13374 = vmatpush3.bf16.msra.mxu1 %v14111_v43  ;;  %13353 = vmatprep.subr.bf16.mxu0 %v14112_v8  ;;  %v14173_v43 = vld [vmem:[#allocation12 + $0x3f0] sm:$0xff]  }
 0x776   :  { %13375 = vmatprep.subr.bf16.mxu1 %v14113_v30  ;;  %v14174_v8 = vld [vmem:[#allocation12 + $0x330] sm:$0xff]  }
 0x777   :  { %v14175_v30 = vld [vmem:[#allocation12 + $0x3b0] sm:$0xff]  }
 0x778   :  { %13354 = vmatpush3.bf16.msra.mxu0 %v14114_v60  ;;  %v14176_v60 = vld [vmem:[#allocation12 + $0x378] sm:$0xff]  }
 0x779   :  { %13376 = vmatpush3.bf16.msra.mxu1 %v14115_v31  ;;  %13383 = vmatprep.subr.bf16.mxu0 %v14116_v40  ;;  %v14177_v31 = vld [vmem:[#allocation12 + $0x3f8] sm:$0xff]  }
 0x77a   :  { %13405 = vmatprep.subr.bf16.mxu1 %v14117_v34  ;;  %v14178_v40 = vld [vmem:[#allocation12 + $0x338] sm:$0xff]  }
 0x77b   :  { %11561 = vmatmul.mubr.bf16.vlgmr.msra.gmra.mrb[36].mxu0 %v14715_v0  ;;  %v14127_v0 = vld [vmem:[#allocation12 + $0x290] sm:$0xff]   ;;  %v14179_v34 = vld [vmem:[#allocation12 + $0x3b8] sm:$0xff]  }
 0x77c   :  { %11601 = vmatmul.mubr.bf16.vlgmr.msra.gmra.mrb[36].mxu1 %v14731_v25  ;;  %13384 = vmatpush3.bf16.msra.mxu0 %v14118_v5  ;;  %v14129_v25 = vld [vmem:[#allocation12 + $0x2d8] sm:$0xff]  }
 0x77d   :  { %11640 = vmatprep.mubr.bf16.mxu0 %v14733_v27  ;;  %13406 = vmatpush3.bf16.msra.mxu1 %v14119_v57  ;;  %v14131_v27 = vld [vmem:[#allocation12 + $0x298] sm:$0xff]  }
 0x77e   :  { %11680 = vmatprep.mubr.bf16.mxu1 %v14746_v53  ;;  %13385 = vmatprep.subr.bf16.mxu0 %v14120_v32  ;;  %v14134_v53 = vld [vmem:[#allocation12 + $0x220] sm:$0xff]  }
 0x77f   :  { %13407 = vmatprep.subr.bf16.mxu1 %v14121_v22 }
 0x780   :  { %13386 = vmatpush3.bf16.msra.mxu0 %v14122_v2 }
 0x781   :  { %13408 = vmatpush3.bf16.msra.mxu1 %v14123_v11  ;;  %13387 = vmatprep.subr.bf16.mxu0 %v14124_v16 }
 0x782   :  { %13409 = vmatprep.subr.bf16.mxu1 %v14125_v35 }
 0x784   :  { %13388 = vmatpush3.bf16.msra.mxu0 %v14126_v37 }
 0x785   :  { %13410 = vmatpush3.bf16.msra.mxu1 %v14127_v0  ;;  %13389 = vmatprep.subr.bf16.mxu0 %v14128_v38 }
 0x786   :  { %13411 = vmatprep.subr.bf16.mxu1 %v14129_v25 }
 0x788   :  { %13390 = vmatpush3.bf16.msra.mxu0 %v14130_v13 }
 0x789   :  { %13412 = vmatpush3.bf16.msra.mxu1 %v14131_v27  ;;  %13391 = vmatprep.subr.bf16.mxu0 %v14132_v45 }
 0x78a   :  { %13413 = vmatprep.subr.bf16.mxu1 %v14133_v21 }
 0x78c   :  { %13392 = vmatpush3.bf16.msra.mxu0 %v14134_v53 }
 0x78d   :  { %13414 = vmatpush3.bf16.msra.mxu1 %v14135_v59  ;;  %13393 = vmatprep.subr.bf16.mxu0 %v14136_v49 }
 0x78e   :  { %13415 = vmatprep.subr.bf16.mxu1 %v14137_v51 }
 0x790   :  { %13394 = vmatpush3.bf16.msra.mxu0 %v14138_v36 }
 0x791   :  { %13416 = vmatpush3.bf16.msra.mxu1 %v14139_v52  ;;  %13395 = vmatprep.subr.bf16.mxu0 %v14140_v54 }
 0x792   :  { %13417 = vmatprep.subr.bf16.mxu1 %v14141_v20 }
 0x794   :  { %13396 = vmatpush3.bf16.msra.mxu0 %v14142_v56 }
 0x795   :  { %13418 = vmatpush3.bf16.msra.mxu1 %v14143_v61  ;;  %13397 = vmatprep.subr.bf16.mxu0 %v14144_v63 }
 0x796   :  { %13419 = vmatprep.subr.bf16.mxu1 %v14145_v3 }
 0x798   :  { %13398 = vmatpush3.bf16.msra.mxu0 %v14146_v33 }
 0x799   :  { %13420 = vmatpush3.bf16.msra.mxu1 %v14147_v4  ;;  %13427 = vmatprep.subr.bf16.mxu0 %v14148_v6 }
 0x79a   :  { %13449 = vmatprep.subr.bf16.mxu1 %v14149_v50 }
 0x79b   :  { %11641 = vmatmul.mubr.bf16.vlgmr.msra.gmra.mrb[40].mxu0 %v14742_v42  ;;  %v14159_v42 = vld [vmem:[#allocation12 + $0x390] sm:$0xff]  }
 0x79c   :  { %11681 = vmatmul.mubr.bf16.vlgmr.msra.gmra.mrb[40].mxu1 %v14754_v62  ;;  %13428 = vmatpush3.bf16.msra.mxu0 %v14150_v28  ;;  %v14161_v62 = vld [vmem:[#allocation12 + $0x3d8] sm:$0xff]  }
 0x79d   :  { %11720 = vmatprep.mubr.bf16.mxu0 %v14758_v55  ;;  %13450 = vmatpush3.bf16.msra.mxu1 %v14151_v14  ;;  %v14163_v55 = vld [vmem:[#allocation12 + $0x398] sm:$0xff]  }
 0x79e   :  { %11760 = vmatprep.mubr.bf16.mxu1 %v14770_v15  ;;  %13429 = vmatprep.subr.bf16.mxu0 %v14152_v17  ;;  %v14166_v15 = vld [vmem:[#allocation12 + $0x320] sm:$0xff]  }
 0x79f   :  { %13451 = vmatprep.subr.bf16.mxu1 %v14153_v18 }
 0x7a0   :  { %13430 = vmatpush3.bf16.msra.mxu0 %v14154_v7 }
 0x7a1   :  { %13452 = vmatpush3.bf16.msra.mxu1 %v14155_v41  ;;  %13431 = vmatprep.subr.bf16.mxu0 %v14156_v19 }
 0x7a2   :  { %13453 = vmatprep.subr.bf16.mxu1 %v14157_v44 }
 0x7a4   :  { %13432 = vmatpush3.bf16.msra.mxu0 %v14158_v46 }
 0x7a5   :  { %13454 = vmatpush3.bf16.msra.mxu1 %v14159_v42  ;;  %13433 = vmatprep.subr.bf16.mxu0 %v14160_v12 }
 0x7a6   :  { %13455 = vmatprep.subr.bf16.mxu1 %v14161_v62 }
 0x7a8   :  { %13434 = vmatpush3.bf16.msra.mxu0 %v14162_v9 }
 0x7a9   :  { %13456 = vmatpush3.bf16.msra.mxu1 %v14163_v55  ;;  %13435 = vmatprep.subr.bf16.mxu0 %v14164_v1 }
 0x7aa   :  { %13457 = vmatprep.subr.bf16.mxu1 %v14165_v24 }
 0x7ac   :  { %13436 = vmatpush3.bf16.msra.mxu0 %v14166_v15 }
 0x7ad   :  { %13458 = vmatpush3.bf16.msra.mxu1 %v14167_v47  ;;  %13437 = vmatprep.subr.bf16.mxu0 %v14168_v26 }
 0x7ae   :  { %13459 = vmatprep.subr.bf16.mxu1 %v14169_v48 }
 0x7b0   :  { %13438 = vmatpush3.bf16.msra.mxu0 %v14170_v58 }
 0x7b1   :  { %13460 = vmatpush3.bf16.msra.mxu1 %v14171_v39  ;;  %13439 = vmatprep.subr.bf16.mxu0 %v14172_v29 }
 0x7b2   :  { %13461 = vmatprep.subr.bf16.mxu1 %v14173_v43 }
 0x7b4   :  { %13440 = vmatpush3.bf16.msra.mxu0 %v14174_v8  ;;  %v13250_v8 = vld [vmem:[#allocation15] ss:$0 sm:$0xff] }
 0x7b5   :  { %13462 = vmatpush3.bf16.msra.mxu1 %v14175_v30  ;;  %13441 = vmatprep.subr.bf16.mxu0 %v14176_v60 }
 0x7b6   :  { %13463 = vmatprep.subr.bf16.mxu1 %v14177_v31 }
 0x7b8   :  { %13442 = vmatpush3.bf16.msra.mxu0 %v14178_v40 }
 0x7b9   :  { %13464 = vmatpush3.bf16.msra.mxu1 %v14179_v34 }
 0x7bb   :  { %11721 = vmatmul.mubr.bf16.vlgmr.msra.gmra.mrb[44].mxu0 %v14766_v10 }
 0x7bc   :  { %11761 = vmatmul.mubr.bf16.vlgmr.msra.gmra.mrb[44].mxu1 %v14778_v23 }
 0x80e   :  { %v13267_v5 = vpop.f32.mrb[28].mxu0  ;;  %v13289_v57 = vpop.f32.mrb[28].mxu1 }
 0x80f   :  { %v13268_v32 = vpop.f32.mrb[29].mxu0  ;;  %v13290_v22 = vpop.f32.mrb[29].mxu1 }
 0x810   :  { %v13269_v2 = vadd.f32 %v13268_v32, %v13267_v5  ;;  %v13291_v11 = vadd.f32 %v13290_v22, %v13289_v57  ;;  %v13270_v16 = vpop.f32.mrb[30].mxu0  ;;  %v13292_v35 = vpop.f32.mrb[30].mxu1 }
 0x811   :  { %v13271_v37 = vpop.f32.mrb[31].mxu0  ;;  %v13293_v0 = vpop.f32.mrb[31].mxu1 }
 0x812   :  { %v10675_v38 = vadd.f32 %v13291_v11, %v13269_v2 }
 0x82e   :  { %v13311_v25 = vpop.f32.mrb[32].mxu0  ;;  %v13333_v13 = vpop.f32.mrb[32].mxu1 }
 0x82f   :  { %v13312_v27 = vpop.f32.mrb[33].mxu0  ;;  %v13334_v45 = vpop.f32.mrb[33].mxu1 }
 0x830   :  { %v13313_v21 = vadd.f32 %v13312_v27, %v13311_v25  ;;  %v13335_v53 = vadd.f32 %v13334_v45, %v13333_v13  ;;  %v13314_v10 = vpop.f32.mrb[34].mxu0  ;;  %v13336_v59 = vpop.f32.mrb[34].mxu1 }
 0x831   :  { %v13315_v23 = vpop.f32.mrb[35].mxu0  ;;  %v13337_v49 = vpop.f32.mrb[35].mxu1 }
 0x832   :  { %v11483_v51 = vadd.f32 %v13313_v21, %v10675_v38 }
 0x834   :  { %v11523_v36 = vadd.f32 %v13335_v53, %v11483_v51 }
 0x84e   :  { %v13355_v52 = vpop.f32.mrb[36].mxu0 }
 0x84f   :  { %v13377_v54 = vpop.f32.mrb[36].mxu1  ;;  %v13356_v20 = vpop.f32.mrb[37].mxu0 }
 0x850   :  { %v13357_v56 = vadd.f32 %v13356_v20, %v13355_v52  ;;  %v13378_v61 = vpop.f32.mrb[37].mxu1  ;;  %v13358_v63 = vpop.f32.mrb[38].mxu0 }
 0x851   :  { %v13379_v3 = vadd.f32 %v13378_v61, %v13377_v54  ;;  %v13380_v33 = vpop.f32.mrb[38].mxu1  ;;  %v13359_v4 = vpop.f32.mrb[39].mxu0 }
 0x852   :  { %v11563_v6 = vadd.f32 %v13357_v56, %v11523_v36  ;;  %v13381_v50 = vpop.f32.mrb[39].mxu1 }
 0x854   :  { %v11603_v28 = vadd.f32 %v13379_v3, %v11563_v6 }
 0x86e   :  { %v13399_v14 = vpop.f32.mrb[40].mxu0 }
 0x86f   :  { %v13421_v17 = vpop.f32.mrb[40].mxu1  ;;  %v13400_v18 = vpop.f32.mrb[41].mxu0 }
 0x870   :  { %v13401_v7 = vadd.f32 %v13400_v18, %v13399_v14  ;;  %v13422_v41 = vpop.f32.mrb[41].mxu1  ;;  %v13402_v19 = vpop.f32.mrb[42].mxu0 }
 0x871   :  { %v13423_v44 = vadd.f32 %v13422_v41, %v13421_v17  ;;  %v13424_v46 = vpop.f32.mrb[42].mxu1  ;;  %v13403_v42 = vpop.f32.mrb[43].mxu0 }
 0x872   :  { %v11643_v12 = vadd.f32 %v13401_v7, %v11603_v28  ;;  %v13425_v62 = vpop.f32.mrb[43].mxu1 }
 0x874   :  { %v11683_v9 = vadd.f32 %v13423_v44, %v11643_v12 }
 0x88e   :  { %v13443_v55 = vpop.f32.mrb[44].mxu0 }
 0x88f   :  { %v13465_v1 = vpop.f32.mrb[44].mxu1  ;;  %v13444_v24 = vpop.f32.mrb[45].mxu0 }
 0x890   :  { %v13445_v15 = vadd.f32 %v13444_v24, %v13443_v55  ;;  %v13466_v47 = vpop.f32.mrb[45].mxu1  ;;  %v13446_v26 = vpop.f32.mrb[46].mxu0 }
 0x891   :  { %v13467_v48 = vadd.f32 %v13466_v47, %v13465_v1  ;;  %v13468_v58 = vpop.f32.mrb[46].mxu1  ;;  %v13447_v39 = vpop.f32.mrb[47].mxu0 }
 0x892   :  { %v11723_v29 = vadd.f32 %v13445_v15, %v11683_v9  ;;  %v13469_v43 = vpop.f32.mrb[47].mxu1 }
 0x894   :  { %v11763_v30 = vadd.f32 %v13467_v48, %v11723_v29 }
 0x896   :  { %v11775_v60 = vadd.f32 %v13250_v8, %v11763_v30 }
 0x898   :  { %11776 = vst [vmem:[%s14879_s10] sm:$0xff] %v11775_v60 }
 0x899   :  { %11781 = vsyncpa [#allocation3], 1 }
 0x89a   :  { %11782 = vsyncpa [#allocation5], 1 }
 0x89b   :  { %11783 = vsyncpa [#allocation8], 1 }
 0x89c   :  { %11784 = vsyncpa [#allocation11], 1 }
 0x89d   :  { %11785 = vsyncpa [#allocation14], 1 }

</bundles_post_ra>
